<compile_context>
chip_gen: v7x
topology: tpu7x:2x2x1
jax: 0.10.0
libtpu: 0.0.40
codegen_flags: <defaults>
</compile_context>

<pallas_src>
import functools
import math

import jax
import jax.numpy as jnp
from jax.experimental import pallas as pl


N_ENC_REFS = 12   # stacked arrays per encoder layer set
N_DEC_REFS = 20   # stacked arrays per decoder layer set


# ------------------------- in-kernel building blocks ------------------------ #

def _layer_norm(y, g, b, eps):
    """LayerNorm over the last axis; g/b are [1, D]."""
    mean = jnp.mean(y, axis=-1, keepdims=True)
    c = y - mean
    var = jnp.mean(c * c, axis=-1, keepdims=True)
    return c * jax.lax.rsqrt(var + eps) * g + b


def _mha_core(q2, k2, v2, w_o, b_o, *, B, Sq, Skv, nhead, dh):
    """Multi-head attention core on VMEM-resident values.

    q2: [B*Sq, D], k2/v2: [B*Skv, D].  The 1/sqrt(dh) scale is already folded
    into the Q projection.  Per-head contexts are folded directly into the
    output projection (accumulated) so no lane-axis concatenate is needed.
    """
    D = nhead * dh
    q3 = q2.reshape(B, Sq, D)
    k3 = k2.reshape(B, Skv, D)
    v3 = v2.reshape(B, Skv, D)
    acc = None
    for h in range(nhead):                       # static loop; B is batched per head
        sl = slice(h * dh, (h + 1) * dh)
        s = jnp.einsum('bqd,bkd->bqk', q3[:, :, sl], k3[:, :, sl],
                       preferred_element_type=jnp.float32)           # [B, Sq, Skv]
        p = jnp.exp(s - jnp.max(s, axis=-1, keepdims=True))
        p = p / jnp.sum(p, axis=-1, keepdims=True)                   # exact softmax
        ctx = jnp.einsum('bqk,bkd->bqd', p, v3[:, :, sl],
                         preferred_element_type=jnp.float32)          # [B, Sq, dh]
        part = jnp.dot(ctx.reshape(B * Sq, dh), w_o[sl, :],
                       preferred_element_type=jnp.float32)            # [B*Sq, D]
        acc = part if acc is None else acc + part
    return acc + b_o


def _self_attn(x2d, w_qkv, b_qkv, w_o, b_o, *, B, S, nhead, dh):
    D = nhead * dh
    qkv = jnp.dot(x2d, w_qkv, preferred_element_type=jnp.float32) + b_qkv
    return _mha_core(qkv[:, :D], qkv[:, D:2 * D], qkv[:, 2 * D:], w_o, b_o,
                     B=B, Sq=S, Skv=S, nhead=nhead, dh=dh)


def _cross_attn(x2d, mem2d, w_q, b_q, w_kv, b_kv, w_o, b_o, *, B, Sq, Skv, nhead, dh):
    D = nhead * dh
    q = jnp.dot(x2d, w_q, preferred_element_type=jnp.float32) + b_q
    kv = jnp.dot(mem2d, w_kv, preferred_element_type=jnp.float32) + b_kv
    return _mha_core(q, kv[:, :D], kv[:, D:], w_o, b_o,
                     B=B, Sq=Sq, Skv=Skv, nhead=nhead, dh=dh)


def _ffn(y, w1, b1, w2, b2):
    h = jnp.maximum(jnp.dot(y, w1, preferred_element_type=jnp.float32) + b1, 0.0)
    return jnp.dot(h, w2, preferred_element_type=jnp.float32) + b2


def _encoder_layer(x2d, wqkv, bqkv, wo, bo, ln1g, ln1b, w1, b1, w2, b2, ln2g, ln2b,
                   *, B, S, nhead, dh, eps):
    a = _self_attn(x2d, wqkv, bqkv, wo, bo, B=B, S=S, nhead=nhead, dh=dh)
    y = _layer_norm(x2d + a, ln1g, ln1b, eps)
    f = _ffn(y, w1, b1, w2, b2)
    return _layer_norm(y + f, ln2g, ln2b, eps)


def _decoder_layer(x2d, mem2d,
                   sa_wqkv, sa_bqkv, sa_wo, sa_bo, ln1g, ln1b,
                   ca_wq, ca_bq, ca_wkv, ca_bkv, ca_wo, ca_bo, ln2g, ln2b,
                   w1, b1, w2, b2, ln3g, ln3b,
                   *, B, S, Sm, nhead, dh, eps):
    a = _self_attn(x2d, sa_wqkv, sa_bqkv, sa_wo, sa_bo, B=B, S=S, nhead=nhead, dh=dh)
    y = _layer_norm(x2d + a, ln1g, ln1b, eps)
    c = _cross_attn(y, mem2d, ca_wq, ca_bq, ca_wkv, ca_bkv, ca_wo, ca_bo,
                    B=B, Sq=S, Skv=Sm, nhead=nhead, dh=dh)
    y = _layer_norm(y + c, ln2g, ln2b, eps)
    f = _ffn(y, w1, b1, w2, b2)
    return _layer_norm(y + f, ln3g, ln3b, eps)


# ------------------------------ fused kernel -------------------------------- #

def _stack_kernel(*refs, B, S, D, nhead, dh, n_enc, n_dec, eps):
    """Whole encoder+decoder stack in one kernel; x stays VMEM-resident."""
    x_ref = refs[0]
    enc_refs = refs[1:1 + N_ENC_REFS]
    dec_refs = refs[1 + N_ENC_REFS:1 + N_ENC_REFS + N_DEC_REFS]
    o_ref = refs[1 + N_ENC_REFS + N_DEC_REFS]

    x = x_ref[...].reshape(B * S, D)

    for l in range(n_enc):                                   # static layer loop
        lp = [r[l] for r in enc_refs]                        # static leading-axis index
        x = _encoder_layer(x, *lp, B=B, S=S, nhead=nhead, dh=dh, eps=eps)

    mem = x                                                  # encoder output (memory)
    for l in range(n_dec):
        lp = [r[l] for r in dec_refs]
        x = _decoder_layer(x, mem, *lp, B=B, S=S, Sm=S, nhead=nhead, dh=dh, eps=eps)

    o_ref[...] = x.reshape(B, S, D)


# ------------------------------ host wrappers -------------------------------- #

def _prepare_stack_args(params, D, dh):
    """Stack per-layer weights along a leading layer axis; fold 1/sqrt(dh) into Q."""
    scale = 1.0 / math.sqrt(dh)
    enc, dec = params["encoder"], params["decoder"]

    def fold_w(w):     # fused [D, 3D] qkv weight: scale the q columns
        return jnp.concatenate([w[:, :D] * scale, w[:, D:]], axis=1)

    def fold_b(b):     # fused [3D] qkv bias
        return jnp.concatenate([b[:D] * scale, b[D:]])

    enc_args = [
        jnp.stack([fold_w(p["self_attn"]["in_proj_w"]) for p in enc]),
        jnp.stack([fold_b(p["self_attn"]["in_proj_b"]).reshape(1, 3 * D) for p in enc]),
        jnp.stack([p["self_attn"]["out_proj_w"] for p in enc]),
        jnp.stack([p["self_attn"]["out_proj_b"].reshape(1, D) for p in enc]),
        jnp.stack([p["ln1_g"].reshape(1, D) for p in enc]),
        jnp.stack([p["ln1_b"].reshape(1, D) for p in enc]),
        jnp.stack([p["ff_w1"] for p in enc]),
        jnp.stack([p["ff_b1"].reshape(1, -1) for p in enc]),
        jnp.stack([p["ff_w2"] for p in enc]),
        jnp.stack([p["ff_b2"].reshape(1, D) for p in enc]),
        jnp.stack([p["ln2_g"].reshape(1, D) for p in enc]),
        jnp.stack([p["ln2_b"].reshape(1, D) for p in enc]),
    ]
    dec_args = [
        jnp.stack([fold_w(p["self_attn"]["in_proj_w"]) for p in dec]),
        jnp.stack([fold_b(p["self_attn"]["in_proj_b"]).reshape(1, 3 * D) for p in dec]),
        jnp.stack([p["self_attn"]["out_proj_w"] for p in dec]),
        jnp.stack([p["self_attn"]["out_proj_b"].reshape(1, D) for p in dec]),
        jnp.stack([p["ln1_g"].reshape(1, D) for p in dec]),
        jnp.stack([p["ln1_b"].reshape(1, D) for p in dec]),
        # cross-attention split into Q and fused KV at wrapper time (no in-kernel
        # weight slicing); Q part carries the folded scale.
        jnp.stack([p["cross_attn"]["in_proj_w"][:, :D] * scale for p in dec]),
        jnp.stack([(p["cross_attn"]["in_proj_b"][:D] * scale).reshape(1, D) for p in dec]),
        jnp.stack([p["cross_attn"]["in_proj_w"][:, D:] for p in dec]),
        jnp.stack([p["cross_attn"]["in_proj_b"][D:].reshape(1, 2 * D) for p in dec]),
        jnp.stack([p["cross_attn"]["out_proj_w"] for p in dec]),
        jnp.stack([p["cross_attn"]["out_proj_b"].reshape(1, D) for p in dec]),
        jnp.stack([p["ln2_g"].reshape(1, D) for p in dec]),
        jnp.stack([p["ln2_b"].reshape(1, D) for p in dec]),
        jnp.stack([p["ff_w1"] for p in dec]),
        jnp.stack([p["ff_b1"].reshape(1, -1) for p in dec]),
        jnp.stack([p["ff_w2"] for p in dec]),
        jnp.stack([p["ff_b2"].reshape(1, D) for p in dec]),
        jnp.stack([p["ln3_g"].reshape(1, D) for p in dec]),
        jnp.stack([p["ln3_b"].reshape(1, D) for p in dec]),
    ]
    return enc_args, dec_args


def model_forward(x, params, nhead):
    B, S, D = x.shape
    dh = D // nhead
    n_enc = len(params["encoder"])
    n_dec = len(params["decoder"])
    F = params["encoder"][0]["ff_w1"].shape[1]
    enc_args, dec_args = _prepare_stack_args(params, D, dh)
    all_args = (x, *enc_args, *dec_args)

    # Advisory cost estimate so XLA schedules the custom call sensibly.
    N = B * S
    attn_fl = 4 * B * nhead * S * S * dh                      # QK^T + PV per attn block
    enc_fl = n_enc * (2 * N * D * 3 * D + 2 * N * D * D + attn_fl + 4 * N * D * F)
    dec_fl = n_dec * (2 * N * D * 3 * D + 2 * N * D * D + attn_fl
                      + 2 * N * D * D + 2 * N * D * 2 * D + 2 * N * D * D + attn_fl
                      + 4 * N * D * F)
    bytes_acc = sum(int(a.size) * a.dtype.itemsize for a in all_args)
    bytes_acc += int(x.size) * x.dtype.itemsize               # output write
    transc = (n_enc + 2 * n_dec) * B * nhead * S * S          # exp per softmax

    kernel = functools.partial(
        _stack_kernel, B=B, S=S, D=D, nhead=nhead, dh=dh,
        n_enc=n_enc, n_dec=n_dec, eps=1e-5)

    # Grid-less call: one invocation, all operands resident whole in VMEM
    # (total ~a few hundred KB here), single dispatch for the entire stack.
    return pl.pallas_call(
        kernel,
        out_shape=jax.ShapeDtypeStruct((B, S, D), jnp.float32),
        cost_estimate=pl.CostEstimate(flops=int(enc_fl + dec_fl),
                                      transcendentals=int(transc),
                                      bytes_accessed=int(bytes_acc)),
    )(*all_args)


# ------------------------------ param init --------------------------------- #

def _attn_params(key, d_model):
    k1, k2 = jax.random.split(key)
    s = 1.0 / math.sqrt(d_model)
    # weights stored in [in, out] layout (already "transposed" vs PyTorch).
    return {
        "in_proj_w": jax.random.uniform(k1, (d_model, 3 * d_model), jnp.float32, -s, s),
        "in_proj_b": jnp.zeros((3 * d_model,), jnp.float32),
        "out_proj_w": jax.random.uniform(k2, (d_model, d_model), jnp.float32, -s, s),
        "out_proj_b": jnp.zeros((d_model,), jnp.float32),
    }


def _ffn_params(key, d_model, dim_ff):
    k1, k2 = jax.random.split(key)
    s1 = 1.0 / math.sqrt(d_model)
    s2 = 1.0 / math.sqrt(dim_ff)
    return {
        "ff_w1": jax.random.uniform(k1, (d_model, dim_ff), jnp.float32, -s1, s1),
        "ff_b1": jnp.zeros((dim_ff,), jnp.float32),
        "ff_w2": jax.random.uniform(k2, (dim_ff, d_model), jnp.float32, -s2, s2),
        "ff_b2": jnp.zeros((d_model,), jnp.float32),
    }


def init_params(key, d_model, dim_ff, num_layers):
    params = {"encoder": [], "decoder": []}
    for _ in range(num_layers):
        key, ka, kf = jax.random.split(key, 3)
        p = {"self_attn": _attn_params(ka, d_model)}
        p.update(_ffn_params(kf, d_model, dim_ff))
        p.update({
            "ln1_g": jnp.ones((d_model,), jnp.float32), "ln1_b": jnp.zeros((d_model,), jnp.float32),
            "ln2_g": jnp.ones((d_model,), jnp.float32), "ln2_b": jnp.zeros((d_model,), jnp.float32),
        })
        params["encoder"].append(p)
    for _ in range(num_layers):
        key, ka, kc, kf = jax.random.split(key, 4)
        p = {"self_attn": _attn_params(ka, d_model),
             "cross_attn": _attn_params(kc, d_model)}
        p.update(_ffn_params(kf, d_model, dim_ff))
        p.update({
            "ln1_g": jnp.ones((d_model,), jnp.float32), "ln1_b": jnp.zeros((d_model,), jnp.float32),
            "ln2_g": jnp.ones((d_model,), jnp.float32), "ln2_b": jnp.zeros((d_model,), jnp.float32),
            "ln3_g": jnp.ones((d_model,), jnp.float32), "ln3_b": jnp.zeros((d_model,), jnp.float32),
        })
        params["decoder"].append(p)
    return params


# ---------------------------------- main ------------------------------------ #

if __name__ == "__main__":
    d_model = 32
    nhead = 4
    dim_feedforward = 64
    num_layers = 2
    batch, seq = 2, 8          # batch_first=True -> x: [batch, seq, d_model]

    key = jax.random.PRNGKey(0)
    key, kx, kp = jax.random.split(key, 3)
    x = jax.random.normal(kx, (batch, seq, d_model), jnp.float32)
    params = init_params(kp, d_model, dim_feedforward, num_layers)

    fwd = jax.jit(functools.partial(model_forward, nhead=nhead))
    out = fwd(x, params)
    out = jax.block_until_ready(out)

    assert out.shape == (batch, seq, d_model)
    assert bool(jnp.all(jnp.isfinite(out)))
    print("KERNEL_OK")
</pallas_src>

<mosaic_0001>
module attributes {stable_mosaic.version = 11 : i64} {
  func.func @_stack_kernel(%arg0: memref<2x8x32xf32, #tpu.memory_space<vmem>>, %arg1: memref<2x32x96xf32, #tpu.memory_space<vmem>>, %arg2: memref<2x1x96xf32, #tpu.memory_space<vmem>>, %arg3: memref<2x32x32xf32, #tpu.memory_space<vmem>>, %arg4: memref<2x1x32xf32, #tpu.memory_space<vmem>>, %arg5: memref<2x1x32xf32, #tpu.memory_space<vmem>>, %arg6: memref<2x1x32xf32, #tpu.memory_space<vmem>>, %arg7: memref<2x32x64xf32, #tpu.memory_space<vmem>>, %arg8: memref<2x1x64xf32, #tpu.memory_space<vmem>>, %arg9: memref<2x64x32xf32, #tpu.memory_space<vmem>>, %arg10: memref<2x1x32xf32, #tpu.memory_space<vmem>>, %arg11: memref<2x1x32xf32, #tpu.memory_space<vmem>>, %arg12: memref<2x1x32xf32, #tpu.memory_space<vmem>>, %arg13: memref<2x32x96xf32, #tpu.memory_space<vmem>>, %arg14: memref<2x1x96xf32, #tpu.memory_space<vmem>>, %arg15: memref<2x32x32xf32, #tpu.memory_space<vmem>>, %arg16: memref<2x1x32xf32, #tpu.memory_space<vmem>>, %arg17: memref<2x1x32xf32, #tpu.memory_space<vmem>>, %arg18: memref<2x1x32xf32, #tpu.memory_space<vmem>>, %arg19: memref<2x32x32xf32, #tpu.memory_space<vmem>>, %arg20: memref<2x1x32xf32, #tpu.memory_space<vmem>>, %arg21: memref<2x32x64xf32, #tpu.memory_space<vmem>>, %arg22: memref<2x1x64xf32, #tpu.memory_space<vmem>>, %arg23: memref<2x32x32xf32, #tpu.memory_space<vmem>>, %arg24: memref<2x1x32xf32, #tpu.memory_space<vmem>>, %arg25: memref<2x1x32xf32, #tpu.memory_space<vmem>>, %arg26: memref<2x1x32xf32, #tpu.memory_space<vmem>>, %arg27: memref<2x32x64xf32, #tpu.memory_space<vmem>>, %arg28: memref<2x1x64xf32, #tpu.memory_space<vmem>>, %arg29: memref<2x64x32xf32, #tpu.memory_space<vmem>>, %arg30: memref<2x1x32xf32, #tpu.memory_space<vmem>>, %arg31: memref<2x1x32xf32, #tpu.memory_space<vmem>>, %arg32: memref<2x1x32xf32, #tpu.memory_space<vmem>>, %arg33: memref<2x8x32xf32, #tpu.memory_space<vmem>>) attributes {dimension_semantics = [], scalar_prefetch = 0 : i64, scratch_operands = 0 : i64, tpu.core_type = #tpu.core_type<tc>} {
    %c0 = arith.constant 0 : index
    %c0_0 = arith.constant 0 : index
    %c0_1 = arith.constant 0 : index
    %0 = vector.load %arg0[%c0, %c0_0, %c0_1] : memref<2x8x32xf32, #tpu.memory_space<vmem>>, vector<2x8x32xf32>
    %1 = vector.shape_cast %0 : vector<2x8x32xf32> to vector<16x32xf32>
    %c0_2 = arith.constant 0 : index
    %c0_3 = arith.constant 0 : index
    %c0_4 = arith.constant 0 : index
    %2 = vector.load %arg1[%c0_2, %c0_3, %c0_4] : memref<2x32x96xf32, #tpu.memory_space<vmem>>, vector<1x32x96xf32>
    %3 = vector.shape_cast %2 : vector<1x32x96xf32> to vector<32x96xf32>
    %c0_5 = arith.constant 0 : index
    %c0_6 = arith.constant 0 : index
    %c0_7 = arith.constant 0 : index
    %4 = vector.load %arg2[%c0_5, %c0_6, %c0_7] : memref<2x1x96xf32, #tpu.memory_space<vmem>>, vector<1x1x96xf32>
    %5 = vector.shape_cast %4 : vector<1x1x96xf32> to vector<1x96xf32>
    %c0_8 = arith.constant 0 : index
    %c0_9 = arith.constant 0 : index
    %c0_10 = arith.constant 0 : index
    %6 = vector.load %arg3[%c0_8, %c0_9, %c0_10] : memref<2x32x32xf32, #tpu.memory_space<vmem>>, vector<1x32x32xf32>
    %7 = vector.shape_cast %6 : vector<1x32x32xf32> to vector<32x32xf32>
    %c0_11 = arith.constant 0 : index
    %c0_12 = arith.constant 0 : index
    %c0_13 = arith.constant 0 : index
    %8 = vector.load %arg4[%c0_11, %c0_12, %c0_13] : memref<2x1x32xf32, #tpu.memory_space<vmem>>, vector<1x1x32xf32>
    %9 = vector.shape_cast %8 : vector<1x1x32xf32> to vector<1x32xf32>
    %c0_14 = arith.constant 0 : index
    %c0_15 = arith.constant 0 : index
    %c0_16 = arith.constant 0 : index
    %10 = vector.load %arg5[%c0_14, %c0_15, %c0_16] : memref<2x1x32xf32, #tpu.memory_space<vmem>>, vector<1x1x32xf32>
    %11 = vector.shape_cast %10 : vector<1x1x32xf32> to vector<1x32xf32>
    %c0_17 = arith.constant 0 : index
    %c0_18 = arith.constant 0 : index
    %c0_19 = arith.constant 0 : index
    %12 = vector.load %arg6[%c0_17, %c0_18, %c0_19] : memref<2x1x32xf32, #tpu.memory_space<vmem>>, vector<1x1x32xf32>
    %13 = vector.shape_cast %12 : vector<1x1x32xf32> to vector<1x32xf32>
    %c0_20 = arith.constant 0 : index
    %c0_21 = arith.constant 0 : index
    %c0_22 = arith.constant 0 : index
    %14 = vector.load %arg7[%c0_20, %c0_21, %c0_22] : memref<2x32x64xf32, #tpu.memory_space<vmem>>, vector<1x32x64xf32>
    %15 = vector.shape_cast %14 : vector<1x32x64xf32> to vector<32x64xf32>
    %c0_23 = arith.constant 0 : index
    %c0_24 = arith.constant 0 : index
    %c0_25 = arith.constant 0 : index
    %16 = vector.load %arg8[%c0_23, %c0_24, %c0_25] : memref<2x1x64xf32, #tpu.memory_space<vmem>>, vector<1x1x64xf32>
    %17 = vector.shape_cast %16 : vector<1x1x64xf32> to vector<1x64xf32>
    %c0_26 = arith.constant 0 : index
    %c0_27 = arith.constant 0 : index
    %c0_28 = arith.constant 0 : index
    %18 = vector.load %arg9[%c0_26, %c0_27, %c0_28] : memref<2x64x32xf32, #tpu.memory_space<vmem>>, vector<1x64x32xf32>
    %19 = vector.shape_cast %18 : vector<1x64x32xf32> to vector<64x32xf32>
    %c0_29 = arith.constant 0 : index
    %c0_30 = arith.constant 0 : index
    %c0_31 = arith.constant 0 : index
    %20 = vector.load %arg10[%c0_29, %c0_30, %c0_31] : memref<2x1x32xf32, #tpu.memory_space<vmem>>, vector<1x1x32xf32>
    %21 = vector.shape_cast %20 : vector<1x1x32xf32> to vector<1x32xf32>
    %c0_32 = arith.constant 0 : index
    %c0_33 = arith.constant 0 : index
    %c0_34 = arith.constant 0 : index
    %22 = vector.load %arg11[%c0_32, %c0_33, %c0_34] : memref<2x1x32xf32, #tpu.memory_space<vmem>>, vector<1x1x32xf32>
    %23 = vector.shape_cast %22 : vector<1x1x32xf32> to vector<1x32xf32>
    %c0_35 = arith.constant 0 : index
    %c0_36 = arith.constant 0 : index
    %c0_37 = arith.constant 0 : index
    %24 = vector.load %arg12[%c0_35, %c0_36, %c0_37] : memref<2x1x32xf32, #tpu.memory_space<vmem>>, vector<1x1x32xf32>
    %25 = vector.shape_cast %24 : vector<1x1x32xf32> to vector<1x32xf32>
    %cst = arith.constant dense<0.000000e+00> : vector<16x96xf32>
    %26 = tpu.matmul %1, %3, %cst {dimension_numbers = #tpu.dot_dimension_numbers<[1], [0], [0], [1], [0, 0, 1, 1], [], []>} : vector<16x32xf32>, vector<32x96xf32>, vector<16x96xf32> -> vector<16x96xf32>
    %27 = vector.broadcast %5 : vector<1x96xf32> to vector<16x96xf32>
    %28 = arith.addf %26, %27 : vector<16x96xf32>
    %29 = vector.extract_strided_slice %28 {offsets = [0, 0], sizes = [16, 32], strides = [1, 1]} : vector<16x96xf32> to vector<16x32xf32>
    %30 = vector.extract_strided_slice %28 {offsets = [0, 32], sizes = [16, 32], strides = [1, 1]} : vector<16x96xf32> to vector<16x32xf32>
    %31 = vector.extract_strided_slice %28 {offsets = [0, 64], sizes = [16, 32], strides = [1, 1]} : vector<16x96xf32> to vector<16x32xf32>
    %32 = vector.shape_cast %29 : vector<16x32xf32> to vector<2x8x32xf32>
    %33 = vector.shape_cast %30 : vector<16x32xf32> to vector<2x8x32xf32>
    %34 = vector.shape_cast %31 : vector<16x32xf32> to vector<2x8x32xf32>
    %35 = vector.extract_strided_slice %32 {offsets = [0, 0, 0], sizes = [2, 8, 8], strides = [1, 1, 1]} : vector<2x8x32xf32> to vector<2x8x8xf32>
    %36 = vector.extract_strided_slice %33 {offsets = [0, 0, 0], sizes = [2, 8, 8], strides = [1, 1, 1]} : vector<2x8x32xf32> to vector<2x8x8xf32>
    "tpu.trace_start"() <{level = 10 : i32, message = "bqd,bkd->bqk"}> : () -> ()
    %cst_38 = arith.constant dense<0.000000e+00> : vector<2x8x8xf32>
    %37 = tpu.matmul %35, %36, %cst_38 {dimension_numbers = #tpu.dot_dimension_numbers<[2], [2], [1], [1], [0, 0, 0, 1, 1, 1], [0], [0]>} : vector<2x8x8xf32>, vector<2x8x8xf32>, vector<2x8x8xf32> -> vector<2x8x8xf32>
    "tpu.trace_stop"() : () -> ()
    %cst_39 = arith.constant dense<0xFF800000> : vector<2x8xf32>
    %38 = vector.multi_reduction <maximumf>, %37, %cst_39 [2] : vector<2x8x8xf32> to vector<2x8xf32>
    %39 = vector.shape_cast %38 : vector<2x8xf32> to vector<2x8x1xf32>
    %40 = vector.broadcast %39 : vector<2x8x1xf32> to vector<2x8x8xf32>
    %41 = arith.subf %37, %40 : vector<2x8x8xf32>
    %42 = math.exp %41 : vector<2x8x8xf32>
    %cst_40 = arith.constant dense<0.000000e+00> : vector<2x8xf32>
    %43 = vector.multi_reduction <add>, %42, %cst_40 [2] : vector<2x8x8xf32> to vector<2x8xf32>
    %44 = vector.shape_cast %43 : vector<2x8xf32> to vector<2x8x1xf32>
    %45 = vector.broadcast %44 : vector<2x8x1xf32> to vector<2x8x8xf32>
    %46 = arith.divf %42, %45 : vector<2x8x8xf32>
    %47 = vector.extract_strided_slice %34 {offsets = [0, 0, 0], sizes = [2, 8, 8], strides = [1, 1, 1]} : vector<2x8x32xf32> to vector<2x8x8xf32>
    "tpu.trace_start"() <{level = 10 : i32, message = "bqk,bkd->bqd"}> : () -> ()
    %cst_41 = arith.constant dense<0.000000e+00> : vector<2x8x8xf32>
    %48 = tpu.matmul %46, %47, %cst_41 {dimension_numbers = #tpu.dot_dimension_numbers<[2], [1], [1], [2], [0, 0, 0, 1, 1, 2], [0], [0]>} : vector<2x8x8xf32>, vector<2x8x8xf32>, vector<2x8x8xf32> -> vector<2x8x8xf32>
    "tpu.trace_stop"() : () -> ()
    %49 = vector.shape_cast %48 : vector<2x8x8xf32> to vector<16x8xf32>
    %50 = vector.extract_strided_slice %7 {offsets = [0, 0], sizes = [8, 32], strides = [1, 1]} : vector<32x32xf32> to vector<8x32xf32>
    %cst_42 = arith.constant dense<0.000000e+00> : vector<16x32xf32>
    %51 = tpu.matmul %49, %50, %cst_42 {dimension_numbers = #tpu.dot_dimension_numbers<[1], [0], [0], [1], [0, 0, 1, 1], [], []>} : vector<16x8xf32>, vector<8x32xf32>, vector<16x32xf32> -> vector<16x32xf32>
    %52 = vector.extract_strided_slice %32 {offsets = [0, 0, 8], sizes = [2, 8, 8], strides = [1, 1, 1]} : vector<2x8x32xf32> to vector<2x8x8xf32>
    %53 = vector.extract_strided_slice %33 {offsets = [0, 0, 8], sizes = [2, 8, 8], strides = [1, 1, 1]} : vector<2x8x32xf32> to vector<2x8x8xf32>
    "tpu.trace_start"() <{level = 10 : i32, message = "bqd,bkd->bqk"}> : () -> ()
    %cst_43 = arith.constant dense<0.000000e+00> : vector<2x8x8xf32>
    %54 = tpu.matmul %52, %53, %cst_43 {dimension_numbers = #tpu.dot_dimension_numbers<[2], [2], [1], [1], [0, 0, 0, 1, 1, 1], [0], [0]>} : vector<2x8x8xf32>, vector<2x8x8xf32>, vector<2x8x8xf32> -> vector<2x8x8xf32>
    "tpu.trace_stop"() : () -> ()
    %cst_44 = arith.constant dense<0xFF800000> : vector<2x8xf32>
    %55 = vector.multi_reduction <maximumf>, %54, %cst_44 [2] : vector<2x8x8xf32> to vector<2x8xf32>
    %56 = vector.shape_cast %55 : vector<2x8xf32> to vector<2x8x1xf32>
    %57 = vector.broadcast %56 : vector<2x8x1xf32> to vector<2x8x8xf32>
    %58 = arith.subf %54, %57 : vector<2x8x8xf32>
    %59 = math.exp %58 : vector<2x8x8xf32>
    %cst_45 = arith.constant dense<0.000000e+00> : vector<2x8xf32>
    %60 = vector.multi_reduction <add>, %59, %cst_45 [2] : vector<2x8x8xf32> to vector<2x8xf32>
    %61 = vector.shape_cast %60 : vector<2x8xf32> to vector<2x8x1xf32>
    %62 = vector.broadcast %61 : vector<2x8x1xf32> to vector<2x8x8xf32>
    %63 = arith.divf %59, %62 : vector<2x8x8xf32>
    %64 = vector.extract_strided_slice %34 {offsets = [0, 0, 8], sizes = [2, 8, 8], strides = [1, 1, 1]} : vector<2x8x32xf32> to vector<2x8x8xf32>
    "tpu.trace_start"() <{level = 10 : i32, message = "bqk,bkd->bqd"}> : () -> ()
    %cst_46 = arith.constant dense<0.000000e+00> : vector<2x8x8xf32>
    %65 = tpu.matmul %63, %64, %cst_46 {dimension_numbers = #tpu.dot_dimension_numbers<[2], [1], [1], [2], [0, 0, 0, 1, 1, 2], [0], [0]>} : vector<2x8x8xf32>, vector<2x8x8xf32>, vector<2x8x8xf32> -> vector<2x8x8xf32>
    "tpu.trace_stop"() : () -> ()
    %66 = vector.shape_cast %65 : vector<2x8x8xf32> to vector<16x8xf32>
    %67 = vector.extract_strided_slice %7 {offsets = [8, 0], sizes = [8, 32], strides = [1, 1]} : vector<32x32xf32> to vector<8x32xf32>
    %cst_47 = arith.constant dense<0.000000e+00> : vector<16x32xf32>
    %68 = tpu.matmul %66, %67, %cst_47 {dimension_numbers = #tpu.dot_dimension_numbers<[1], [0], [0], [1], [0, 0, 1, 1], [], []>} : vector<16x8xf32>, vector<8x32xf32>, vector<16x32xf32> -> vector<16x32xf32>
    %69 = arith.addf %51, %68 : vector<16x32xf32>
    %70 = vector.extract_strided_slice %32 {offsets = [0, 0, 16], sizes = [2, 8, 8], strides = [1, 1, 1]} : vector<2x8x32xf32> to vector<2x8x8xf32>
    %71 = vector.extract_strided_slice %33 {offsets = [0, 0, 16], sizes = [2, 8, 8], strides = [1, 1, 1]} : vector<2x8x32xf32> to vector<2x8x8xf32>
    "tpu.trace_start"() <{level = 10 : i32, message = "bqd,bkd->bqk"}> : () -> ()
    %cst_48 = arith.constant dense<0.000000e+00> : vector<2x8x8xf32>
    %72 = tpu.matmul %70, %71, %cst_48 {dimension_numbers = #tpu.dot_dimension_numbers<[2], [2], [1], [1], [0, 0, 0, 1, 1, 1], [0], [0]>} : vector<2x8x8xf32>, vector<2x8x8xf32>, vector<2x8x8xf32> -> vector<2x8x8xf32>
    "tpu.trace_stop"() : () -> ()
    %cst_49 = arith.constant dense<0xFF800000> : vector<2x8xf32>
    %73 = vector.multi_reduction <maximumf>, %72, %cst_49 [2] : vector<2x8x8xf32> to vector<2x8xf32>
    %74 = vector.shape_cast %73 : vector<2x8xf32> to vector<2x8x1xf32>
    %75 = vector.broadcast %74 : vector<2x8x1xf32> to vector<2x8x8xf32>
    %76 = arith.subf %72, %75 : vector<2x8x8xf32>
    %77 = math.exp %76 : vector<2x8x8xf32>
    %cst_50 = arith.constant dense<0.000000e+00> : vector<2x8xf32>
    %78 = vector.multi_reduction <add>, %77, %cst_50 [2] : vector<2x8x8xf32> to vector<2x8xf32>
    %79 = vector.shape_cast %78 : vector<2x8xf32> to vector<2x8x1xf32>
    %80 = vector.broadcast %79 : vector<2x8x1xf32> to vector<2x8x8xf32>
    %81 = arith.divf %77, %80 : vector<2x8x8xf32>
    %82 = vector.extract_strided_slice %34 {offsets = [0, 0, 16], sizes = [2, 8, 8], strides = [1, 1, 1]} : vector<2x8x32xf32> to vector<2x8x8xf32>
    "tpu.trace_start"() <{level = 10 : i32, message = "bqk,bkd->bqd"}> : () -> ()
    %cst_51 = arith.constant dense<0.000000e+00> : vector<2x8x8xf32>
    %83 = tpu.matmul %81, %82, %cst_51 {dimension_numbers = #tpu.dot_dimension_numbers<[2], [1], [1], [2], [0, 0, 0, 1, 1, 2], [0], [0]>} : vector<2x8x8xf32>, vector<2x8x8xf32>, vector<2x8x8xf32> -> vector<2x8x8xf32>
    "tpu.trace_stop"() : () -> ()
    %84 = vector.shape_cast %83 : vector<2x8x8xf32> to vector<16x8xf32>
    %85 = vector.extract_strided_slice %7 {offsets = [16, 0], sizes = [8, 32], strides = [1, 1]} : vector<32x32xf32> to vector<8x32xf32>
    %cst_52 = arith.constant dense<0.000000e+00> : vector<16x32xf32>
    %86 = tpu.matmul %84, %85, %cst_52 {dimension_numbers = #tpu.dot_dimension_numbers<[1], [0], [0], [1], [0, 0, 1, 1], [], []>} : vector<16x8xf32>, vector<8x32xf32>, vector<16x32xf32> -> vector<16x32xf32>
    %87 = arith.addf %69, %86 : vector<16x32xf32>
    %88 = vector.extract_strided_slice %32 {offsets = [0, 0, 24], sizes = [2, 8, 8], strides = [1, 1, 1]} : vector<2x8x32xf32> to vector<2x8x8xf32>
    %89 = vector.extract_strided_slice %33 {offsets = [0, 0, 24], sizes = [2, 8, 8], strides = [1, 1, 1]} : vector<2x8x32xf32> to vector<2x8x8xf32>
    "tpu.trace_start"() <{level = 10 : i32, message = "bqd,bkd->bqk"}> : () -> ()
    %cst_53 = arith.constant dense<0.000000e+00> : vector<2x8x8xf32>
    %90 = tpu.matmul %88, %89, %cst_53 {dimension_numbers = #tpu.dot_dimension_numbers<[2], [2], [1], [1], [0, 0, 0, 1, 1, 1], [0], [0]>} : vector<2x8x8xf32>, vector<2x8x8xf32>, vector<2x8x8xf32> -> vector<2x8x8xf32>
    "tpu.trace_stop"() : () -> ()
    %cst_54 = arith.constant dense<0xFF800000> : vector<2x8xf32>
    %91 = vector.multi_reduction <maximumf>, %90, %cst_54 [2] : vector<2x8x8xf32> to vector<2x8xf32>
    %92 = vector.shape_cast %91 : vector<2x8xf32> to vector<2x8x1xf32>
    %93 = vector.broadcast %92 : vector<2x8x1xf32> to vector<2x8x8xf32>
    %94 = arith.subf %90, %93 : vector<2x8x8xf32>
    %95 = math.exp %94 : vector<2x8x8xf32>
    %cst_55 = arith.constant dense<0.000000e+00> : vector<2x8xf32>
    %96 = vector.multi_reduction <add>, %95, %cst_55 [2] : vector<2x8x8xf32> to vector<2x8xf32>
    %97 = vector.shape_cast %96 : vector<2x8xf32> to vector<2x8x1xf32>
    %98 = vector.broadcast %97 : vector<2x8x1xf32> to vector<2x8x8xf32>
    %99 = arith.divf %95, %98 : vector<2x8x8xf32>
    %100 = vector.extract_strided_slice %34 {offsets = [0, 0, 24], sizes = [2, 8, 8], strides = [1, 1, 1]} : vector<2x8x32xf32> to vector<2x8x8xf32>
    "tpu.trace_start"() <{level = 10 : i32, message = "bqk,bkd->bqd"}> : () -> ()
    %cst_56 = arith.constant dense<0.000000e+00> : vector<2x8x8xf32>
    %101 = tpu.matmul %99, %100, %cst_56 {dimension_numbers = #tpu.dot_dimension_numbers<[2], [1], [1], [2], [0, 0, 0, 1, 1, 2], [0], [0]>} : vector<2x8x8xf32>, vector<2x8x8xf32>, vector<2x8x8xf32> -> vector<2x8x8xf32>
    "tpu.trace_stop"() : () -> ()
    %102 = vector.shape_cast %101 : vector<2x8x8xf32> to vector<16x8xf32>
    %103 = vector.extract_strided_slice %7 {offsets = [24, 0], sizes = [8, 32], strides = [1, 1]} : vector<32x32xf32> to vector<8x32xf32>
    %cst_57 = arith.constant dense<0.000000e+00> : vector<16x32xf32>
    %104 = tpu.matmul %102, %103, %cst_57 {dimension_numbers = #tpu.dot_dimension_numbers<[1], [0], [0], [1], [0, 0, 1, 1], [], []>} : vector<16x8xf32>, vector<8x32xf32>, vector<16x32xf32> -> vector<16x32xf32>
    %105 = arith.addf %87, %104 : vector<16x32xf32>
    %106 = vector.broadcast %9 : vector<1x32xf32> to vector<16x32xf32>
    %107 = arith.addf %105, %106 : vector<16x32xf32>
    %108 = arith.addf %1, %107 : vector<16x32xf32>
    %cst_58 = arith.constant dense<0.000000e+00> : vector<16xf32>
    %109 = vector.multi_reduction <add>, %108, %cst_58 [1] : vector<16x32xf32> to vector<16xf32>
    %110 = vector.shape_cast %109 : vector<16xf32> to vector<16x1xf32>
    %cst_59 = arith.constant 3.200000e+01 : f32
    %111 = vector.broadcast %cst_59 : f32 to vector<16x1xf32>
    %112 = arith.divf %110, %111 : vector<16x1xf32>
    %113 = vector.broadcast %112 : vector<16x1xf32> to vector<16x32xf32>
    %114 = arith.subf %108, %113 : vector<16x32xf32>
    %115 = arith.mulf %114, %114 : vector<16x32xf32>
    %cst_60 = arith.constant dense<0.000000e+00> : vector<16xf32>
    %116 = vector.multi_reduction <add>, %115, %cst_60 [1] : vector<16x32xf32> to vector<16xf32>
    %117 = vector.shape_cast %116 : vector<16xf32> to vector<16x1xf32>
    %cst_61 = arith.constant 3.200000e+01 : f32
    %118 = vector.broadcast %cst_61 : f32 to vector<16x1xf32>
    %119 = arith.divf %117, %118 : vector<16x1xf32>
    %cst_62 = arith.constant 9.99999974E-6 : f32
    %120 = vector.broadcast %cst_62 : f32 to vector<16x1xf32>
    %121 = arith.addf %119, %120 : vector<16x1xf32>
    %122 = math.rsqrt %121 : vector<16x1xf32>
    %123 = vector.broadcast %122 : vector<16x1xf32> to vector<16x32xf32>
    %124 = arith.mulf %114, %123 : vector<16x32xf32>
    %125 = vector.broadcast %11 : vector<1x32xf32> to vector<16x32xf32>
    %126 = arith.mulf %124, %125 : vector<16x32xf32>
    %127 = vector.broadcast %13 : vector<1x32xf32> to vector<16x32xf32>
    %128 = arith.addf %126, %127 : vector<16x32xf32>
    %cst_63 = arith.constant dense<0.000000e+00> : vector<16x64xf32>
    %129 = tpu.matmul %128, %15, %cst_63 {dimension_numbers = #tpu.dot_dimension_numbers<[1], [0], [0], [1], [0, 0, 1, 1], [], []>} : vector<16x32xf32>, vector<32x64xf32>, vector<16x64xf32> -> vector<16x64xf32>
    %130 = vector.broadcast %17 : vector<1x64xf32> to vector<16x64xf32>
    %131 = arith.addf %129, %130 : vector<16x64xf32>
    %cst_64 = arith.constant 0.000000e+00 : f32
    %132 = vector.broadcast %cst_64 : f32 to vector<16x64xf32>
    %133 = arith.maximumf %131, %132 : vector<16x64xf32>
    %cst_65 = arith.constant dense<0.000000e+00> : vector<16x32xf32>
    %134 = tpu.matmul %133, %19, %cst_65 {dimension_numbers = #tpu.dot_dimension_numbers<[1], [0], [0], [1], [0, 0, 1, 1], [], []>} : vector<16x64xf32>, vector<64x32xf32>, vector<16x32xf32> -> vector<16x32xf32>
    %135 = vector.broadcast %21 : vector<1x32xf32> to vector<16x32xf32>
    %136 = arith.addf %134, %135 : vector<16x32xf32>
    %137 = arith.addf %128, %136 : vector<16x32xf32>
    %cst_66 = arith.constant dense<0.000000e+00> : vector<16xf32>
    %138 = vector.multi_reduction <add>, %137, %cst_66 [1] : vector<16x32xf32> to vector<16xf32>
    %139 = vector.shape_cast %138 : vector<16xf32> to vector<16x1xf32>
    %cst_67 = arith.constant 3.200000e+01 : f32
    %140 = vector.broadcast %cst_67 : f32 to vector<16x1xf32>
    %141 = arith.divf %139, %140 : vector<16x1xf32>
    %142 = vector.broadcast %141 : vector<16x1xf32> to vector<16x32xf32>
    %143 = arith.subf %137, %142 : vector<16x32xf32>
    %144 = arith.mulf %143, %143 : vector<16x32xf32>
    %cst_68 = arith.constant dense<0.000000e+00> : vector<16xf32>
    %145 = vector.multi_reduction <add>, %144, %cst_68 [1] : vector<16x32xf32> to vector<16xf32>
    %146 = vector.shape_cast %145 : vector<16xf32> to vector<16x1xf32>
    %cst_69 = arith.constant 3.200000e+01 : f32
    %147 = vector.broadcast %cst_69 : f32 to vector<16x1xf32>
    %148 = arith.divf %146, %147 : vector<16x1xf32>
    %cst_70 = arith.constant 9.99999974E-6 : f32
    %149 = vector.broadcast %cst_70 : f32 to vector<16x1xf32>
    %150 = arith.addf %148, %149 : vector<16x1xf32>
    %151 = math.rsqrt %150 : vector<16x1xf32>
    %152 = vector.broadcast %151 : vector<16x1xf32> to vector<16x32xf32>
    %153 = arith.mulf %143, %152 : vector<16x32xf32>
    %154 = vector.broadcast %23 : vector<1x32xf32> to vector<16x32xf32>
    %155 = arith.mulf %153, %154 : vector<16x32xf32>
    %156 = vector.broadcast %25 : vector<1x32xf32> to vector<16x32xf32>
    %157 = arith.addf %155, %156 : vector<16x32xf32>
    %c1 = arith.constant 1 : index
    %c0_71 = arith.constant 0 : index
    %c0_72 = arith.constant 0 : index
    %158 = vector.load %arg1[%c1, %c0_71, %c0_72] : memref<2x32x96xf32, #tpu.memory_space<vmem>>, vector<1x32x96xf32>
    %159 = vector.shape_cast %158 : vector<1x32x96xf32> to vector<32x96xf32>
    %c1_73 = arith.constant 1 : index
    %c0_74 = arith.constant 0 : index
    %c0_75 = arith.constant 0 : index
    %160 = vector.load %arg2[%c1_73, %c0_74, %c0_75] : memref<2x1x96xf32, #tpu.memory_space<vmem>>, vector<1x1x96xf32>
    %161 = vector.shape_cast %160 : vector<1x1x96xf32> to vector<1x96xf32>
    %c1_76 = arith.constant 1 : index
    %c0_77 = arith.constant 0 : index
    %c0_78 = arith.constant 0 : index
    %162 = vector.load %arg3[%c1_76, %c0_77, %c0_78] : memref<2x32x32xf32, #tpu.memory_space<vmem>>, vector<1x32x32xf32>
    %163 = vector.shape_cast %162 : vector<1x32x32xf32> to vector<32x32xf32>
    %c1_79 = arith.constant 1 : index
    %c0_80 = arith.constant 0 : index
    %c0_81 = arith.constant 0 : index
    %164 = vector.load %arg4[%c1_79, %c0_80, %c0_81] : memref<2x1x32xf32, #tpu.memory_space<vmem>>, vector<1x1x32xf32>
    %165 = vector.shape_cast %164 : vector<1x1x32xf32> to vector<1x32xf32>
    %c1_82 = arith.constant 1 : index
    %c0_83 = arith.constant 0 : index
    %c0_84 = arith.constant 0 : index
    %166 = vector.load %arg5[%c1_82, %c0_83, %c0_84] : memref<2x1x32xf32, #tpu.memory_space<vmem>>, vector<1x1x32xf32>
    %167 = vector.shape_cast %166 : vector<1x1x32xf32> to vector<1x32xf32>
    %c1_85 = arith.constant 1 : index
    %c0_86 = arith.constant 0 : index
    %c0_87 = arith.constant 0 : index
    %168 = vector.load %arg6[%c1_85, %c0_86, %c0_87] : memref<2x1x32xf32, #tpu.memory_space<vmem>>, vector<1x1x32xf32>
    %169 = vector.shape_cast %168 : vector<1x1x32xf32> to vector<1x32xf32>
    %c1_88 = arith.constant 1 : index
    %c0_89 = arith.constant 0 : index
    %c0_90 = arith.constant 0 : index
    %170 = vector.load %arg7[%c1_88, %c0_89, %c0_90] : memref<2x32x64xf32, #tpu.memory_space<vmem>>, vector<1x32x64xf32>
    %171 = vector.shape_cast %170 : vector<1x32x64xf32> to vector<32x64xf32>
    %c1_91 = arith.constant 1 : index
    %c0_92 = arith.constant 0 : index
    %c0_93 = arith.constant 0 : index
    %172 = vector.load %arg8[%c1_91, %c0_92, %c0_93] : memref<2x1x64xf32, #tpu.memory_space<vmem>>, vector<1x1x64xf32>
    %173 = vector.shape_cast %172 : vector<1x1x64xf32> to vector<1x64xf32>
    %c1_94 = arith.constant 1 : index
    %c0_95 = arith.constant 0 : index
    %c0_96 = arith.constant 0 : index
    %174 = vector.load %arg9[%c1_94, %c0_95, %c0_96] : memref<2x64x32xf32, #tpu.memory_space<vmem>>, vector<1x64x32xf32>
    %175 = vector.shape_cast %174 : vector<1x64x32xf32> to vector<64x32xf32>
    %c1_97 = arith.constant 1 : index
    %c0_98 = arith.constant 0 : index
    %c0_99 = arith.constant 0 : index
    %176 = vector.load %arg10[%c1_97, %c0_98, %c0_99] : memref<2x1x32xf32, #tpu.memory_space<vmem>>, vector<1x1x32xf32>
    %177 = vector.shape_cast %176 : vector<1x1x32xf32> to vector<1x32xf32>
    %c1_100 = arith.constant 1 : index
    %c0_101 = arith.constant 0 : index
    %c0_102 = arith.constant 0 : index
    %178 = vector.load %arg11[%c1_100, %c0_101, %c0_102] : memref<2x1x32xf32, #tpu.memory_space<vmem>>, vector<1x1x32xf32>
    %179 = vector.shape_cast %178 : vector<1x1x32xf32> to vector<1x32xf32>
    %c1_103 = arith.constant 1 : index
    %c0_104 = arith.constant 0 : index
    %c0_105 = arith.constant 0 : index
    %180 = vector.load %arg12[%c1_103, %c0_104, %c0_105] : memref<2x1x32xf32, #tpu.memory_space<vmem>>, vector<1x1x32xf32>
    %181 = vector.shape_cast %180 : vector<1x1x32xf32> to vector<1x32xf32>
    %cst_106 = arith.constant dense<0.000000e+00> : vector<16x96xf32>
    %182 = tpu.matmul %157, %159, %cst_106 {dimension_numbers = #tpu.dot_dimension_numbers<[1], [0], [0], [1], [0, 0, 1, 1], [], []>} : vector<16x32xf32>, vector<32x96xf32>, vector<16x96xf32> -> vector<16x96xf32>
    %183 = vector.broadcast %161 : vector<1x96xf32> to vector<16x96xf32>
    %184 = arith.addf %182, %183 : vector<16x96xf32>
    %185 = vector.extract_strided_slice %184 {offsets = [0, 0], sizes = [16, 32], strides = [1, 1]} : vector<16x96xf32> to vector<16x32xf32>
    %186 = vector.extract_strided_slice %184 {offsets = [0, 32], sizes = [16, 32], strides = [1, 1]} : vector<16x96xf32> to vector<16x32xf32>
    %187 = vector.extract_strided_slice %184 {offsets = [0, 64], sizes = [16, 32], strides = [1, 1]} : vector<16x96xf32> to vector<16x32xf32>
    %188 = vector.shape_cast %185 : vector<16x32xf32> to vector<2x8x32xf32>
    %189 = vector.shape_cast %186 : vector<16x32xf32> to vector<2x8x32xf32>
    %190 = vector.shape_cast %187 : vector<16x32xf32> to vector<2x8x32xf32>
    %191 = vector.extract_strided_slice %188 {offsets = [0, 0, 0], sizes = [2, 8, 8], strides = [1, 1, 1]} : vector<2x8x32xf32> to vector<2x8x8xf32>
    %192 = vector.extract_strided_slice %189 {offsets = [0, 0, 0], sizes = [2, 8, 8], strides = [1, 1, 1]} : vector<2x8x32xf32> to vector<2x8x8xf32>
    "tpu.trace_start"() <{level = 10 : i32, message = "bqd,bkd->bqk"}> : () -> ()
    %cst_107 = arith.constant dense<0.000000e+00> : vector<2x8x8xf32>
    %193 = tpu.matmul %191, %192, %cst_107 {dimension_numbers = #tpu.dot_dimension_numbers<[2], [2], [1], [1], [0, 0, 0, 1, 1, 1], [0], [0]>} : vector<2x8x8xf32>, vector<2x8x8xf32>, vector<2x8x8xf32> -> vector<2x8x8xf32>
    "tpu.trace_stop"() : () -> ()
    %cst_108 = arith.constant dense<0xFF800000> : vector<2x8xf32>
    %194 = vector.multi_reduction <maximumf>, %193, %cst_108 [2] : vector<2x8x8xf32> to vector<2x8xf32>
    %195 = vector.shape_cast %194 : vector<2x8xf32> to vector<2x8x1xf32>
    %196 = vector.broadcast %195 : vector<2x8x1xf32> to vector<2x8x8xf32>
    %197 = arith.subf %193, %196 : vector<2x8x8xf32>
    %198 = math.exp %197 : vector<2x8x8xf32>
    %cst_109 = arith.constant dense<0.000000e+00> : vector<2x8xf32>
    %199 = vector.multi_reduction <add>, %198, %cst_109 [2] : vector<2x8x8xf32> to vector<2x8xf32>
    %200 = vector.shape_cast %199 : vector<2x8xf32> to vector<2x8x1xf32>
    %201 = vector.broadcast %200 : vector<2x8x1xf32> to vector<2x8x8xf32>
    %202 = arith.divf %198, %201 : vector<2x8x8xf32>
    %203 = vector.extract_strided_slice %190 {offsets = [0, 0, 0], sizes = [2, 8, 8], strides = [1, 1, 1]} : vector<2x8x32xf32> to vector<2x8x8xf32>
    "tpu.trace_start"() <{level = 10 : i32, message = "bqk,bkd->bqd"}> : () -> ()
    %cst_110 = arith.constant dense<0.000000e+00> : vector<2x8x8xf32>
    %204 = tpu.matmul %202, %203, %cst_110 {dimension_numbers = #tpu.dot_dimension_numbers<[2], [1], [1], [2], [0, 0, 0, 1, 1, 2], [0], [0]>} : vector<2x8x8xf32>, vector<2x8x8xf32>, vector<2x8x8xf32> -> vector<2x8x8xf32>
    "tpu.trace_stop"() : () -> ()
    %205 = vector.shape_cast %204 : vector<2x8x8xf32> to vector<16x8xf32>
    %206 = vector.extract_strided_slice %163 {offsets = [0, 0], sizes = [8, 32], strides = [1, 1]} : vector<32x32xf32> to vector<8x32xf32>
    %cst_111 = arith.constant dense<0.000000e+00> : vector<16x32xf32>
    %207 = tpu.matmul %205, %206, %cst_111 {dimension_numbers = #tpu.dot_dimension_numbers<[1], [0], [0], [1], [0, 0, 1, 1], [], []>} : vector<16x8xf32>, vector<8x32xf32>, vector<16x32xf32> -> vector<16x32xf32>
    %208 = vector.extract_strided_slice %188 {offsets = [0, 0, 8], sizes = [2, 8, 8], strides = [1, 1, 1]} : vector<2x8x32xf32> to vector<2x8x8xf32>
    %209 = vector.extract_strided_slice %189 {offsets = [0, 0, 8], sizes = [2, 8, 8], strides = [1, 1, 1]} : vector<2x8x32xf32> to vector<2x8x8xf32>
    "tpu.trace_start"() <{level = 10 : i32, message = "bqd,bkd->bqk"}> : () -> ()
    %cst_112 = arith.constant dense<0.000000e+00> : vector<2x8x8xf32>
    %210 = tpu.matmul %208, %209, %cst_112 {dimension_numbers = #tpu.dot_dimension_numbers<[2], [2], [1], [1], [0, 0, 0, 1, 1, 1], [0], [0]>} : vector<2x8x8xf32>, vector<2x8x8xf32>, vector<2x8x8xf32> -> vector<2x8x8xf32>
    "tpu.trace_stop"() : () -> ()
    %cst_113 = arith.constant dense<0xFF800000> : vector<2x8xf32>
    %211 = vector.multi_reduction <maximumf>, %210, %cst_113 [2] : vector<2x8x8xf32> to vector<2x8xf32>
    %212 = vector.shape_cast %211 : vector<2x8xf32> to vector<2x8x1xf32>
    %213 = vector.broadcast %212 : vector<2x8x1xf32> to vector<2x8x8xf32>
    %214 = arith.subf %210, %213 : vector<2x8x8xf32>
    %215 = math.exp %214 : vector<2x8x8xf32>
    %cst_114 = arith.constant dense<0.000000e+00> : vector<2x8xf32>
    %216 = vector.multi_reduction <add>, %215, %cst_114 [2] : vector<2x8x8xf32> to vector<2x8xf32>
    %217 = vector.shape_cast %216 : vector<2x8xf32> to vector<2x8x1xf32>
    %218 = vector.broadcast %217 : vector<2x8x1xf32> to vector<2x8x8xf32>
    %219 = arith.divf %215, %218 : vector<2x8x8xf32>
    %220 = vector.extract_strided_slice %190 {offsets = [0, 0, 8], sizes = [2, 8, 8], strides = [1, 1, 1]} : vector<2x8x32xf32> to vector<2x8x8xf32>
    "tpu.trace_start"() <{level = 10 : i32, message = "bqk,bkd->bqd"}> : () -> ()
    %cst_115 = arith.constant dense<0.000000e+00> : vector<2x8x8xf32>
    %221 = tpu.matmul %219, %220, %cst_115 {dimension_numbers = #tpu.dot_dimension_numbers<[2], [1], [1], [2], [0, 0, 0, 1, 1, 2], [0], [0]>} : vector<2x8x8xf32>, vector<2x8x8xf32>, vector<2x8x8xf32> -> vector<2x8x8xf32>
    "tpu.trace_stop"() : () -> ()
    %222 = vector.shape_cast %221 : vector<2x8x8xf32> to vector<16x8xf32>
    %223 = vector.extract_strided_slice %163 {offsets = [8, 0], sizes = [8, 32], strides = [1, 1]} : vector<32x32xf32> to vector<8x32xf32>
    %cst_116 = arith.constant dense<0.000000e+00> : vector<16x32xf32>
    %224 = tpu.matmul %222, %223, %cst_116 {dimension_numbers = #tpu.dot_dimension_numbers<[1], [0], [0], [1], [0, 0, 1, 1], [], []>} : vector<16x8xf32>, vector<8x32xf32>, vector<16x32xf32> -> vector<16x32xf32>
    %225 = arith.addf %207, %224 : vector<16x32xf32>
    %226 = vector.extract_strided_slice %188 {offsets = [0, 0, 16], sizes = [2, 8, 8], strides = [1, 1, 1]} : vector<2x8x32xf32> to vector<2x8x8xf32>
    %227 = vector.extract_strided_slice %189 {offsets = [0, 0, 16], sizes = [2, 8, 8], strides = [1, 1, 1]} : vector<2x8x32xf32> to vector<2x8x8xf32>
    "tpu.trace_start"() <{level = 10 : i32, message = "bqd,bkd->bqk"}> : () -> ()
    %cst_117 = arith.constant dense<0.000000e+00> : vector<2x8x8xf32>
    %228 = tpu.matmul %226, %227, %cst_117 {dimension_numbers = #tpu.dot_dimension_numbers<[2], [2], [1], [1], [0, 0, 0, 1, 1, 1], [0], [0]>} : vector<2x8x8xf32>, vector<2x8x8xf32>, vector<2x8x8xf32> -> vector<2x8x8xf32>
    "tpu.trace_stop"() : () -> ()
    %cst_118 = arith.constant dense<0xFF800000> : vector<2x8xf32>
    %229 = vector.multi_reduction <maximumf>, %228, %cst_118 [2] : vector<2x8x8xf32> to vector<2x8xf32>
    %230 = vector.shape_cast %229 : vector<2x8xf32> to vector<2x8x1xf32>
    %231 = vector.broadcast %230 : vector<2x8x1xf32> to vector<2x8x8xf32>
    %232 = arith.subf %228, %231 : vector<2x8x8xf32>
    %233 = math.exp %232 : vector<2x8x8xf32>
    %cst_119 = arith.constant dense<0.000000e+00> : vector<2x8xf32>
    %234 = vector.multi_reduction <add>, %233, %cst_119 [2] : vector<2x8x8xf32> to vector<2x8xf32>
    %235 = vector.shape_cast %234 : vector<2x8xf32> to vector<2x8x1xf32>
    %236 = vector.broadcast %235 : vector<2x8x1xf32> to vector<2x8x8xf32>
    %237 = arith.divf %233, %236 : vector<2x8x8xf32>
    %238 = vector.extract_strided_slice %190 {offsets = [0, 0, 16], sizes = [2, 8, 8], strides = [1, 1, 1]} : vector<2x8x32xf32> to vector<2x8x8xf32>
    "tpu.trace_start"() <{level = 10 : i32, message = "bqk,bkd->bqd"}> : () -> ()
    %cst_120 = arith.constant dense<0.000000e+00> : vector<2x8x8xf32>
    %239 = tpu.matmul %237, %238, %cst_120 {dimension_numbers = #tpu.dot_dimension_numbers<[2], [1], [1], [2], [0, 0, 0, 1, 1, 2], [0], [0]>} : vector<2x8x8xf32>, vector<2x8x8xf32>, vector<2x8x8xf32> -> vector<2x8x8xf32>
    "tpu.trace_stop"() : () -> ()
    %240 = vector.shape_cast %239 : vector<2x8x8xf32> to vector<16x8xf32>
    %241 = vector.extract_strided_slice %163 {offsets = [16, 0], sizes = [8, 32], strides = [1, 1]} : vector<32x32xf32> to vector<8x32xf32>
    %cst_121 = arith.constant dense<0.000000e+00> : vector<16x32xf32>
    %242 = tpu.matmul %240, %241, %cst_121 {dimension_numbers = #tpu.dot_dimension_numbers<[1], [0], [0], [1], [0, 0, 1, 1], [], []>} : vector<16x8xf32>, vector<8x32xf32>, vector<16x32xf32> -> vector<16x32xf32>
    %243 = arith.addf %225, %242 : vector<16x32xf32>
    %244 = vector.extract_strided_slice %188 {offsets = [0, 0, 24], sizes = [2, 8, 8], strides = [1, 1, 1]} : vector<2x8x32xf32> to vector<2x8x8xf32>
    %245 = vector.extract_strided_slice %189 {offsets = [0, 0, 24], sizes = [2, 8, 8], strides = [1, 1, 1]} : vector<2x8x32xf32> to vector<2x8x8xf32>
    "tpu.trace_start"() <{level = 10 : i32, message = "bqd,bkd->bqk"}> : () -> ()
    %cst_122 = arith.constant dense<0.000000e+00> : vector<2x8x8xf32>
    %246 = tpu.matmul %244, %245, %cst_122 {dimension_numbers = #tpu.dot_dimension_numbers<[2], [2], [1], [1], [0, 0, 0, 1, 1, 1], [0], [0]>} : vector<2x8x8xf32>, vector<2x8x8xf32>, vector<2x8x8xf32> -> vector<2x8x8xf32>
    "tpu.trace_stop"() : () -> ()
    %cst_123 = arith.constant dense<0xFF800000> : vector<2x8xf32>
    %247 = vector.multi_reduction <maximumf>, %246, %cst_123 [2] : vector<2x8x8xf32> to vector<2x8xf32>
    %248 = vector.shape_cast %247 : vector<2x8xf32> to vector<2x8x1xf32>
    %249 = vector.broadcast %248 : vector<2x8x1xf32> to vector<2x8x8xf32>
    %250 = arith.subf %246, %249 : vector<2x8x8xf32>
    %251 = math.exp %250 : vector<2x8x8xf32>
    %cst_124 = arith.constant dense<0.000000e+00> : vector<2x8xf32>
    %252 = vector.multi_reduction <add>, %251, %cst_124 [2] : vector<2x8x8xf32> to vector<2x8xf32>
    %253 = vector.shape_cast %252 : vector<2x8xf32> to vector<2x8x1xf32>
    %254 = vector.broadcast %253 : vector<2x8x1xf32> to vector<2x8x8xf32>
    %255 = arith.divf %251, %254 : vector<2x8x8xf32>
    %256 = vector.extract_strided_slice %190 {offsets = [0, 0, 24], sizes = [2, 8, 8], strides = [1, 1, 1]} : vector<2x8x32xf32> to vector<2x8x8xf32>
    "tpu.trace_start"() <{level = 10 : i32, message = "bqk,bkd->bqd"}> : () -> ()
    %cst_125 = arith.constant dense<0.000000e+00> : vector<2x8x8xf32>
    %257 = tpu.matmul %255, %256, %cst_125 {dimension_numbers = #tpu.dot_dimension_numbers<[2], [1], [1], [2], [0, 0, 0, 1, 1, 2], [0], [0]>} : vector<2x8x8xf32>, vector<2x8x8xf32>, vector<2x8x8xf32> -> vector<2x8x8xf32>
    "tpu.trace_stop"() : () -> ()
    %258 = vector.shape_cast %257 : vector<2x8x8xf32> to vector<16x8xf32>
    %259 = vector.extract_strided_slice %163 {offsets = [24, 0], sizes = [8, 32], strides = [1, 1]} : vector<32x32xf32> to vector<8x32xf32>
    %cst_126 = arith.constant dense<0.000000e+00> : vector<16x32xf32>
    %260 = tpu.matmul %258, %259, %cst_126 {dimension_numbers = #tpu.dot_dimension_numbers<[1], [0], [0], [1], [0, 0, 1, 1], [], []>} : vector<16x8xf32>, vector<8x32xf32>, vector<16x32xf32> -> vector<16x32xf32>
    %261 = arith.addf %243, %260 : vector<16x32xf32>
    %262 = vector.broadcast %165 : vector<1x32xf32> to vector<16x32xf32>
    %263 = arith.addf %261, %262 : vector<16x32xf32>
    %264 = arith.addf %157, %263 : vector<16x32xf32>
    %cst_127 = arith.constant dense<0.000000e+00> : vector<16xf32>
    %265 = vector.multi_reduction <add>, %264, %cst_127 [1] : vector<16x32xf32> to vector<16xf32>
    %266 = vector.shape_cast %265 : vector<16xf32> to vector<16x1xf32>
    %cst_128 = arith.constant 3.200000e+01 : f32
    %267 = vector.broadcast %cst_128 : f32 to vector<16x1xf32>
    %268 = arith.divf %266, %267 : vector<16x1xf32>
    %269 = vector.broadcast %268 : vector<16x1xf32> to vector<16x32xf32>
    %270 = arith.subf %264, %269 : vector<16x32xf32>
    %271 = arith.mulf %270, %270 : vector<16x32xf32>
    %cst_129 = arith.constant dense<0.000000e+00> : vector<16xf32>
    %272 = vector.multi_reduction <add>, %271, %cst_129 [1] : vector<16x32xf32> to vector<16xf32>
    %273 = vector.shape_cast %272 : vector<16xf32> to vector<16x1xf32>
    %cst_130 = arith.constant 3.200000e+01 : f32
    %274 = vector.broadcast %cst_130 : f32 to vector<16x1xf32>
    %275 = arith.divf %273, %274 : vector<16x1xf32>
    %cst_131 = arith.constant 9.99999974E-6 : f32
    %276 = vector.broadcast %cst_131 : f32 to vector<16x1xf32>
    %277 = arith.addf %275, %276 : vector<16x1xf32>
    %278 = math.rsqrt %277 : vector<16x1xf32>
    %279 = vector.broadcast %278 : vector<16x1xf32> to vector<16x32xf32>
    %280 = arith.mulf %270, %279 : vector<16x32xf32>
    %281 = vector.broadcast %167 : vector<1x32xf32> to vector<16x32xf32>
    %282 = arith.mulf %280, %281 : vector<16x32xf32>
    %283 = vector.broadcast %169 : vector<1x32xf32> to vector<16x32xf32>
    %284 = arith.addf %282, %283 : vector<16x32xf32>
    %cst_132 = arith.constant dense<0.000000e+00> : vector<16x64xf32>
    %285 = tpu.matmul %284, %171, %cst_132 {dimension_numbers = #tpu.dot_dimension_numbers<[1], [0], [0], [1], [0, 0, 1, 1], [], []>} : vector<16x32xf32>, vector<32x64xf32>, vector<16x64xf32> -> vector<16x64xf32>
    %286 = vector.broadcast %173 : vector<1x64xf32> to vector<16x64xf32>
    %287 = arith.addf %285, %286 : vector<16x64xf32>
    %cst_133 = arith.constant 0.000000e+00 : f32
    %288 = vector.broadcast %cst_133 : f32 to vector<16x64xf32>
    %289 = arith.maximumf %287, %288 : vector<16x64xf32>
    %cst_134 = arith.constant dense<0.000000e+00> : vector<16x32xf32>
    %290 = tpu.matmul %289, %175, %cst_134 {dimension_numbers = #tpu.dot_dimension_numbers<[1], [0], [0], [1], [0, 0, 1, 1], [], []>} : vector<16x64xf32>, vector<64x32xf32>, vector<16x32xf32> -> vector<16x32xf32>
    %291 = vector.broadcast %177 : vector<1x32xf32> to vector<16x32xf32>
    %292 = arith.addf %290, %291 : vector<16x32xf32>
    %293 = arith.addf %284, %292 : vector<16x32xf32>
    %cst_135 = arith.constant dense<0.000000e+00> : vector<16xf32>
    %294 = vector.multi_reduction <add>, %293, %cst_135 [1] : vector<16x32xf32> to vector<16xf32>
    %295 = vector.shape_cast %294 : vector<16xf32> to vector<16x1xf32>
    %cst_136 = arith.constant 3.200000e+01 : f32
    %296 = vector.broadcast %cst_136 : f32 to vector<16x1xf32>
    %297 = arith.divf %295, %296 : vector<16x1xf32>
    %298 = vector.broadcast %297 : vector<16x1xf32> to vector<16x32xf32>
    %299 = arith.subf %293, %298 : vector<16x32xf32>
    %300 = arith.mulf %299, %299 : vector<16x32xf32>
    %cst_137 = arith.constant dense<0.000000e+00> : vector<16xf32>
    %301 = vector.multi_reduction <add>, %300, %cst_137 [1] : vector<16x32xf32> to vector<16xf32>
    %302 = vector.shape_cast %301 : vector<16xf32> to vector<16x1xf32>
    %cst_138 = arith.constant 3.200000e+01 : f32
    %303 = vector.broadcast %cst_138 : f32 to vector<16x1xf32>
    %304 = arith.divf %302, %303 : vector<16x1xf32>
    %cst_139 = arith.constant 9.99999974E-6 : f32
    %305 = vector.broadcast %cst_139 : f32 to vector<16x1xf32>
    %306 = arith.addf %304, %305 : vector<16x1xf32>
    %307 = math.rsqrt %306 : vector<16x1xf32>
    %308 = vector.broadcast %307 : vector<16x1xf32> to vector<16x32xf32>
    %309 = arith.mulf %299, %308 : vector<16x32xf32>
    %310 = vector.broadcast %179 : vector<1x32xf32> to vector<16x32xf32>
    %311 = arith.mulf %309, %310 : vector<16x32xf32>
    %312 = vector.broadcast %181 : vector<1x32xf32> to vector<16x32xf32>
    %313 = arith.addf %311, %312 : vector<16x32xf32>
    %c0_140 = arith.constant 0 : index
    %c0_141 = arith.constant 0 : index
    %c0_142 = arith.constant 0 : index
    %314 = vector.load %arg13[%c0_140, %c0_141, %c0_142] : memref<2x32x96xf32, #tpu.memory_space<vmem>>, vector<1x32x96xf32>
    %315 = vector.shape_cast %314 : vector<1x32x96xf32> to vector<32x96xf32>
    %c0_143 = arith.constant 0 : index
    %c0_144 = arith.constant 0 : index
    %c0_145 = arith.constant 0 : index
    %316 = vector.load %arg14[%c0_143, %c0_144, %c0_145] : memref<2x1x96xf32, #tpu.memory_space<vmem>>, vector<1x1x96xf32>
    %317 = vector.shape_cast %316 : vector<1x1x96xf32> to vector<1x96xf32>
    %c0_146 = arith.constant 0 : index
    %c0_147 = arith.constant 0 : index
    %c0_148 = arith.constant 0 : index
    %318 = vector.load %arg15[%c0_146, %c0_147, %c0_148] : memref<2x32x32xf32, #tpu.memory_space<vmem>>, vector<1x32x32xf32>
    %319 = vector.shape_cast %318 : vector<1x32x32xf32> to vector<32x32xf32>
    %c0_149 = arith.constant 0 : index
    %c0_150 = arith.constant 0 : index
    %c0_151 = arith.constant 0 : index
    %320 = vector.load %arg16[%c0_149, %c0_150, %c0_151] : memref<2x1x32xf32, #tpu.memory_space<vmem>>, vector<1x1x32xf32>
    %321 = vector.shape_cast %320 : vector<1x1x32xf32> to vector<1x32xf32>
    %c0_152 = arith.constant 0 : index
    %c0_153 = arith.constant 0 : index
    %c0_154 = arith.constant 0 : index
    %322 = vector.load %arg17[%c0_152, %c0_153, %c0_154] : memref<2x1x32xf32, #tpu.memory_space<vmem>>, vector<1x1x32xf32>
    %323 = vector.shape_cast %322 : vector<1x1x32xf32> to vector<1x32xf32>
    %c0_155 = arith.constant 0 : index
    %c0_156 = arith.constant 0 : index
    %c0_157 = arith.constant 0 : index
    %324 = vector.load %arg18[%c0_155, %c0_156, %c0_157] : memref<2x1x32xf32, #tpu.memory_space<vmem>>, vector<1x1x32xf32>
    %325 = vector.shape_cast %324 : vector<1x1x32xf32> to vector<1x32xf32>
    %c0_158 = arith.constant 0 : index
    %c0_159 = arith.constant 0 : index
    %c0_160 = arith.constant 0 : index
    %326 = vector.load %arg19[%c0_158, %c0_159, %c0_160] : memref<2x32x32xf32, #tpu.memory_space<vmem>>, vector<1x32x32xf32>
    %327 = vector.shape_cast %326 : vector<1x32x32xf32> to vector<32x32xf32>
    %c0_161 = arith.constant 0 : index
    %c0_162 = arith.constant 0 : index
    %c0_163 = arith.constant 0 : index
    %328 = vector.load %arg20[%c0_161, %c0_162, %c0_163] : memref<2x1x32xf32, #tpu.memory_space<vmem>>, vector<1x1x32xf32>
    %329 = vector.shape_cast %328 : vector<1x1x32xf32> to vector<1x32xf32>
    %c0_164 = arith.constant 0 : index
    %c0_165 = arith.constant 0 : index
    %c0_166 = arith.constant 0 : index
    %330 = vector.load %arg21[%c0_164, %c0_165, %c0_166] : memref<2x32x64xf32, #tpu.memory_space<vmem>>, vector<1x32x64xf32>
    %331 = vector.shape_cast %330 : vector<1x32x64xf32> to vector<32x64xf32>
    %c0_167 = arith.constant 0 : index
    %c0_168 = arith.constant 0 : index
    %c0_169 = arith.constant 0 : index
    %332 = vector.load %arg22[%c0_167, %c0_168, %c0_169] : memref<2x1x64xf32, #tpu.memory_space<vmem>>, vector<1x1x64xf32>
    %333 = vector.shape_cast %332 : vector<1x1x64xf32> to vector<1x64xf32>
    %c0_170 = arith.constant 0 : index
    %c0_171 = arith.constant 0 : index
    %c0_172 = arith.constant 0 : index
    %334 = vector.load %arg23[%c0_170, %c0_171, %c0_172] : memref<2x32x32xf32, #tpu.memory_space<vmem>>, vector<1x32x32xf32>
    %335 = vector.shape_cast %334 : vector<1x32x32xf32> to vector<32x32xf32>
    %c0_173 = arith.constant 0 : index
    %c0_174 = arith.constant 0 : index
    %c0_175 = arith.constant 0 : index
    %336 = vector.load %arg24[%c0_173, %c0_174, %c0_175] : memref<2x1x32xf32, #tpu.memory_space<vmem>>, vector<1x1x32xf32>
    %337 = vector.shape_cast %336 : vector<1x1x32xf32> to vector<1x32xf32>
    %c0_176 = arith.constant 0 : index
    %c0_177 = arith.constant 0 : index
    %c0_178 = arith.constant 0 : index
    %338 = vector.load %arg25[%c0_176, %c0_177, %c0_178] : memref<2x1x32xf32, #tpu.memory_space<vmem>>, vector<1x1x32xf32>
    %339 = vector.shape_cast %338 : vector<1x1x32xf32> to vector<1x32xf32>
    %c0_179 = arith.constant 0 : index
    %c0_180 = arith.constant 0 : index
    %c0_181 = arith.constant 0 : index
    %340 = vector.load %arg26[%c0_179, %c0_180, %c0_181] : memref<2x1x32xf32, #tpu.memory_space<vmem>>, vector<1x1x32xf32>
    %341 = vector.shape_cast %340 : vector<1x1x32xf32> to vector<1x32xf32>
    %c0_182 = arith.constant 0 : index
    %c0_183 = arith.constant 0 : index
    %c0_184 = arith.constant 0 : index
    %342 = vector.load %arg27[%c0_182, %c0_183, %c0_184] : memref<2x32x64xf32, #tpu.memory_space<vmem>>, vector<1x32x64xf32>
    %343 = vector.shape_cast %342 : vector<1x32x64xf32> to vector<32x64xf32>
    %c0_185 = arith.constant 0 : index
    %c0_186 = arith.constant 0 : index
    %c0_187 = arith.constant 0 : index
    %344 = vector.load %arg28[%c0_185, %c0_186, %c0_187] : memref<2x1x64xf32, #tpu.memory_space<vmem>>, vector<1x1x64xf32>
    %345 = vector.shape_cast %344 : vector<1x1x64xf32> to vector<1x64xf32>
    %c0_188 = arith.constant 0 : index
    %c0_189 = arith.constant 0 : index
    %c0_190 = arith.constant 0 : index
    %346 = vector.load %arg29[%c0_188, %c0_189, %c0_190] : memref<2x64x32xf32, #tpu.memory_space<vmem>>, vector<1x64x32xf32>
    %347 = vector.shape_cast %346 : vector<1x64x32xf32> to vector<64x32xf32>
    %c0_191 = arith.constant 0 : index
    %c0_192 = arith.constant 0 : index
    %c0_193 = arith.constant 0 : index
    %348 = vector.load %arg30[%c0_191, %c0_192, %c0_193] : memref<2x1x32xf32, #tpu.memory_space<vmem>>, vector<1x1x32xf32>
    %349 = vector.shape_cast %348 : vector<1x1x32xf32> to vector<1x32xf32>
    %c0_194 = arith.constant 0 : index
    %c0_195 = arith.constant 0 : index
    %c0_196 = arith.constant 0 : index
    %350 = vector.load %arg31[%c0_194, %c0_195, %c0_196] : memref<2x1x32xf32, #tpu.memory_space<vmem>>, vector<1x1x32xf32>
    %351 = vector.shape_cast %350 : vector<1x1x32xf32> to vector<1x32xf32>
    %c0_197 = arith.constant 0 : index
    %c0_198 = arith.constant 0 : index
    %c0_199 = arith.constant 0 : index
    %352 = vector.load %arg32[%c0_197, %c0_198, %c0_199] : memref<2x1x32xf32, #tpu.memory_space<vmem>>, vector<1x1x32xf32>
    %353 = vector.shape_cast %352 : vector<1x1x32xf32> to vector<1x32xf32>
    %cst_200 = arith.constant dense<0.000000e+00> : vector<16x96xf32>
    %354 = tpu.matmul %313, %315, %cst_200 {dimension_numbers = #tpu.dot_dimension_numbers<[1], [0], [0], [1], [0, 0, 1, 1], [], []>} : vector<16x32xf32>, vector<32x96xf32>, vector<16x96xf32> -> vector<16x96xf32>
    %355 = vector.broadcast %317 : vector<1x96xf32> to vector<16x96xf32>
    %356 = arith.addf %354, %355 : vector<16x96xf32>
    %357 = vector.extract_strided_slice %356 {offsets = [0, 0], sizes = [16, 32], strides = [1, 1]} : vector<16x96xf32> to vector<16x32xf32>
    %358 = vector.extract_strided_slice %356 {offsets = [0, 32], sizes = [16, 32], strides = [1, 1]} : vector<16x96xf32> to vector<16x32xf32>
    %359 = vector.extract_strided_slice %356 {offsets = [0, 64], sizes = [16, 32], strides = [1, 1]} : vector<16x96xf32> to vector<16x32xf32>
    %360 = vector.shape_cast %357 : vector<16x32xf32> to vector<2x8x32xf32>
    %361 = vector.shape_cast %358 : vector<16x32xf32> to vector<2x8x32xf32>
    %362 = vector.shape_cast %359 : vector<16x32xf32> to vector<2x8x32xf32>
    %363 = vector.extract_strided_slice %360 {offsets = [0, 0, 0], sizes = [2, 8, 8], strides = [1, 1, 1]} : vector<2x8x32xf32> to vector<2x8x8xf32>
    %364 = vector.extract_strided_slice %361 {offsets = [0, 0, 0], sizes = [2, 8, 8], strides = [1, 1, 1]} : vector<2x8x32xf32> to vector<2x8x8xf32>
    "tpu.trace_start"() <{level = 10 : i32, message = "bqd,bkd->bqk"}> : () -> ()
    %cst_201 = arith.constant dense<0.000000e+00> : vector<2x8x8xf32>
    %365 = tpu.matmul %363, %364, %cst_201 {dimension_numbers = #tpu.dot_dimension_numbers<[2], [2], [1], [1], [0, 0, 0, 1, 1, 1], [0], [0]>} : vector<2x8x8xf32>, vector<2x8x8xf32>, vector<2x8x8xf32> -> vector<2x8x8xf32>
    "tpu.trace_stop"() : () -> ()
    %cst_202 = arith.constant dense<0xFF800000> : vector<2x8xf32>
    %366 = vector.multi_reduction <maximumf>, %365, %cst_202 [2] : vector<2x8x8xf32> to vector<2x8xf32>
    %367 = vector.shape_cast %366 : vector<2x8xf32> to vector<2x8x1xf32>
    %368 = vector.broadcast %367 : vector<2x8x1xf32> to vector<2x8x8xf32>
    %369 = arith.subf %365, %368 : vector<2x8x8xf32>
    %370 = math.exp %369 : vector<2x8x8xf32>
    %cst_203 = arith.constant dense<0.000000e+00> : vector<2x8xf32>
    %371 = vector.multi_reduction <add>, %370, %cst_203 [2] : vector<2x8x8xf32> to vector<2x8xf32>
    %372 = vector.shape_cast %371 : vector<2x8xf32> to vector<2x8x1xf32>
    %373 = vector.broadcast %372 : vector<2x8x1xf32> to vector<2x8x8xf32>
    %374 = arith.divf %370, %373 : vector<2x8x8xf32>
    %375 = vector.extract_strided_slice %362 {offsets = [0, 0, 0], sizes = [2, 8, 8], strides = [1, 1, 1]} : vector<2x8x32xf32> to vector<2x8x8xf32>
    "tpu.trace_start"() <{level = 10 : i32, message = "bqk,bkd->bqd"}> : () -> ()
    %cst_204 = arith.constant dense<0.000000e+00> : vector<2x8x8xf32>
    %376 = tpu.matmul %374, %375, %cst_204 {dimension_numbers = #tpu.dot_dimension_numbers<[2], [1], [1], [2], [0, 0, 0, 1, 1, 2], [0], [0]>} : vector<2x8x8xf32>, vector<2x8x8xf32>, vector<2x8x8xf32> -> vector<2x8x8xf32>
    "tpu.trace_stop"() : () -> ()
    %377 = vector.shape_cast %376 : vector<2x8x8xf32> to vector<16x8xf32>
    %378 = vector.extract_strided_slice %319 {offsets = [0, 0], sizes = [8, 32], strides = [1, 1]} : vector<32x32xf32> to vector<8x32xf32>
    %cst_205 = arith.constant dense<0.000000e+00> : vector<16x32xf32>
    %379 = tpu.matmul %377, %378, %cst_205 {dimension_numbers = #tpu.dot_dimension_numbers<[1], [0], [0], [1], [0, 0, 1, 1], [], []>} : vector<16x8xf32>, vector<8x32xf32>, vector<16x32xf32> -> vector<16x32xf32>
    %380 = vector.extract_strided_slice %360 {offsets = [0, 0, 8], sizes = [2, 8, 8], strides = [1, 1, 1]} : vector<2x8x32xf32> to vector<2x8x8xf32>
    %381 = vector.extract_strided_slice %361 {offsets = [0, 0, 8], sizes = [2, 8, 8], strides = [1, 1, 1]} : vector<2x8x32xf32> to vector<2x8x8xf32>
    "tpu.trace_start"() <{level = 10 : i32, message = "bqd,bkd->bqk"}> : () -> ()
    %cst_206 = arith.constant dense<0.000000e+00> : vector<2x8x8xf32>
    %382 = tpu.matmul %380, %381, %cst_206 {dimension_numbers = #tpu.dot_dimension_numbers<[2], [2], [1], [1], [0, 0, 0, 1, 1, 1], [0], [0]>} : vector<2x8x8xf32>, vector<2x8x8xf32>, vector<2x8x8xf32> -> vector<2x8x8xf32>
    "tpu.trace_stop"() : () -> ()
    %cst_207 = arith.constant dense<0xFF800000> : vector<2x8xf32>
    %383 = vector.multi_reduction <maximumf>, %382, %cst_207 [2] : vector<2x8x8xf32> to vector<2x8xf32>
    %384 = vector.shape_cast %383 : vector<2x8xf32> to vector<2x8x1xf32>
    %385 = vector.broadcast %384 : vector<2x8x1xf32> to vector<2x8x8xf32>
    %386 = arith.subf %382, %385 : vector<2x8x8xf32>
    %387 = math.exp %386 : vector<2x8x8xf32>
    %cst_208 = arith.constant dense<0.000000e+00> : vector<2x8xf32>
    %388 = vector.multi_reduction <add>, %387, %cst_208 [2] : vector<2x8x8xf32> to vector<2x8xf32>
    %389 = vector.shape_cast %388 : vector<2x8xf32> to vector<2x8x1xf32>
    %390 = vector.broadcast %389 : vector<2x8x1xf32> to vector<2x8x8xf32>
    %391 = arith.divf %387, %390 : vector<2x8x8xf32>
    %392 = vector.extract_strided_slice %362 {offsets = [0, 0, 8], sizes = [2, 8, 8], strides = [1, 1, 1]} : vector<2x8x32xf32> to vector<2x8x8xf32>
    "tpu.trace_start"() <{level = 10 : i32, message = "bqk,bkd->bqd"}> : () -> ()
    %cst_209 = arith.constant dense<0.000000e+00> : vector<2x8x8xf32>
    %393 = tpu.matmul %391, %392, %cst_209 {dimension_numbers = #tpu.dot_dimension_numbers<[2], [1], [1], [2], [0, 0, 0, 1, 1, 2], [0], [0]>} : vector<2x8x8xf32>, vector<2x8x8xf32>, vector<2x8x8xf32> -> vector<2x8x8xf32>
    "tpu.trace_stop"() : () -> ()
    %394 = vector.shape_cast %393 : vector<2x8x8xf32> to vector<16x8xf32>
    %395 = vector.extract_strided_slice %319 {offsets = [8, 0], sizes = [8, 32], strides = [1, 1]} : vector<32x32xf32> to vector<8x32xf32>
    %cst_210 = arith.constant dense<0.000000e+00> : vector<16x32xf32>
    %396 = tpu.matmul %394, %395, %cst_210 {dimension_numbers = #tpu.dot_dimension_numbers<[1], [0], [0], [1], [0, 0, 1, 1], [], []>} : vector<16x8xf32>, vector<8x32xf32>, vector<16x32xf32> -> vector<16x32xf32>
    %397 = arith.addf %379, %396 : vector<16x32xf32>
    %398 = vector.extract_strided_slice %360 {offsets = [0, 0, 16], sizes = [2, 8, 8], strides = [1, 1, 1]} : vector<2x8x32xf32> to vector<2x8x8xf32>
    %399 = vector.extract_strided_slice %361 {offsets = [0, 0, 16], sizes = [2, 8, 8], strides = [1, 1, 1]} : vector<2x8x32xf32> to vector<2x8x8xf32>
    "tpu.trace_start"() <{level = 10 : i32, message = "bqd,bkd->bqk"}> : () -> ()
    %cst_211 = arith.constant dense<0.000000e+00> : vector<2x8x8xf32>
    %400 = tpu.matmul %398, %399, %cst_211 {dimension_numbers = #tpu.dot_dimension_numbers<[2], [2], [1], [1], [0, 0, 0, 1, 1, 1], [0], [0]>} : vector<2x8x8xf32>, vector<2x8x8xf32>, vector<2x8x8xf32> -> vector<2x8x8xf32>
    "tpu.trace_stop"() : () -> ()
    %cst_212 = arith.constant dense<0xFF800000> : vector<2x8xf32>
    %401 = vector.multi_reduction <maximumf>, %400, %cst_212 [2] : vector<2x8x8xf32> to vector<2x8xf32>
    %402 = vector.shape_cast %401 : vector<2x8xf32> to vector<2x8x1xf32>
    %403 = vector.broadcast %402 : vector<2x8x1xf32> to vector<2x8x8xf32>
    %404 = arith.subf %400, %403 : vector<2x8x8xf32>
    %405 = math.exp %404 : vector<2x8x8xf32>
    %cst_213 = arith.constant dense<0.000000e+00> : vector<2x8xf32>
    %406 = vector.multi_reduction <add>, %405, %cst_213 [2] : vector<2x8x8xf32> to vector<2x8xf32>
    %407 = vector.shape_cast %406 : vector<2x8xf32> to vector<2x8x1xf32>
    %408 = vector.broadcast %407 : vector<2x8x1xf32> to vector<2x8x8xf32>
    %409 = arith.divf %405, %408 : vector<2x8x8xf32>
    %410 = vector.extract_strided_slice %362 {offsets = [0, 0, 16], sizes = [2, 8, 8], strides = [1, 1, 1]} : vector<2x8x32xf32> to vector<2x8x8xf32>
    "tpu.trace_start"() <{level = 10 : i32, message = "bqk,bkd->bqd"}> : () -> ()
    %cst_214 = arith.constant dense<0.000000e+00> : vector<2x8x8xf32>
    %411 = tpu.matmul %409, %410, %cst_214 {dimension_numbers = #tpu.dot_dimension_numbers<[2], [1], [1], [2], [0, 0, 0, 1, 1, 2], [0], [0]>} : vector<2x8x8xf32>, vector<2x8x8xf32>, vector<2x8x8xf32> -> vector<2x8x8xf32>
    "tpu.trace_stop"() : () -> ()
    %412 = vector.shape_cast %411 : vector<2x8x8xf32> to vector<16x8xf32>
    %413 = vector.extract_strided_slice %319 {offsets = [16, 0], sizes = [8, 32], strides = [1, 1]} : vector<32x32xf32> to vector<8x32xf32>
    %cst_215 = arith.constant dense<0.000000e+00> : vector<16x32xf32>
    %414 = tpu.matmul %412, %413, %cst_215 {dimension_numbers = #tpu.dot_dimension_numbers<[1], [0], [0], [1], [0, 0, 1, 1], [], []>} : vector<16x8xf32>, vector<8x32xf32>, vector<16x32xf32> -> vector<16x32xf32>
    %415 = arith.addf %397, %414 : vector<16x32xf32>
    %416 = vector.extract_strided_slice %360 {offsets = [0, 0, 24], sizes = [2, 8, 8], strides = [1, 1, 1]} : vector<2x8x32xf32> to vector<2x8x8xf32>
    %417 = vector.extract_strided_slice %361 {offsets = [0, 0, 24], sizes = [2, 8, 8], strides = [1, 1, 1]} : vector<2x8x32xf32> to vector<2x8x8xf32>
    "tpu.trace_start"() <{level = 10 : i32, message = "bqd,bkd->bqk"}> : () -> ()
    %cst_216 = arith.constant dense<0.000000e+00> : vector<2x8x8xf32>
    %418 = tpu.matmul %416, %417, %cst_216 {dimension_numbers = #tpu.dot_dimension_numbers<[2], [2], [1], [1], [0, 0, 0, 1, 1, 1], [0], [0]>} : vector<2x8x8xf32>, vector<2x8x8xf32>, vector<2x8x8xf32> -> vector<2x8x8xf32>
    "tpu.trace_stop"() : () -> ()
    %cst_217 = arith.constant dense<0xFF800000> : vector<2x8xf32>
    %419 = vector.multi_reduction <maximumf>, %418, %cst_217 [2] : vector<2x8x8xf32> to vector<2x8xf32>
    %420 = vector.shape_cast %419 : vector<2x8xf32> to vector<2x8x1xf32>
    %421 = vector.broadcast %420 : vector<2x8x1xf32> to vector<2x8x8xf32>
    %422 = arith.subf %418, %421 : vector<2x8x8xf32>
    %423 = math.exp %422 : vector<2x8x8xf32>
    %cst_218 = arith.constant dense<0.000000e+00> : vector<2x8xf32>
    %424 = vector.multi_reduction <add>, %423, %cst_218 [2] : vector<2x8x8xf32> to vector<2x8xf32>
    %425 = vector.shape_cast %424 : vector<2x8xf32> to vector<2x8x1xf32>
    %426 = vector.broadcast %425 : vector<2x8x1xf32> to vector<2x8x8xf32>
    %427 = arith.divf %423, %426 : vector<2x8x8xf32>
    %428 = vector.extract_strided_slice %362 {offsets = [0, 0, 24], sizes = [2, 8, 8], strides = [1, 1, 1]} : vector<2x8x32xf32> to vector<2x8x8xf32>
    "tpu.trace_start"() <{level = 10 : i32, message = "bqk,bkd->bqd"}> : () -> ()
    %cst_219 = arith.constant dense<0.000000e+00> : vector<2x8x8xf32>
    %429 = tpu.matmul %427, %428, %cst_219 {dimension_numbers = #tpu.dot_dimension_numbers<[2], [1], [1], [2], [0, 0, 0, 1, 1, 2], [0], [0]>} : vector<2x8x8xf32>, vector<2x8x8xf32>, vector<2x8x8xf32> -> vector<2x8x8xf32>
    "tpu.trace_stop"() : () -> ()
    %430 = vector.shape_cast %429 : vector<2x8x8xf32> to vector<16x8xf32>
    %431 = vector.extract_strided_slice %319 {offsets = [24, 0], sizes = [8, 32], strides = [1, 1]} : vector<32x32xf32> to vector<8x32xf32>
    %cst_220 = arith.constant dense<0.000000e+00> : vector<16x32xf32>
    %432 = tpu.matmul %430, %431, %cst_220 {dimension_numbers = #tpu.dot_dimension_numbers<[1], [0], [0], [1], [0, 0, 1, 1], [], []>} : vector<16x8xf32>, vector<8x32xf32>, vector<16x32xf32> -> vector<16x32xf32>
    %433 = arith.addf %415, %432 : vector<16x32xf32>
    %434 = vector.broadcast %321 : vector<1x32xf32> to vector<16x32xf32>
    %435 = arith.addf %433, %434 : vector<16x32xf32>
    %436 = arith.addf %313, %435 : vector<16x32xf32>
    %cst_221 = arith.constant dense<0.000000e+00> : vector<16xf32>
    %437 = vector.multi_reduction <add>, %436, %cst_221 [1] : vector<16x32xf32> to vector<16xf32>
    %438 = vector.shape_cast %437 : vector<16xf32> to vector<16x1xf32>
    %cst_222 = arith.constant 3.200000e+01 : f32
    %439 = vector.broadcast %cst_222 : f32 to vector<16x1xf32>
    %440 = arith.divf %438, %439 : vector<16x1xf32>
    %441 = vector.broadcast %440 : vector<16x1xf32> to vector<16x32xf32>
    %442 = arith.subf %436, %441 : vector<16x32xf32>
    %443 = arith.mulf %442, %442 : vector<16x32xf32>
    %cst_223 = arith.constant dense<0.000000e+00> : vector<16xf32>
    %444 = vector.multi_reduction <add>, %443, %cst_223 [1] : vector<16x32xf32> to vector<16xf32>
    %445 = vector.shape_cast %444 : vector<16xf32> to vector<16x1xf32>
    %cst_224 = arith.constant 3.200000e+01 : f32
    %446 = vector.broadcast %cst_224 : f32 to vector<16x1xf32>
    %447 = arith.divf %445, %446 : vector<16x1xf32>
    %cst_225 = arith.constant 9.99999974E-6 : f32
    %448 = vector.broadcast %cst_225 : f32 to vector<16x1xf32>
    %449 = arith.addf %447, %448 : vector<16x1xf32>
    %450 = math.rsqrt %449 : vector<16x1xf32>
    %451 = vector.broadcast %450 : vector<16x1xf32> to vector<16x32xf32>
    %452 = arith.mulf %442, %451 : vector<16x32xf32>
    %453 = vector.broadcast %323 : vector<1x32xf32> to vector<16x32xf32>
    %454 = arith.mulf %452, %453 : vector<16x32xf32>
    %455 = vector.broadcast %325 : vector<1x32xf32> to vector<16x32xf32>
    %456 = arith.addf %454, %455 : vector<16x32xf32>
    %cst_226 = arith.constant dense<0.000000e+00> : vector<16x32xf32>
    %457 = tpu.matmul %456, %327, %cst_226 {dimension_numbers = #tpu.dot_dimension_numbers<[1], [0], [0], [1], [0, 0, 1, 1], [], []>} : vector<16x32xf32>, vector<32x32xf32>, vector<16x32xf32> -> vector<16x32xf32>
    %458 = vector.broadcast %329 : vector<1x32xf32> to vector<16x32xf32>
    %459 = arith.addf %457, %458 : vector<16x32xf32>
    %cst_227 = arith.constant dense<0.000000e+00> : vector<16x64xf32>
    %460 = tpu.matmul %313, %331, %cst_227 {dimension_numbers = #tpu.dot_dimension_numbers<[1], [0], [0], [1], [0, 0, 1, 1], [], []>} : vector<16x32xf32>, vector<32x64xf32>, vector<16x64xf32> -> vector<16x64xf32>
    %461 = vector.broadcast %333 : vector<1x64xf32> to vector<16x64xf32>
    %462 = arith.addf %460, %461 : vector<16x64xf32>
    %463 = vector.extract_strided_slice %462 {offsets = [0, 0], sizes = [16, 32], strides = [1, 1]} : vector<16x64xf32> to vector<16x32xf32>
    %464 = vector.extract_strided_slice %462 {offsets = [0, 32], sizes = [16, 32], strides = [1, 1]} : vector<16x64xf32> to vector<16x32xf32>
    %465 = vector.shape_cast %459 : vector<16x32xf32> to vector<2x8x32xf32>
    %466 = vector.shape_cast %463 : vector<16x32xf32> to vector<2x8x32xf32>
    %467 = vector.shape_cast %464 : vector<16x32xf32> to vector<2x8x32xf32>
    %468 = vector.extract_strided_slice %465 {offsets = [0, 0, 0], sizes = [2, 8, 8], strides = [1, 1, 1]} : vector<2x8x32xf32> to vector<2x8x8xf32>
    %469 = vector.extract_strided_slice %466 {offsets = [0, 0, 0], sizes = [2, 8, 8], strides = [1, 1, 1]} : vector<2x8x32xf32> to vector<2x8x8xf32>
    "tpu.trace_start"() <{level = 10 : i32, message = "bqd,bkd->bqk"}> : () -> ()
    %cst_228 = arith.constant dense<0.000000e+00> : vector<2x8x8xf32>
    %470 = tpu.matmul %468, %469, %cst_228 {dimension_numbers = #tpu.dot_dimension_numbers<[2], [2], [1], [1], [0, 0, 0, 1, 1, 1], [0], [0]>} : vector<2x8x8xf32>, vector<2x8x8xf32>, vector<2x8x8xf32> -> vector<2x8x8xf32>
    "tpu.trace_stop"() : () -> ()
    %cst_229 = arith.constant dense<0xFF800000> : vector<2x8xf32>
    %471 = vector.multi_reduction <maximumf>, %470, %cst_229 [2] : vector<2x8x8xf32> to vector<2x8xf32>
    %472 = vector.shape_cast %471 : vector<2x8xf32> to vector<2x8x1xf32>
    %473 = vector.broadcast %472 : vector<2x8x1xf32> to vector<2x8x8xf32>
    %474 = arith.subf %470, %473 : vector<2x8x8xf32>
    %475 = math.exp %474 : vector<2x8x8xf32>
    %cst_230 = arith.constant dense<0.000000e+00> : vector<2x8xf32>
    %476 = vector.multi_reduction <add>, %475, %cst_230 [2] : vector<2x8x8xf32> to vector<2x8xf32>
    %477 = vector.shape_cast %476 : vector<2x8xf32> to vector<2x8x1xf32>
    %478 = vector.broadcast %477 : vector<2x8x1xf32> to vector<2x8x8xf32>
    %479 = arith.divf %475, %478 : vector<2x8x8xf32>
    %480 = vector.extract_strided_slice %467 {offsets = [0, 0, 0], sizes = [2, 8, 8], strides = [1, 1, 1]} : vector<2x8x32xf32> to vector<2x8x8xf32>
    "tpu.trace_start"() <{level = 10 : i32, message = "bqk,bkd->bqd"}> : () -> ()
    %cst_231 = arith.constant dense<0.000000e+00> : vector<2x8x8xf32>
    %481 = tpu.matmul %479, %480, %cst_231 {dimension_numbers = #tpu.dot_dimension_numbers<[2], [1], [1], [2], [0, 0, 0, 1, 1, 2], [0], [0]>} : vector<2x8x8xf32>, vector<2x8x8xf32>, vector<2x8x8xf32> -> vector<2x8x8xf32>
    "tpu.trace_stop"() : () -> ()
    %482 = vector.shape_cast %481 : vector<2x8x8xf32> to vector<16x8xf32>
    %483 = vector.extract_strided_slice %335 {offsets = [0, 0], sizes = [8, 32], strides = [1, 1]} : vector<32x32xf32> to vector<8x32xf32>
    %cst_232 = arith.constant dense<0.000000e+00> : vector<16x32xf32>
    %484 = tpu.matmul %482, %483, %cst_232 {dimension_numbers = #tpu.dot_dimension_numbers<[1], [0], [0], [1], [0, 0, 1, 1], [], []>} : vector<16x8xf32>, vector<8x32xf32>, vector<16x32xf32> -> vector<16x32xf32>
    %485 = vector.extract_strided_slice %465 {offsets = [0, 0, 8], sizes = [2, 8, 8], strides = [1, 1, 1]} : vector<2x8x32xf32> to vector<2x8x8xf32>
    %486 = vector.extract_strided_slice %466 {offsets = [0, 0, 8], sizes = [2, 8, 8], strides = [1, 1, 1]} : vector<2x8x32xf32> to vector<2x8x8xf32>
    "tpu.trace_start"() <{level = 10 : i32, message = "bqd,bkd->bqk"}> : () -> ()
    %cst_233 = arith.constant dense<0.000000e+00> : vector<2x8x8xf32>
    %487 = tpu.matmul %485, %486, %cst_233 {dimension_numbers = #tpu.dot_dimension_numbers<[2], [2], [1], [1], [0, 0, 0, 1, 1, 1], [0], [0]>} : vector<2x8x8xf32>, vector<2x8x8xf32>, vector<2x8x8xf32> -> vector<2x8x8xf32>
    "tpu.trace_stop"() : () -> ()
    %cst_234 = arith.constant dense<0xFF800000> : vector<2x8xf32>
    %488 = vector.multi_reduction <maximumf>, %487, %cst_234 [2] : vector<2x8x8xf32> to vector<2x8xf32>
    %489 = vector.shape_cast %488 : vector<2x8xf32> to vector<2x8x1xf32>
    %490 = vector.broadcast %489 : vector<2x8x1xf32> to vector<2x8x8xf32>
    %491 = arith.subf %487, %490 : vector<2x8x8xf32>
    %492 = math.exp %491 : vector<2x8x8xf32>
    %cst_235 = arith.constant dense<0.000000e+00> : vector<2x8xf32>
    %493 = vector.multi_reduction <add>, %492, %cst_235 [2] : vector<2x8x8xf32> to vector<2x8xf32>
    %494 = vector.shape_cast %493 : vector<2x8xf32> to vector<2x8x1xf32>
    %495 = vector.broadcast %494 : vector<2x8x1xf32> to vector<2x8x8xf32>
    %496 = arith.divf %492, %495 : vector<2x8x8xf32>
    %497 = vector.extract_strided_slice %467 {offsets = [0, 0, 8], sizes = [2, 8, 8], strides = [1, 1, 1]} : vector<2x8x32xf32> to vector<2x8x8xf32>
    "tpu.trace_start"() <{level = 10 : i32, message = "bqk,bkd->bqd"}> : () -> ()
    %cst_236 = arith.constant dense<0.000000e+00> : vector<2x8x8xf32>
    %498 = tpu.matmul %496, %497, %cst_236 {dimension_numbers = #tpu.dot_dimension_numbers<[2], [1], [1], [2], [0, 0, 0, 1, 1, 2], [0], [0]>} : vector<2x8x8xf32>, vector<2x8x8xf32>, vector<2x8x8xf32> -> vector<2x8x8xf32>
    "tpu.trace_stop"() : () -> ()
    %499 = vector.shape_cast %498 : vector<2x8x8xf32> to vector<16x8xf32>
    %500 = vector.extract_strided_slice %335 {offsets = [8, 0], sizes = [8, 32], strides = [1, 1]} : vector<32x32xf32> to vector<8x32xf32>
    %cst_237 = arith.constant dense<0.000000e+00> : vector<16x32xf32>
    %501 = tpu.matmul %499, %500, %cst_237 {dimension_numbers = #tpu.dot_dimension_numbers<[1], [0], [0], [1], [0, 0, 1, 1], [], []>} : vector<16x8xf32>, vector<8x32xf32>, vector<16x32xf32> -> vector<16x32xf32>
    %502 = arith.addf %484, %501 : vector<16x32xf32>
    %503 = vector.extract_strided_slice %465 {offsets = [0, 0, 16], sizes = [2, 8, 8], strides = [1, 1, 1]} : vector<2x8x32xf32> to vector<2x8x8xf32>
    %504 = vector.extract_strided_slice %466 {offsets = [0, 0, 16], sizes = [2, 8, 8], strides = [1, 1, 1]} : vector<2x8x32xf32> to vector<2x8x8xf32>
    "tpu.trace_start"() <{level = 10 : i32, message = "bqd,bkd->bqk"}> : () -> ()
    %cst_238 = arith.constant dense<0.000000e+00> : vector<2x8x8xf32>
    %505 = tpu.matmul %503, %504, %cst_238 {dimension_numbers = #tpu.dot_dimension_numbers<[2], [2], [1], [1], [0, 0, 0, 1, 1, 1], [0], [0]>} : vector<2x8x8xf32>, vector<2x8x8xf32>, vector<2x8x8xf32> -> vector<2x8x8xf32>
    "tpu.trace_stop"() : () -> ()
    %cst_239 = arith.constant dense<0xFF800000> : vector<2x8xf32>
    %506 = vector.multi_reduction <maximumf>, %505, %cst_239 [2] : vector<2x8x8xf32> to vector<2x8xf32>
    %507 = vector.shape_cast %506 : vector<2x8xf32> to vector<2x8x1xf32>
    %508 = vector.broadcast %507 : vector<2x8x1xf32> to vector<2x8x8xf32>
    %509 = arith.subf %505, %508 : vector<2x8x8xf32>
    %510 = math.exp %509 : vector<2x8x8xf32>
    %cst_240 = arith.constant dense<0.000000e+00> : vector<2x8xf32>
    %511 = vector.multi_reduction <add>, %510, %cst_240 [2] : vector<2x8x8xf32> to vector<2x8xf32>
    %512 = vector.shape_cast %511 : vector<2x8xf32> to vector<2x8x1xf32>
    %513 = vector.broadcast %512 : vector<2x8x1xf32> to vector<2x8x8xf32>
    %514 = arith.divf %510, %513 : vector<2x8x8xf32>
    %515 = vector.extract_strided_slice %467 {offsets = [0, 0, 16], sizes = [2, 8, 8], strides = [1, 1, 1]} : vector<2x8x32xf32> to vector<2x8x8xf32>
    "tpu.trace_start"() <{level = 10 : i32, message = "bqk,bkd->bqd"}> : () -> ()
    %cst_241 = arith.constant dense<0.000000e+00> : vector<2x8x8xf32>
    %516 = tpu.matmul %514, %515, %cst_241 {dimension_numbers = #tpu.dot_dimension_numbers<[2], [1], [1], [2], [0, 0, 0, 1, 1, 2], [0], [0]>} : vector<2x8x8xf32>, vector<2x8x8xf32>, vector<2x8x8xf32> -> vector<2x8x8xf32>
    "tpu.trace_stop"() : () -> ()
    %517 = vector.shape_cast %516 : vector<2x8x8xf32> to vector<16x8xf32>
    %518 = vector.extract_strided_slice %335 {offsets = [16, 0], sizes = [8, 32], strides = [1, 1]} : vector<32x32xf32> to vector<8x32xf32>
    %cst_242 = arith.constant dense<0.000000e+00> : vector<16x32xf32>
    %519 = tpu.matmul %517, %518, %cst_242 {dimension_numbers = #tpu.dot_dimension_numbers<[1], [0], [0], [1], [0, 0, 1, 1], [], []>} : vector<16x8xf32>, vector<8x32xf32>, vector<16x32xf32> -> vector<16x32xf32>
    %520 = arith.addf %502, %519 : vector<16x32xf32>
    %521 = vector.extract_strided_slice %465 {offsets = [0, 0, 24], sizes = [2, 8, 8], strides = [1, 1, 1]} : vector<2x8x32xf32> to vector<2x8x8xf32>
    %522 = vector.extract_strided_slice %466 {offsets = [0, 0, 24], sizes = [2, 8, 8], strides = [1, 1, 1]} : vector<2x8x32xf32> to vector<2x8x8xf32>
    "tpu.trace_start"() <{level = 10 : i32, message = "bqd,bkd->bqk"}> : () -> ()
    %cst_243 = arith.constant dense<0.000000e+00> : vector<2x8x8xf32>
    %523 = tpu.matmul %521, %522, %cst_243 {dimension_numbers = #tpu.dot_dimension_numbers<[2], [2], [1], [1], [0, 0, 0, 1, 1, 1], [0], [0]>} : vector<2x8x8xf32>, vector<2x8x8xf32>, vector<2x8x8xf32> -> vector<2x8x8xf32>
    "tpu.trace_stop"() : () -> ()
    %cst_244 = arith.constant dense<0xFF800000> : vector<2x8xf32>
    %524 = vector.multi_reduction <maximumf>, %523, %cst_244 [2] : vector<2x8x8xf32> to vector<2x8xf32>
    %525 = vector.shape_cast %524 : vector<2x8xf32> to vector<2x8x1xf32>
    %526 = vector.broadcast %525 : vector<2x8x1xf32> to vector<2x8x8xf32>
    %527 = arith.subf %523, %526 : vector<2x8x8xf32>
    %528 = math.exp %527 : vector<2x8x8xf32>
    %cst_245 = arith.constant dense<0.000000e+00> : vector<2x8xf32>
    %529 = vector.multi_reduction <add>, %528, %cst_245 [2] : vector<2x8x8xf32> to vector<2x8xf32>
    %530 = vector.shape_cast %529 : vector<2x8xf32> to vector<2x8x1xf32>
    %531 = vector.broadcast %530 : vector<2x8x1xf32> to vector<2x8x8xf32>
    %532 = arith.divf %528, %531 : vector<2x8x8xf32>
    %533 = vector.extract_strided_slice %467 {offsets = [0, 0, 24], sizes = [2, 8, 8], strides = [1, 1, 1]} : vector<2x8x32xf32> to vector<2x8x8xf32>
    "tpu.trace_start"() <{level = 10 : i32, message = "bqk,bkd->bqd"}> : () -> ()
    %cst_246 = arith.constant dense<0.000000e+00> : vector<2x8x8xf32>
    %534 = tpu.matmul %532, %533, %cst_246 {dimension_numbers = #tpu.dot_dimension_numbers<[2], [1], [1], [2], [0, 0, 0, 1, 1, 2], [0], [0]>} : vector<2x8x8xf32>, vector<2x8x8xf32>, vector<2x8x8xf32> -> vector<2x8x8xf32>
    "tpu.trace_stop"() : () -> ()
    %535 = vector.shape_cast %534 : vector<2x8x8xf32> to vector<16x8xf32>
    %536 = vector.extract_strided_slice %335 {offsets = [24, 0], sizes = [8, 32], strides = [1, 1]} : vector<32x32xf32> to vector<8x32xf32>
    %cst_247 = arith.constant dense<0.000000e+00> : vector<16x32xf32>
    %537 = tpu.matmul %535, %536, %cst_247 {dimension_numbers = #tpu.dot_dimension_numbers<[1], [0], [0], [1], [0, 0, 1, 1], [], []>} : vector<16x8xf32>, vector<8x32xf32>, vector<16x32xf32> -> vector<16x32xf32>
    %538 = arith.addf %520, %537 : vector<16x32xf32>
    %539 = vector.broadcast %337 : vector<1x32xf32> to vector<16x32xf32>
    %540 = arith.addf %538, %539 : vector<16x32xf32>
    %541 = arith.addf %456, %540 : vector<16x32xf32>
    %cst_248 = arith.constant dense<0.000000e+00> : vector<16xf32>
    %542 = vector.multi_reduction <add>, %541, %cst_248 [1] : vector<16x32xf32> to vector<16xf32>
    %543 = vector.shape_cast %542 : vector<16xf32> to vector<16x1xf32>
    %cst_249 = arith.constant 3.200000e+01 : f32
    %544 = vector.broadcast %cst_249 : f32 to vector<16x1xf32>
    %545 = arith.divf %543, %544 : vector<16x1xf32>
    %546 = vector.broadcast %545 : vector<16x1xf32> to vector<16x32xf32>
    %547 = arith.subf %541, %546 : vector<16x32xf32>
    %548 = arith.mulf %547, %547 : vector<16x32xf32>
    %cst_250 = arith.constant dense<0.000000e+00> : vector<16xf32>
    %549 = vector.multi_reduction <add>, %548, %cst_250 [1] : vector<16x32xf32> to vector<16xf32>
    %550 = vector.shape_cast %549 : vector<16xf32> to vector<16x1xf32>
    %cst_251 = arith.constant 3.200000e+01 : f32
    %551 = vector.broadcast %cst_251 : f32 to vector<16x1xf32>
    %552 = arith.divf %550, %551 : vector<16x1xf32>
    %cst_252 = arith.constant 9.99999974E-6 : f32
    %553 = vector.broadcast %cst_252 : f32 to vector<16x1xf32>
    %554 = arith.addf %552, %553 : vector<16x1xf32>
    %555 = math.rsqrt %554 : vector<16x1xf32>
    %556 = vector.broadcast %555 : vector<16x1xf32> to vector<16x32xf32>
    %557 = arith.mulf %547, %556 : vector<16x32xf32>
    %558 = vector.broadcast %339 : vector<1x32xf32> to vector<16x32xf32>
    %559 = arith.mulf %557, %558 : vector<16x32xf32>
    %560 = vector.broadcast %341 : vector<1x32xf32> to vector<16x32xf32>
    %561 = arith.addf %559, %560 : vector<16x32xf32>
    %cst_253 = arith.constant dense<0.000000e+00> : vector<16x64xf32>
    %562 = tpu.matmul %561, %343, %cst_253 {dimension_numbers = #tpu.dot_dimension_numbers<[1], [0], [0], [1], [0, 0, 1, 1], [], []>} : vector<16x32xf32>, vector<32x64xf32>, vector<16x64xf32> -> vector<16x64xf32>
    %563 = vector.broadcast %345 : vector<1x64xf32> to vector<16x64xf32>
    %564 = arith.addf %562, %563 : vector<16x64xf32>
    %cst_254 = arith.constant 0.000000e+00 : f32
    %565 = vector.broadcast %cst_254 : f32 to vector<16x64xf32>
    %566 = arith.maximumf %564, %565 : vector<16x64xf32>
    %cst_255 = arith.constant dense<0.000000e+00> : vector<16x32xf32>
    %567 = tpu.matmul %566, %347, %cst_255 {dimension_numbers = #tpu.dot_dimension_numbers<[1], [0], [0], [1], [0, 0, 1, 1], [], []>} : vector<16x64xf32>, vector<64x32xf32>, vector<16x32xf32> -> vector<16x32xf32>
    %568 = vector.broadcast %349 : vector<1x32xf32> to vector<16x32xf32>
    %569 = arith.addf %567, %568 : vector<16x32xf32>
    %570 = arith.addf %561, %569 : vector<16x32xf32>
    %cst_256 = arith.constant dense<0.000000e+00> : vector<16xf32>
    %571 = vector.multi_reduction <add>, %570, %cst_256 [1] : vector<16x32xf32> to vector<16xf32>
    %572 = vector.shape_cast %571 : vector<16xf32> to vector<16x1xf32>
    %cst_257 = arith.constant 3.200000e+01 : f32
    %573 = vector.broadcast %cst_257 : f32 to vector<16x1xf32>
    %574 = arith.divf %572, %573 : vector<16x1xf32>
    %575 = vector.broadcast %574 : vector<16x1xf32> to vector<16x32xf32>
    %576 = arith.subf %570, %575 : vector<16x32xf32>
    %577 = arith.mulf %576, %576 : vector<16x32xf32>
    %cst_258 = arith.constant dense<0.000000e+00> : vector<16xf32>
    %578 = vector.multi_reduction <add>, %577, %cst_258 [1] : vector<16x32xf32> to vector<16xf32>
    %579 = vector.shape_cast %578 : vector<16xf32> to vector<16x1xf32>
    %cst_259 = arith.constant 3.200000e+01 : f32
    %580 = vector.broadcast %cst_259 : f32 to vector<16x1xf32>
    %581 = arith.divf %579, %580 : vector<16x1xf32>
    %cst_260 = arith.constant 9.99999974E-6 : f32
    %582 = vector.broadcast %cst_260 : f32 to vector<16x1xf32>
    %583 = arith.addf %581, %582 : vector<16x1xf32>
    %584 = math.rsqrt %583 : vector<16x1xf32>
    %585 = vector.broadcast %584 : vector<16x1xf32> to vector<16x32xf32>
    %586 = arith.mulf %576, %585 : vector<16x32xf32>
    %587 = vector.broadcast %351 : vector<1x32xf32> to vector<16x32xf32>
    %588 = arith.mulf %586, %587 : vector<16x32xf32>
    %589 = vector.broadcast %353 : vector<1x32xf32> to vector<16x32xf32>
    %590 = arith.addf %588, %589 : vector<16x32xf32>
    %c1_261 = arith.constant 1 : index
    %c0_262 = arith.constant 0 : index
    %c0_263 = arith.constant 0 : index
    %591 = vector.load %arg13[%c1_261, %c0_262, %c0_263] : memref<2x32x96xf32, #tpu.memory_space<vmem>>, vector<1x32x96xf32>
    %592 = vector.shape_cast %591 : vector<1x32x96xf32> to vector<32x96xf32>
    %c1_264 = arith.constant 1 : index
    %c0_265 = arith.constant 0 : index
    %c0_266 = arith.constant 0 : index
    %593 = vector.load %arg14[%c1_264, %c0_265, %c0_266] : memref<2x1x96xf32, #tpu.memory_space<vmem>>, vector<1x1x96xf32>
    %594 = vector.shape_cast %593 : vector<1x1x96xf32> to vector<1x96xf32>
    %c1_267 = arith.constant 1 : index
    %c0_268 = arith.constant 0 : index
    %c0_269 = arith.constant 0 : index
    %595 = vector.load %arg15[%c1_267, %c0_268, %c0_269] : memref<2x32x32xf32, #tpu.memory_space<vmem>>, vector<1x32x32xf32>
    %596 = vector.shape_cast %595 : vector<1x32x32xf32> to vector<32x32xf32>
    %c1_270 = arith.constant 1 : index
    %c0_271 = arith.constant 0 : index
    %c0_272 = arith.constant 0 : index
    %597 = vector.load %arg16[%c1_270, %c0_271, %c0_272] : memref<2x1x32xf32, #tpu.memory_space<vmem>>, vector<1x1x32xf32>
    %598 = vector.shape_cast %597 : vector<1x1x32xf32> to vector<1x32xf32>
    %c1_273 = arith.constant 1 : index
    %c0_274 = arith.constant 0 : index
    %c0_275 = arith.constant 0 : index
    %599 = vector.load %arg17[%c1_273, %c0_274, %c0_275] : memref<2x1x32xf32, #tpu.memory_space<vmem>>, vector<1x1x32xf32>
    %600 = vector.shape_cast %599 : vector<1x1x32xf32> to vector<1x32xf32>
    %c1_276 = arith.constant 1 : index
    %c0_277 = arith.constant 0 : index
    %c0_278 = arith.constant 0 : index
    %601 = vector.load %arg18[%c1_276, %c0_277, %c0_278] : memref<2x1x32xf32, #tpu.memory_space<vmem>>, vector<1x1x32xf32>
    %602 = vector.shape_cast %601 : vector<1x1x32xf32> to vector<1x32xf32>
    %c1_279 = arith.constant 1 : index
    %c0_280 = arith.constant 0 : index
    %c0_281 = arith.constant 0 : index
    %603 = vector.load %arg19[%c1_279, %c0_280, %c0_281] : memref<2x32x32xf32, #tpu.memory_space<vmem>>, vector<1x32x32xf32>
    %604 = vector.shape_cast %603 : vector<1x32x32xf32> to vector<32x32xf32>
    %c1_282 = arith.constant 1 : index
    %c0_283 = arith.constant 0 : index
    %c0_284 = arith.constant 0 : index
    %605 = vector.load %arg20[%c1_282, %c0_283, %c0_284] : memref<2x1x32xf32, #tpu.memory_space<vmem>>, vector<1x1x32xf32>
    %606 = vector.shape_cast %605 : vector<1x1x32xf32> to vector<1x32xf32>
    %c1_285 = arith.constant 1 : index
    %c0_286 = arith.constant 0 : index
    %c0_287 = arith.constant 0 : index
    %607 = vector.load %arg21[%c1_285, %c0_286, %c0_287] : memref<2x32x64xf32, #tpu.memory_space<vmem>>, vector<1x32x64xf32>
    %608 = vector.shape_cast %607 : vector<1x32x64xf32> to vector<32x64xf32>
    %c1_288 = arith.constant 1 : index
    %c0_289 = arith.constant 0 : index
    %c0_290 = arith.constant 0 : index
    %609 = vector.load %arg22[%c1_288, %c0_289, %c0_290] : memref<2x1x64xf32, #tpu.memory_space<vmem>>, vector<1x1x64xf32>
    %610 = vector.shape_cast %609 : vector<1x1x64xf32> to vector<1x64xf32>
    %c1_291 = arith.constant 1 : index
    %c0_292 = arith.constant 0 : index
    %c0_293 = arith.constant 0 : index
    %611 = vector.load %arg23[%c1_291, %c0_292, %c0_293] : memref<2x32x32xf32, #tpu.memory_space<vmem>>, vector<1x32x32xf32>
    %612 = vector.shape_cast %611 : vector<1x32x32xf32> to vector<32x32xf32>
    %c1_294 = arith.constant 1 : index
    %c0_295 = arith.constant 0 : index
    %c0_296 = arith.constant 0 : index
    %613 = vector.load %arg24[%c1_294, %c0_295, %c0_296] : memref<2x1x32xf32, #tpu.memory_space<vmem>>, vector<1x1x32xf32>
    %614 = vector.shape_cast %613 : vector<1x1x32xf32> to vector<1x32xf32>
    %c1_297 = arith.constant 1 : index
    %c0_298 = arith.constant 0 : index
    %c0_299 = arith.constant 0 : index
    %615 = vector.load %arg25[%c1_297, %c0_298, %c0_299] : memref<2x1x32xf32, #tpu.memory_space<vmem>>, vector<1x1x32xf32>
    %616 = vector.shape_cast %615 : vector<1x1x32xf32> to vector<1x32xf32>
    %c1_300 = arith.constant 1 : index
    %c0_301 = arith.constant 0 : index
    %c0_302 = arith.constant 0 : index
    %617 = vector.load %arg26[%c1_300, %c0_301, %c0_302] : memref<2x1x32xf32, #tpu.memory_space<vmem>>, vector<1x1x32xf32>
    %618 = vector.shape_cast %617 : vector<1x1x32xf32> to vector<1x32xf32>
    %c1_303 = arith.constant 1 : index
    %c0_304 = arith.constant 0 : index
    %c0_305 = arith.constant 0 : index
    %619 = vector.load %arg27[%c1_303, %c0_304, %c0_305] : memref<2x32x64xf32, #tpu.memory_space<vmem>>, vector<1x32x64xf32>
    %620 = vector.shape_cast %619 : vector<1x32x64xf32> to vector<32x64xf32>
    %c1_306 = arith.constant 1 : index
    %c0_307 = arith.constant 0 : index
    %c0_308 = arith.constant 0 : index
    %621 = vector.load %arg28[%c1_306, %c0_307, %c0_308] : memref<2x1x64xf32, #tpu.memory_space<vmem>>, vector<1x1x64xf32>
    %622 = vector.shape_cast %621 : vector<1x1x64xf32> to vector<1x64xf32>
    %c1_309 = arith.constant 1 : index
    %c0_310 = arith.constant 0 : index
    %c0_311 = arith.constant 0 : index
    %623 = vector.load %arg29[%c1_309, %c0_310, %c0_311] : memref<2x64x32xf32, #tpu.memory_space<vmem>>, vector<1x64x32xf32>
    %624 = vector.shape_cast %623 : vector<1x64x32xf32> to vector<64x32xf32>
    %c1_312 = arith.constant 1 : index
    %c0_313 = arith.constant 0 : index
    %c0_314 = arith.constant 0 : index
    %625 = vector.load %arg30[%c1_312, %c0_313, %c0_314] : memref<2x1x32xf32, #tpu.memory_space<vmem>>, vector<1x1x32xf32>
    %626 = vector.shape_cast %625 : vector<1x1x32xf32> to vector<1x32xf32>
    %c1_315 = arith.constant 1 : index
    %c0_316 = arith.constant 0 : index
    %c0_317 = arith.constant 0 : index
    %627 = vector.load %arg31[%c1_315, %c0_316, %c0_317] : memref<2x1x32xf32, #tpu.memory_space<vmem>>, vector<1x1x32xf32>
    %628 = vector.shape_cast %627 : vector<1x1x32xf32> to vector<1x32xf32>
    %c1_318 = arith.constant 1 : index
    %c0_319 = arith.constant 0 : index
    %c0_320 = arith.constant 0 : index
    %629 = vector.load %arg32[%c1_318, %c0_319, %c0_320] : memref<2x1x32xf32, #tpu.memory_space<vmem>>, vector<1x1x32xf32>
    %630 = vector.shape_cast %629 : vector<1x1x32xf32> to vector<1x32xf32>
    %cst_321 = arith.constant dense<0.000000e+00> : vector<16x96xf32>
    %631 = tpu.matmul %590, %592, %cst_321 {dimension_numbers = #tpu.dot_dimension_numbers<[1], [0], [0], [1], [0, 0, 1, 1], [], []>} : vector<16x32xf32>, vector<32x96xf32>, vector<16x96xf32> -> vector<16x96xf32>
    %632 = vector.broadcast %594 : vector<1x96xf32> to vector<16x96xf32>
    %633 = arith.addf %631, %632 : vector<16x96xf32>
    %634 = vector.extract_strided_slice %633 {offsets = [0, 0], sizes = [16, 32], strides = [1, 1]} : vector<16x96xf32> to vector<16x32xf32>
    %635 = vector.extract_strided_slice %633 {offsets = [0, 32], sizes = [16, 32], strides = [1, 1]} : vector<16x96xf32> to vector<16x32xf32>
    %636 = vector.extract_strided_slice %633 {offsets = [0, 64], sizes = [16, 32], strides = [1, 1]} : vector<16x96xf32> to vector<16x32xf32>
    %637 = vector.shape_cast %634 : vector<16x32xf32> to vector<2x8x32xf32>
    %638 = vector.shape_cast %635 : vector<16x32xf32> to vector<2x8x32xf32>
    %639 = vector.shape_cast %636 : vector<16x32xf32> to vector<2x8x32xf32>
    %640 = vector.extract_strided_slice %637 {offsets = [0, 0, 0], sizes = [2, 8, 8], strides = [1, 1, 1]} : vector<2x8x32xf32> to vector<2x8x8xf32>
    %641 = vector.extract_strided_slice %638 {offsets = [0, 0, 0], sizes = [2, 8, 8], strides = [1, 1, 1]} : vector<2x8x32xf32> to vector<2x8x8xf32>
    "tpu.trace_start"() <{level = 10 : i32, message = "bqd,bkd->bqk"}> : () -> ()
    %cst_322 = arith.constant dense<0.000000e+00> : vector<2x8x8xf32>
    %642 = tpu.matmul %640, %641, %cst_322 {dimension_numbers = #tpu.dot_dimension_numbers<[2], [2], [1], [1], [0, 0, 0, 1, 1, 1], [0], [0]>} : vector<2x8x8xf32>, vector<2x8x8xf32>, vector<2x8x8xf32> -> vector<2x8x8xf32>
    "tpu.trace_stop"() : () -> ()
    %cst_323 = arith.constant dense<0xFF800000> : vector<2x8xf32>
    %643 = vector.multi_reduction <maximumf>, %642, %cst_323 [2] : vector<2x8x8xf32> to vector<2x8xf32>
    %644 = vector.shape_cast %643 : vector<2x8xf32> to vector<2x8x1xf32>
    %645 = vector.broadcast %644 : vector<2x8x1xf32> to vector<2x8x8xf32>
    %646 = arith.subf %642, %645 : vector<2x8x8xf32>
    %647 = math.exp %646 : vector<2x8x8xf32>
    %cst_324 = arith.constant dense<0.000000e+00> : vector<2x8xf32>
    %648 = vector.multi_reduction <add>, %647, %cst_324 [2] : vector<2x8x8xf32> to vector<2x8xf32>
    %649 = vector.shape_cast %648 : vector<2x8xf32> to vector<2x8x1xf32>
    %650 = vector.broadcast %649 : vector<2x8x1xf32> to vector<2x8x8xf32>
    %651 = arith.divf %647, %650 : vector<2x8x8xf32>
    %652 = vector.extract_strided_slice %639 {offsets = [0, 0, 0], sizes = [2, 8, 8], strides = [1, 1, 1]} : vector<2x8x32xf32> to vector<2x8x8xf32>
    "tpu.trace_start"() <{level = 10 : i32, message = "bqk,bkd->bqd"}> : () -> ()
    %cst_325 = arith.constant dense<0.000000e+00> : vector<2x8x8xf32>
    %653 = tpu.matmul %651, %652, %cst_325 {dimension_numbers = #tpu.dot_dimension_numbers<[2], [1], [1], [2], [0, 0, 0, 1, 1, 2], [0], [0]>} : vector<2x8x8xf32>, vector<2x8x8xf32>, vector<2x8x8xf32> -> vector<2x8x8xf32>
    "tpu.trace_stop"() : () -> ()
    %654 = vector.shape_cast %653 : vector<2x8x8xf32> to vector<16x8xf32>
    %655 = vector.extract_strided_slice %596 {offsets = [0, 0], sizes = [8, 32], strides = [1, 1]} : vector<32x32xf32> to vector<8x32xf32>
    %cst_326 = arith.constant dense<0.000000e+00> : vector<16x32xf32>
    %656 = tpu.matmul %654, %655, %cst_326 {dimension_numbers = #tpu.dot_dimension_numbers<[1], [0], [0], [1], [0, 0, 1, 1], [], []>} : vector<16x8xf32>, vector<8x32xf32>, vector<16x32xf32> -> vector<16x32xf32>
    %657 = vector.extract_strided_slice %637 {offsets = [0, 0, 8], sizes = [2, 8, 8], strides = [1, 1, 1]} : vector<2x8x32xf32> to vector<2x8x8xf32>
    %658 = vector.extract_strided_slice %638 {offsets = [0, 0, 8], sizes = [2, 8, 8], strides = [1, 1, 1]} : vector<2x8x32xf32> to vector<2x8x8xf32>
    "tpu.trace_start"() <{level = 10 : i32, message = "bqd,bkd->bqk"}> : () -> ()
    %cst_327 = arith.constant dense<0.000000e+00> : vector<2x8x8xf32>
    %659 = tpu.matmul %657, %658, %cst_327 {dimension_numbers = #tpu.dot_dimension_numbers<[2], [2], [1], [1], [0, 0, 0, 1, 1, 1], [0], [0]>} : vector<2x8x8xf32>, vector<2x8x8xf32>, vector<2x8x8xf32> -> vector<2x8x8xf32>
    "tpu.trace_stop"() : () -> ()
    %cst_328 = arith.constant dense<0xFF800000> : vector<2x8xf32>
    %660 = vector.multi_reduction <maximumf>, %659, %cst_328 [2] : vector<2x8x8xf32> to vector<2x8xf32>
    %661 = vector.shape_cast %660 : vector<2x8xf32> to vector<2x8x1xf32>
    %662 = vector.broadcast %661 : vector<2x8x1xf32> to vector<2x8x8xf32>
    %663 = arith.subf %659, %662 : vector<2x8x8xf32>
    %664 = math.exp %663 : vector<2x8x8xf32>
    %cst_329 = arith.constant dense<0.000000e+00> : vector<2x8xf32>
    %665 = vector.multi_reduction <add>, %664, %cst_329 [2] : vector<2x8x8xf32> to vector<2x8xf32>
    %666 = vector.shape_cast %665 : vector<2x8xf32> to vector<2x8x1xf32>
    %667 = vector.broadcast %666 : vector<2x8x1xf32> to vector<2x8x8xf32>
    %668 = arith.divf %664, %667 : vector<2x8x8xf32>
    %669 = vector.extract_strided_slice %639 {offsets = [0, 0, 8], sizes = [2, 8, 8], strides = [1, 1, 1]} : vector<2x8x32xf32> to vector<2x8x8xf32>
    "tpu.trace_start"() <{level = 10 : i32, message = "bqk,bkd->bqd"}> : () -> ()
    %cst_330 = arith.constant dense<0.000000e+00> : vector<2x8x8xf32>
    %670 = tpu.matmul %668, %669, %cst_330 {dimension_numbers = #tpu.dot_dimension_numbers<[2], [1], [1], [2], [0, 0, 0, 1, 1, 2], [0], [0]>} : vector<2x8x8xf32>, vector<2x8x8xf32>, vector<2x8x8xf32> -> vector<2x8x8xf32>
    "tpu.trace_stop"() : () -> ()
    %671 = vector.shape_cast %670 : vector<2x8x8xf32> to vector<16x8xf32>
    %672 = vector.extract_strided_slice %596 {offsets = [8, 0], sizes = [8, 32], strides = [1, 1]} : vector<32x32xf32> to vector<8x32xf32>
    %cst_331 = arith.constant dense<0.000000e+00> : vector<16x32xf32>
    %673 = tpu.matmul %671, %672, %cst_331 {dimension_numbers = #tpu.dot_dimension_numbers<[1], [0], [0], [1], [0, 0, 1, 1], [], []>} : vector<16x8xf32>, vector<8x32xf32>, vector<16x32xf32> -> vector<16x32xf32>
    %674 = arith.addf %656, %673 : vector<16x32xf32>
    %675 = vector.extract_strided_slice %637 {offsets = [0, 0, 16], sizes = [2, 8, 8], strides = [1, 1, 1]} : vector<2x8x32xf32> to vector<2x8x8xf32>
    %676 = vector.extract_strided_slice %638 {offsets = [0, 0, 16], sizes = [2, 8, 8], strides = [1, 1, 1]} : vector<2x8x32xf32> to vector<2x8x8xf32>
    "tpu.trace_start"() <{level = 10 : i32, message = "bqd,bkd->bqk"}> : () -> ()
    %cst_332 = arith.constant dense<0.000000e+00> : vector<2x8x8xf32>
    %677 = tpu.matmul %675, %676, %cst_332 {dimension_numbers = #tpu.dot_dimension_numbers<[2], [2], [1], [1], [0, 0, 0, 1, 1, 1], [0], [0]>} : vector<2x8x8xf32>, vector<2x8x8xf32>, vector<2x8x8xf32> -> vector<2x8x8xf32>
    "tpu.trace_stop"() : () -> ()
    %cst_333 = arith.constant dense<0xFF800000> : vector<2x8xf32>
    %678 = vector.multi_reduction <maximumf>, %677, %cst_333 [2] : vector<2x8x8xf32> to vector<2x8xf32>
    %679 = vector.shape_cast %678 : vector<2x8xf32> to vector<2x8x1xf32>
    %680 = vector.broadcast %679 : vector<2x8x1xf32> to vector<2x8x8xf32>
    %681 = arith.subf %677, %680 : vector<2x8x8xf32>
    %682 = math.exp %681 : vector<2x8x8xf32>
    %cst_334 = arith.constant dense<0.000000e+00> : vector<2x8xf32>
    %683 = vector.multi_reduction <add>, %682, %cst_334 [2] : vector<2x8x8xf32> to vector<2x8xf32>
    %684 = vector.shape_cast %683 : vector<2x8xf32> to vector<2x8x1xf32>
    %685 = vector.broadcast %684 : vector<2x8x1xf32> to vector<2x8x8xf32>
    %686 = arith.divf %682, %685 : vector<2x8x8xf32>
    %687 = vector.extract_strided_slice %639 {offsets = [0, 0, 16], sizes = [2, 8, 8], strides = [1, 1, 1]} : vector<2x8x32xf32> to vector<2x8x8xf32>
    "tpu.trace_start"() <{level = 10 : i32, message = "bqk,bkd->bqd"}> : () -> ()
    %cst_335 = arith.constant dense<0.000000e+00> : vector<2x8x8xf32>
    %688 = tpu.matmul %686, %687, %cst_335 {dimension_numbers = #tpu.dot_dimension_numbers<[2], [1], [1], [2], [0, 0, 0, 1, 1, 2], [0], [0]>} : vector<2x8x8xf32>, vector<2x8x8xf32>, vector<2x8x8xf32> -> vector<2x8x8xf32>
    "tpu.trace_stop"() : () -> ()
    %689 = vector.shape_cast %688 : vector<2x8x8xf32> to vector<16x8xf32>
    %690 = vector.extract_strided_slice %596 {offsets = [16, 0], sizes = [8, 32], strides = [1, 1]} : vector<32x32xf32> to vector<8x32xf32>
    %cst_336 = arith.constant dense<0.000000e+00> : vector<16x32xf32>
    %691 = tpu.matmul %689, %690, %cst_336 {dimension_numbers = #tpu.dot_dimension_numbers<[1], [0], [0], [1], [0, 0, 1, 1], [], []>} : vector<16x8xf32>, vector<8x32xf32>, vector<16x32xf32> -> vector<16x32xf32>
    %692 = arith.addf %674, %691 : vector<16x32xf32>
    %693 = vector.extract_strided_slice %637 {offsets = [0, 0, 24], sizes = [2, 8, 8], strides = [1, 1, 1]} : vector<2x8x32xf32> to vector<2x8x8xf32>
    %694 = vector.extract_strided_slice %638 {offsets = [0, 0, 24], sizes = [2, 8, 8], strides = [1, 1, 1]} : vector<2x8x32xf32> to vector<2x8x8xf32>
    "tpu.trace_start"() <{level = 10 : i32, message = "bqd,bkd->bqk"}> : () -> ()
    %cst_337 = arith.constant dense<0.000000e+00> : vector<2x8x8xf32>
    %695 = tpu.matmul %693, %694, %cst_337 {dimension_numbers = #tpu.dot_dimension_numbers<[2], [2], [1], [1], [0, 0, 0, 1, 1, 1], [0], [0]>} : vector<2x8x8xf32>, vector<2x8x8xf32>, vector<2x8x8xf32> -> vector<2x8x8xf32>
    "tpu.trace_stop"() : () -> ()
    %cst_338 = arith.constant dense<0xFF800000> : vector<2x8xf32>
    %696 = vector.multi_reduction <maximumf>, %695, %cst_338 [2] : vector<2x8x8xf32> to vector<2x8xf32>
    %697 = vector.shape_cast %696 : vector<2x8xf32> to vector<2x8x1xf32>
    %698 = vector.broadcast %697 : vector<2x8x1xf32> to vector<2x8x8xf32>
    %699 = arith.subf %695, %698 : vector<2x8x8xf32>
    %700 = math.exp %699 : vector<2x8x8xf32>
    %cst_339 = arith.constant dense<0.000000e+00> : vector<2x8xf32>
    %701 = vector.multi_reduction <add>, %700, %cst_339 [2] : vector<2x8x8xf32> to vector<2x8xf32>
    %702 = vector.shape_cast %701 : vector<2x8xf32> to vector<2x8x1xf32>
    %703 = vector.broadcast %702 : vector<2x8x1xf32> to vector<2x8x8xf32>
    %704 = arith.divf %700, %703 : vector<2x8x8xf32>
    %705 = vector.extract_strided_slice %639 {offsets = [0, 0, 24], sizes = [2, 8, 8], strides = [1, 1, 1]} : vector<2x8x32xf32> to vector<2x8x8xf32>
    "tpu.trace_start"() <{level = 10 : i32, message = "bqk,bkd->bqd"}> : () -> ()
    %cst_340 = arith.constant dense<0.000000e+00> : vector<2x8x8xf32>
    %706 = tpu.matmul %704, %705, %cst_340 {dimension_numbers = #tpu.dot_dimension_numbers<[2], [1], [1], [2], [0, 0, 0, 1, 1, 2], [0], [0]>} : vector<2x8x8xf32>, vector<2x8x8xf32>, vector<2x8x8xf32> -> vector<2x8x8xf32>
    "tpu.trace_stop"() : () -> ()
    %707 = vector.shape_cast %706 : vector<2x8x8xf32> to vector<16x8xf32>
    %708 = vector.extract_strided_slice %596 {offsets = [24, 0], sizes = [8, 32], strides = [1, 1]} : vector<32x32xf32> to vector<8x32xf32>
    %cst_341 = arith.constant dense<0.000000e+00> : vector<16x32xf32>
    %709 = tpu.matmul %707, %708, %cst_341 {dimension_numbers = #tpu.dot_dimension_numbers<[1], [0], [0], [1], [0, 0, 1, 1], [], []>} : vector<16x8xf32>, vector<8x32xf32>, vector<16x32xf32> -> vector<16x32xf32>
    %710 = arith.addf %692, %709 : vector<16x32xf32>
    %711 = vector.broadcast %598 : vector<1x32xf32> to vector<16x32xf32>
    %712 = arith.addf %710, %711 : vector<16x32xf32>
    %713 = arith.addf %590, %712 : vector<16x32xf32>
    %cst_342 = arith.constant dense<0.000000e+00> : vector<16xf32>
    %714 = vector.multi_reduction <add>, %713, %cst_342 [1] : vector<16x32xf32> to vector<16xf32>
    %715 = vector.shape_cast %714 : vector<16xf32> to vector<16x1xf32>
    %cst_343 = arith.constant 3.200000e+01 : f32
    %716 = vector.broadcast %cst_343 : f32 to vector<16x1xf32>
    %717 = arith.divf %715, %716 : vector<16x1xf32>
    %718 = vector.broadcast %717 : vector<16x1xf32> to vector<16x32xf32>
    %719 = arith.subf %713, %718 : vector<16x32xf32>
    %720 = arith.mulf %719, %719 : vector<16x32xf32>
    %cst_344 = arith.constant dense<0.000000e+00> : vector<16xf32>
    %721 = vector.multi_reduction <add>, %720, %cst_344 [1] : vector<16x32xf32> to vector<16xf32>
    %722 = vector.shape_cast %721 : vector<16xf32> to vector<16x1xf32>
    %cst_345 = arith.constant 3.200000e+01 : f32
    %723 = vector.broadcast %cst_345 : f32 to vector<16x1xf32>
    %724 = arith.divf %722, %723 : vector<16x1xf32>
    %cst_346 = arith.constant 9.99999974E-6 : f32
    %725 = vector.broadcast %cst_346 : f32 to vector<16x1xf32>
    %726 = arith.addf %724, %725 : vector<16x1xf32>
    %727 = math.rsqrt %726 : vector<16x1xf32>
    %728 = vector.broadcast %727 : vector<16x1xf32> to vector<16x32xf32>
    %729 = arith.mulf %719, %728 : vector<16x32xf32>
    %730 = vector.broadcast %600 : vector<1x32xf32> to vector<16x32xf32>
    %731 = arith.mulf %729, %730 : vector<16x32xf32>
    %732 = vector.broadcast %602 : vector<1x32xf32> to vector<16x32xf32>
    %733 = arith.addf %731, %732 : vector<16x32xf32>
    %cst_347 = arith.constant dense<0.000000e+00> : vector<16x32xf32>
    %734 = tpu.matmul %733, %604, %cst_347 {dimension_numbers = #tpu.dot_dimension_numbers<[1], [0], [0], [1], [0, 0, 1, 1], [], []>} : vector<16x32xf32>, vector<32x32xf32>, vector<16x32xf32> -> vector<16x32xf32>
    %735 = vector.broadcast %606 : vector<1x32xf32> to vector<16x32xf32>
    %736 = arith.addf %734, %735 : vector<16x32xf32>
    %cst_348 = arith.constant dense<0.000000e+00> : vector<16x64xf32>
    %737 = tpu.matmul %313, %608, %cst_348 {dimension_numbers = #tpu.dot_dimension_numbers<[1], [0], [0], [1], [0, 0, 1, 1], [], []>} : vector<16x32xf32>, vector<32x64xf32>, vector<16x64xf32> -> vector<16x64xf32>
    %738 = vector.broadcast %610 : vector<1x64xf32> to vector<16x64xf32>
    %739 = arith.addf %737, %738 : vector<16x64xf32>
    %740 = vector.extract_strided_slice %739 {offsets = [0, 0], sizes = [16, 32], strides = [1, 1]} : vector<16x64xf32> to vector<16x32xf32>
    %741 = vector.extract_strided_slice %739 {offsets = [0, 32], sizes = [16, 32], strides = [1, 1]} : vector<16x64xf32> to vector<16x32xf32>
    %742 = vector.shape_cast %736 : vector<16x32xf32> to vector<2x8x32xf32>
    %743 = vector.shape_cast %740 : vector<16x32xf32> to vector<2x8x32xf32>
    %744 = vector.shape_cast %741 : vector<16x32xf32> to vector<2x8x32xf32>
    %745 = vector.extract_strided_slice %742 {offsets = [0, 0, 0], sizes = [2, 8, 8], strides = [1, 1, 1]} : vector<2x8x32xf32> to vector<2x8x8xf32>
    %746 = vector.extract_strided_slice %743 {offsets = [0, 0, 0], sizes = [2, 8, 8], strides = [1, 1, 1]} : vector<2x8x32xf32> to vector<2x8x8xf32>
    "tpu.trace_start"() <{level = 10 : i32, message = "bqd,bkd->bqk"}> : () -> ()
    %cst_349 = arith.constant dense<0.000000e+00> : vector<2x8x8xf32>
    %747 = tpu.matmul %745, %746, %cst_349 {dimension_numbers = #tpu.dot_dimension_numbers<[2], [2], [1], [1], [0, 0, 0, 1, 1, 1], [0], [0]>} : vector<2x8x8xf32>, vector<2x8x8xf32>, vector<2x8x8xf32> -> vector<2x8x8xf32>
    "tpu.trace_stop"() : () -> ()
    %cst_350 = arith.constant dense<0xFF800000> : vector<2x8xf32>
    %748 = vector.multi_reduction <maximumf>, %747, %cst_350 [2] : vector<2x8x8xf32> to vector<2x8xf32>
    %749 = vector.shape_cast %748 : vector<2x8xf32> to vector<2x8x1xf32>
    %750 = vector.broadcast %749 : vector<2x8x1xf32> to vector<2x8x8xf32>
    %751 = arith.subf %747, %750 : vector<2x8x8xf32>
    %752 = math.exp %751 : vector<2x8x8xf32>
    %cst_351 = arith.constant dense<0.000000e+00> : vector<2x8xf32>
    %753 = vector.multi_reduction <add>, %752, %cst_351 [2] : vector<2x8x8xf32> to vector<2x8xf32>
    %754 = vector.shape_cast %753 : vector<2x8xf32> to vector<2x8x1xf32>
    %755 = vector.broadcast %754 : vector<2x8x1xf32> to vector<2x8x8xf32>
    %756 = arith.divf %752, %755 : vector<2x8x8xf32>
    %757 = vector.extract_strided_slice %744 {offsets = [0, 0, 0], sizes = [2, 8, 8], strides = [1, 1, 1]} : vector<2x8x32xf32> to vector<2x8x8xf32>
    "tpu.trace_start"() <{level = 10 : i32, message = "bqk,bkd->bqd"}> : () -> ()
    %cst_352 = arith.constant dense<0.000000e+00> : vector<2x8x8xf32>
    %758 = tpu.matmul %756, %757, %cst_352 {dimension_numbers = #tpu.dot_dimension_numbers<[2], [1], [1], [2], [0, 0, 0, 1, 1, 2], [0], [0]>} : vector<2x8x8xf32>, vector<2x8x8xf32>, vector<2x8x8xf32> -> vector<2x8x8xf32>
    "tpu.trace_stop"() : () -> ()
    %759 = vector.shape_cast %758 : vector<2x8x8xf32> to vector<16x8xf32>
    %760 = vector.extract_strided_slice %612 {offsets = [0, 0], sizes = [8, 32], strides = [1, 1]} : vector<32x32xf32> to vector<8x32xf32>
    %cst_353 = arith.constant dense<0.000000e+00> : vector<16x32xf32>
    %761 = tpu.matmul %759, %760, %cst_353 {dimension_numbers = #tpu.dot_dimension_numbers<[1], [0], [0], [1], [0, 0, 1, 1], [], []>} : vector<16x8xf32>, vector<8x32xf32>, vector<16x32xf32> -> vector<16x32xf32>
    %762 = vector.extract_strided_slice %742 {offsets = [0, 0, 8], sizes = [2, 8, 8], strides = [1, 1, 1]} : vector<2x8x32xf32> to vector<2x8x8xf32>
    %763 = vector.extract_strided_slice %743 {offsets = [0, 0, 8], sizes = [2, 8, 8], strides = [1, 1, 1]} : vector<2x8x32xf32> to vector<2x8x8xf32>
    "tpu.trace_start"() <{level = 10 : i32, message = "bqd,bkd->bqk"}> : () -> ()
    %cst_354 = arith.constant dense<0.000000e+00> : vector<2x8x8xf32>
    %764 = tpu.matmul %762, %763, %cst_354 {dimension_numbers = #tpu.dot_dimension_numbers<[2], [2], [1], [1], [0, 0, 0, 1, 1, 1], [0], [0]>} : vector<2x8x8xf32>, vector<2x8x8xf32>, vector<2x8x8xf32> -> vector<2x8x8xf32>
    "tpu.trace_stop"() : () -> ()
    %cst_355 = arith.constant dense<0xFF800000> : vector<2x8xf32>
    %765 = vector.multi_reduction <maximumf>, %764, %cst_355 [2] : vector<2x8x8xf32> to vector<2x8xf32>
    %766 = vector.shape_cast %765 : vector<2x8xf32> to vector<2x8x1xf32>
    %767 = vector.broadcast %766 : vector<2x8x1xf32> to vector<2x8x8xf32>
    %768 = arith.subf %764, %767 : vector<2x8x8xf32>
    %769 = math.exp %768 : vector<2x8x8xf32>
    %cst_356 = arith.constant dense<0.000000e+00> : vector<2x8xf32>
    %770 = vector.multi_reduction <add>, %769, %cst_356 [2] : vector<2x8x8xf32> to vector<2x8xf32>
    %771 = vector.shape_cast %770 : vector<2x8xf32> to vector<2x8x1xf32>
    %772 = vector.broadcast %771 : vector<2x8x1xf32> to vector<2x8x8xf32>
    %773 = arith.divf %769, %772 : vector<2x8x8xf32>
    %774 = vector.extract_strided_slice %744 {offsets = [0, 0, 8], sizes = [2, 8, 8], strides = [1, 1, 1]} : vector<2x8x32xf32> to vector<2x8x8xf32>
    "tpu.trace_start"() <{level = 10 : i32, message = "bqk,bkd->bqd"}> : () -> ()
    %cst_357 = arith.constant dense<0.000000e+00> : vector<2x8x8xf32>
    %775 = tpu.matmul %773, %774, %cst_357 {dimension_numbers = #tpu.dot_dimension_numbers<[2], [1], [1], [2], [0, 0, 0, 1, 1, 2], [0], [0]>} : vector<2x8x8xf32>, vector<2x8x8xf32>, vector<2x8x8xf32> -> vector<2x8x8xf32>
    "tpu.trace_stop"() : () -> ()
    %776 = vector.shape_cast %775 : vector<2x8x8xf32> to vector<16x8xf32>
    %777 = vector.extract_strided_slice %612 {offsets = [8, 0], sizes = [8, 32], strides = [1, 1]} : vector<32x32xf32> to vector<8x32xf32>
    %cst_358 = arith.constant dense<0.000000e+00> : vector<16x32xf32>
    %778 = tpu.matmul %776, %777, %cst_358 {dimension_numbers = #tpu.dot_dimension_numbers<[1], [0], [0], [1], [0, 0, 1, 1], [], []>} : vector<16x8xf32>, vector<8x32xf32>, vector<16x32xf32> -> vector<16x32xf32>
    %779 = arith.addf %761, %778 : vector<16x32xf32>
    %780 = vector.extract_strided_slice %742 {offsets = [0, 0, 16], sizes = [2, 8, 8], strides = [1, 1, 1]} : vector<2x8x32xf32> to vector<2x8x8xf32>
    %781 = vector.extract_strided_slice %743 {offsets = [0, 0, 16], sizes = [2, 8, 8], strides = [1, 1, 1]} : vector<2x8x32xf32> to vector<2x8x8xf32>
    "tpu.trace_start"() <{level = 10 : i32, message = "bqd,bkd->bqk"}> : () -> ()
    %cst_359 = arith.constant dense<0.000000e+00> : vector<2x8x8xf32>
    %782 = tpu.matmul %780, %781, %cst_359 {dimension_numbers = #tpu.dot_dimension_numbers<[2], [2], [1], [1], [0, 0, 0, 1, 1, 1], [0], [0]>} : vector<2x8x8xf32>, vector<2x8x8xf32>, vector<2x8x8xf32> -> vector<2x8x8xf32>
    "tpu.trace_stop"() : () -> ()
    %cst_360 = arith.constant dense<0xFF800000> : vector<2x8xf32>
    %783 = vector.multi_reduction <maximumf>, %782, %cst_360 [2] : vector<2x8x8xf32> to vector<2x8xf32>
    %784 = vector.shape_cast %783 : vector<2x8xf32> to vector<2x8x1xf32>
    %785 = vector.broadcast %784 : vector<2x8x1xf32> to vector<2x8x8xf32>
    %786 = arith.subf %782, %785 : vector<2x8x8xf32>
    %787 = math.exp %786 : vector<2x8x8xf32>
    %cst_361 = arith.constant dense<0.000000e+00> : vector<2x8xf32>
    %788 = vector.multi_reduction <add>, %787, %cst_361 [2] : vector<2x8x8xf32> to vector<2x8xf32>
    %789 = vector.shape_cast %788 : vector<2x8xf32> to vector<2x8x1xf32>
    %790 = vector.broadcast %789 : vector<2x8x1xf32> to vector<2x8x8xf32>
    %791 = arith.divf %787, %790 : vector<2x8x8xf32>
    %792 = vector.extract_strided_slice %744 {offsets = [0, 0, 16], sizes = [2, 8, 8], strides = [1, 1, 1]} : vector<2x8x32xf32> to vector<2x8x8xf32>
    "tpu.trace_start"() <{level = 10 : i32, message = "bqk,bkd->bqd"}> : () -> ()
    %cst_362 = arith.constant dense<0.000000e+00> : vector<2x8x8xf32>
    %793 = tpu.matmul %791, %792, %cst_362 {dimension_numbers = #tpu.dot_dimension_numbers<[2], [1], [1], [2], [0, 0, 0, 1, 1, 2], [0], [0]>} : vector<2x8x8xf32>, vector<2x8x8xf32>, vector<2x8x8xf32> -> vector<2x8x8xf32>
    "tpu.trace_stop"() : () -> ()
    %794 = vector.shape_cast %793 : vector<2x8x8xf32> to vector<16x8xf32>
    %795 = vector.extract_strided_slice %612 {offsets = [16, 0], sizes = [8, 32], strides = [1, 1]} : vector<32x32xf32> to vector<8x32xf32>
    %cst_363 = arith.constant dense<0.000000e+00> : vector<16x32xf32>
    %796 = tpu.matmul %794, %795, %cst_363 {dimension_numbers = #tpu.dot_dimension_numbers<[1], [0], [0], [1], [0, 0, 1, 1], [], []>} : vector<16x8xf32>, vector<8x32xf32>, vector<16x32xf32> -> vector<16x32xf32>
    %797 = arith.addf %779, %796 : vector<16x32xf32>
    %798 = vector.extract_strided_slice %742 {offsets = [0, 0, 24], sizes = [2, 8, 8], strides = [1, 1, 1]} : vector<2x8x32xf32> to vector<2x8x8xf32>
    %799 = vector.extract_strided_slice %743 {offsets = [0, 0, 24], sizes = [2, 8, 8], strides = [1, 1, 1]} : vector<2x8x32xf32> to vector<2x8x8xf32>
    "tpu.trace_start"() <{level = 10 : i32, message = "bqd,bkd->bqk"}> : () -> ()
    %cst_364 = arith.constant dense<0.000000e+00> : vector<2x8x8xf32>
    %800 = tpu.matmul %798, %799, %cst_364 {dimension_numbers = #tpu.dot_dimension_numbers<[2], [2], [1], [1], [0, 0, 0, 1, 1, 1], [0], [0]>} : vector<2x8x8xf32>, vector<2x8x8xf32>, vector<2x8x8xf32> -> vector<2x8x8xf32>
    "tpu.trace_stop"() : () -> ()
    %cst_365 = arith.constant dense<0xFF800000> : vector<2x8xf32>
    %801 = vector.multi_reduction <maximumf>, %800, %cst_365 [2] : vector<2x8x8xf32> to vector<2x8xf32>
    %802 = vector.shape_cast %801 : vector<2x8xf32> to vector<2x8x1xf32>
    %803 = vector.broadcast %802 : vector<2x8x1xf32> to vector<2x8x8xf32>
    %804 = arith.subf %800, %803 : vector<2x8x8xf32>
    %805 = math.exp %804 : vector<2x8x8xf32>
    %cst_366 = arith.constant dense<0.000000e+00> : vector<2x8xf32>
    %806 = vector.multi_reduction <add>, %805, %cst_366 [2] : vector<2x8x8xf32> to vector<2x8xf32>
    %807 = vector.shape_cast %806 : vector<2x8xf32> to vector<2x8x1xf32>
    %808 = vector.broadcast %807 : vector<2x8x1xf32> to vector<2x8x8xf32>
    %809 = arith.divf %805, %808 : vector<2x8x8xf32>
    %810 = vector.extract_strided_slice %744 {offsets = [0, 0, 24], sizes = [2, 8, 8], strides = [1, 1, 1]} : vector<2x8x32xf32> to vector<2x8x8xf32>
    "tpu.trace_start"() <{level = 10 : i32, message = "bqk,bkd->bqd"}> : () -> ()
    %cst_367 = arith.constant dense<0.000000e+00> : vector<2x8x8xf32>
    %811 = tpu.matmul %809, %810, %cst_367 {dimension_numbers = #tpu.dot_dimension_numbers<[2], [1], [1], [2], [0, 0, 0, 1, 1, 2], [0], [0]>} : vector<2x8x8xf32>, vector<2x8x8xf32>, vector<2x8x8xf32> -> vector<2x8x8xf32>
    "tpu.trace_stop"() : () -> ()
    %812 = vector.shape_cast %811 : vector<2x8x8xf32> to vector<16x8xf32>
    %813 = vector.extract_strided_slice %612 {offsets = [24, 0], sizes = [8, 32], strides = [1, 1]} : vector<32x32xf32> to vector<8x32xf32>
    %cst_368 = arith.constant dense<0.000000e+00> : vector<16x32xf32>
    %814 = tpu.matmul %812, %813, %cst_368 {dimension_numbers = #tpu.dot_dimension_numbers<[1], [0], [0], [1], [0, 0, 1, 1], [], []>} : vector<16x8xf32>, vector<8x32xf32>, vector<16x32xf32> -> vector<16x32xf32>
    %815 = arith.addf %797, %814 : vector<16x32xf32>
    %816 = vector.broadcast %614 : vector<1x32xf32> to vector<16x32xf32>
    %817 = arith.addf %815, %816 : vector<16x32xf32>
    %818 = arith.addf %733, %817 : vector<16x32xf32>
    %cst_369 = arith.constant dense<0.000000e+00> : vector<16xf32>
    %819 = vector.multi_reduction <add>, %818, %cst_369 [1] : vector<16x32xf32> to vector<16xf32>
    %820 = vector.shape_cast %819 : vector<16xf32> to vector<16x1xf32>
    %cst_370 = arith.constant 3.200000e+01 : f32
    %821 = vector.broadcast %cst_370 : f32 to vector<16x1xf32>
    %822 = arith.divf %820, %821 : vector<16x1xf32>
    %823 = vector.broadcast %822 : vector<16x1xf32> to vector<16x32xf32>
    %824 = arith.subf %818, %823 : vector<16x32xf32>
    %825 = arith.mulf %824, %824 : vector<16x32xf32>
    %cst_371 = arith.constant dense<0.000000e+00> : vector<16xf32>
    %826 = vector.multi_reduction <add>, %825, %cst_371 [1] : vector<16x32xf32> to vector<16xf32>
    %827 = vector.shape_cast %826 : vector<16xf32> to vector<16x1xf32>
    %cst_372 = arith.constant 3.200000e+01 : f32
    %828 = vector.broadcast %cst_372 : f32 to vector<16x1xf32>
    %829 = arith.divf %827, %828 : vector<16x1xf32>
    %cst_373 = arith.constant 9.99999974E-6 : f32
    %830 = vector.broadcast %cst_373 : f32 to vector<16x1xf32>
    %831 = arith.addf %829, %830 : vector<16x1xf32>
    %832 = math.rsqrt %831 : vector<16x1xf32>
    %833 = vector.broadcast %832 : vector<16x1xf32> to vector<16x32xf32>
    %834 = arith.mulf %824, %833 : vector<16x32xf32>
    %835 = vector.broadcast %616 : vector<1x32xf32> to vector<16x32xf32>
    %836 = arith.mulf %834, %835 : vector<16x32xf32>
    %837 = vector.broadcast %618 : vector<1x32xf32> to vector<16x32xf32>
    %838 = arith.addf %836, %837 : vector<16x32xf32>
    %cst_374 = arith.constant dense<0.000000e+00> : vector<16x64xf32>
    %839 = tpu.matmul %838, %620, %cst_374 {dimension_numbers = #tpu.dot_dimension_numbers<[1], [0], [0], [1], [0, 0, 1, 1], [], []>} : vector<16x32xf32>, vector<32x64xf32>, vector<16x64xf32> -> vector<16x64xf32>
    %840 = vector.broadcast %622 : vector<1x64xf32> to vector<16x64xf32>
    %841 = arith.addf %839, %840 : vector<16x64xf32>
    %cst_375 = arith.constant 0.000000e+00 : f32
    %842 = vector.broadcast %cst_375 : f32 to vector<16x64xf32>
    %843 = arith.maximumf %841, %842 : vector<16x64xf32>
    %cst_376 = arith.constant dense<0.000000e+00> : vector<16x32xf32>
    %844 = tpu.matmul %843, %624, %cst_376 {dimension_numbers = #tpu.dot_dimension_numbers<[1], [0], [0], [1], [0, 0, 1, 1], [], []>} : vector<16x64xf32>, vector<64x32xf32>, vector<16x32xf32> -> vector<16x32xf32>
    %845 = vector.broadcast %626 : vector<1x32xf32> to vector<16x32xf32>
    %846 = arith.addf %844, %845 : vector<16x32xf32>
    %847 = arith.addf %838, %846 : vector<16x32xf32>
    %cst_377 = arith.constant dense<0.000000e+00> : vector<16xf32>
    %848 = vector.multi_reduction <add>, %847, %cst_377 [1] : vector<16x32xf32> to vector<16xf32>
    %849 = vector.shape_cast %848 : vector<16xf32> to vector<16x1xf32>
    %cst_378 = arith.constant 3.200000e+01 : f32
    %850 = vector.broadcast %cst_378 : f32 to vector<16x1xf32>
    %851 = arith.divf %849, %850 : vector<16x1xf32>
    %852 = vector.broadcast %851 : vector<16x1xf32> to vector<16x32xf32>
    %853 = arith.subf %847, %852 : vector<16x32xf32>
    %854 = arith.mulf %853, %853 : vector<16x32xf32>
    %cst_379 = arith.constant dense<0.000000e+00> : vector<16xf32>
    %855 = vector.multi_reduction <add>, %854, %cst_379 [1] : vector<16x32xf32> to vector<16xf32>
    %856 = vector.shape_cast %855 : vector<16xf32> to vector<16x1xf32>
    %cst_380 = arith.constant 3.200000e+01 : f32
    %857 = vector.broadcast %cst_380 : f32 to vector<16x1xf32>
    %858 = arith.divf %856, %857 : vector<16x1xf32>
    %cst_381 = arith.constant 9.99999974E-6 : f32
    %859 = vector.broadcast %cst_381 : f32 to vector<16x1xf32>
    %860 = arith.addf %858, %859 : vector<16x1xf32>
    %861 = math.rsqrt %860 : vector<16x1xf32>
    %862 = vector.broadcast %861 : vector<16x1xf32> to vector<16x32xf32>
    %863 = arith.mulf %853, %862 : vector<16x32xf32>
    %864 = vector.broadcast %628 : vector<1x32xf32> to vector<16x32xf32>
    %865 = arith.mulf %863, %864 : vector<16x32xf32>
    %866 = vector.broadcast %630 : vector<1x32xf32> to vector<16x32xf32>
    %867 = arith.addf %865, %866 : vector<16x32xf32>
    %868 = vector.shape_cast %867 : vector<16x32xf32> to vector<2x8x32xf32>
    %c0_382 = arith.constant 0 : index
    %c0_383 = arith.constant 0 : index
    %c0_384 = arith.constant 0 : index
    %869 = vector.load %arg33[%c0_382, %c0_383, %c0_384] : memref<2x8x32xf32, #tpu.memory_space<vmem>>, vector<2x8x32xf32>
    tpu.vector_store %arg33[%c0_382, %c0_383, %c0_384], %868 {strides = array<i32>} : memref<2x8x32xf32, #tpu.memory_space<vmem>>, vector<2x8x32xf32>,
    return
  }
}

</mosaic_0001>

<bundles_post_ra>
// kernel: model_forward.1
= control target key start
LH: loop header
LB: loop body
LE: loop exit
PB: predicated region body
PF: predicated region fallthrough
CT: control target
= control target key end

     0   :  { %s14146_s6 = smov 1   ;;  %s14147_s10 = smov 2   ;;  %s15564_s0 = inlined_call_operand.smem [shape: u32[34], index: -1, kind: input, shape index: {}] }
   0x1   :  { %s14203_s5 = sld [smem:[%s15564_s0]]   ;;  %s14148_s14 = smov 3  }
   0x2   :  { %s14208_s9 = sld [smem:[%s15564_s0 + %s14146_s6]]   ;;  %s14149_s18 = smov 4  }
   0x3   :  { %s14213_s13 = sld [smem:[%s15564_s0 + %s14147_s10]]   ;;  %s14150_s22 = smov 5  }
   0x4   :  { %s14218_s17 = sld [smem:[%s15564_s0 + %s14148_s14]]   ;;  %s14151_s26 = smov 6  }
   0x5   :  { %s14223_s21 = sld [smem:[%s15564_s0 + %s14149_s18]]   ;;  %s14152_s30 = smov 7  }
   0x6   :  { %s14228_s25 = sld [smem:[%s15564_s0 + %s14150_s22]]   ;;  %s14153_s4 = smov 8  }
   0x7   :  { %s14233_s29 = sld [smem:[%s15564_s0 + %s14151_s26]]   ;;  %s14154_s10 = smov 9  }
   0x8   :  { %s14238_s3 = sld [smem:[%s15564_s0 + %s14152_s30]]   ;;  %s14155_s15 = smov 10  }
   0x9   :  { %s14243_s8 = sld [smem:[%s15564_s0 + %s14153_s4]]   ;;  %s14156_s20 = smov 11  }
   0xa   :  { %s14248_s14 = sld [smem:[%s15564_s0 + %s14154_s10]]   ;;  %s14157_s26 = smov 12  }
   0xb   :  { %s14253_s19 = sld [smem:[%s15564_s0 + %s14155_s15]]   ;;  %s14158_s1 = smov 13  }
   0xc   :  { %s14258_s24 = sld [smem:[%s15564_s0 + %s14156_s20]]   ;;  %s14159_s7 = smov 14  }
   0xd   :  { %s14263_s30 = sld [smem:[%s15564_s0 + %s14157_s26]]   ;;  %s14160_s15 = smov 15  }
   0xe   :  { %s14268_s6 = sld [smem:[%s15564_s0 + %s14158_s1]]   ;;  %s14161_s22 = smov 16  }
   0xf   :  { %s14273_s12 = sld [smem:[%s15564_s0 + %s14159_s7]]   ;;  %s14162_s28 = smov 17  }
  0x10   :  { %s14278_s20 = sld [smem:[%s15564_s0 + %s14160_s15]]   ;;  %s14163_s7 = smov 18  }
  0x11   :  { %s14283_s27 = sld [smem:[%s15564_s0 + %s14161_s22]]   ;;  %s14164_s15 = smov 19  }
  0x12   :  { %s14288_s4 = sld [smem:[%s15564_s0 + %s14162_s28]]   ;;  %s14165_s22 = smov 20  }
  0x13   :  { %s14166_s28 = smov 21  }
  0x15   :  { %15583 = sst [smem:[#allocation5_spill]] %s14273_s12 }
  0x16   :  { %15584 = sst [smem:[#allocation6_spill]] %s14278_s20 }
  0x17   :  { %15585 = sst [smem:[#allocation7_spill]] %s14283_s27 }
  0x18   :  { %15586 = sst [smem:[#allocation8_spill]] %s14288_s4 }
  0x19   :  { %s14293_s12 = sld [smem:[%s15564_s0 + %s14163_s7]]   ;;  %s14167_s7 = smov 22  }
  0x1a   :  { %s14298_s20 = sld [smem:[%s15564_s0 + %s14164_s15]]   ;;  %s14168_s15 = smov 23  }
  0x1b   :  { %s14303_s27 = sld [smem:[%s15564_s0 + %s14165_s22]]   ;;  %s14169_s22 = smov 24  }
  0x1c   :  { %s14308_s4 = sld [smem:[%s15564_s0 + %s14166_s28]]   ;;  %s14170_s28 = smov 25  }
  0x1f   :  { %15587 = sst [smem:[#allocation9_spill]] %s14293_s12 }
  0x20   :  { %15588 = sst [smem:[#allocation10_spill]] %s14298_s20 }
  0x21   :  { %15589 = sst [smem:[#allocation11_spill]] %s14303_s27 }
  0x22   :  { %15590 = sst [smem:[#allocation12_spill]] %s14308_s4 }
  0x23   :  { %s14313_s12 = sld [smem:[%s15564_s0 + %s14167_s7]]   ;;  %s14171_s7 = smov 26  }
  0x24   :  { %s14318_s20 = sld [smem:[%s15564_s0 + %s14168_s15]]   ;;  %s14172_s15 = smov 27  }
  0x25   :  { %s14323_s27 = sld [smem:[%s15564_s0 + %s14169_s22]]   ;;  %s14173_s22 = smov 28  }
  0x26   :  { %s14328_s4 = sld [smem:[%s15564_s0 + %s14170_s28]]   ;;  %s14174_s28 = smov 29  }
  0x29   :  { %15591 = sst [smem:[#allocation13_spill]] %s14313_s12 }
  0x2a   :  { %15592 = sst [smem:[#allocation14_spill]] %s14318_s20 }
  0x2b   :  { %15593 = sst [smem:[#allocation15_spill]] %s14323_s27 }
  0x2c   :  { %15594 = sst [smem:[#allocation16_spill]] %s14328_s4 }
  0x2d   :  { %s14333_s12 = sld [smem:[%s15564_s0 + %s14171_s7]]   ;;  %s14175_s7 = smov 30  }
  0x2e   :  { %s14338_s20 = sld [smem:[%s15564_s0 + %s14172_s15]]   ;;  %s14176_s15 = smov 31  }
  0x2f   :  { %s14343_s27 = sld [smem:[%s15564_s0 + %s14173_s22]]   ;;  %s14177_s22 = smov 32  }
  0x30   :  { %s14348_s4 = sld [smem:[%s15564_s0 + %s14174_s28]]   ;;  %s14178_s28 = smov 33  }
  0x33   :  { %15595 = sst [smem:[#allocation17_spill]] %s14333_s12 }
  0x34   :  { %15596 = sst [smem:[#allocation18_spill]] %s14338_s20 }
  0x35   :  { %15597 = sst [smem:[#allocation19_spill]] %s14343_s27 }
  0x36   :  { %15598 = sst [smem:[#allocation20_spill]] %s14348_s4 }
  0x37   :  { %s14353_s12 = sld [smem:[%s15564_s0 + %s14175_s7]]  }
  0x38   :  { %s14358_s20 = sld [smem:[%s15564_s0 + %s14176_s15]]  }
  0x39   :  { %s14363_s27 = sld [smem:[%s15564_s0 + %s14177_s22]]  }
  0x3a   :  { %s14368_s4 = sld [smem:[%s15564_s0 + %s14178_s28]]  }
  0x3b   :  { %v141_v0 = vld [vmem:[%s14208_s9] sm:$0xff]  ;;  %v142_v1 = vld [vmem:[%s14208_s9 + $0x8] sm:$0xff]  ;;  %v143_v2 = vld [vmem:[%s14208_s9 + $0x10] sm:$0xff]  ;;  %vm175_vm0 = vcmask 261120  }
  0x3c   :  { %v13645_v3 = vpack.c.bf16 %v142_v1, %v141_v0  ;;  %v144_v4 = vld [vmem:[%s14208_s9 + $0x18] sm:$0xff]  ;;  %v14375_v5 = vld [vmem:[%s14203_s5] sm:$0xff] }
  0x3d   :  { %v13649_v6 = vpack.c.bf16 %v144_v4, %v143_v2  ;;  %12845 = vmatprep.mubr.msk.f32.mxu1 %vm175_vm0, %v14375_v5 }
  0x3e   :  { %72 = vsyncpa [#allocation3], 0  ;;  %13646 = vmatprep.subr.bf16.mxu1 %v13645_v3  ;;  %v14380_v7 = vld [vmem:[%s14203_s5 + $0x8] sm:$0xff]  ;;  %v14179_v8 = vmov 0.0   ;;  %vm14180_vm1 = vmmov 0   ;;  %s14181_s0 = smov 96  }
  0x3f   :  { %13648 = vmatpush3.bf16.msra.mxu1 %v13645_v3  ;;  %12858 = vmatprep.subr.mxu0 %v14179_v8  ;;  %v12122_v9 = vld [vmem:[%s14213_s13] ss:$0 sm:$0xff]  ;;  %s14182_s5 = smov 64   ;;  %s14183_s7 = smov 120   ;;  %vm260_vm2 = vcmask 64512   ;;  %vm2052_vm3 = vcmask 523264  }
  0x40   :  { %13650 = vmatprep.subr.bf16.mxu1 %v13649_v6  ;;  %12860 = vmatprep.mubr.msk.f32.mxu0 %vm14180_vm1, %v14179_v8  ;;  %s14184_s10 = smov 88   ;;  %s14185_s11 = smov 80  }
  0x41   :  { %s14186_s15 = smov 56   ;;  %s14187_s16 = smov 112  }
  0x42   :  { %s14188_s18 = smov 48   ;;  %s14189_s22 = smov 72  }
  0x43   :  { %13652 = vmatpush3.bf16.msra.mxu1 %v13649_v6  ;;  %s14190_s23 = smov 104   ;;  %s15581_s26 = smov 40  }
  0x44   :  { %12848 = vmatprep.subr.mxu1 %v14179_v8  ;;  %s15611_s28 = sld [smem:[#allocation20_spill]]  ;;  %s15612_s1 = sld [smem:[#allocation16_spill]] }
  0x45   :  { %s15613_s2 = sld [smem:[#allocation17_spill]] }
  0x46   :  { %12846 = vmatmul.mubr.msk.f32.vlgmr.msra.gmra.mrb[0].mxu1 %vm175_vm0, %v14380_v7 }
  0x47   :  { %12850 = vmatprep.mubr.msk.f32.mxu1 %vm14180_vm1, %v14179_v8 }
 0x119   :  { %v12847_v10 = vpop.f32.mrb[0].mxu1 }
 0x11a   :  { %v248_v11 = vpop.f32.mrb[1].mxu1  ;;  %v14395_v13 = vadd.f32 %v12847_v10, %v12122_v9 }
 0x11b   :  { %v14391_v12 = vadd.f32 %v12122_v9, %v248_v11 }
 0x11d   :  { %258 = vrot.lane.b32.xlu0 %v14391_v12, %s14181_s0 }
 0x121   :  { %336 = vrot.lane.b32.xlu0 %v14395_v13, %s14181_s0 }
 0x125   :  { %510 = vrot.lane.b32.xlu0 %v14395_v13, %s14182_s5 }
 0x129   :  { %664 = vrot.lane.b32.xlu0 %v14395_v13, %s14183_s7 }
 0x18f   :  { %v259_v14 = vpop.permute.xlu0 %258 }
 0x190   :  { %12849 = vmatpush3.xpose.msk.msra.mxu1 %vm260_vm2, %v259_v14 }
 0x191   :  { %12853 = vmatprep.subr.mxu1 %v14179_v8 }
 0x193   :  { %12851 = vmatmul.mubr.msk.f32.vlgmr.msra.gmra.mrb[2].mxu1 %vm260_vm2, %v14391_v12  ;;  %v337_v15 = vpop.permute.xlu0 %336 }
 0x194   :  { %12854 = vmatpush3.xpose.msk.msra.mxu1 %vm260_vm2, %v337_v15  ;;  %12855 = vmatprep.mubr.msk.f32.mxu1 %vm14180_vm1, %v14179_v8 }
 0x195   :  { %12863 = vmatprep.subr.mxu1 %v14179_v8 }
 0x197   :  { %12856 = vmatmul.mubr.msk.f32.vlgmr.msra.gmra.mrb[4].mxu1 %vm260_vm2, %v14395_v13  ;;  %v511_v16 = vpop.permute.xlu0 %510 }
 0x198   :  { %12864 = vmatpush3.msra.mxu1 %v511_v16  ;;  %12865 = vmatprep.mubr.msk.f32.mxu1 %vm14180_vm1, %v14179_v8 }
 0x199   :  { %12873 = vmatprep.subr.mxu1 %v14179_v8 }
 0x19b   :  { %v665_v23 = vpop.permute.xlu0 %664 }
 0x266   :  { %v331_v17 = vpop.f32.mrb[2].mxu1 }
 0x267   :  { %v12852_v18 = vpop.f32.mrb[3].mxu1  ;;  %v412_v19 = vsel %vm260_vm2, %v331_v17, -inf }
 0x268   :  { %413 = vmax.xlane.f32.xlu0 %v412_v19  ;;  %v146_v18 = vld [vmem:[%s14218_s17] sm:$0xff] }
 0x26a   :  { %v408_v20 = vpop.f32.mrb[4].mxu1 }
 0x26b   :  { %v12857_v21 = vpop.f32.mrb[5].mxu1  ;;  %v415_v22 = vsel %vm260_vm2, %v408_v20, -inf }
 0x26c   :  { %416 = vmax.xlane.f32.xlu1 %v415_v22 }
 0x27e   :  { %434 = vrot.lane.b32.xlu0 %v14391_v12, %s14182_s5 }
 0x282   :  { %586 = vrot.lane.b32.xlu0 %v14391_v12, %s14183_s7 }
 0x2f5   :  { %v414_v24 = vpop.xlane.xlu0 %413 }
 0x2f6   :  { %v418_v31 = vsub.f32 %v331_v17, %v414_v24  ;;  %v147_v17 = vld [vmem:[%s14218_s17 + $0x8] sm:$0xff] }
 0x2f8   :  { %v420_v32 = vmul.f32 1.442695, %v418_v31 }
 0x2f9   :  { %v417_v25 = vpop.xlane.xlu1 %416  ;;  %v435_v26 = vpop.permute.xlu0 %434 }
 0x2fa   :  { %v419_v27 = vsub.f32 %v408_v20, %v417_v25  ;;  %12859 = vmatpush3.msra.mxu0 %v435_v26 }
 0x2fb   :  { %12868 = vmatprep.subr.mxu0 %v14179_v8 }
 0x2fc   :  { %v422_v28 = vmul.f32 1.442695, %v419_v27 }
 0x2fd   :  { %v587_v43 = vpop.permute.xlu0 %586 }
 0x2fe   :  { %13890 = vpow2.f32 %v422_v28 }
 0x2ff   :  { %13892 = vpow2.f32 %v420_v32 }
 0x308   :  { %v13891_v29 = vpop.eup %13890 }
 0x309   :  { %v427_v30 = vsel %vm260_vm2, %v13891_v29, 0.0  ;;  %v13893_v33 = vpop.eup %13892 }
 0x30a   :  { %428 = vadd.xlane.f32.xlu1 %v427_v30  ;;  %v424_v34 = vsel %vm260_vm2, %v13893_v33, 0.0 }
 0x31b   :  { %666 = vrot.lane.b32.xlu1 %v14395_v13, %s14184_s10 }
 0x33f   :  { %425 = vadd.xlane.f32.xlu1 %v424_v34 }
 0x350   :  { %588 = vrot.lane.b32.xlu1 %v14391_v12, %s14184_s10 }
 0x354   :  { %1080 = vrot.lane.b32.xlu1 %v14391_v12, %s14185_s11 }
 0x397   :  { %v429_v35 = vpop.xlane.xlu1 %428 }
 0x398   :  { %13894 = vrcp.f32 %v429_v35 }
 0x39b   :  { %v667_v38 = vpop.permute.xlu1 %666 }
 0x3a2   :  { %v13895_v36 = vpop.eup %13894 }
 0x3a3   :  { %v433_v37 = vmul.f32 %v13895_v36, %v13891_v29 }
 0x3a5   :  { %12866 = vmatmul.mubr.msk.f32.vlgmr.msra.gmra.mrb[6].mxu1 %vm260_vm2, %v433_v37 }
 0x3a6   :  { %12874 = vmatpush3.xpose.msk.msra.mxu1 %vm260_vm2, %v667_v38  ;;  %12875 = vmatprep.mubr.msk.f32.mxu1 %vm14180_vm1, %v14179_v8 }
 0x3a7   :  { %12883 = vmatprep.subr.mxu1 %v14179_v8 }
 0x3a9   :  { %12876 = vmatmul.mubr.msk.f32.vlgmr.msra.gmra.mrb[8].mxu1 %vm260_vm2, %v665_v23 }
 0x3aa   :  { %12885 = vmatprep.mubr.msk.f32.mxu1 %vm14180_vm1, %v14179_v8 }
 0x3cc   :  { %v426_v39 = vpop.xlane.xlu1 %425 }
 0x3cd   :  { %13896 = vrcp.f32 %v426_v39 }
 0x3d0   :  { %v589_v42 = vpop.permute.xlu1 %588 }
 0x3d4   :  { %v1081_v4 = vpop.permute.xlu1 %1080 }
 0x3d7   :  { %v13897_v40 = vpop.eup %13896 }
 0x3d8   :  { %v431_v41 = vmul.f32 %v13897_v40, %v13893_v33  ;;  %v148_v40 = vld [vmem:[%s14218_s17 + $0x10] sm:$0xff] }
 0x3da   :  { %12861 = vmatmul.mubr.msk.f32.vlgmr.msra.gmra.mrb[0].mxu0 %vm260_vm2, %v431_v41 }
 0x3db   :  { %12869 = vmatpush3.xpose.msk.msra.mxu0 %vm260_vm2, %v589_v42  ;;  %12870 = vmatprep.mubr.msk.f32.mxu0 %vm14180_vm1, %v14179_v8 }
 0x3dc   :  { %12878 = vmatprep.subr.mxu0 %v14179_v8 }
 0x3de   :  { %12871 = vmatmul.mubr.msk.f32.vlgmr.msra.gmra.mrb[2].mxu0 %vm260_vm2, %v587_v43 }
 0x3df   :  { %12880 = vmatprep.mubr.msk.f32.mxu0 %vm14180_vm1, %v14179_v8 }
 0x478   :  { %v14447_v44 = vpop.f32.mrb[6].mxu1 }
 0x479   :  { %v12867_v45 = vpop.f32.mrb[7].mxu1 }
 0x47c   :  { %v738_v46 = vpop.f32.mrb[8].mxu1 }
 0x47d   :  { %v12877_v47 = vpop.f32.mrb[9].mxu1  ;;  %v745_v48 = vsel %vm260_vm2, %v738_v46, -inf }
 0x47e   :  { %746 = vmax.xlane.f32.xlu0 %v745_v48 }
 0x494   :  { %840 = vrot.lane.b32.xlu0 %v14395_v13, %s14186_s15 }
 0x498   :  { %1078 = vrot.lane.b32.xlu0 %v14391_v12, %s14187_s16 }
 0x49c   :  { %1158 = vrot.lane.b32.xlu0 %v14395_v13, %s14185_s11 }
 0x4ad   :  { %v14456_v49 = vpop.f32.mrb[0].mxu0 }
 0x4ae   :  { %v12862_v50 = vpop.f32.mrb[1].mxu0 }
 0x4b1   :  { %v660_v51 = vpop.f32.mrb[2].mxu0 }
 0x4b2   :  { %v12872_v52 = vpop.f32.mrb[3].mxu0  ;;  %v742_v53 = vsel %vm260_vm2, %v660_v51, -inf }
 0x4bb   :  { %743 = vmax.xlane.f32.xlu0 %v742_v53 }
 0x4d1   :  { %764 = vrot.lane.b32.xlu0 %v14391_v12, %s14186_s15 }
 0x4d5   :  { %1256 = vrot.lane.b32.xlu0 %v14391_v12, %s14188_s18 }
 0x4d9   :  { %1493 = vrot.lane.b32.xlu0 %v14391_v12, %s14189_s22 }
 0x4dd   :  { %1571 = vrot.lane.b32.xlu0 %v14395_v13, %s14189_s22 }
 0x4e1   :  { %1491 = vrot.lane.b32.xlu0 %v14391_v12, %s14190_s23 }
 0x4e5   :  { %1569 = vrot.lane.b32.xlu0 %v14395_v13, %s14190_s23 }
 0x50b   :  { %v747_v54 = vpop.xlane.xlu0 %746 }
 0x50c   :  { %v749_v55 = vsub.f32 %v738_v46, %v747_v54 }
 0x50e   :  { %v752_v56 = vmul.f32 1.442695, %v749_v55 }
 0x50f   :  { %v841_v57 = vpop.permute.xlu0 %840 }
 0x510   :  { %13898 = vpow2.f32 %v752_v56  ;;  %12884 = vmatpush3.msra.mxu1 %v841_v57 }
 0x511   :  { %12898 = vmatprep.subr.mxu1 %v14179_v8 }
 0x513   :  { %v1079_v60 = vpop.permute.xlu0 %1078 }
 0x517   :  { %v1159_v61 = vpop.permute.xlu0 %1158 }
 0x51a   :  { %v13899_v58 = vpop.eup %13898 }
 0x51b   :  { %v757_v59 = vsel %vm260_vm2, %v13899_v58, 0.0 }
 0x51c   :  { %758 = vadd.xlane.f32.xlu1 %v757_v59 }
 0x52d   :  { %1156 = vrot.lane.b32.xlu1 %v14395_v13, %s14187_s16 }
 0x548   :  { %v744_v62 = vpop.xlane.xlu0 %743 }
 0x549   :  { %v748_v63 = vsub.f32 %v660_v51, %v744_v62 }
 0x54b   :  { %v750_v0 = vmul.f32 1.442695, %v748_v63 }
 0x54c   :  { %v765_v1 = vpop.permute.xlu0 %764 }
 0x54d   :  { %13900 = vpow2.f32 %v750_v0  ;;  %12879 = vmatpush3.msra.mxu0 %v765_v1 }
 0x54e   :  { %12888 = vmatprep.subr.mxu0 %v147_v17 }
 0x550   :  { %v1257_v29 = vpop.permute.xlu0 %1256 }
 0x557   :  { %v13901_v2 = vpop.eup %13900 }
 0x558   :  { %v754_v3 = vsel %vm260_vm2, %v13901_v2, 0.0 }
 0x559   :  { %755 = vadd.xlane.f32.xlu1 %v754_v3 }
 0x5a9   :  { %v759_v6 = vpop.xlane.xlu1 %758 }
 0x5aa   :  { %13902 = vrcp.f32 %v759_v6 }
 0x5ad   :  { %v1157_v11 = vpop.permute.xlu1 %1156 }
 0x5b4   :  { %v13903_v9 = vpop.eup %13902 }
 0x5b5   :  { %v763_v10 = vmul.f32 %v13903_v9, %v13899_v58 }
 0x5b7   :  { %12886 = vmatmul.mubr.msk.f32.vlgmr.msra.gmra.mrb[10].mxu1 %vm260_vm2, %v763_v10 }
 0x5b8   :  { %12899 = vmatpush3.xpose.msk.msra.mxu1 %vm260_vm2, %v1081_v4  ;;  %12900 = vmatprep.mubr.msk.f32.mxu1 %vm14180_vm1, %v14179_v8 }
 0x5b9   :  { %12903 = vmatprep.subr.mxu1 %v14179_v8 }
 0x5bb   :  { %12901 = vmatmul.mubr.msk.f32.vlgmr.msra.gmra.mrb[12].mxu1 %vm260_vm2, %v1079_v60 }
 0x5bc   :  { %12904 = vmatpush3.xpose.msk.msra.mxu1 %vm260_vm2, %v1159_v61  ;;  %12905 = vmatprep.mubr.msk.f32.mxu1 %vm14180_vm1, %v14179_v8 }
 0x5bd   :  { %12913 = vmatprep.subr.mxu1 %v14179_v8 }
 0x5bf   :  { %12906 = vmatmul.mubr.msk.f32.vlgmr.msra.gmra.mrb[14].mxu1 %vm260_vm2, %v1157_v11 }
 0x5c0   :  { %12915 = vmatprep.mubr.msk.f32.mxu1 %vm14180_vm1, %v14179_v8 }
 0x5e6   :  { %v756_v14 = vpop.xlane.xlu1 %755 }
 0x5e7   :  { %13904 = vrcp.f32 %v756_v14 }
 0x5f1   :  { %v13905_v15 = vpop.eup %13904 }
 0x5f2   :  { %v761_v16 = vmul.f32 %v13905_v15, %v13901_v2 }
 0x5f4   :  { %12881 = vmatmul.mubr.msk.f32.vlgmr.msra.gmra.mrb[4].mxu0 %vm260_vm2, %v761_v16 }
 0x5f5   :  { %12889 = vmatpush3.msra.mxu0 %v147_v17  ;;  %v149_v17 = vld [vmem:[%s14218_s17 + $0x18] sm:$0xff] }
 0x5f6   :  { %12893 = vmatprep.subr.mxu0 %v146_v18 }
 0x68a   :  { %v912_v19 = vpop.f32.mrb[10].mxu1 }
 0x68b   :  { %v12887_v20 = vpop.f32.mrb[11].mxu1 }
 0x68e   :  { %v1152_v21 = vpop.f32.mrb[12].mxu1 }
 0x68f   :  { %v12902_v22 = vpop.f32.mrb[13].mxu1  ;;  %v1234_v23 = vsel %vm260_vm2, %v1152_v21, -inf }
 0x690   :  { %1235 = vmax.xlane.f32.xlu1 %v1234_v23 }
 0x692   :  { %v1230_v24 = vpop.f32.mrb[14].mxu1 }
 0x693   :  { %v12907_v25 = vpop.f32.mrb[15].mxu1  ;;  %v1237_v26 = vsel %vm260_vm2, %v1230_v24, -inf }
 0x694   :  { %1238 = vmax.xlane.f32.xlu1 %v1237_v26 }
 0x6c7   :  { %v836_v27 = vpop.f32.mrb[4].mxu0 }
 0x6c8   :  { %v12882_v28 = vpop.f32.mrb[5].mxu0  ;;  %12890 = vmatprep.mubr.msk.f32.mxu0 %vm260_vm2, %v836_v27 }
 0x6c9   :  { %12891 = vmatmul.mubr.msk.f32.vlgmr.msra.gmra.mrb[6].mxu0 %vm260_vm2, %v912_v19 }
 0x6ca   :  { %12895 = vmatprep.mubr.msk.f32.mxu0 %vm260_vm2, %v14456_v49  ;;  %12894 = vmatpush3.msra.mxu0 %v146_v18 }
 0x6cb   :  { %12908 = vmatprep.subr.mxu0 %v14179_v8 }
 0x6d1   :  { %12896 = vmatmul.mubr.msk.f32.vlgmr.msra.gmra.mrb[6].mxu0 %vm260_vm2, %v14447_v44  ;;  %v1494_v44 = vpop.permute.xlu0 %1493 }
 0x6d2   :  { %12909 = vmatpush3.msra.mxu0 %v1257_v29  ;;  %12910 = vmatprep.mubr.msk.f32.mxu0 %vm14180_vm1, %v14179_v8 }
 0x6d3   :  { %12918 = vmatprep.subr.mxu0 %v148_v40 }
 0x6d5   :  { %v1572_v48 = vpop.permute.xlu0 %1571 }
 0x6d9   :  { %v1492_v50 = vpop.permute.xlu0 %1491 }
 0x6dd   :  { %v1570_v55 = vpop.permute.xlu0 %1569 }
 0x71d   :  { %v1236_v30 = vpop.xlane.xlu1 %1235 }
 0x71e   :  { %v1240_v31 = vsub.f32 %v1152_v21, %v1236_v30 }
 0x720   :  { %v1242_v32 = vmul.f32 1.442695, %v1240_v31 }
 0x721   :  { %v1239_v33 = vpop.xlane.xlu1 %1238 }
 0x722   :  { %13906 = vpow2.f32 %v1242_v32  ;;  %v1241_v34 = vsub.f32 %v1230_v24, %v1239_v33 }
 0x724   :  { %v1244_v35 = vmul.f32 1.442695, %v1241_v34 }
 0x726   :  { %13908 = vpow2.f32 %v1244_v35 }
 0x72c   :  { %v13907_v36 = vpop.eup %13906 }
 0x72d   :  { %v1246_v37 = vsel %vm260_vm2, %v13907_v36, 0.0 }
 0x72e   :  { %1247 = vadd.xlane.f32.xlu1 %v1246_v37 }
 0x730   :  { %v13909_v38 = vpop.eup %13908 }
 0x731   :  { %v1249_v39 = vsel %vm260_vm2, %v13909_v38, 0.0 }
 0x732   :  { %1250 = vadd.xlane.f32.xlu1 %v1249_v39 }
 0x743   :  { %1332 = vrot.lane.b32.xlu1 %v14395_v13, %s14188_s18 }
 0x7bb   :  { %v1248_v41 = vpop.xlane.xlu1 %1247 }
 0x7bc   :  { %13910 = vrcp.f32 %v1248_v41  ;;  %v153_v41 = vld [vmem:[%s14238_s3] sm:$0xff] }
 0x7bf   :  { %v1251_v42 = vpop.xlane.xlu1 %1250 }
 0x7c0   :  { %13912 = vrcp.f32 %v1251_v42  ;;  %v154_v42 = vld [vmem:[%s14238_s3 + $0x8] sm:$0xff] }
 0x7c3   :  { %v1333_v43 = vpop.permute.xlu1 %1332 }
 0x7c4   :  { %12914 = vmatpush3.msra.mxu1 %v1333_v43  ;;  %v155_v43 = vld [vmem:[%s14238_s3 + $0x10] sm:$0xff] }
 0x7c5   :  { %12923 = vmatprep.subr.mxu1 %v14179_v8 }
 0x7c6   :  { %v13911_v45 = vpop.eup %13910 }
 0x7c7   :  { %v1253_v46 = vmul.f32 %v13911_v45, %v13907_v36  ;;  %v156_v45 = vld [vmem:[%s14238_s3 + $0x18] sm:$0xff] }
 0x7c9   :  { %12911 = vmatmul.mubr.msk.f32.vlgmr.msra.gmra.mrb[8].mxu0 %vm260_vm2, %v1253_v46  ;;  %v13657_v46 = vpack.c.bf16 %v156_v45, %v155_v43 }
 0x7ca   :  { %v13913_v47 = vpop.eup %13912  ;;  %12919 = vmatpush3.msra.mxu0 %v148_v40 }
 0x7cb   :  { %v1255_v49 = vmul.f32 %v13913_v47, %v13909_v38  ;;  %12928 = vmatprep.subr.mxu0 %v14179_v8  ;;  %v158_v47 = vld [vmem:[%s14248_s14] sm:$0xff] }
 0x7cd   :  { %12916 = vmatmul.mubr.msk.f32.vlgmr.msra.gmra.mrb[16].mxu1 %vm260_vm2, %v1255_v49  ;;  %v160_v49 = vld [vmem:[%s14248_s14 + $0x10] sm:$0xff] }
 0x7ce   :  { %12924 = vmatpush3.xpose.msk.msra.mxu1 %vm260_vm2, %v1494_v44  ;;  %12925 = vmatprep.mubr.msk.f32.mxu1 %vm14180_vm1, %v14179_v8  ;;  %v13653_v44 = vpack.c.bf16 %v154_v42, %v153_v41  ;;  %v12171_v42 = vld [vmem:[%s14208_s9 + $0x38] sm:$0xff] }
 0x7cf   :  { %12933 = vmatprep.subr.mxu1 %v14179_v8 }
 0x7d1   :  { %12926 = vmatmul.mubr.msk.f32.vlgmr.msra.gmra.mrb[18].mxu1 %vm260_vm2, %v1492_v50 }
 0x7d2   :  { %12935 = vmatprep.mubr.msk.f32.mxu1 %vm14180_vm1, %v14179_v8 }
 0x89c   :  { %v1328_v51 = vpop.f32.mrb[8].mxu0 }
 0x89d   :  { %v12912_v52 = vpop.f32.mrb[9].mxu0  ;;  %12920 = vmatprep.mubr.msk.f32.mxu0 %vm260_vm2, %v1328_v51  ;;  %v161_v51 = vld [vmem:[%s14248_s14 + $0x18] sm:$0xff] }
 0x89e   :  { %v13665_v52 = vpack.c.bf16 %v161_v51, %v160_v49  ;;  %v12166_v51 = vld [vmem:[%s14258_s24] ss:$0 sm:$0xff] }
 0x8a0   :  { %v1404_v53 = vpop.f32.mrb[16].mxu1 }
 0x8a1   :  { %v12917_v54 = vpop.f32.mrb[17].mxu1  ;;  %12921 = vmatmul.mubr.msk.f32.vlgmr.msra.gmra.mrb[6].mxu0 %vm260_vm2, %v1404_v53  ;;  %v162_v53 = vld [vmem:[%s14248_s14 + $0x20] sm:$0xff] }
 0x8a2   :  { %12929 = vmatpush3.xpose.msk.msra.mxu0 %vm260_vm2, %v1572_v48  ;;  %12930 = vmatprep.mubr.msk.f32.mxu0 %vm14180_vm1, %v14179_v8  ;;  %v159_v48 = vld [vmem:[%s14248_s14 + $0x8] sm:$0xff] }
 0x8a3   :  { %12938 = vmatprep.subr.mxu0 %v14179_v8  ;;  %v13661_v50 = vpack.c.bf16 %v159_v48, %v158_v47  ;;  %v163_v54 = vld [vmem:[%s14248_s14 + $0x28] sm:$0xff] }
 0x8a4   :  { %v1565_v56 = vpop.f32.mrb[18].mxu1 }
 0x8a5   :  { %v12927_v57 = vpop.f32.mrb[19].mxu1  ;;  %12931 = vmatmul.mubr.msk.f32.vlgmr.msra.gmra.mrb[10].mxu0 %vm260_vm2, %v1570_v55  ;;  %v1647_v58 = vsel %vm260_vm2, %v1565_v56, -inf  ;;  %v13669_v55 = vpack.c.bf16 %v163_v54, %v162_v53 }
 0x8a6   :  { %1648 = vmax.xlane.f32.xlu1 %v1647_v58  ;;  %12940 = vmatprep.mubr.msk.f32.mxu0 %vm14180_vm1, %v14179_v8 }
 0x933   :  { %v1649_v59 = vpop.xlane.xlu1 %1648 }
 0x934   :  { %v1653_v60 = vsub.f32 %v1565_v56, %v1649_v59 }
 0x936   :  { %v1655_v61 = vmul.f32 1.442695, %v1653_v60 }
 0x938   :  { %13914 = vpow2.f32 %v1655_v61 }
 0x942   :  { %v13915_v1 = vpop.eup %13914 }
 0x943   :  { %v1659_v2 = vsel %vm260_vm2, %v13915_v1, 0.0 }
 0x978   :  { %v1643_v62 = vpop.f32.mrb[10].mxu0 }
 0x979   :  { %v12932_v63 = vpop.f32.mrb[11].mxu0  ;;  %v1650_v0 = vsel %vm260_vm2, %v1643_v62, -inf }
 0x97a   :  { %1651 = vmax.xlane.f32.xlu0 %v1650_v0  ;;  %v12158_v63 = vld [vmem:[%s14228_s25] ss:$0 sm:$0xff] }
 0x97e   :  { %1660 = vadd.xlane.f32.xlu0 %v1659_v2 }
 0x994   :  { %1669 = vrot.lane.b32.xlu0 %v14391_v12, %s15581_s26 }
 0xa07   :  { %v1652_v3 = vpop.xlane.xlu0 %1651 }
 0xa08   :  { %v1654_v4 = vsub.f32 %v1643_v62, %v1652_v3  ;;  %v12159_v3 = vld [vmem:[%s14233_s29] ss:$0 sm:$0xff] }
 0xa0a   :  { %v1657_v6 = vmul.f32 1.442695, %v1654_v4 }
 0xa0b   :  { %v1661_v9 = vpop.xlane.xlu0 %1660 }
 0xa0c   :  { %13916 = vpow2.f32 %v1657_v6 }
 0xa0d   :  { %13918 = vrcp.f32 %v1661_v9 }
 0xa0f   :  { %v1670_v10 = vpop.permute.xlu0 %1669 }
 0xa10   :  { %12934 = vmatpush3.msra.mxu1 %v1670_v10 }
 0xa11   :  { %13654 = vmatprep.subr.bf16.mxu1 %v13653_v44 }
 0xa16   :  { %v13917_v11 = vpop.eup %13916 }
 0xa17   :  { %v13919_v14 = vpop.eup %13918  ;;  %v1662_v15 = vsel %vm260_vm2, %v13917_v11, 0.0 }
 0xa18   :  { %1663 = vadd.xlane.f32.xlu1 %v1662_v15  ;;  %v1666_v16 = vmul.f32 %v13919_v14, %v13915_v1  ;;  %v165_v14 = vld [vmem:[%s14248_s14 + $0x38] sm:$0xff] }
 0xa1a   :  { %12936 = vmatmul.mubr.msk.f32.vlgmr.msra.gmra.mrb[20].mxu1 %vm260_vm2, %v1666_v16  ;;  %v12160_v16 = vld [vmem:[%s14243_s8] ss:$0 sm:$0xff] }
 0xa1b   :  { %13656 = vmatpush3.bf16.msra.mxu1 %v13653_v44 }
 0xa1c   :  { %13658 = vmatprep.subr.bf16.mxu1 %v13657_v46 }
 0xa1f   :  { %13660 = vmatpush3.bf16.msra.mxu1 %v13657_v46 }
 0xa29   :  { %1745 = vrot.lane.b32.xlu1 %v14395_v13, %s15581_s26  ;;  %v12157_v13 = vld [vmem:[%s14223_s21] ss:$0 sm:$0xff] }
 0xaa5   :  { %v1664_v12 = vpop.xlane.xlu1 %1663 }
 0xaa6   :  { %13920 = vrcp.f32 %v1664_v12 }
 0xaa9   :  { %v1746_v18 = vpop.permute.xlu1 %1745 }
 0xaaa   :  { %12939 = vmatpush3.msra.mxu0 %v1746_v18 }
 0xaab   :  { %12943 = vmatprep.subr.mxu0 %v149_v17 }
 0xab0   :  { %v13921_v19 = vpop.eup %13920 }
 0xab1   :  { %v1668_v20 = vmul.f32 %v13921_v19, %v13917_v11  ;;  %v164_v11 = vld [vmem:[%s14248_s14 + $0x30] sm:$0xff] }
 0xab2   :  { %v13673_v15 = vpack.c.bf16 %v165_v14, %v164_v11 }
 0xab3   :  { %12941 = vmatmul.mubr.msk.f32.vlgmr.msra.gmra.mrb[12].mxu0 %vm260_vm2, %v1668_v20 }
 0xab4   :  { %12944 = vmatpush3.msra.mxu0 %v149_v17 }
 0xab5   :  { %13662 = vmatprep.subr.bf16.mxu0 %v13661_v50 }
 0xaed   :  { %v1741_v21 = vpop.f32.mrb[20].mxu1 }
 0xaee   :  { %v12937_v22 = vpop.f32.mrb[21].mxu1  ;;  %12945 = vmatprep.mubr.msk.f32.mxu0 %vm260_vm2, %v1741_v21 }
 0xaef   :  { %v12163_v22 = vld [vmem:[%s14253_s19] ss:$0 sm:$0xff] }
 0xb86   :  { %v1817_v23 = vpop.f32.mrb[12].mxu0 }
 0xb87   :  { %v12942_v24 = vpop.f32.mrb[13].mxu0  ;;  %12946 = vmatmul.mubr.msk.f32.vlgmr.msra.gmra.mrb[6].mxu0 %vm260_vm2, %v1817_v23 }
 0xb88   :  { %13664 = vmatpush3.bf16.msra.mxu0 %v13661_v50 }
 0xb89   :  { %13666 = vmatprep.subr.bf16.mxu0 %v13665_v52 }
 0xb8c   :  { %13668 = vmatpush3.bf16.msra.mxu0 %v13665_v52 }
 0xb8d   :  { %13670 = vmatprep.subr.bf16.mxu0 %v13669_v55 }
 0xb90   :  { %13672 = vmatpush3.bf16.msra.mxu0 %v13669_v55  ;;  %v12167_v55 = vld [vmem:[%s14263_s30] ss:$0 sm:$0xff] }
 0xb91   :  { %13674 = vmatprep.subr.bf16.mxu0 %v13673_v15 }
 0xb94   :  { %13676 = vmatpush3.bf16.msra.mxu0 %v13673_v15 }
 0xb95   :  { %12999 = vmatprep.subr.mxu0 %v14179_v8 }
 0xc5a   :  { %v12947_v25 = vpop.f32.mrb[6].mxu0 }
 0xc5b   :  { %v1911_v26 = vadd.f32 %v12947_v25, %v12157_v13  ;;  %v1893_v27 = vpop.f32.mrb[7].mxu0 }
 0xc5c   :  { %v1910_v28 = vadd.f32 %v12157_v13, %v1893_v27 }
 0xc5d   :  { %v1913_v29 = vadd.f32 %v1911_v26, %v14380_v7 }
 0xc5e   :  { %v1912_v30 = vadd.f32 %v1910_v28, %v14375_v5 }
 0xc5f   :  { %v1917_v31 = vsel %vm175_vm0, %v1913_v29, 0.0 }
 0xc60   :  { %1918 = vadd.xlane.f32.xlu0 %v1917_v31  ;;  %v1914_v32 = vsel %vm175_vm0, %v1912_v30, 0.0 }
 0xc61   :  { %1915 = vadd.xlane.f32.xlu1 %v1914_v32 }
 0xced   :  { %v1919_v33 = vpop.xlane.xlu0 %1918 }
 0xcee   :  { %v1922_v34 = vmul.f32 0.03125, %v1919_v33  ;;  %v1916_v35 = vpop.xlane.xlu1 %1915 }
 0xcef   :  { %v1921_v36 = vmul.f32 0.03125, %v1916_v35 }
 0xcf0   :  { %v1924_v37 = vsub.f32 %v1913_v29, %v1922_v34 }
 0xcf1   :  { %v1923_v38 = vsub.f32 %v1912_v30, %v1921_v36 }
 0xcf2   :  { %v1926_v39 = vmul.f32 %v1924_v37, %v1924_v37 }
 0xcf3   :  { %v1925_v7 = vmul.f32 %v1923_v38, %v1923_v38 }
 0xcf4   :  { %v1930_v5 = vsel %vm175_vm0, %v1926_v39, 0.0 }
 0xcf5   :  { %1931 = vadd.xlane.f32.xlu1 %v1930_v5  ;;  %v1927_v40 = vsel %vm175_vm0, %v1925_v7, 0.0  ;;  %v12168_v7 = vld [vmem:[%s14208_s9 + $0x20] sm:$0xff]  ;;  %v12169_v5 = vld [vmem:[%s14208_s9 + $0x28] sm:$0xff] }
 0xcf6   :  { %1928 = vadd.xlane.f32.xlu0 %v1927_v40  ;;  %v12170_v40 = vld [vmem:[%s14208_s9 + $0x30] sm:$0xff]  ;;  %v13677_v41 = vpack.c.bf16 %v12169_v5, %v12168_v7  ;;  %s15599_s9 = sld [smem:[#allocation5_spill]] }
 0xcf7   :  { %v13681_v43 = vpack.c.bf16 %v12171_v42, %v12170_v40 }
 0xcf8   :  { %13678 = vmatprep.subr.bf16.mxu1 %v13677_v41 }
 0xd82   :  { %v1932_v56 = vpop.xlane.xlu1 %1931 }
 0xd83   :  { %v1934_v57 = vmul.f32 0.03125, %v1932_v56  ;;  %v1929_v58 = vpop.xlane.xlu0 %1928 }
 0xd84   :  { %v1933_v59 = vmul.f32 0.03125, %v1929_v58 }
 0xd85   :  { %v1936_v60 = vadd.f32 1e-05, %v1934_v57 }
 0xd86   :  { %v1935_v61 = vadd.f32 1e-05, %v1933_v59 }
 0xd87   :  { %13922 = vrsqrt.f32 %v1936_v60  ;;  %v12196_v60 = vld [vmem:[%s14213_s13 + $0x1] ss:$0 sm:$0xff]  ;;  %s15600_s13 = sld [smem:[#allocation6_spill]] }
 0xd88   :  { %13924 = vrsqrt.f32 %v1935_v61 }
 0xd91   :  { %v13923_v62 = vpop.eup %13922 }
 0xd92   :  { %v13925_v0 = vpop.eup %13924  ;;  %v1940_v1 = vmul.f32 %v13923_v62, %v1924_v37 }
 0xd93   :  { %v1939_v2 = vmul.f32 %v13925_v0, %v1923_v38 }
 0xd94   :  { %v1948_v4 = vmul.f32 %v12158_v63, %v1940_v1 }
 0xd95   :  { %v1947_v6 = vmul.f32 %v12158_v63, %v1939_v2 }
 0xd96   :  { %v1956_v10 = vadd.f32 %v12159_v3, %v1948_v4 }
 0xd97   :  { %v1955_v9 = vadd.f32 %v12159_v3, %v1947_v6 }
 0xd99   :  { %12956 = vmatprep.mubr.msk.f32.mxu1 %vm175_vm0, %v1955_v9 }
 0xd9a   :  { %12957 = vmatmul.mubr.msk.f32.vlgmr.msra.gmra.mrb[22].mxu1 %vm175_vm0, %v1956_v10 }
 0xd9b   :  { %13680 = vmatpush3.bf16.msra.mxu1 %v13677_v41 }
 0xd9c   :  { %13682 = vmatprep.subr.bf16.mxu1 %v13681_v43 }
 0xd9f   :  { %13684 = vmatpush3.bf16.msra.mxu1 %v13681_v43 }
 0xda0   :  { %12989 = vmatprep.subr.mxu1 %v14179_v8 }
 0xe6d   :  { %v12958_v12 = vpop.f32.mrb[22].mxu1 }
 0xe6e   :  { %v2041_v17 = vadd.f32 %v12958_v12, %v12160_v16  ;;  %v2035_v18 = vpop.f32.mrb[23].mxu1 }
 0xe6f   :  { %v2036_v19 = vadd.f32 %v12160_v16, %v2035_v18 }
 0xe70   :  { %v2045_v21 = vmax.f32 %v2041_v17, 0.0 }
 0xe71   :  { %v2044_v20 = vmax.f32 %v2036_v19, 0.0 }
 0xe73   :  { %12975 = vmatprep.mubr.msk.f32.mxu0 %vm2052_vm3, %v2044_v20 }
 0xe74   :  { %12976 = vmatmul.mubr.msk.f32.vlgmr.msra.gmra.mrb[14].mxu0 %vm2052_vm3, %v2045_v21 }
 0xe75   :  { %13001 = vmatprep.mubr.msk.f32.mxu0 %vm14180_vm1, %v14179_v8 }
 0xf47   :  { %v12977_v23 = vpop.f32.mrb[14].mxu0 }
 0xf48   :  { %v2131_v24 = vadd.f32 %v12977_v23, %v12163_v22  ;;  %v2125_v13 = vpop.f32.mrb[15].mxu0 }
 0xf49   :  { %v2126_v25 = vadd.f32 %v12163_v22, %v2125_v13 }
 0xf4a   :  { %v2135_v26 = vadd.f32 %v2131_v24, %v1956_v10 }
 0xf4b   :  { %v2134_v27 = vadd.f32 %v2126_v25, %v1955_v9 }
 0xf4c   :  { %v2139_v28 = vsel %vm175_vm0, %v2135_v26, 0.0 }
 0xf4d   :  { %2140 = vadd.xlane.f32.xlu1 %v2139_v28  ;;  %v2136_v29 = vsel %vm175_vm0, %v2134_v27, 0.0 }
 0xf4e   :  { %2137 = vadd.xlane.f32.xlu0 %v2136_v29 }
 0xfda   :  { %v2141_v30 = vpop.xlane.xlu1 %2140 }
 0xfdb   :  { %v2143_v31 = vmul.f32 0.03125, %v2141_v30  ;;  %v2138_v32 = vpop.xlane.xlu0 %2137 }
 0xfdc   :  { %v2142_v33 = vmul.f32 0.03125, %v2138_v32 }
 0xfdd   :  { %v2145_v34 = vsub.f32 %v2135_v26, %v2143_v31 }
 0xfde   :  { %v2144_v35 = vsub.f32 %v2134_v27, %v2142_v33 }
 0xfdf   :  { %v2147_v36 = vmul.f32 %v2145_v34, %v2145_v34 }
 0xfe0   :  { %v2146_v37 = vmul.f32 %v2144_v35, %v2144_v35 }
 0xfe1   :  { %v2151_v38 = vsel %vm175_vm0, %v2147_v36, 0.0 }
 0xfe2   :  { %2152 = vadd.xlane.f32.xlu1 %v2151_v38  ;;  %v2148_v39 = vsel %vm175_vm0, %v2146_v37, 0.0 }
 0xfe3   :  { %2149 = vadd.xlane.f32.xlu0 %v2148_v39 }
0x106f   :  { %v2153_v44 = vpop.xlane.xlu1 %2152 }
0x1070   :  { %v2155_v45 = vmul.f32 0.03125, %v2153_v44  ;;  %v2150_v46 = vpop.xlane.xlu0 %2149 }
0x1071   :  { %v2154_v47 = vmul.f32 0.03125, %v2150_v46 }
0x1072   :  { %v2157_v48 = vadd.f32 1e-05, %v2155_v45 }
0x1073   :  { %v2156_v49 = vadd.f32 1e-05, %v2154_v47 }
0x1074   :  { %13926 = vrsqrt.f32 %v2157_v48 }
0x1075   :  { %13928 = vrsqrt.f32 %v2156_v49 }
0x107e   :  { %v13927_v50 = vpop.eup %13926 }
0x107f   :  { %v13929_v52 = vpop.eup %13928  ;;  %v2161_v53 = vmul.f32 %v13927_v50, %v2145_v34 }
0x1080   :  { %v2160_v54 = vmul.f32 %v13929_v52, %v2144_v35 }
0x1081   :  { %v2169_v56 = vmul.f32 %v12166_v51, %v2161_v53 }
0x1082   :  { %v2168_v57 = vmul.f32 %v12166_v51, %v2160_v54 }
0x1083   :  { %v14584_v59 = vadd.f32 %v12167_v55, %v2169_v56 }
0x1084   :  { %v14582_v58 = vadd.f32 %v12167_v55, %v2168_v57 }
0x1086   :  { %12986 = vmatprep.mubr.msk.f32.mxu1 %vm175_vm0, %v14582_v58 }
0x1087   :  { %12987 = vmatmul.mubr.msk.f32.vlgmr.msra.gmra.mrb[24].mxu1 %vm175_vm0, %v14584_v59 }
0x1088   :  { %12991 = vmatprep.mubr.msk.f32.mxu1 %vm14180_vm1, %v14179_v8 }
0x115a   :  { %v12988_v61 = vpop.f32.mrb[24].mxu1 }
0x115b   :  { %v14593_v62 = vadd.f32 %v12988_v61, %v12196_v60  ;;  %v2296_v63 = vpop.f32.mrb[25].mxu1 }
0x115c   :  { %v14595_v0 = vadd.f32 %v12196_v60, %v2296_v63 }
0x115d   :  { %2383 = vrot.lane.b32.xlu1 %v14593_v62, %s14181_s0 }
0x115e   :  { %2306 = vrot.lane.b32.xlu0 %v14595_v0, %s14181_s0 }
0x11cf   :  { %v2384_v2 = vpop.permute.xlu1 %2383 }
0x11d0   :  { %v2307_v1 = vpop.permute.xlu0 %2306 }
0x11d1   :  { %12990 = vmatpush3.xpose.msk.msra.mxu1 %vm260_vm2, %v2307_v1 }
0x11d2   :  { %12994 = vmatprep.subr.mxu1 %v14179_v8 }
0x11d4   :  { %12992 = vmatmul.mubr.msk.f32.vlgmr.msra.gmra.mrb[26].mxu1 %vm260_vm2, %v14595_v0 }
0x11d5   :  { %12995 = vmatpush3.xpose.msk.msra.mxu1 %vm260_vm2, %v2384_v2  ;;  %12996 = vmatprep.mubr.msk.f32.mxu1 %vm14180_vm1, %v14179_v8 }
0x11d6   :  { %13004 = vmatprep.subr.mxu1 %v14179_v8 }
0x11d8   :  { %12997 = vmatmul.mubr.msk.f32.vlgmr.msra.gmra.mrb[28].mxu1 %vm260_vm2, %v14593_v62 }
0x11d9   :  { %13006 = vmatprep.mubr.msk.f32.mxu1 %vm14180_vm1, %v14179_v8 }
0x12a7   :  { %v2378_v3 = vpop.f32.mrb[26].mxu1 }
0x12a8   :  { %v12993_v4 = vpop.f32.mrb[27].mxu1  ;;  %v2459_v17 = vsel %vm260_vm2, %v2378_v3, -inf }
0x12ab   :  { %v2455_v6 = vpop.f32.mrb[28].mxu1 }
0x12ac   :  { %v12998_v9 = vpop.f32.mrb[29].mxu1  ;;  %v2462_v10 = vsel %vm260_vm2, %v2455_v6, -inf }
0x12ad   :  { %2463 = vmax.xlane.f32.xlu1 %v2462_v10 }
0x12be   :  { %2713 = vrot.lane.b32.xlu1 %v14593_v62, %s14184_s10 }
0x12c2   :  { %2711 = vrot.lane.b32.xlu1 %v14593_v62, %s14183_s7 }
0x133a   :  { %v2464_v11 = vpop.xlane.xlu1 %2463 }
0x133b   :  { %v2466_v14 = vsub.f32 %v2455_v6, %v2464_v11 }
0x133d   :  { %v2469_v15 = vmul.f32 1.442695, %v2466_v14 }
0x133e   :  { %v2714_v21 = vpop.permute.xlu1 %2713 }
0x133f   :  { %13930 = vpow2.f32 %v2469_v15 }
0x1342   :  { %v2712_v23 = vpop.permute.xlu1 %2711 }
0x1349   :  { %v13931_v16 = vpop.eup %13930 }
0x134a   :  { %v2474_v12 = vsel %vm260_vm2, %v13931_v16, 0.0 }
0x134b   :  { %2475 = vadd.xlane.f32.xlu0 %v2474_v12  ;;  %v12174_v12 = vld [vmem:[%s14218_s17 + $0x28] sm:$0xff] }
0x1361   :  { %2557 = vrot.lane.b32.xlu0 %v14593_v62, %s14182_s5 }
0x1380   :  { %2460 = vmax.xlane.f32.xlu0 %v2459_v17  ;;  %v12173_v17 = vld [vmem:[%s14218_s17 + $0x20] sm:$0xff] }
0x1396   :  { %2481 = vrot.lane.b32.xlu0 %v14595_v0, %s14182_s5 }
0x139a   :  { %2633 = vrot.lane.b32.xlu0 %v14595_v0, %s14183_s7 }
0x13d8   :  { %v2476_v18 = vpop.xlane.xlu0 %2475 }
0x13d9   :  { %13932 = vrcp.f32 %v2476_v18 }
0x13dc   :  { %v2558_v19 = vpop.permute.xlu0 %2557 }
0x13dd   :  { %13005 = vmatpush3.msra.mxu1 %v2558_v19 }
0x13de   :  { %13014 = vmatprep.subr.mxu1 %v14179_v8 }
0x13e3   :  { %v13933_v20 = vpop.eup %13932 }
0x13e4   :  { %v2480_v22 = vmul.f32 %v13933_v20, %v13931_v16 }
0x13e6   :  { %13007 = vmatmul.mubr.msk.f32.vlgmr.msra.gmra.mrb[30].mxu1 %vm260_vm2, %v2480_v22 }
0x13e7   :  { %13015 = vmatpush3.xpose.msk.msra.mxu1 %vm260_vm2, %v2714_v21  ;;  %13016 = vmatprep.mubr.msk.f32.mxu1 %vm14180_vm1, %v14179_v8 }
0x13e8   :  { %13024 = vmatprep.subr.mxu1 %v14179_v8 }
0x13ea   :  { %13017 = vmatmul.mubr.msk.f32.vlgmr.msra.gmra.mrb[32].mxu1 %vm260_vm2, %v2712_v23 }
0x13eb   :  { %13026 = vmatprep.mubr.msk.f32.mxu1 %vm14180_vm1, %v14179_v8 }
0x140d   :  { %v2461_v24 = vpop.xlane.xlu0 %2460 }
0x140e   :  { %v2465_v13 = vsub.f32 %v2378_v3, %v2461_v24 }
0x1410   :  { %v2467_v25 = vmul.f32 1.442695, %v2465_v13 }
0x1411   :  { %v2482_v26 = vpop.permute.xlu0 %2481 }
0x1412   :  { %13934 = vpow2.f32 %v2467_v25  ;;  %13000 = vmatpush3.msra.mxu0 %v2482_v26 }
0x1413   :  { %13009 = vmatprep.subr.mxu0 %v14179_v8 }
0x1415   :  { %v2634_v35 = vpop.permute.xlu0 %2633 }
0x141c   :  { %v13935_v27 = vpop.eup %13934 }
0x141d   :  { %v2471_v28 = vsel %vm260_vm2, %v13935_v27, 0.0 }
0x141e   :  { %2472 = vadd.xlane.f32.xlu1 %v2471_v28 }
0x142f   :  { %2635 = vrot.lane.b32.xlu1 %v14595_v0, %s14184_s10 }
0x14ab   :  { %v2473_v29 = vpop.xlane.xlu1 %2472 }
0x14ac   :  { %13936 = vrcp.f32 %v2473_v29  ;;  %v12175_v29 = vld [vmem:[%s14218_s17 + $0x30] sm:$0xff] }
0x14af   :  { %v2636_v32 = vpop.permute.xlu1 %2635 }
0x14b6   :  { %v13937_v30 = vpop.eup %13936 }
0x14b7   :  { %v2478_v31 = vmul.f32 %v13937_v30, %v13935_v27 }
0x14b9   :  { %13002 = vmatmul.mubr.msk.f32.vlgmr.msra.gmra.mrb[16].mxu0 %vm260_vm2, %v2478_v31  ;;  %v14640_v33 = vpop.f32.mrb[30].mxu1 }
0x14ba   :  { %13010 = vmatpush3.xpose.msk.msra.mxu0 %vm260_vm2, %v2636_v32  ;;  %v13008_v34 = vpop.f32.mrb[31].mxu1  ;;  %13011 = vmatprep.mubr.msk.f32.mxu0 %vm14180_vm1, %v14179_v8 }
0x14bb   :  { %13019 = vmatprep.subr.mxu0 %v14179_v8 }
0x14bd   :  { %13012 = vmatmul.mubr.msk.f32.vlgmr.msra.gmra.mrb[18].mxu0 %vm260_vm2, %v2634_v35  ;;  %v2785_v36 = vpop.f32.mrb[32].mxu1 }
0x14be   :  { %v13018_v37 = vpop.f32.mrb[33].mxu1  ;;  %v2792_v38 = vsel %vm260_vm2, %v2785_v36, -inf  ;;  %13021 = vmatprep.mubr.msk.f32.mxu0 %vm14180_vm1, %v14179_v8 }
0x14bf   :  { %2793 = vmax.xlane.f32.xlu1 %v2792_v38 }
0x14d0   :  { %3127 = vrot.lane.b32.xlu1 %v14595_v0, %s14185_s11 }
0x14d4   :  { %3125 = vrot.lane.b32.xlu1 %v14595_v0, %s14187_s16 }
0x14d8   :  { %3203 = vrot.lane.b32.xlu1 %v14593_v62, %s14187_s16 }
0x154c   :  { %v2794_v39 = vpop.xlane.xlu1 %2793 }
0x154d   :  { %v2796_v7 = vsub.f32 %v2785_v36, %v2794_v39 }
0x154f   :  { %v2799_v5 = vmul.f32 1.442695, %v2796_v7 }
0x1550   :  { %v3128_v49 = vpop.permute.xlu1 %3127 }
0x1551   :  { %13938 = vpow2.f32 %v2799_v5 }
0x1554   :  { %v3126_v52 = vpop.permute.xlu1 %3125 }
0x1558   :  { %v3204_v54 = vpop.permute.xlu1 %3203 }
0x155b   :  { %v13939_v40 = vpop.eup %13938 }
0x155c   :  { %v2804_v41 = vsel %vm260_vm2, %v13939_v40, 0.0 }
0x155d   :  { %2805 = vadd.xlane.f32.xlu0 %v2804_v41 }
0x1573   :  { %2887 = vrot.lane.b32.xlu0 %v14593_v62, %s14186_s15 }
0x1577   :  { %3205 = vrot.lane.b32.xlu0 %v14593_v62, %s14185_s11 }
0x158c   :  { %v14661_v42 = vpop.f32.mrb[16].mxu0 }
0x158d   :  { %v13003_v43 = vpop.f32.mrb[17].mxu0 }
0x1590   :  { %v2707_v44 = vpop.f32.mrb[18].mxu0 }
0x1591   :  { %v13013_v45 = vpop.f32.mrb[19].mxu0  ;;  %v2789_v46 = vsel %vm260_vm2, %v2707_v44, -inf }
0x1596   :  { %2790 = vmax.xlane.f32.xlu0 %v2789_v46 }
0x15ac   :  { %2811 = vrot.lane.b32.xlu0 %v14595_v0, %s14186_s15 }
0x15b0   :  { %3303 = vrot.lane.b32.xlu0 %v14595_v0, %s14188_s18 }
0x15b4   :  { %3540 = vrot.lane.b32.xlu0 %v14595_v0, %s14189_s22 }
0x15b8   :  { %3618 = vrot.lane.b32.xlu0 %v14593_v62, %s14189_s22 }
0x15bc   :  { %3538 = vrot.lane.b32.xlu0 %v14595_v0, %s14190_s23 }
0x15c0   :  { %3616 = vrot.lane.b32.xlu0 %v14593_v62, %s14190_s23 }
0x15ea   :  { %v2806_v47 = vpop.xlane.xlu0 %2805 }
0x15eb   :  { %13940 = vrcp.f32 %v2806_v47 }
0x15ee   :  { %v2888_v48 = vpop.permute.xlu0 %2887 }
0x15ef   :  { %13025 = vmatpush3.msra.mxu1 %v2888_v48 }
0x15f0   :  { %13039 = vmatprep.subr.mxu1 %v14179_v8 }
0x15f2   :  { %v3206_v53 = vpop.permute.xlu0 %3205 }
0x15f5   :  { %v13941_v50 = vpop.eup %13940 }
0x15f6   :  { %v2810_v51 = vmul.f32 %v13941_v50, %v13939_v40 }
0x15f8   :  { %13027 = vmatmul.mubr.msk.f32.vlgmr.msra.gmra.mrb[34].mxu1 %vm260_vm2, %v2810_v51 }
0x15f9   :  { %13040 = vmatpush3.xpose.msk.msra.mxu1 %vm260_vm2, %v3128_v49  ;;  %13041 = vmatprep.mubr.msk.f32.mxu1 %vm14180_vm1, %v14179_v8 }
0x15fa   :  { %13044 = vmatprep.subr.mxu1 %v14179_v8 }
0x15fc   :  { %13042 = vmatmul.mubr.msk.f32.vlgmr.msra.gmra.mrb[36].mxu1 %vm260_vm2, %v3126_v52 }
0x15fd   :  { %13045 = vmatpush3.xpose.msk.msra.mxu1 %vm260_vm2, %v3206_v53  ;;  %13046 = vmatprep.mubr.msk.f32.mxu1 %vm14180_vm1, %v14179_v8 }
0x15fe   :  { %13054 = vmatprep.subr.mxu1 %v14179_v8 }
0x1600   :  { %13047 = vmatmul.mubr.msk.f32.vlgmr.msra.gmra.mrb[38].mxu1 %vm260_vm2, %v3204_v54 }
0x1601   :  { %13056 = vmatprep.mubr.msk.f32.mxu1 %vm14180_vm1, %v14179_v8 }
0x1623   :  { %v2791_v55 = vpop.xlane.xlu0 %2790 }
0x1624   :  { %v2795_v56 = vsub.f32 %v2707_v44, %v2791_v55 }
0x1626   :  { %v2797_v57 = vmul.f32 1.442695, %v2795_v56 }
0x1627   :  { %v2812_v60 = vpop.permute.xlu0 %2811 }
0x1628   :  { %13942 = vpow2.f32 %v2797_v57  ;;  %13020 = vmatpush3.msra.mxu0 %v2812_v60 }
0x1629   :  { %13029 = vmatprep.subr.mxu0 %v12174_v12 }
0x162b   :  { %v3304_v30 = vpop.permute.xlu0 %3303 }
0x162f   :  { %v3541_v35 = vpop.permute.xlu0 %3540 }
0x1632   :  { %v13943_v61 = vpop.eup %13942 }
0x1633   :  { %v2801_v63 = vsel %vm260_vm2, %v13943_v61, 0.0 }
0x1634   :  { %2802 = vadd.xlane.f32.xlu1 %v2801_v63 }
0x16c1   :  { %v2803_v1 = vpop.xlane.xlu1 %2802 }
0x16c2   :  { %13944 = vrcp.f32 %v2803_v1 }
0x16cb   :  { %v2959_v2 = vpop.f32.mrb[34].mxu1 }
0x16cc   :  { %v13945_v3 = vpop.eup %13944  ;;  %v13028_v4 = vpop.f32.mrb[35].mxu1 }
0x16cd   :  { %v2808_v6 = vmul.f32 %v13945_v3, %v13943_v61  ;;  %v12176_v4 = vld [vmem:[%s14218_s17 + $0x38] sm:$0xff]  ;;  %s15601_s17 = sld [smem:[#allocation12_spill]] }
0x16cf   :  { %13022 = vmatmul.mubr.msk.f32.vlgmr.msra.gmra.mrb[20].mxu0 %vm260_vm2, %v2808_v6  ;;  %v3199_v9 = vpop.f32.mrb[36].mxu1 }
0x16d0   :  { %v13043_v10 = vpop.f32.mrb[37].mxu1  ;;  %v3281_v11 = vsel %vm260_vm2, %v3199_v9, -inf  ;;  %13030 = vmatpush3.msra.mxu0 %v12174_v12 }
0x16d1   :  { %3282 = vmax.xlane.f32.xlu1 %v3281_v11  ;;  %13034 = vmatprep.subr.mxu0 %v12173_v17 }
0x16d3   :  { %v3277_v14 = vpop.f32.mrb[38].mxu1 }
0x16d4   :  { %v13048_v15 = vpop.f32.mrb[39].mxu1  ;;  %v3284_v16 = vsel %vm260_vm2, %v3277_v14, -inf }
0x16d5   :  { %3285 = vmax.xlane.f32.xlu1 %v3284_v16 }
0x175e   :  { %v3283_v18 = vpop.xlane.xlu1 %3282 }
0x175f   :  { %v3287_v19 = vsub.f32 %v3199_v9, %v3283_v18 }
0x1761   :  { %v3289_v20 = vmul.f32 1.442695, %v3287_v19 }
0x1762   :  { %v3286_v21 = vpop.xlane.xlu1 %3285 }
0x1763   :  { %13946 = vpow2.f32 %v3289_v20  ;;  %v3288_v22 = vsub.f32 %v3277_v14, %v3286_v21 }
0x1765   :  { %v3291_v23 = vmul.f32 1.442695, %v3288_v22 }
0x1767   :  { %13948 = vpow2.f32 %v3291_v23 }
0x176d   :  { %v13947_v24 = vpop.eup %13946 }
0x176e   :  { %v3293_v13 = vsel %vm260_vm2, %v13947_v24, 0.0 }
0x176f   :  { %3294 = vadd.xlane.f32.xlu1 %v3293_v13 }
0x1771   :  { %v13949_v25 = vpop.eup %13948 }
0x1772   :  { %v3296_v26 = vsel %vm260_vm2, %v13949_v25, 0.0 }
0x1773   :  { %3297 = vadd.xlane.f32.xlu1 %v3296_v26 }
0x1784   :  { %3379 = vrot.lane.b32.xlu1 %v14593_v62, %s14188_s18 }
0x17a2   :  { %v2883_v27 = vpop.f32.mrb[20].mxu0 }
0x17a3   :  { %v13023_v28 = vpop.f32.mrb[21].mxu0  ;;  %13031 = vmatprep.mubr.msk.f32.mxu0 %vm260_vm2, %v2883_v27 }
0x17a4   :  { %13032 = vmatmul.mubr.msk.f32.vlgmr.msra.gmra.mrb[22].mxu0 %vm260_vm2, %v2959_v2 }
0x17a5   :  { %13036 = vmatprep.mubr.msk.f32.mxu0 %vm260_vm2, %v14661_v42  ;;  %13035 = vmatpush3.msra.mxu0 %v12173_v17 }
0x17a6   :  { %13049 = vmatprep.subr.mxu0 %v14179_v8 }
0x17ac   :  { %13037 = vmatmul.mubr.msk.f32.vlgmr.msra.gmra.mrb[22].mxu0 %vm260_vm2, %v14640_v33  ;;  %v3619_v33 = vpop.permute.xlu0 %3618 }
0x17ad   :  { %13050 = vmatpush3.msra.mxu0 %v3304_v30  ;;  %13051 = vmatprep.mubr.msk.f32.mxu0 %vm14180_vm1, %v14179_v8 }
0x17ae   :  { %13059 = vmatprep.subr.mxu0 %v12175_v29 }
0x17b0   :  { %v3539_v7 = vpop.permute.xlu0 %3538 }
0x17b4   :  { %v3617_v43 = vpop.permute.xlu0 %3616 }
0x17fc   :  { %v3295_v31 = vpop.xlane.xlu1 %3294 }
0x17fd   :  { %13950 = vrcp.f32 %v3295_v31  ;;  %v12180_v31 = vld [vmem:[%s14238_s3 + $0x20] sm:$0xff] }
0x1800   :  { %v3298_v32 = vpop.xlane.xlu1 %3297 }
0x1801   :  { %13952 = vrcp.f32 %v3298_v32  ;;  %v12181_v32 = vld [vmem:[%s14238_s3 + $0x28] sm:$0xff] }
0x1804   :  { %v3380_v34 = vpop.permute.xlu1 %3379 }
0x1805   :  { %13055 = vmatpush3.msra.mxu1 %v3380_v34  ;;  %v12182_v34 = vld [vmem:[%s14238_s3 + $0x30] sm:$0xff] }
0x1806   :  { %13064 = vmatprep.subr.mxu1 %v14179_v8 }
0x1807   :  { %v13951_v36 = vpop.eup %13950 }
0x1808   :  { %v3300_v37 = vmul.f32 %v13951_v36, %v13947_v24  ;;  %v12183_v36 = vld [vmem:[%s14238_s3 + $0x38] sm:$0xff]  ;;  %s15605_s3 = sld [smem:[#allocation8_spill]] }
0x180a   :  { %13052 = vmatmul.mubr.msk.f32.vlgmr.msra.gmra.mrb[24].mxu0 %vm260_vm2, %v3300_v37  ;;  %v13689_v37 = vpack.c.bf16 %v12183_v36, %v12182_v34 }
0x180b   :  { %v13953_v38 = vpop.eup %13952  ;;  %13060 = vmatpush3.msra.mxu0 %v12175_v29 }
0x180c   :  { %v3302_v39 = vmul.f32 %v13953_v38, %v13949_v25  ;;  %13069 = vmatprep.subr.mxu0 %v14179_v8  ;;  %v12185_v38 = vld [vmem:[%s14248_s14 + $0x40] sm:$0xff] }
0x180e   :  { %13057 = vmatmul.mubr.msk.f32.vlgmr.msra.gmra.mrb[40].mxu1 %vm260_vm2, %v3302_v39  ;;  %v12187_v39 = vld [vmem:[%s14248_s14 + $0x50] sm:$0xff] }
0x180f   :  { %13065 = vmatpush3.xpose.msk.msra.mxu1 %vm260_vm2, %v3541_v35  ;;  %13066 = vmatprep.mubr.msk.f32.mxu1 %vm14180_vm1, %v14179_v8  ;;  %v13685_v35 = vpack.c.bf16 %v12181_v32, %v12180_v31  ;;  %v4226_v32 = vld [vmem:[%s14268_s6 + $0x18] sm:$0xff] }
0x1810   :  { %13074 = vmatprep.subr.mxu1 %v14179_v8 }
0x1812   :  { %13067 = vmatmul.mubr.msk.f32.vlgmr.msra.gmra.mrb[42].mxu1 %vm260_vm2, %v3539_v7 }
0x1813   :  { %13076 = vmatprep.mubr.msk.f32.mxu1 %vm14180_vm1, %v14179_v8 }
0x18dd   :  { %v3375_v5 = vpop.f32.mrb[24].mxu0 }
0x18de   :  { %v13053_v40 = vpop.f32.mrb[25].mxu0  ;;  %13061 = vmatprep.mubr.msk.f32.mxu0 %vm260_vm2, %v3375_v5  ;;  %v12188_v5 = vld [vmem:[%s14248_s14 + $0x58] sm:$0xff] }
0x18df   :  { %v13697_v40 = vpack.c.bf16 %v12188_v5, %v12187_v39  ;;  %v12240_v5 = vld [vmem:[%s14258_s24 + $0x1] ss:$0 sm:$0xff]  ;;  %s15609_s24 = sld [smem:[#allocation15_spill]] }
0x18e1   :  { %v3451_v41 = vpop.f32.mrb[40].mxu1 }
0x18e2   :  { %v13058_v42 = vpop.f32.mrb[41].mxu1  ;;  %13062 = vmatmul.mubr.msk.f32.vlgmr.msra.gmra.mrb[22].mxu0 %vm260_vm2, %v3451_v41  ;;  %v12189_v41 = vld [vmem:[%s14248_s14 + $0x60] sm:$0xff] }
0x18e3   :  { %13070 = vmatpush3.xpose.msk.msra.mxu0 %vm260_vm2, %v3619_v33  ;;  %13071 = vmatprep.mubr.msk.f32.mxu0 %vm14180_vm1, %v14179_v8  ;;  %v12186_v33 = vld [vmem:[%s14248_s14 + $0x48] sm:$0xff] }
0x18e4   :  { %13079 = vmatprep.subr.mxu0 %v14179_v8  ;;  %v13693_v7 = vpack.c.bf16 %v12186_v33, %v12185_v38  ;;  %v12190_v42 = vld [vmem:[%s14248_s14 + $0x68] sm:$0xff] }
0x18e5   :  { %v3612_v44 = vpop.f32.mrb[42].mxu1 }
0x18e6   :  { %v13068_v45 = vpop.f32.mrb[43].mxu1  ;;  %13072 = vmatmul.mubr.msk.f32.vlgmr.msra.gmra.mrb[26].mxu0 %vm260_vm2, %v3617_v43  ;;  %v3694_v46 = vsel %vm260_vm2, %v3612_v44, -inf  ;;  %v13701_v43 = vpack.c.bf16 %v12190_v42, %v12189_v41 }
0x18e7   :  { %3695 = vmax.xlane.f32.xlu1 %v3694_v46  ;;  %13081 = vmatprep.mubr.msk.f32.mxu0 %vm14180_vm1, %v14179_v8 }
0x1974   :  { %v3696_v47 = vpop.xlane.xlu1 %3695 }
0x1975   :  { %v3700_v48 = vsub.f32 %v3612_v44, %v3696_v47 }
0x1977   :  { %v3702_v49 = vmul.f32 1.442695, %v3700_v48 }
0x1979   :  { %13954 = vpow2.f32 %v3702_v49 }
0x1983   :  { %v13955_v53 = vpop.eup %13954 }
0x1984   :  { %v3706_v54 = vsel %vm260_vm2, %v13955_v53, 0.0 }
0x19b9   :  { %v3690_v50 = vpop.f32.mrb[26].mxu0 }
0x19ba   :  { %v13073_v51 = vpop.f32.mrb[27].mxu0  ;;  %v3697_v52 = vsel %vm260_vm2, %v3690_v50, -inf }
0x19bb   :  { %3698 = vmax.xlane.f32.xlu0 %v3697_v52  ;;  %v12232_v51 = vld [vmem:[%s14228_s25 + $0x1] ss:$0 sm:$0xff]  ;;  %s15603_s25 = sld [smem:[#allocation13_spill]] }
0x19bf   :  { %3707 = vadd.xlane.f32.xlu0 %v3706_v54 }
0x19d5   :  { %3716 = vrot.lane.b32.xlu0 %v14595_v0, %s15581_s26 }
0x1a48   :  { %v3699_v55 = vpop.xlane.xlu0 %3698 }
0x1a49   :  { %v3701_v56 = vsub.f32 %v3690_v50, %v3699_v55  ;;  %v12233_v55 = vld [vmem:[%s14233_s29 + $0x1] ss:$0 sm:$0xff]  ;;  %s15604_s29 = sld [smem:[#allocation10_spill]] }
0x1a4b   :  { %v3704_v57 = vmul.f32 1.442695, %v3701_v56 }
0x1a4c   :  { %v3708_v60 = vpop.xlane.xlu0 %3707 }
0x1a4d   :  { %13956 = vpow2.f32 %v3704_v57 }
0x1a4e   :  { %13958 = vrcp.f32 %v3708_v60 }
0x1a50   :  { %v3717_v61 = vpop.permute.xlu0 %3716 }
0x1a51   :  { %13075 = vmatpush3.msra.mxu1 %v3717_v61 }
0x1a52   :  { %13686 = vmatprep.subr.bf16.mxu1 %v13685_v35 }
0x1a57   :  { %v13957_v63 = vpop.eup %13956 }
0x1a58   :  { %v13959_v1 = vpop.eup %13958  ;;  %v3709_v2 = vsel %vm260_vm2, %v13957_v63, 0.0 }
0x1a59   :  { %3710 = vadd.xlane.f32.xlu1 %v3709_v2  ;;  %v3713_v3 = vmul.f32 %v13959_v1, %v13955_v53  ;;  %v12192_v1 = vld [vmem:[%s14248_s14 + $0x78] sm:$0xff] }
0x1a5b   :  { %13077 = vmatmul.mubr.msk.f32.vlgmr.msra.gmra.mrb[44].mxu1 %vm260_vm2, %v3713_v3  ;;  %v12234_v3 = vld [vmem:[%s14243_s8 + $0x1] ss:$0 sm:$0xff]  ;;  %s15606_s8 = sld [smem:[#allocation9_spill]] }
0x1a5c   :  { %13688 = vmatpush3.bf16.msra.mxu1 %v13685_v35 }
0x1a5d   :  { %13690 = vmatprep.subr.bf16.mxu1 %v13689_v37 }
0x1a60   :  { %13692 = vmatpush3.bf16.msra.mxu1 %v13689_v37 }
0x1a6a   :  { %3792 = vrot.lane.b32.xlu1 %v14593_v62, %s15581_s26  ;;  %v12231_v62 = vld [vmem:[%s14223_s21 + $0x1] ss:$0 sm:$0xff]  ;;  %s15602_s21 = sld [smem:[#allocation7_spill]] }
0x1ae6   :  { %v3711_v0 = vpop.xlane.xlu1 %3710 }
0x1ae7   :  { %13960 = vrcp.f32 %v3711_v0 }
0x1aea   :  { %v3793_v6 = vpop.permute.xlu1 %3792 }
0x1aeb   :  { %13080 = vmatpush3.msra.mxu0 %v3793_v6 }
0x1aec   :  { %13084 = vmatprep.subr.mxu0 %v12176_v4 }
0x1af1   :  { %v13961_v9 = vpop.eup %13960 }
0x1af2   :  { %v3715_v10 = vmul.f32 %v13961_v9, %v13957_v63  ;;  %v12191_v63 = vld [vmem:[%s14248_s14 + $0x70] sm:$0xff]  ;;  %s15607_s14 = sld [smem:[#allocation11_spill]] }
0x1af3   :  { %v13705_v2 = vpack.c.bf16 %v12192_v1, %v12191_v63 }
0x1af4   :  { %13082 = vmatmul.mubr.msk.f32.vlgmr.msra.gmra.mrb[28].mxu0 %vm260_vm2, %v3715_v10 }
0x1af5   :  { %13085 = vmatpush3.msra.mxu0 %v12176_v4 }
0x1af6   :  { %13694 = vmatprep.subr.bf16.mxu0 %v13693_v7 }
0x1b2e   :  { %v3788_v11 = vpop.f32.mrb[44].mxu1 }
0x1b2f   :  { %v13078_v14 = vpop.f32.mrb[45].mxu1  ;;  %13086 = vmatprep.mubr.msk.f32.mxu0 %vm260_vm2, %v3788_v11 }
0x1b30   :  { %v12237_v14 = vld [vmem:[%s14253_s19 + $0x1] ss:$0 sm:$0xff]  ;;  %s15608_s19 = sld [smem:[#allocation14_spill]] }
0x1bc7   :  { %v3864_v15 = vpop.f32.mrb[28].mxu0 }
0x1bc8   :  { %v13083_v16 = vpop.f32.mrb[29].mxu0  ;;  %13087 = vmatmul.mubr.msk.f32.vlgmr.msra.gmra.mrb[22].mxu0 %vm260_vm2, %v3864_v15 }
0x1bc9   :  { %13696 = vmatpush3.bf16.msra.mxu0 %v13693_v7 }
0x1bca   :  { %13698 = vmatprep.subr.bf16.mxu0 %v13697_v40 }
0x1bcd   :  { %13700 = vmatpush3.bf16.msra.mxu0 %v13697_v40 }
0x1bce   :  { %13702 = vmatprep.subr.bf16.mxu0 %v13701_v43 }
0x1bd1   :  { %13704 = vmatpush3.bf16.msra.mxu0 %v13701_v43  ;;  %v12241_v43 = vld [vmem:[%s14263_s30 + $0x1] ss:$0 sm:$0xff]  ;;  %s15610_s30 = sld [smem:[#allocation18_spill]] }
0x1bd2   :  { %13706 = vmatprep.subr.bf16.mxu0 %v13705_v2 }
0x1bd5   :  { %13708 = vmatpush3.bf16.msra.mxu0 %v13705_v2 }
0x1bd6   :  { %13140 = vmatprep.subr.mxu0 %v14179_v8 }
0x1c9b   :  { %v13088_v12 = vpop.f32.mrb[22].mxu0 }
0x1c9c   :  { %v3958_v17 = vadd.f32 %v13088_v12, %v12231_v62  ;;  %v3940_v18 = vpop.f32.mrb[23].mxu0 }
0x1c9d   :  { %v3957_v19 = vadd.f32 %v12231_v62, %v3940_v18 }
0x1c9e   :  { %v3960_v20 = vadd.f32 %v3958_v17, %v14584_v59 }
0x1c9f   :  { %v3959_v21 = vadd.f32 %v3957_v19, %v14582_v58 }
0x1ca0   :  { %v3964_v22 = vsel %vm175_vm0, %v3960_v20, 0.0 }
0x1ca1   :  { %3965 = vadd.xlane.f32.xlu0 %v3964_v22  ;;  %v3961_v23 = vsel %vm175_vm0, %v3959_v21, 0.0 }
0x1ca2   :  { %3962 = vadd.xlane.f32.xlu1 %v3961_v23 }
0x1d2e   :  { %v3966_v24 = vpop.xlane.xlu0 %3965 }
0x1d2f   :  { %v3968_v13 = vmul.f32 0.03125, %v3966_v24  ;;  %v3963_v25 = vpop.xlane.xlu1 %3962 }
0x1d30   :  { %v3967_v26 = vmul.f32 0.03125, %v3963_v25 }
0x1d31   :  { %v3970_v27 = vsub.f32 %v3960_v20, %v3968_v13 }
0x1d32   :  { %v3969_v28 = vsub.f32 %v3959_v21, %v3967_v26 }
0x1d33   :  { %v3972_v29 = vmul.f32 %v3970_v27, %v3970_v27 }
0x1d34   :  { %v3971_v59 = vmul.f32 %v3969_v28, %v3969_v28 }
0x1d35   :  { %v3976_v58 = vsel %vm175_vm0, %v3972_v29, 0.0 }
0x1d36   :  { %3977 = vadd.xlane.f32.xlu1 %v3976_v58  ;;  %v3973_v30 = vsel %vm175_vm0, %v3971_v59, 0.0  ;;  %v4223_v59 = vld [vmem:[%s14268_s6] sm:$0xff]  ;;  %v4224_v58 = vld [vmem:[%s14268_s6 + $0x8] sm:$0xff] }
0x1d37   :  { %3974 = vadd.xlane.f32.xlu0 %v3973_v30  ;;  %v4225_v30 = vld [vmem:[%s14268_s6 + $0x10] sm:$0xff]  ;;  %v13709_v31 = vpack.c.bf16 %v4224_v58, %v4223_v59 }
0x1d38   :  { %v13713_v34 = vpack.c.bf16 %v4226_v32, %v4225_v30 }
0x1d39   :  { %13710 = vmatprep.subr.bf16.mxu1 %v13709_v31 }
0x1dc3   :  { %v3978_v44 = vpop.xlane.xlu1 %3977 }
0x1dc4   :  { %v3980_v45 = vmul.f32 0.03125, %v3978_v44  ;;  %v3975_v46 = vpop.xlane.xlu0 %3974 }
0x1dc5   :  { %v3979_v47 = vmul.f32 0.03125, %v3975_v46 }
0x1dc6   :  { %v3982_v48 = vadd.f32 1e-05, %v3980_v45 }
0x1dc7   :  { %v3981_v49 = vadd.f32 1e-05, %v3979_v47 }
0x1dc8   :  { %13962 = vrsqrt.f32 %v3982_v48  ;;  %v12242_v48 = vld [vmem:[%s15599_s9] ss:$0 sm:$0xff] }
0x1dc9   :  { %13964 = vrsqrt.f32 %v3981_v49 }
0x1dd2   :  { %v13963_v50 = vpop.eup %13962 }
0x1dd3   :  { %v13965_v52 = vpop.eup %13964  ;;  %v3986_v53 = vmul.f32 %v13963_v50, %v3970_v27 }
0x1dd4   :  { %v3985_v54 = vmul.f32 %v13965_v52, %v3969_v28 }
0x1dd5   :  { %v3994_v56 = vmul.f32 %v12232_v51, %v3986_v53 }
0x1dd6   :  { %v3993_v57 = vmul.f32 %v12232_v51, %v3985_v54 }
0x1dd7   :  { %v4002_v61 = vadd.f32 %v12233_v55, %v3994_v56 }
0x1dd8   :  { %v4001_v60 = vadd.f32 %v12233_v55, %v3993_v57 }
0x1dda   :  { %13097 = vmatprep.mubr.msk.f32.mxu1 %vm175_vm0, %v4001_v60 }
0x1ddb   :  { %13098 = vmatmul.mubr.msk.f32.vlgmr.msra.gmra.mrb[46].mxu1 %vm175_vm0, %v4002_v61 }
0x1ddc   :  { %13712 = vmatpush3.bf16.msra.mxu1 %v13709_v31 }
0x1ddd   :  { %13714 = vmatprep.subr.bf16.mxu1 %v13713_v34 }
0x1de0   :  { %13716 = vmatpush3.bf16.msra.mxu1 %v13713_v34 }
0x1de1   :  { %13130 = vmatprep.subr.mxu1 %v14179_v8 }
0x1eae   :  { %v13099_v0 = vpop.f32.mrb[46].mxu1 }
0x1eaf   :  { %v4087_v4 = vadd.f32 %v13099_v0, %v12234_v3  ;;  %v4081_v6 = vpop.f32.mrb[47].mxu1 }
0x1eb0   :  { %v4082_v9 = vadd.f32 %v12234_v3, %v4081_v6 }
0x1eb1   :  { %v4091_v11 = vmax.f32 %v4087_v4, 0.0 }
0x1eb2   :  { %v4090_v10 = vmax.f32 %v4082_v9, 0.0 }
0x1eb4   :  { %13116 = vmatprep.mubr.msk.f32.mxu0 %vm2052_vm3, %v4090_v10 }
0x1eb5   :  { %13117 = vmatmul.mubr.msk.f32.vlgmr.msra.gmra.mrb[30].mxu0 %vm2052_vm3, %v4091_v11 }
0x1eb6   :  { %13142 = vmatprep.mubr.msk.f32.mxu0 %vm14180_vm1, %v14179_v8 }
0x1f88   :  { %v13118_v15 = vpop.f32.mrb[30].mxu0 }
0x1f89   :  { %v4176_v16 = vadd.f32 %v13118_v15, %v12237_v14  ;;  %v4170_v62 = vpop.f32.mrb[31].mxu0 }
0x1f8a   :  { %v4171_v12 = vadd.f32 %v12237_v14, %v4170_v62 }
0x1f8b   :  { %v4180_v17 = vadd.f32 %v4176_v16, %v4002_v61 }
0x1f8c   :  { %v4179_v18 = vadd.f32 %v4171_v12, %v4001_v60 }
0x1f8d   :  { %v4184_v19 = vsel %vm175_vm0, %v4180_v17, 0.0 }
0x1f8e   :  { %4185 = vadd.xlane.f32.xlu1 %v4184_v19  ;;  %v4181_v20 = vsel %vm175_vm0, %v4179_v18, 0.0 }
0x1f8f   :  { %4182 = vadd.xlane.f32.xlu0 %v4181_v20 }
0x201b   :  { %v4186_v21 = vpop.xlane.xlu1 %4185 }
0x201c   :  { %v4188_v22 = vmul.f32 0.03125, %v4186_v21  ;;  %v4183_v23 = vpop.xlane.xlu0 %4182 }
0x201d   :  { %v4187_v24 = vmul.f32 0.03125, %v4183_v23 }
0x201e   :  { %v4190_v13 = vsub.f32 %v4180_v17, %v4188_v22 }
0x201f   :  { %v4189_v25 = vsub.f32 %v4179_v18, %v4187_v24 }
0x2020   :  { %v4192_v26 = vmul.f32 %v4190_v13, %v4190_v13 }
0x2021   :  { %v4191_v27 = vmul.f32 %v4189_v25, %v4189_v25 }
0x2022   :  { %v4196_v28 = vsel %vm175_vm0, %v4192_v26, 0.0 }
0x2023   :  { %4197 = vadd.xlane.f32.xlu1 %v4196_v28  ;;  %v4193_v29 = vsel %vm175_vm0, %v4191_v27, 0.0 }
0x2024   :  { %4194 = vadd.xlane.f32.xlu0 %v4193_v29 }
0x20b0   :  { %v4198_v35 = vpop.xlane.xlu1 %4197 }
0x20b1   :  { %v4200_v36 = vmul.f32 0.03125, %v4198_v35  ;;  %v4195_v37 = vpop.xlane.xlu0 %4194 }
0x20b2   :  { %v4199_v38 = vmul.f32 0.03125, %v4195_v37 }
0x20b3   :  { %v4202_v33 = vadd.f32 1e-05, %v4200_v36 }
0x20b4   :  { %v4201_v39 = vadd.f32 1e-05, %v4199_v38 }
0x20b5   :  { %13966 = vrsqrt.f32 %v4202_v33 }
0x20b6   :  { %13968 = vrsqrt.f32 %v4201_v39 }
0x20bf   :  { %v13967_v7 = vpop.eup %13966 }
0x20c0   :  { %v13969_v40 = vpop.eup %13968  ;;  %v4206_v41 = vmul.f32 %v13967_v7, %v4190_v13 }
0x20c1   :  { %v4205_v42 = vmul.f32 %v13969_v40, %v4189_v25 }
0x20c2   :  { %v4214_v44 = vmul.f32 %v12240_v5, %v4206_v41 }
0x20c3   :  { %v4213_v45 = vmul.f32 %v12240_v5, %v4205_v42 }
0x20c4   :  { %v14786_v47 = vadd.f32 %v12241_v43, %v4214_v44 }
0x20c5   :  { %v14784_v46 = vadd.f32 %v12241_v43, %v4213_v45 }
0x20c7   :  { %13127 = vmatprep.mubr.msk.f32.mxu1 %vm175_vm0, %v14784_v46 }
0x20c8   :  { %13128 = vmatmul.mubr.msk.f32.vlgmr.msra.gmra.mrb[48].mxu1 %vm175_vm0, %v14786_v47 }
0x20c9   :  { %13132 = vmatprep.mubr.msk.f32.mxu1 %vm14180_vm1, %v14179_v8 }
0x219b   :  { %v13129_v49 = vpop.f32.mrb[48].mxu1 }
0x219c   :  { %v14795_v50 = vadd.f32 %v13129_v49, %v12242_v48  ;;  %v4346_v51 = vpop.f32.mrb[49].mxu1 }
0x219d   :  { %v14797_v52 = vadd.f32 %v12242_v48, %v4346_v51 }
0x219e   :  { %4433 = vrot.lane.b32.xlu1 %v14795_v50, %s14181_s0 }
0x219f   :  { %4356 = vrot.lane.b32.xlu0 %v14797_v52, %s14181_s0 }
0x2210   :  { %v4434_v54 = vpop.permute.xlu1 %4433 }
0x2211   :  { %v4357_v53 = vpop.permute.xlu0 %4356 }
0x2212   :  { %13131 = vmatpush3.xpose.msk.msra.mxu1 %vm260_vm2, %v4357_v53 }
0x2213   :  { %13135 = vmatprep.subr.mxu1 %v14179_v8 }
0x2215   :  { %13133 = vmatmul.mubr.msk.f32.vlgmr.msra.gmra.mrb[50].mxu1 %vm260_vm2, %v14797_v52 }
0x2216   :  { %13136 = vmatpush3.xpose.msk.msra.mxu1 %vm260_vm2, %v4434_v54  ;;  %13137 = vmatprep.mubr.msk.f32.mxu1 %vm14180_vm1, %v14179_v8 }
0x2217   :  { %13145 = vmatprep.subr.mxu1 %v14179_v8 }
0x2219   :  { %13138 = vmatmul.mubr.msk.f32.vlgmr.msra.gmra.mrb[52].mxu1 %vm260_vm2, %v14795_v50 }
0x221a   :  { %13147 = vmatprep.mubr.msk.f32.mxu1 %vm14180_vm1, %v14179_v8 }
0x22e8   :  { %v4428_v55 = vpop.f32.mrb[50].mxu1 }
0x22e9   :  { %v13134_v56 = vpop.f32.mrb[51].mxu1  ;;  %v4509_v4 = vsel %vm260_vm2, %v4428_v55, -inf }
0x22ec   :  { %v4505_v57 = vpop.f32.mrb[52].mxu1 }
0x22ed   :  { %v13139_v60 = vpop.f32.mrb[53].mxu1  ;;  %v4512_v61 = vsel %vm260_vm2, %v4505_v57, -inf }
0x22ee   :  { %4513 = vmax.xlane.f32.xlu1 %v4512_v61 }
0x22ff   :  { %4763 = vrot.lane.b32.xlu1 %v14795_v50, %s14184_s10 }
0x2303   :  { %4761 = vrot.lane.b32.xlu1 %v14795_v50, %s14183_s7 }
0x237b   :  { %v4514_v63 = vpop.xlane.xlu1 %4513 }
0x237c   :  { %v4516_v1 = vsub.f32 %v4505_v57, %v4514_v63 }
0x237e   :  { %v4519_v2 = vmul.f32 1.442695, %v4516_v1 }
0x237f   :  { %v4764_v11 = vpop.permute.xlu1 %4763 }
0x2380   :  { %13970 = vpow2.f32 %v4519_v2 }
0x2383   :  { %v4762_v15 = vpop.permute.xlu1 %4761 }
0x238a   :  { %v13971_v3 = vpop.eup %13970 }
0x238b   :  { %v4524_v0 = vsel %vm260_vm2, %v13971_v3, 0.0 }
0x238c   :  { %4525 = vadd.xlane.f32.xlu0 %v4524_v0  ;;  %v4229_v0 = vld [vmem:[%s15600_s13 + $0x8] sm:$0xff] }
0x23a2   :  { %4607 = vrot.lane.b32.xlu0 %v14795_v50, %s14182_s5 }
0x23c1   :  { %4510 = vmax.xlane.f32.xlu0 %v4509_v4  ;;  %v4228_v4 = vld [vmem:[%s15600_s13] sm:$0xff] }
0x23d7   :  { %4531 = vrot.lane.b32.xlu0 %v14797_v52, %s14182_s5 }
0x23db   :  { %4683 = vrot.lane.b32.xlu0 %v14797_v52, %s14183_s7 }
0x2419   :  { %v4526_v6 = vpop.xlane.xlu0 %4525 }
0x241a   :  { %13972 = vrcp.f32 %v4526_v6 }
0x241d   :  { %v4608_v9 = vpop.permute.xlu0 %4607 }
0x241e   :  { %13146 = vmatpush3.msra.mxu1 %v4608_v9 }
0x241f   :  { %13155 = vmatprep.subr.mxu1 %v14179_v8 }
0x2424   :  { %v13973_v10 = vpop.eup %13972 }
0x2425   :  { %v4530_v14 = vmul.f32 %v13973_v10, %v13971_v3 }
0x2427   :  { %13148 = vmatmul.mubr.msk.f32.vlgmr.msra.gmra.mrb[54].mxu1 %vm260_vm2, %v4530_v14 }
0x2428   :  { %13156 = vmatpush3.xpose.msk.msra.mxu1 %vm260_vm2, %v4764_v11  ;;  %13157 = vmatprep.mubr.msk.f32.mxu1 %vm14180_vm1, %v14179_v8 }
0x2429   :  { %13165 = vmatprep.subr.mxu1 %v14179_v8 }
0x242b   :  { %13158 = vmatmul.mubr.msk.f32.vlgmr.msra.gmra.mrb[56].mxu1 %vm260_vm2, %v4762_v15 }
0x242c   :  { %13167 = vmatprep.mubr.msk.f32.mxu1 %vm14180_vm1, %v14179_v8 }
0x244e   :  { %v4511_v16 = vpop.xlane.xlu0 %4510 }
0x244f   :  { %v4515_v62 = vsub.f32 %v4428_v55, %v4511_v16 }
0x2451   :  { %v4517_v12 = vmul.f32 1.442695, %v4515_v62 }
0x2452   :  { %v4532_v17 = vpop.permute.xlu0 %4531 }
0x2453   :  { %13974 = vpow2.f32 %v4517_v12  ;;  %13141 = vmatpush3.msra.mxu0 %v4532_v17 }
0x2454   :  { %13150 = vmatprep.subr.mxu0 %v14179_v8 }
0x2456   :  { %v4684_v25 = vpop.permute.xlu0 %4683 }
0x245d   :  { %v13975_v18 = vpop.eup %13974 }
0x245e   :  { %v4521_v19 = vsel %vm260_vm2, %v13975_v18, 0.0 }
0x245f   :  { %4522 = vadd.xlane.f32.xlu1 %v4521_v19 }
0x2470   :  { %4685 = vrot.lane.b32.xlu1 %v14797_v52, %s14184_s10 }
0x24ec   :  { %v4523_v20 = vpop.xlane.xlu1 %4522 }
0x24ed   :  { %13976 = vrcp.f32 %v4523_v20  ;;  %v4230_v20 = vld [vmem:[%s15600_s13 + $0x10] sm:$0xff] }
0x24f0   :  { %v4686_v23 = vpop.permute.xlu1 %4685 }
0x24f7   :  { %v13977_v21 = vpop.eup %13976 }
0x24f8   :  { %v4528_v22 = vmul.f32 %v13977_v21, %v13975_v18 }
0x24fa   :  { %13143 = vmatmul.mubr.msk.f32.vlgmr.msra.gmra.mrb[32].mxu0 %vm260_vm2, %v4528_v22  ;;  %v14842_v24 = vpop.f32.mrb[54].mxu1 }
0x24fb   :  { %13151 = vmatpush3.xpose.msk.msra.mxu0 %vm260_vm2, %v4686_v23  ;;  %v13149_v13 = vpop.f32.mrb[55].mxu1  ;;  %13152 = vmatprep.mubr.msk.f32.mxu0 %vm14180_vm1, %v14179_v8 }
0x24fc   :  { %13160 = vmatprep.subr.mxu0 %v14179_v8 }
0x24fe   :  { %13153 = vmatmul.mubr.msk.f32.vlgmr.msra.gmra.mrb[34].mxu0 %vm260_vm2, %v4684_v25  ;;  %v4835_v26 = vpop.f32.mrb[56].mxu1 }
0x24ff   :  { %v13159_v27 = vpop.f32.mrb[57].mxu1  ;;  %v4842_v28 = vsel %vm260_vm2, %v4835_v26, -inf  ;;  %13162 = vmatprep.mubr.msk.f32.mxu0 %vm14180_vm1, %v14179_v8 }
0x2500   :  { %4843 = vmax.xlane.f32.xlu1 %v4842_v28 }
0x2511   :  { %5177 = vrot.lane.b32.xlu1 %v14797_v52, %s14185_s11 }
0x2515   :  { %5175 = vrot.lane.b32.xlu1 %v14797_v52, %s14187_s16 }
0x2519   :  { %5253 = vrot.lane.b32.xlu1 %v14795_v50, %s14187_s16 }
0x258d   :  { %v4844_v29 = vpop.xlane.xlu1 %4843 }
0x258e   :  { %v4846_v59 = vsub.f32 %v4835_v26, %v4844_v29 }
0x2590   :  { %v4849_v58 = vmul.f32 1.442695, %v4846_v59 }
0x2591   :  { %v5178_v39 = vpop.permute.xlu1 %5177 }
0x2592   :  { %13978 = vpow2.f32 %v4849_v58 }
0x2595   :  { %v5176_v40 = vpop.permute.xlu1 %5175 }
0x2599   :  { %v5254_v42 = vpop.permute.xlu1 %5253 }
0x259c   :  { %v13979_v30 = vpop.eup %13978 }
0x259d   :  { %v4854_v31 = vsel %vm260_vm2, %v13979_v30, 0.0 }
0x259e   :  { %4855 = vadd.xlane.f32.xlu0 %v4854_v31 }
0x25b4   :  { %4937 = vrot.lane.b32.xlu0 %v14795_v50, %s14186_s15 }
0x25b8   :  { %5255 = vrot.lane.b32.xlu0 %v14795_v50, %s14185_s11 }
0x25cd   :  { %v14863_v32 = vpop.f32.mrb[32].mxu0 }
0x25ce   :  { %v13144_v34 = vpop.f32.mrb[33].mxu0 }
0x25d1   :  { %v4757_v35 = vpop.f32.mrb[34].mxu0 }
0x25d2   :  { %v13154_v36 = vpop.f32.mrb[35].mxu0  ;;  %v4839_v37 = vsel %vm260_vm2, %v4757_v35, -inf }
0x25d7   :  { %4840 = vmax.xlane.f32.xlu0 %v4839_v37 }
0x25ed   :  { %4861 = vrot.lane.b32.xlu0 %v14797_v52, %s14186_s15 }
0x25f1   :  { %5353 = vrot.lane.b32.xlu0 %v14797_v52, %s14188_s18 }
0x25f5   :  { %5590 = vrot.lane.b32.xlu0 %v14797_v52, %s14189_s22 }
0x25f9   :  { %5668 = vrot.lane.b32.xlu0 %v14795_v50, %s14189_s22 }
0x25fd   :  { %5588 = vrot.lane.b32.xlu0 %v14797_v52, %s14190_s23 }
0x2601   :  { %5666 = vrot.lane.b32.xlu0 %v14795_v50, %s14190_s23 }
0x262b   :  { %v4856_v38 = vpop.xlane.xlu0 %4855 }
0x262c   :  { %13980 = vrcp.f32 %v4856_v38 }
0x262f   :  { %v4938_v33 = vpop.permute.xlu0 %4937 }
0x2630   :  { %13166 = vmatpush3.msra.mxu1 %v4938_v33 }
0x2631   :  { %13180 = vmatprep.subr.mxu1 %v14179_v8 }
0x2633   :  { %v5256_v41 = vpop.permute.xlu0 %5255 }
0x2636   :  { %v13981_v7 = vpop.eup %13980 }
0x2637   :  { %v4860_v5 = vmul.f32 %v13981_v7, %v13979_v30 }
0x2639   :  { %13168 = vmatmul.mubr.msk.f32.vlgmr.msra.gmra.mrb[58].mxu1 %vm260_vm2, %v4860_v5 }
0x263a   :  { %13181 = vmatpush3.xpose.msk.msra.mxu1 %vm260_vm2, %v5178_v39  ;;  %13182 = vmatprep.mubr.msk.f32.mxu1 %vm14180_vm1, %v14179_v8 }
0x263b   :  { %13185 = vmatprep.subr.mxu1 %v14179_v8 }
0x263d   :  { %13183 = vmatmul.mubr.msk.f32.vlgmr.msra.gmra.mrb[60].mxu1 %vm260_vm2, %v5176_v40 }
0x263e   :  { %13186 = vmatpush3.xpose.msk.msra.mxu1 %vm260_vm2, %v5256_v41  ;;  %13187 = vmatprep.mubr.msk.f32.mxu1 %vm14180_vm1, %v14179_v8 }
0x263f   :  { %13195 = vmatprep.subr.mxu1 %v14179_v8 }
0x2641   :  { %13188 = vmatmul.mubr.msk.f32.vlgmr.msra.gmra.mrb[62].mxu1 %vm260_vm2, %v5254_v42 }
0x2642   :  { %13197 = vmatprep.mubr.msk.f32.mxu1 %vm14180_vm1, %v14179_v8 }
0x2664   :  { %v4841_v43 = vpop.xlane.xlu0 %4840 }
0x2665   :  { %v4845_v44 = vsub.f32 %v4757_v35, %v4841_v43 }
0x2667   :  { %v4847_v45 = vmul.f32 1.442695, %v4845_v44 }
0x2668   :  { %v4862_v48 = vpop.permute.xlu0 %4861 }
0x2669   :  { %13982 = vpow2.f32 %v4847_v45  ;;  %13161 = vmatpush3.msra.mxu0 %v4862_v48 }
0x266a   :  { %13170 = vmatprep.subr.mxu0 %v4229_v0 }
0x266c   :  { %v5354_v21 = vpop.permute.xlu0 %5353 }
0x2670   :  { %v5591_v25 = vpop.permute.xlu0 %5590 }
0x2673   :  { %v13983_v49 = vpop.eup %13982 }
0x2674   :  { %v4851_v51 = vsel %vm260_vm2, %v13983_v49, 0.0 }
0x2675   :  { %4852 = vadd.xlane.f32.xlu1 %v4851_v51 }
0x2702   :  { %v4853_v53 = vpop.xlane.xlu1 %4852 }
0x2703   :  { %13984 = vrcp.f32 %v4853_v53 }
0x270c   :  { %v5009_v54 = vpop.f32.mrb[58].mxu1 }
0x270d   :  { %v13985_v55 = vpop.eup %13984  ;;  %v13169_v56 = vpop.f32.mrb[59].mxu1 }
0x270e   :  { %v4858_v57 = vmul.f32 %v13985_v55, %v13983_v49  ;;  %v4231_v56 = vld [vmem:[%s15600_s13 + $0x18] sm:$0xff] }
0x2710   :  { %13163 = vmatmul.mubr.msk.f32.vlgmr.msra.gmra.mrb[36].mxu0 %vm260_vm2, %v4858_v57  ;;  %v5249_v60 = vpop.f32.mrb[60].mxu1 }
0x2711   :  { %v13184_v61 = vpop.f32.mrb[61].mxu1  ;;  %v5331_v63 = vsel %vm260_vm2, %v5249_v60, -inf  ;;  %13171 = vmatpush3.msra.mxu0 %v4229_v0  ;;  %v4242_v0 = vld [vmem:[%s15601_s17 + $0x10] sm:$0xff] }
0x2712   :  { %5332 = vmax.xlane.f32.xlu1 %v5331_v63  ;;  %13175 = vmatprep.subr.mxu0 %v4228_v4 }
0x2714   :  { %v5327_v1 = vpop.f32.mrb[62].mxu1 }
0x2715   :  { %v13189_v2 = vpop.f32.mrb[63].mxu1  ;;  %v5334_v3 = vsel %vm260_vm2, %v5327_v1, -inf }
0x2716   :  { %5335 = vmax.xlane.f32.xlu1 %v5334_v3  ;;  %v4240_v2 = vld [vmem:[%s15601_s17] sm:$0xff]  ;;  %v4241_v3 = vld [vmem:[%s15601_s17 + $0x8] sm:$0xff] }
0x279f   :  { %v5333_v6 = vpop.xlane.xlu1 %5332 }
0x27a0   :  { %v5337_v9 = vsub.f32 %v5249_v60, %v5333_v6 }
0x27a2   :  { %v5339_v10 = vmul.f32 1.442695, %v5337_v9 }
0x27a3   :  { %v5336_v11 = vpop.xlane.xlu1 %5335 }
0x27a4   :  { %13986 = vpow2.f32 %v5339_v10  ;;  %v5338_v14 = vsub.f32 %v5327_v1, %v5336_v11  ;;  %v12277_v11 = vld [vmem:[%s15602_s21] ss:$0 sm:$0xff] }
0x27a6   :  { %v5341_v15 = vmul.f32 1.442695, %v5338_v14 }
0x27a8   :  { %13988 = vpow2.f32 %v5341_v15 }
0x27ae   :  { %v13987_v16 = vpop.eup %13986 }
0x27af   :  { %v5343_v62 = vsel %vm260_vm2, %v13987_v16, 0.0 }
0x27b0   :  { %5344 = vadd.xlane.f32.xlu1 %v5343_v62 }
0x27b2   :  { %v13989_v12 = vpop.eup %13988 }
0x27b3   :  { %v5346_v17 = vsel %vm260_vm2, %v13989_v12, 0.0 }
0x27b4   :  { %5347 = vadd.xlane.f32.xlu1 %v5346_v17 }
0x27c5   :  { %5429 = vrot.lane.b32.xlu1 %v14795_v50, %s14188_s18 }
0x27e3   :  { %v4933_v18 = vpop.f32.mrb[36].mxu0 }
0x27e4   :  { %v13164_v19 = vpop.f32.mrb[37].mxu0  ;;  %13172 = vmatprep.mubr.msk.f32.mxu0 %vm260_vm2, %v4933_v18 }
0x27e5   :  { %13173 = vmatmul.mubr.msk.f32.vlgmr.msra.gmra.mrb[38].mxu0 %vm260_vm2, %v5009_v54 }
0x27e6   :  { %13177 = vmatprep.mubr.msk.f32.mxu0 %vm260_vm2, %v14863_v32  ;;  %13176 = vmatpush3.msra.mxu0 %v4228_v4  ;;  %v4243_v4 = vld [vmem:[%s15601_s17 + $0x18] sm:$0xff] }
0x27e7   :  { %13190 = vmatprep.subr.mxu0 %v14179_v8  ;;  %v13729_v6 = vpack.c.bf16 %v4243_v4, %v4242_v0 }
0x27ed   :  { %13178 = vmatmul.mubr.msk.f32.vlgmr.msra.gmra.mrb[38].mxu0 %vm260_vm2, %v14842_v24  ;;  %v5669_v24 = vpop.permute.xlu0 %5668 }
0x27ee   :  { %13191 = vmatpush3.msra.mxu0 %v5354_v21  ;;  %13192 = vmatprep.mubr.msk.f32.mxu0 %vm14180_vm1, %v14179_v8 }
0x27ef   :  { %13200 = vmatprep.subr.mxu0 %v4230_v20 }
0x27f1   :  { %v5589_v59 = vpop.permute.xlu0 %5588 }
0x27f5   :  { %v5667_v34 = vpop.permute.xlu0 %5666 }
0x283d   :  { %v5345_v22 = vpop.xlane.xlu1 %5344 }
0x283e   :  { %13990 = vrcp.f32 %v5345_v22 }
0x2841   :  { %v5348_v23 = vpop.xlane.xlu1 %5347 }
0x2842   :  { %13992 = vrcp.f32 %v5348_v23 }
0x2845   :  { %v5430_v13 = vpop.permute.xlu1 %5429 }
0x2846   :  { %13196 = vmatpush3.msra.mxu1 %v5430_v13 }
0x2847   :  { %13205 = vmatprep.subr.mxu1 %v14179_v8 }
0x2848   :  { %v13991_v26 = vpop.eup %13990 }
0x2849   :  { %v5350_v27 = vmul.f32 %v13991_v26, %v13987_v16 }
0x284b   :  { %13193 = vmatmul.mubr.msk.f32.vlgmr.msra.gmra.mrb[40].mxu0 %vm260_vm2, %v5350_v27 }
0x284c   :  { %v13993_v28 = vpop.eup %13992  ;;  %13201 = vmatpush3.msra.mxu0 %v4230_v20  ;;  %v12283_v20 = vld [vmem:[%s15603_s25] ss:$0 sm:$0xff] }
0x284d   :  { %v5352_v29 = vmul.f32 %v13993_v28, %v13989_v12  ;;  %13210 = vmatprep.subr.mxu0 %v14179_v8 }
0x284f   :  { %13198 = vmatmul.mubr.msk.f32.vlgmr.msra.gmra.mrb[64].mxu1 %vm260_vm2, %v5352_v29 }
0x2850   :  { %13206 = vmatpush3.xpose.msk.msra.mxu1 %vm260_vm2, %v5591_v25  ;;  %13207 = vmatprep.mubr.msk.f32.mxu1 %vm14180_vm1, %v14179_v8 }
0x2851   :  { %13215 = vmatprep.subr.mxu1 %v14179_v8 }
0x2853   :  { %13208 = vmatmul.mubr.msk.f32.vlgmr.msra.gmra.mrb[66].mxu1 %vm260_vm2, %v5589_v59 }
0x2854   :  { %13217 = vmatprep.mubr.msk.f32.mxu1 %vm14180_vm1, %v14179_v8 }
0x291e   :  { %v5425_v58 = vpop.f32.mrb[40].mxu0 }
0x291f   :  { %v13194_v30 = vpop.f32.mrb[41].mxu0  ;;  %13202 = vmatprep.mubr.msk.f32.mxu0 %vm260_vm2, %v5425_v58 }
0x2922   :  { %v5501_v31 = vpop.f32.mrb[64].mxu1 }
0x2923   :  { %v13199_v32 = vpop.f32.mrb[65].mxu1  ;;  %13203 = vmatmul.mubr.msk.f32.vlgmr.msra.gmra.mrb[38].mxu0 %vm260_vm2, %v5501_v31 }
0x2924   :  { %13211 = vmatpush3.xpose.msk.msra.mxu0 %vm260_vm2, %v5669_v24  ;;  %13212 = vmatprep.mubr.msk.f32.mxu0 %vm14180_vm1, %v14179_v8  ;;  %v4235_v32 = vld [vmem:[%s15604_s29] sm:$0xff] }
0x2925   :  { %13220 = vmatprep.subr.mxu0 %v14179_v8 }
0x2926   :  { %v5662_v35 = vpop.f32.mrb[66].mxu1 }
0x2927   :  { %v13209_v36 = vpop.f32.mrb[67].mxu1  ;;  %13213 = vmatmul.mubr.msk.f32.vlgmr.msra.gmra.mrb[42].mxu0 %vm260_vm2, %v5667_v34  ;;  %v5744_v37 = vsel %vm260_vm2, %v5662_v35, -inf  ;;  %v4236_v34 = vld [vmem:[%s15604_s29 + $0x8] sm:$0xff] }
0x2928   :  { %5745 = vmax.xlane.f32.xlu1 %v5744_v37  ;;  %13222 = vmatprep.mubr.msk.f32.mxu0 %vm14180_vm1, %v14179_v8  ;;  %v13717_v36 = vpack.c.bf16 %v4236_v34, %v4235_v32  ;;  %v4238_v37 = vld [vmem:[%s15604_s29 + $0x18] sm:$0xff] }
0x29b5   :  { %v5746_v38 = vpop.xlane.xlu1 %5745 }
0x29b6   :  { %v5750_v33 = vsub.f32 %v5662_v35, %v5746_v38  ;;  %v4237_v35 = vld [vmem:[%s15604_s29 + $0x10] sm:$0xff] }
0x29b7   :  { %v13721_v38 = vpack.c.bf16 %v4238_v37, %v4237_v35 }
0x29b8   :  { %v5752_v39 = vmul.f32 1.442695, %v5750_v33 }
0x29ba   :  { %13994 = vpow2.f32 %v5752_v39 }
0x29c4   :  { %v13995_v41 = vpop.eup %13994 }
0x29c5   :  { %v5756_v42 = vsel %vm260_vm2, %v13995_v41, 0.0 }
0x29fa   :  { %v5740_v7 = vpop.f32.mrb[42].mxu0 }
0x29fb   :  { %v13214_v5 = vpop.f32.mrb[43].mxu0  ;;  %v5747_v40 = vsel %vm260_vm2, %v5740_v7, -inf }
0x29fc   :  { %5748 = vmax.xlane.f32.xlu0 %v5747_v40 }
0x2a00   :  { %5757 = vadd.xlane.f32.xlu0 %v5756_v42 }
0x2a16   :  { %5766 = vrot.lane.b32.xlu0 %v14797_v52, %s15581_s26 }
0x2a89   :  { %v5749_v43 = vpop.xlane.xlu0 %5748 }
0x2a8a   :  { %v5751_v44 = vsub.f32 %v5740_v7, %v5749_v43  ;;  %v12278_v43 = vld [vmem:[%s15605_s3] ss:$0 sm:$0xff] }
0x2a8c   :  { %v5754_v45 = vmul.f32 1.442695, %v5751_v44 }
0x2a8d   :  { %v5758_v48 = vpop.xlane.xlu0 %5757 }
0x2a8e   :  { %13996 = vpow2.f32 %v5754_v45 }
0x2a8f   :  { %13998 = vrcp.f32 %v5758_v48 }
0x2a91   :  { %v5767_v49 = vpop.permute.xlu0 %5766 }
0x2a92   :  { %13216 = vmatpush3.msra.mxu1 %v5767_v49  ;;  %v12279_v49 = vld [vmem:[%s15606_s8] ss:$0 sm:$0xff] }
0x2a93   :  { %13718 = vmatprep.subr.bf16.mxu1 %v13717_v36 }
0x2a98   :  { %v13997_v51 = vpop.eup %13996 }
0x2a99   :  { %v13999_v53 = vpop.eup %13998  ;;  %v5759_v54 = vsel %vm260_vm2, %v13997_v51, 0.0 }
0x2a9a   :  { %5760 = vadd.xlane.f32.xlu1 %v5759_v54  ;;  %v5763_v55 = vmul.f32 %v13999_v53, %v13995_v41 }
0x2a9c   :  { %13218 = vmatmul.mubr.msk.f32.vlgmr.msra.gmra.mrb[68].mxu1 %vm260_vm2, %v5763_v55 }
0x2a9d   :  { %13720 = vmatpush3.bf16.msra.mxu1 %v13717_v36 }
0x2a9e   :  { %13722 = vmatprep.subr.bf16.mxu1 %v13721_v38 }
0x2aa1   :  { %13724 = vmatpush3.bf16.msra.mxu1 %v13721_v38 }
0x2aa2   :  { %13252 = vmatprep.subr.mxu1 %v14179_v8 }
0x2aab   :  { %5842 = vrot.lane.b32.xlu1 %v14795_v50, %s15581_s26  ;;  %v13725_v50 = vpack.c.bf16 %v4241_v3, %v4240_v2  ;;  %s15614_s26 = sld [smem:[#allocation19_spill]] }
0x2b27   :  { %v5761_v52 = vpop.xlane.xlu1 %5760 }
0x2b28   :  { %14000 = vrcp.f32 %v5761_v52  ;;  %v12280_v52 = vld [vmem:[%s15607_s14] ss:$0 sm:$0xff] }
0x2b2b   :  { %v5843_v57 = vpop.permute.xlu1 %5842 }
0x2b2c   :  { %13221 = vmatpush3.msra.mxu0 %v5843_v57 }
0x2b2d   :  { %13225 = vmatprep.subr.mxu0 %v4231_v56 }
0x2b32   :  { %v14001_v60 = vpop.eup %14000 }
0x2b33   :  { %v5765_v61 = vmul.f32 %v14001_v60, %v13997_v51 }
0x2b35   :  { %13223 = vmatmul.mubr.msk.f32.vlgmr.msra.gmra.mrb[44].mxu0 %vm260_vm2, %v5765_v61 }
0x2b36   :  { %13226 = vmatpush3.msra.mxu0 %v4231_v56 }
0x2b37   :  { %13726 = vmatprep.subr.bf16.mxu0 %v13725_v50 }
0x2b6f   :  { %v5838_v63 = vpop.f32.mrb[68].mxu1 }
0x2b70   :  { %v13219_v1 = vpop.f32.mrb[69].mxu1  ;;  %13227 = vmatprep.mubr.msk.f32.mxu0 %vm260_vm2, %v5838_v63 }
0x2c08   :  { %v5914_v9 = vpop.f32.mrb[44].mxu0 }
0x2c09   :  { %v13224_v10 = vpop.f32.mrb[45].mxu0  ;;  %13228 = vmatmul.mubr.msk.f32.vlgmr.msra.gmra.mrb[38].mxu0 %vm260_vm2, %v5914_v9 }
0x2c0a   :  { %13728 = vmatpush3.bf16.msra.mxu0 %v13725_v50  ;;  %13249 = vmatprep.mubr.msk.f32.mxu0 %vm175_vm0, %v14784_v46 }
0x2c0b   :  { %13730 = vmatprep.subr.bf16.mxu0 %v13729_v6 }
0x2c0e   :  { %13732 = vmatpush3.bf16.msra.mxu0 %v13729_v6 }
0x2c0f   :  { %13262 = vmatprep.subr.mxu0 %v14179_v8 }
0x2c11   :  { %13250 = vmatmul.mubr.msk.f32.vlgmr.msra.gmra.mrb[46].mxu0 %vm175_vm0, %v14786_v47 }
0x2c12   :  { %13264 = vmatprep.mubr.msk.f32.mxu0 %vm14180_vm1, %v14179_v8 }
0x2cdc   :  { %v13229_v14 = vpop.f32.mrb[38].mxu0 }
0x2cdd   :  { %v6008_v15 = vadd.f32 %v13229_v14, %v12277_v11  ;;  %v5990_v16 = vpop.f32.mrb[39].mxu0 }
0x2cde   :  { %v6007_v62 = vadd.f32 %v12277_v11, %v5990_v16 }
0x2cdf   :  { %v6010_v12 = vadd.f32 %v6008_v15, %v14786_v47 }
0x2ce0   :  { %v6009_v17 = vadd.f32 %v6007_v62, %v14784_v46 }
0x2ce1   :  { %v6014_v18 = vsel %vm175_vm0, %v6010_v12, 0.0 }
0x2ce2   :  { %6015 = vadd.xlane.f32.xlu0 %v6014_v18  ;;  %v6011_v19 = vsel %vm175_vm0, %v6009_v17, 0.0 }
0x2ce3   :  { %6012 = vadd.xlane.f32.xlu1 %v6011_v19 }
0x2ce4   :  { %v13251_v21 = vpop.f32.mrb[46].mxu0 }
0x2ce5   :  { %v6212_v22 = vpop.f32.mrb[47].mxu0  ;;  %v14966_v31 = vadd.f32 %v13251_v21, %v12283_v20 }
0x2ce6   :  { %v14962_v23 = vadd.f32 %v12283_v20, %v6212_v22 }
0x2d6f   :  { %v6016_v13 = vpop.xlane.xlu0 %6015 }
0x2d70   :  { %v6018_v25 = vmul.f32 0.03125, %v6016_v13  ;;  %v6013_v26 = vpop.xlane.xlu1 %6012 }
0x2d71   :  { %v6017_v27 = vmul.f32 0.03125, %v6013_v26 }
0x2d72   :  { %v6020_v28 = vsub.f32 %v6010_v12, %v6018_v25 }
0x2d73   :  { %v6019_v24 = vsub.f32 %v6009_v17, %v6017_v27 }
0x2d74   :  { %v6022_v29 = vmul.f32 %v6020_v28, %v6020_v28 }
0x2d75   :  { %v6021_v59 = vmul.f32 %v6019_v24, %v6019_v24 }
0x2d76   :  { %v6026_v58 = vsel %vm175_vm0, %v6022_v29, 0.0 }
0x2d77   :  { %6027 = vadd.xlane.f32.xlu1 %v6026_v58  ;;  %v6023_v30 = vsel %vm175_vm0, %v6021_v59, 0.0 }
0x2d78   :  { %6024 = vadd.xlane.f32.xlu0 %v6023_v30 }
0x2d88   :  { %6627 = vrot.lane.b32.xlu1 %v14966_v31, %s14183_s7 }
0x2e04   :  { %v6028_v33 = vpop.xlane.xlu1 %6027 }
0x2e05   :  { %v6030_v39 = vmul.f32 0.03125, %v6028_v33  ;;  %v6025_v7 = vpop.xlane.xlu0 %6024 }
0x2e06   :  { %v6029_v5 = vmul.f32 0.03125, %v6025_v7 }
0x2e07   :  { %v6032_v40 = vadd.f32 1e-05, %v6030_v39 }
0x2e08   :  { %v6031_v41 = vadd.f32 1e-05, %v6029_v5  ;;  %v6628_v19 = vpop.permute.xlu1 %6627 }
0x2e09   :  { %14002 = vrsqrt.f32 %v6032_v40 }
0x2e0a   :  { %14004 = vrsqrt.f32 %v6031_v41 }
0x2e13   :  { %v14003_v42 = vpop.eup %14002 }
0x2e14   :  { %v14005_v44 = vpop.eup %14004  ;;  %v6036_v45 = vmul.f32 %v14003_v42, %v6020_v28 }
0x2e15   :  { %v6035_v48 = vmul.f32 %v14005_v44, %v6019_v24 }
0x2e16   :  { %v6044_v51 = vmul.f32 %v12278_v43, %v6036_v45 }
0x2e17   :  { %v6043_v53 = vmul.f32 %v12278_v43, %v6035_v48 }
0x2e18   :  { %v14979_v55 = vadd.f32 %v12279_v49, %v6044_v51 }
0x2e19   :  { %v14977_v54 = vadd.f32 %v12279_v49, %v6043_v53 }
0x2e1b   :  { %13238 = vmatprep.mubr.msk.f32.mxu1 %vm175_vm0, %v14977_v54 }
0x2e1c   :  { %13239 = vmatmul.mubr.msk.f32.vlgmr.msra.gmra.mrb[70].mxu1 %vm175_vm0, %v14979_v55 }
0x2e1d   :  { %13253 = vmatpush3.xpose.msk.msra.mxu1 %vm260_vm2, %v14962_v23  ;;  %13254 = vmatprep.mubr.msk.f32.mxu1 %vm14180_vm1, %v14179_v8 }
0x2e1e   :  { %13257 = vmatprep.subr.mxu1 %v14179_v8 }
0x2eef   :  { %v13240_v56 = vpop.f32.mrb[70].mxu1 }
0x2ef0   :  { %v6131_v57 = vpop.f32.mrb[71].mxu1  ;;  %v14999_v61 = vadd.f32 %v13240_v56, %v12280_v52 }
0x2ef1   :  { %v14991_v60 = vadd.f32 %v12280_v52, %v6131_v57 }
0x2ef3   :  { %13255 = vmatmul.mubr.msk.f32.vlgmr.msra.gmra.mrb[72].mxu1 %vm260_vm2, %v14991_v60 }
0x2ef4   :  { %13258 = vmatpush3.xpose.msk.msra.mxu1 %vm260_vm2, %v14966_v31  ;;  %13259 = vmatprep.mubr.msk.f32.mxu1 %vm14180_vm1, %v14179_v8 }
0x2ef5   :  { %13267 = vmatprep.subr.mxu1 %v14179_v8 }
0x2ef7   :  { %13260 = vmatmul.mubr.msk.f32.vlgmr.msra.gmra.mrb[74].mxu1 %vm260_vm2, %v14999_v61 }
0x2ef8   :  { %13269 = vmatprep.mubr.msk.f32.mxu1 %vm14180_vm1, %v14179_v8 }
0x2fc6   :  { %v6293_v63 = vpop.f32.mrb[72].mxu1 }
0x2fc7   :  { %v13256_v1 = vpop.f32.mrb[73].mxu1  ;;  %v6373_v0 = vsel %vm260_vm2, %v6293_v63, -inf }
0x2fca   :  { %v6369_v2 = vpop.f32.mrb[74].mxu1 }
0x2fcb   :  { %v13261_v3 = vpop.f32.mrb[75].mxu1  ;;  %v6376_v50 = vsel %vm260_vm2, %v6369_v2, -inf }
0x2fcc   :  { %6377 = vmax.xlane.f32.xlu0 %v6376_v50 }
0x2fe2   :  { %6471 = vrot.lane.b32.xlu0 %v14966_v31, %s14181_s0 }
0x3001   :  { %6374 = vmax.xlane.f32.xlu0 %v6373_v0 }
0x3017   :  { %6395 = vrot.lane.b32.xlu0 %v14962_v23, %s14181_s0 }
0x301b   :  { %6547 = vrot.lane.b32.xlu0 %v14991_v60, %s14183_s7 }
0x3059   :  { %v6378_v4 = vpop.xlane.xlu0 %6377 }
0x305a   :  { %v6380_v6 = vsub.f32 %v6369_v2, %v6378_v4 }
0x305c   :  { %v6383_v9 = vmul.f32 1.442695, %v6380_v6 }
0x305d   :  { %v6472_v10 = vpop.permute.xlu0 %6471 }
0x305e   :  { %14006 = vpow2.f32 %v6383_v9  ;;  %13268 = vmatpush3.msra.mxu1 %v6472_v10 }
0x305f   :  { %13277 = vmatprep.subr.mxu1 %v14179_v8 }
0x3068   :  { %v14007_v11 = vpop.eup %14006 }
0x3069   :  { %v6388_v14 = vsel %vm260_vm2, %v14007_v11, 0.0 }
0x306a   :  { %6389 = vadd.xlane.f32.xlu1 %v6388_v14  ;;  %v4246_v14 = vld [vmem:[%s15608_s19 + $0x8] sm:$0xff] }
0x307b   :  { %6625 = vrot.lane.b32.xlu1 %v14999_v61, %s14183_s7 }
0x308e   :  { %v6375_v15 = vpop.xlane.xlu0 %6374 }
0x308f   :  { %v6379_v16 = vsub.f32 %v6293_v63, %v6375_v15  ;;  %v4245_v15 = vld [vmem:[%s15608_s19] sm:$0xff] }
0x3091   :  { %v6381_v62 = vmul.f32 1.442695, %v6379_v16 }
0x3092   :  { %v6396_v12 = vpop.permute.xlu0 %6395 }
0x3093   :  { %14008 = vpow2.f32 %v6381_v62  ;;  %13263 = vmatpush3.msra.mxu0 %v6396_v12 }
0x3094   :  { %13272 = vmatprep.subr.mxu0 %v14179_v8 }
0x3096   :  { %v6548_v24 = vpop.permute.xlu0 %6547 }
0x309d   :  { %v14009_v17 = vpop.eup %14008 }
0x309e   :  { %v6385_v18 = vsel %vm260_vm2, %v14009_v17, 0.0 }
0x309f   :  { %6386 = vadd.xlane.f32.xlu1 %v6385_v18 }
0x30b0   :  { %6549 = vrot.lane.b32.xlu1 %v14962_v23, %s14183_s7 }
0x30f7   :  { %v6390_v20 = vpop.xlane.xlu1 %6389 }
0x30f8   :  { %14010 = vrcp.f32 %v6390_v20 }
0x30fb   :  { %v6626_v13 = vpop.permute.xlu1 %6625 }
0x3102   :  { %v14011_v21 = vpop.eup %14010 }
0x3103   :  { %v6394_v22 = vmul.f32 %v14011_v21, %v14007_v11 }
0x3105   :  { %13270 = vmatmul.mubr.msk.f32.vlgmr.msra.gmra.mrb[76].mxu1 %vm260_vm2, %v6394_v22 }
0x3106   :  { %13278 = vmatpush3.xpose.msk.msra.mxu1 %vm260_vm2, %v6628_v19  ;;  %13279 = vmatprep.mubr.msk.f32.mxu1 %vm14180_vm1, %v14179_v8 }
0x3107   :  { %13287 = vmatprep.subr.mxu1 %v14179_v8 }
0x3109   :  { %13280 = vmatmul.mubr.msk.f32.vlgmr.msra.gmra.mrb[78].mxu1 %vm260_vm2, %v6626_v13 }
0x310a   :  { %13289 = vmatprep.mubr.msk.f32.mxu1 %vm14180_vm1, %v14179_v8 }
0x312c   :  { %v6387_v25 = vpop.xlane.xlu1 %6386 }
0x312d   :  { %14012 = vrcp.f32 %v6387_v25 }
0x3130   :  { %v6550_v28 = vpop.permute.xlu1 %6549 }
0x3137   :  { %v14013_v26 = vpop.eup %14012 }
0x3138   :  { %v6392_v27 = vmul.f32 %v14013_v26, %v14009_v17 }
0x313a   :  { %13265 = vmatmul.mubr.msk.f32.vlgmr.msra.gmra.mrb[48].mxu0 %vm260_vm2, %v6392_v27  ;;  %v4247_v27 = vld [vmem:[%s15608_s19 + $0x10] sm:$0xff] }
0x313b   :  { %13273 = vmatpush3.xpose.msk.msra.mxu0 %vm260_vm2, %v6550_v28  ;;  %13274 = vmatprep.mubr.msk.f32.mxu0 %vm14180_vm1, %v14179_v8 }
0x313c   :  { %13282 = vmatprep.subr.mxu0 %v14179_v8 }
0x313e   :  { %13275 = vmatmul.mubr.msk.f32.vlgmr.msra.gmra.mrb[50].mxu0 %vm260_vm2, %v6548_v24 }
0x313f   :  { %13284 = vmatprep.mubr.msk.f32.mxu0 %vm14180_vm1, %v14179_v8 }
0x31d8   :  { %v15038_v29 = vpop.f32.mrb[76].mxu1 }
0x31d9   :  { %v13271_v59 = vpop.f32.mrb[77].mxu1 }
0x31dc   :  { %v6699_v58 = vpop.f32.mrb[78].mxu1 }
0x31dd   :  { %v13281_v30 = vpop.f32.mrb[79].mxu1  ;;  %v6706_v32 = vsel %vm260_vm2, %v6699_v58, -inf }
0x31de   :  { %6707 = vmax.xlane.f32.xlu1 %v6706_v32 }
0x31ef   :  { %7041 = vrot.lane.b32.xlu1 %v14962_v23, %s14187_s16 }
0x31f3   :  { %7039 = vrot.lane.b32.xlu1 %v14991_v60, %s14187_s16 }
0x31f7   :  { %7117 = vrot.lane.b32.xlu1 %v14999_v61, %s14187_s16 }
0x320d   :  { %v15047_v34 = vpop.f32.mrb[48].mxu0 }
0x320e   :  { %v13266_v35 = vpop.f32.mrb[49].mxu0 }
0x3211   :  { %v6621_v36 = vpop.f32.mrb[50].mxu0 }
0x3212   :  { %v13276_v37 = vpop.f32.mrb[51].mxu0  ;;  %v6703_v40 = vsel %vm260_vm2, %v6621_v36, -inf }
0x326b   :  { %v6708_v38 = vpop.xlane.xlu1 %6707 }
0x326c   :  { %v6710_v33 = vsub.f32 %v6699_v58, %v6708_v38 }
0x326e   :  { %v6713_v39 = vmul.f32 1.442695, %v6710_v33 }
0x326f   :  { %v7042_v43 = vpop.permute.xlu1 %7041 }
0x3270   :  { %14014 = vpow2.f32 %v6713_v39 }
0x3273   :  { %v7040_v48 = vpop.permute.xlu1 %7039 }
0x3277   :  { %v7118_v51 = vpop.permute.xlu1 %7117 }
0x327a   :  { %v14015_v7 = vpop.eup %14014 }
0x327b   :  { %v6718_v5 = vsel %vm260_vm2, %v14015_v7, 0.0 }
0x327c   :  { %6719 = vadd.xlane.f32.xlu0 %v6718_v5 }
0x3292   :  { %6801 = vrot.lane.b32.xlu0 %v14966_v31, %s14184_s10 }
0x3296   :  { %7119 = vrot.lane.b32.xlu0 %v14966_v31, %s14187_s16 }
0x32b5   :  { %6704 = vmax.xlane.f32.xlu0 %v6703_v40 }
0x32cb   :  { %6725 = vrot.lane.b32.xlu0 %v14962_v23, %s14184_s10 }
0x32cf   :  { %7217 = vrot.lane.b32.xlu0 %v14962_v23, %s14185_s11 }
0x32d3   :  { %7454 = vrot.lane.b32.xlu0 %v14962_v23, %s14190_s23 }
0x32d7   :  { %7532 = vrot.lane.b32.xlu0 %v14966_v31, %s14190_s23 }
0x32db   :  { %7452 = vrot.lane.b32.xlu0 %v14991_v60, %s14190_s23 }
0x32df   :  { %7530 = vrot.lane.b32.xlu0 %v14999_v61, %s14190_s23 }
0x3309   :  { %v6720_v41 = vpop.xlane.xlu0 %6719 }
0x330a   :  { %14016 = vrcp.f32 %v6720_v41 }
0x330d   :  { %v6802_v42 = vpop.permute.xlu0 %6801 }
0x330e   :  { %13288 = vmatpush3.msra.mxu1 %v6802_v42 }
0x330f   :  { %13302 = vmatprep.subr.mxu1 %v14179_v8 }
0x3311   :  { %v7120_v49 = vpop.permute.xlu0 %7119 }
0x3314   :  { %v14017_v44 = vpop.eup %14016 }
0x3315   :  { %v6724_v45 = vmul.f32 %v14017_v44, %v14015_v7 }
0x3317   :  { %13290 = vmatmul.mubr.msk.f32.vlgmr.msra.gmra.mrb[80].mxu1 %vm260_vm2, %v6724_v45 }
0x3318   :  { %13303 = vmatpush3.xpose.msk.msra.mxu1 %vm260_vm2, %v7042_v43  ;;  %13304 = vmatprep.mubr.msk.f32.mxu1 %vm14180_vm1, %v14179_v8 }
0x3319   :  { %13307 = vmatprep.subr.mxu1 %v14179_v8 }
0x331b   :  { %13305 = vmatmul.mubr.msk.f32.vlgmr.msra.gmra.mrb[82].mxu1 %vm260_vm2, %v7040_v48 }
0x331c   :  { %13308 = vmatpush3.xpose.msk.msra.mxu1 %vm260_vm2, %v7120_v49  ;;  %13309 = vmatprep.mubr.msk.f32.mxu1 %vm14180_vm1, %v14179_v8 }
0x331d   :  { %13317 = vmatprep.subr.mxu1 %v14179_v8 }
0x331f   :  { %13310 = vmatmul.mubr.msk.f32.vlgmr.msra.gmra.mrb[84].mxu1 %vm260_vm2, %v7118_v51 }
0x3320   :  { %13319 = vmatprep.mubr.msk.f32.mxu1 %vm14180_vm1, %v14179_v8 }
0x3342   :  { %v6705_v53 = vpop.xlane.xlu0 %6704 }
0x3343   :  { %v6709_v52 = vsub.f32 %v6621_v36, %v6705_v53 }
0x3345   :  { %v6711_v56 = vmul.f32 1.442695, %v6709_v52 }
0x3346   :  { %v6726_v57 = vpop.permute.xlu0 %6725 }
0x3347   :  { %14018 = vpow2.f32 %v6711_v56  ;;  %13283 = vmatpush3.msra.mxu0 %v6726_v57 }
0x3348   :  { %13292 = vmatprep.subr.mxu0 %v4246_v14 }
0x334a   :  { %v7218_v28 = vpop.permute.xlu0 %7217 }
0x334e   :  { %v7455_v30 = vpop.permute.xlu0 %7454 }
0x3351   :  { %v14019_v60 = vpop.eup %14018 }
0x3352   :  { %v6715_v61 = vsel %vm260_vm2, %v14019_v60, 0.0 }
0x3353   :  { %6716 = vadd.xlane.f32.xlu1 %v6715_v61 }
0x33e0   :  { %v6717_v63 = vpop.xlane.xlu1 %6716 }
0x33e1   :  { %14020 = vrcp.f32 %v6717_v63 }
0x33ea   :  { %v6873_v1 = vpop.f32.mrb[80].mxu1 }
0x33eb   :  { %v14021_v2 = vpop.eup %14020  ;;  %v13291_v3 = vpop.f32.mrb[81].mxu1 }
0x33ec   :  { %v6722_v50 = vmul.f32 %v14021_v2, %v14019_v60 }
0x33ee   :  { %13285 = vmatmul.mubr.msk.f32.vlgmr.msra.gmra.mrb[52].mxu0 %vm260_vm2, %v6722_v50  ;;  %v7113_v0 = vpop.f32.mrb[82].mxu1 }
0x33ef   :  { %v13306_v4 = vpop.f32.mrb[83].mxu1  ;;  %v7195_v6 = vsel %vm260_vm2, %v7113_v0, -inf  ;;  %13293 = vmatpush3.msra.mxu0 %v4246_v14 }
0x33f0   :  { %7196 = vmax.xlane.f32.xlu1 %v7195_v6  ;;  %13297 = vmatprep.subr.mxu0 %v4245_v15 }
0x33f2   :  { %v7191_v9 = vpop.f32.mrb[84].mxu1 }
0x33f3   :  { %v13311_v10 = vpop.f32.mrb[85].mxu1  ;;  %v7198_v11 = vsel %vm260_vm2, %v7191_v9, -inf }
0x33f4   :  { %7199 = vmax.xlane.f32.xlu1 %v7198_v11 }
0x347d   :  { %v7197_v16 = vpop.xlane.xlu1 %7196 }
0x347e   :  { %v7201_v62 = vsub.f32 %v7113_v0, %v7197_v16  ;;  %v4248_v0 = vld [vmem:[%s15608_s19 + $0x18] sm:$0xff] }
0x3480   :  { %v7203_v12 = vmul.f32 1.442695, %v7201_v62 }
0x3481   :  { %v7200_v17 = vpop.xlane.xlu1 %7199 }
0x3482   :  { %14022 = vpow2.f32 %v7203_v12  ;;  %v7202_v18 = vsub.f32 %v7191_v9, %v7200_v17 }
0x3484   :  { %v7205_v19 = vmul.f32 1.442695, %v7202_v18 }
0x3486   :  { %14024 = vpow2.f32 %v7205_v19 }
0x348c   :  { %v14023_v20 = vpop.eup %14022 }
0x348d   :  { %v7207_v21 = vsel %vm260_vm2, %v14023_v20, 0.0 }
0x348e   :  { %7208 = vadd.xlane.f32.xlu1 %v7207_v21 }
0x3490   :  { %v14025_v22 = vpop.eup %14024 }
0x3491   :  { %v7210_v13 = vsel %vm260_vm2, %v14025_v22, 0.0 }
0x3492   :  { %7211 = vadd.xlane.f32.xlu1 %v7210_v13 }
0x34a3   :  { %7293 = vrot.lane.b32.xlu1 %v14966_v31, %s14185_s11 }
0x34c1   :  { %v6797_v25 = vpop.f32.mrb[52].mxu0 }
0x34c2   :  { %v13286_v26 = vpop.f32.mrb[53].mxu0  ;;  %13294 = vmatprep.mubr.msk.f32.mxu0 %vm260_vm2, %v6797_v25 }
0x34c3   :  { %13295 = vmatmul.mubr.msk.f32.vlgmr.msra.gmra.mrb[54].mxu0 %vm260_vm2, %v6873_v1 }
0x34c4   :  { %13299 = vmatprep.mubr.msk.f32.mxu0 %vm260_vm2, %v15047_v34  ;;  %13298 = vmatpush3.msra.mxu0 %v4245_v15 }
0x34c5   :  { %13312 = vmatprep.subr.mxu0 %v14179_v8 }
0x34cb   :  { %13300 = vmatmul.mubr.msk.f32.vlgmr.msra.gmra.mrb[54].mxu0 %vm260_vm2, %v15038_v29  ;;  %v7533_v29 = vpop.permute.xlu0 %7532 }
0x34cc   :  { %13313 = vmatpush3.msra.mxu0 %v7218_v28  ;;  %13314 = vmatprep.mubr.msk.f32.mxu0 %vm14180_vm1, %v14179_v8 }
0x34cd   :  { %13322 = vmatprep.subr.mxu0 %v4247_v27 }
0x34cf   :  { %v7453_v37 = vpop.permute.xlu0 %7452 }
0x34d3   :  { %v7531_v5 = vpop.permute.xlu0 %7530 }
0x351b   :  { %v7209_v24 = vpop.xlane.xlu1 %7208 }
0x351c   :  { %14026 = vrcp.f32 %v7209_v24 }
0x351f   :  { %v7212_v59 = vpop.xlane.xlu1 %7211 }
0x3520   :  { %14028 = vrcp.f32 %v7212_v59 }
0x3523   :  { %v7294_v58 = vpop.permute.xlu1 %7293 }
0x3524   :  { %13318 = vmatpush3.msra.mxu1 %v7294_v58  ;;  %v4252_v58 = vld [vmem:[%s15610_s30] sm:$0xff] }
0x3525   :  { %13327 = vmatprep.subr.mxu1 %v14179_v8 }
0x3526   :  { %v14027_v32 = vpop.eup %14026 }
0x3527   :  { %v7214_v34 = vmul.f32 %v14027_v32, %v14023_v20 }
0x3529   :  { %13315 = vmatmul.mubr.msk.f32.vlgmr.msra.gmra.mrb[56].mxu0 %vm260_vm2, %v7214_v34  ;;  %v4254_v34 = vld [vmem:[%s15610_s30 + $0x10] sm:$0xff] }
0x352a   :  { %v14029_v35 = vpop.eup %14028  ;;  %13323 = vmatpush3.msra.mxu0 %v4247_v27 }
0x352b   :  { %v7216_v36 = vmul.f32 %v14029_v35, %v14025_v22  ;;  %13332 = vmatprep.subr.mxu0 %v14179_v8  ;;  %v4255_v35 = vld [vmem:[%s15610_s30 + $0x18] sm:$0xff] }
0x352d   :  { %13320 = vmatmul.mubr.msk.f32.vlgmr.msra.gmra.mrb[86].mxu1 %vm260_vm2, %v7216_v36  ;;  %v4257_v36 = vld [vmem:[%s15611_s28] sm:$0xff] }
0x352e   :  { %13328 = vmatpush3.xpose.msk.msra.mxu1 %vm260_vm2, %v7455_v30  ;;  %13329 = vmatprep.mubr.msk.f32.mxu1 %vm14180_vm1, %v14179_v8  ;;  %v4253_v30 = vld [vmem:[%s15610_s30 + $0x8] sm:$0xff] }
0x352f   :  { %13337 = vmatprep.subr.mxu1 %v14179_v8  ;;  %v13733_v32 = vpack.c.bf16 %v4253_v30, %v4252_v58  ;;  %v12330_v58 = vld [vmem:[%s14268_s6 + $0x28] sm:$0xff] }
0x3531   :  { %13330 = vmatmul.mubr.msk.f32.vlgmr.msra.gmra.mrb[88].mxu1 %vm260_vm2, %v7453_v37  ;;  %v4258_v37 = vld [vmem:[%s15611_s28 + $0x8] sm:$0xff] }
0x3532   :  { %13339 = vmatprep.mubr.msk.f32.mxu1 %vm14180_vm1, %v14179_v8 }
0x35fc   :  { %v7289_v38 = vpop.f32.mrb[56].mxu0 }
0x35fd   :  { %v13316_v33 = vpop.f32.mrb[57].mxu0  ;;  %13324 = vmatprep.mubr.msk.f32.mxu0 %vm260_vm2, %v7289_v38  ;;  %v4259_v38 = vld [vmem:[%s15611_s28 + $0x10] sm:$0xff] }
0x35fe   :  { %v13741_v33 = vpack.c.bf16 %v4258_v37, %v4257_v36 }
0x3600   :  { %v7365_v39 = vpop.f32.mrb[86].mxu1 }
0x3601   :  { %v13321_v7 = vpop.f32.mrb[87].mxu1  ;;  %13325 = vmatmul.mubr.msk.f32.vlgmr.msra.gmra.mrb[54].mxu0 %vm260_vm2, %v7365_v39  ;;  %v4260_v39 = vld [vmem:[%s15611_s28 + $0x18] sm:$0xff] }
0x3602   :  { %13333 = vmatpush3.xpose.msk.msra.mxu0 %vm260_vm2, %v7533_v29  ;;  %13334 = vmatprep.mubr.msk.f32.mxu0 %vm14180_vm1, %v14179_v8  ;;  %v13737_v29 = vpack.c.bf16 %v4255_v35, %v4254_v34  ;;  %v13745_v7 = vpack.c.bf16 %v4260_v39, %v4259_v38  ;;  %v12332_v34 = vld [vmem:[%s14268_s6 + $0x38] sm:$0xff] }
0x3603   :  { %13342 = vmatprep.subr.mxu0 %v14179_v8 }
0x3604   :  { %v7526_v40 = vpop.f32.mrb[88].mxu1 }
0x3605   :  { %v13331_v41 = vpop.f32.mrb[89].mxu1  ;;  %13335 = vmatmul.mubr.msk.f32.vlgmr.msra.gmra.mrb[58].mxu0 %vm260_vm2, %v7531_v5  ;;  %v7608_v42 = vsel %vm260_vm2, %v7526_v40, -inf  ;;  %v4261_v5 = vld [vmem:[%s15611_s28 + $0x20] sm:$0xff] }
0x3606   :  { %7609 = vmax.xlane.f32.xlu1 %v7608_v42  ;;  %13344 = vmatprep.mubr.msk.f32.mxu0 %vm14180_vm1, %v14179_v8 }
0x3693   :  { %v7610_v43 = vpop.xlane.xlu1 %7609 }
0x3694   :  { %v7614_v44 = vsub.f32 %v7526_v40, %v7610_v43  ;;  %v4262_v40 = vld [vmem:[%s15611_s28 + $0x28] sm:$0xff] }
0x3695   :  { %v13749_v41 = vpack.c.bf16 %v4262_v40, %v4261_v5  ;;  %v12327_v5 = vld [vmem:[%s14358_s20] ss:$0 sm:$0xff] }
0x3696   :  { %v7616_v45 = vmul.f32 1.442695, %v7614_v44 }
0x3698   :  { %14030 = vpow2.f32 %v7616_v45 }
0x36a2   :  { %v14031_v53 = vpop.eup %14030 }
0x36a3   :  { %v7620_v52 = vsel %vm260_vm2, %v14031_v53, 0.0 }
0x36d8   :  { %v7604_v48 = vpop.f32.mrb[58].mxu0 }
0x36d9   :  { %v13336_v49 = vpop.f32.mrb[59].mxu0  ;;  %v7611_v51 = vsel %vm260_vm2, %v7604_v48, -inf }
0x36da   :  { %7612 = vmax.xlane.f32.xlu0 %v7611_v51 }
0x36de   :  { %7621 = vadd.xlane.f32.xlu0 %v7620_v52 }
0x36f4   :  { %7630 = vrot.lane.b32.xlu0 %v14962_v23, %s14189_s22 }
0x3767   :  { %v7613_v56 = vpop.xlane.xlu0 %7612 }
0x3768   :  { %v7615_v57 = vsub.f32 %v7604_v48, %v7613_v56 }
0x376a   :  { %v7618_v60 = vmul.f32 1.442695, %v7615_v57 }
0x376b   :  { %v7622_v61 = vpop.xlane.xlu0 %7621 }
0x376c   :  { %14032 = vpow2.f32 %v7618_v60  ;;  %v12320_v60 = vld [vmem:[%s15613_s2] ss:$0 sm:$0xff] }
0x376d   :  { %14034 = vrcp.f32 %v7622_v61 }
0x376f   :  { %v7631_v63 = vpop.permute.xlu0 %7630 }
0x3770   :  { %13338 = vmatpush3.msra.mxu1 %v7631_v63 }
0x3771   :  { %13734 = vmatprep.subr.bf16.mxu1 %v13733_v32 }
0x3776   :  { %v14033_v1 = vpop.eup %14032 }
0x3777   :  { %v14035_v2 = vpop.eup %14034  ;;  %v7623_v3 = vsel %vm260_vm2, %v14033_v1, 0.0 }
0x3778   :  { %v7627_v50 = vmul.f32 %v14035_v2, %v14031_v53  ;;  %7624 = vadd.xlane.f32.xlu1 %v7623_v3  ;;  %v12319_v53 = vld [vmem:[%s15612_s1] ss:$0 sm:$0xff]  ;;  %v4263_v3 = vld [vmem:[%s15611_s28 + $0x30] sm:$0xff] }
0x377a   :  { %13340 = vmatmul.mubr.msk.f32.vlgmr.msra.gmra.mrb[90].mxu1 %vm260_vm2, %v7627_v50  ;;  %v4264_v50 = vld [vmem:[%s15611_s28 + $0x38] sm:$0xff] }
0x377b   :  { %13736 = vmatpush3.bf16.msra.mxu1 %v13733_v32  ;;  %v12331_v32 = vld [vmem:[%s14268_s6 + $0x30] sm:$0xff] }
0x377c   :  { %13738 = vmatprep.subr.bf16.mxu1 %v13737_v29  ;;  %v13761_v35 = vpack.c.bf16 %v12332_v34, %v12331_v32 }
0x377f   :  { %13740 = vmatpush3.bf16.msra.mxu1 %v13737_v29 }
0x3789   :  { %7706 = vrot.lane.b32.xlu1 %v14966_v31, %s14189_s22  ;;  %v12318_v31 = vld [vmem:[%s15609_s24] ss:$0 sm:$0xff] }
0x3805   :  { %v7625_v23 = vpop.xlane.xlu1 %7624 }
0x3806   :  { %14036 = vrcp.f32 %v7625_v23  ;;  %v13753_v23 = vpack.c.bf16 %v4264_v50, %v4263_v3 }
0x3809   :  { %v7707_v4 = vpop.permute.xlu1 %7706 }
0x380a   :  { %13343 = vmatpush3.msra.mxu0 %v7707_v4 }
0x380b   :  { %13347 = vmatprep.subr.mxu0 %v4248_v0 }
0x3810   :  { %v14037_v6 = vpop.eup %14036 }
0x3811   :  { %v7629_v9 = vmul.f32 %v14037_v6, %v14033_v1 }
0x3813   :  { %13345 = vmatmul.mubr.msk.f32.vlgmr.msra.gmra.mrb[60].mxu0 %vm260_vm2, %v7629_v9 }
0x3814   :  { %13348 = vmatpush3.msra.mxu0 %v4248_v0  ;;  %v12321_v0 = vld [vmem:[%s15614_s26] ss:$0 sm:$0xff] }
0x3815   :  { %13742 = vmatprep.subr.bf16.mxu0 %v13741_v33 }
0x384d   :  { %v7702_v10 = vpop.f32.mrb[90].mxu1 }
0x384e   :  { %v13341_v11 = vpop.f32.mrb[91].mxu1  ;;  %13349 = vmatprep.mubr.msk.f32.mxu0 %vm260_vm2, %v7702_v10 }
0x38e6   :  { %v7778_v14 = vpop.f32.mrb[60].mxu0 }
0x38e7   :  { %v13346_v15 = vpop.f32.mrb[61].mxu0  ;;  %13350 = vmatmul.mubr.msk.f32.vlgmr.msra.gmra.mrb[54].mxu0 %vm260_vm2, %v7778_v14 }
0x38e8   :  { %13744 = vmatpush3.bf16.msra.mxu0 %v13741_v33  ;;  %v12324_v15 = vld [vmem:[%s14353_s12] ss:$0 sm:$0xff] }
0x38e9   :  { %13746 = vmatprep.subr.bf16.mxu0 %v13745_v7 }
0x38ec   :  { %13748 = vmatpush3.bf16.msra.mxu0 %v13745_v7 }
0x38ed   :  { %13750 = vmatprep.subr.bf16.mxu0 %v13749_v41 }
0x38f0   :  { %13752 = vmatpush3.bf16.msra.mxu0 %v13749_v41 }
0x38f1   :  { %13754 = vmatprep.subr.bf16.mxu0 %v13753_v23 }
0x38f4   :  { %13756 = vmatpush3.bf16.msra.mxu0 %v13753_v23 }
0x38f5   :  { %13403 = vmatprep.subr.mxu0 %v14179_v8 }
0x39ba   :  { %v13351_v16 = vpop.f32.mrb[54].mxu0 }
0x39bb   :  { %v7872_v62 = vadd.f32 %v13351_v16, %v12318_v31  ;;  %v7854_v12 = vpop.f32.mrb[55].mxu0 }
0x39bc   :  { %v7871_v17 = vadd.f32 %v12318_v31, %v7854_v12 }
0x39bd   :  { %v7874_v18 = vadd.f32 %v7872_v62, %v14979_v55 }
0x39be   :  { %v7873_v19 = vadd.f32 %v7871_v17, %v14977_v54 }
0x39bf   :  { %v7878_v20 = vsel %vm175_vm0, %v7874_v18, 0.0 }
0x39c0   :  { %7879 = vadd.xlane.f32.xlu0 %v7878_v20  ;;  %v7875_v21 = vsel %vm175_vm0, %v7873_v19, 0.0 }
0x39c1   :  { %7876 = vadd.xlane.f32.xlu1 %v7875_v21 }
0x3a4d   :  { %v7880_v22 = vpop.xlane.xlu0 %7879 }
0x3a4e   :  { %v7882_v13 = vmul.f32 0.03125, %v7880_v22  ;;  %v7877_v25 = vpop.xlane.xlu1 %7876 }
0x3a4f   :  { %v7881_v26 = vmul.f32 0.03125, %v7877_v25 }
0x3a50   :  { %v7884_v27 = vsub.f32 %v7874_v18, %v7882_v13 }
0x3a51   :  { %v7883_v28 = vsub.f32 %v7873_v19, %v7881_v26 }
0x3a52   :  { %v7886_v24 = vmul.f32 %v7884_v27, %v7884_v27 }
0x3a53   :  { %v7885_v55 = vmul.f32 %v7883_v28, %v7883_v28 }
0x3a54   :  { %v7890_v54 = vsel %vm175_vm0, %v7886_v24, 0.0 }
0x3a55   :  { %7891 = vadd.xlane.f32.xlu1 %v7890_v54  ;;  %v7887_v59 = vsel %vm175_vm0, %v7885_v55, 0.0 }
0x3a56   :  { %7888 = vadd.xlane.f32.xlu0 %v7887_v59  ;;  %v12329_v59 = vld [vmem:[%s14268_s6 + $0x20] sm:$0xff]  ;;  %s15615_s6 = smov 40  }
0x3a57   :  { %v13757_v30 = vpack.c.bf16 %v12330_v58, %v12329_v59 }
0x3a59   :  { %13758 = vmatprep.subr.bf16.mxu1 %v13757_v30 }
0x3ae2   :  { %v7892_v42 = vpop.xlane.xlu1 %7891 }
0x3ae3   :  { %v7894_v43 = vmul.f32 0.03125, %v7892_v42  ;;  %v7889_v44 = vpop.xlane.xlu0 %7888 }
0x3ae4   :  { %v7893_v45 = vmul.f32 0.03125, %v7889_v44 }
0x3ae5   :  { %v7896_v48 = vadd.f32 1e-05, %v7894_v43  ;;  %v12328_v43 = vld [vmem:[%s14363_s27] ss:$0 sm:$0xff] }
0x3ae6   :  { %v7895_v49 = vadd.f32 1e-05, %v7893_v45 }
0x3ae7   :  { %14038 = vrsqrt.f32 %v7896_v48 }
0x3ae8   :  { %14040 = vrsqrt.f32 %v7895_v49 }
0x3af1   :  { %v14039_v51 = vpop.eup %14038 }
0x3af2   :  { %v14041_v52 = vpop.eup %14040  ;;  %v7900_v56 = vmul.f32 %v14039_v51, %v7884_v27  ;;  %v12374_v51 = vld [vmem:[%s15599_s9 + $0x1] ss:$0 sm:$0xff] }
0x3af3   :  { %v7899_v57 = vmul.f32 %v14041_v52, %v7883_v28 }
0x3af4   :  { %v7908_v61 = vmul.f32 %v12319_v53, %v7900_v56 }
0x3af5   :  { %v7907_v63 = vmul.f32 %v12319_v53, %v7899_v57 }
0x3af6   :  { %v7916_v2 = vadd.f32 %v12320_v60, %v7908_v61 }
0x3af7   :  { %v7915_v1 = vadd.f32 %v12320_v60, %v7907_v63 }
0x3af9   :  { %13360 = vmatprep.mubr.msk.f32.mxu1 %vm175_vm0, %v7915_v1 }
0x3afa   :  { %13361 = vmatmul.mubr.msk.f32.vlgmr.msra.gmra.mrb[92].mxu1 %vm175_vm0, %v7916_v2 }
0x3afb   :  { %13760 = vmatpush3.bf16.msra.mxu1 %v13757_v30 }
0x3afc   :  { %13762 = vmatprep.subr.bf16.mxu1 %v13761_v35 }
0x3aff   :  { %13764 = vmatpush3.bf16.msra.mxu1 %v13761_v35 }
0x3b00   :  { %13393 = vmatprep.subr.mxu1 %v14179_v8 }
0x3bcd   :  { %v13362_v4 = vpop.f32.mrb[92].mxu1 }
0x3bce   :  { %v8001_v6 = vadd.f32 %v13362_v4, %v12321_v0  ;;  %v7995_v9 = vpop.f32.mrb[93].mxu1 }
0x3bcf   :  { %v7996_v10 = vadd.f32 %v12321_v0, %v7995_v9 }
0x3bd0   :  { %v8005_v14 = vmax.f32 %v8001_v6, 0.0 }
0x3bd1   :  { %v8004_v11 = vmax.f32 %v7996_v10, 0.0 }
0x3bd3   :  { %13379 = vmatprep.mubr.msk.f32.mxu0 %vm2052_vm3, %v8004_v11 }
0x3bd4   :  { %13380 = vmatmul.mubr.msk.f32.vlgmr.msra.gmra.mrb[62].mxu0 %vm2052_vm3, %v8005_v14 }
0x3bd5   :  { %13405 = vmatprep.mubr.msk.f32.mxu0 %vm14180_vm1, %v14179_v8 }
0x3ca7   :  { %v13381_v31 = vpop.f32.mrb[62].mxu0 }
0x3ca8   :  { %v8090_v16 = vadd.f32 %v13381_v31, %v12324_v15  ;;  %v8084_v62 = vpop.f32.mrb[63].mxu0 }
0x3ca9   :  { %v8085_v12 = vadd.f32 %v12324_v15, %v8084_v62 }
0x3caa   :  { %v8094_v17 = vadd.f32 %v8090_v16, %v7916_v2 }
0x3cab   :  { %v8093_v18 = vadd.f32 %v8085_v12, %v7915_v1 }
0x3cac   :  { %v8098_v19 = vsel %vm175_vm0, %v8094_v17, 0.0 }
0x3cad   :  { %8099 = vadd.xlane.f32.xlu1 %v8098_v19  ;;  %v8095_v20 = vsel %vm175_vm0, %v8093_v18, 0.0 }
0x3cae   :  { %8096 = vadd.xlane.f32.xlu0 %v8095_v20 }
0x3d3a   :  { %v8100_v21 = vpop.xlane.xlu1 %8099 }
0x3d3b   :  { %v8102_v22 = vmul.f32 0.03125, %v8100_v21  ;;  %v8097_v13 = vpop.xlane.xlu0 %8096 }
0x3d3c   :  { %v8101_v25 = vmul.f32 0.03125, %v8097_v13 }
0x3d3d   :  { %v8104_v26 = vsub.f32 %v8094_v17, %v8102_v22 }
0x3d3e   :  { %v8103_v27 = vsub.f32 %v8093_v18, %v8101_v25 }
0x3d3f   :  { %v8106_v28 = vmul.f32 %v8104_v26, %v8104_v26 }
0x3d40   :  { %v8105_v24 = vmul.f32 %v8103_v27, %v8103_v27 }
0x3d41   :  { %v8110_v55 = vsel %vm175_vm0, %v8106_v28, 0.0 }
0x3d42   :  { %8111 = vadd.xlane.f32.xlu1 %v8110_v55  ;;  %v8107_v54 = vsel %vm175_vm0, %v8105_v24, 0.0 }
0x3d43   :  { %8108 = vadd.xlane.f32.xlu0 %v8107_v54 }
0x3dcf   :  { %v8112_v29 = vpop.xlane.xlu1 %8111 }
0x3dd0   :  { %v8114_v36 = vmul.f32 0.03125, %v8112_v29  ;;  %v8109_v37 = vpop.xlane.xlu0 %8108 }
0x3dd1   :  { %v8113_v38 = vmul.f32 0.03125, %v8109_v37 }
0x3dd2   :  { %v8116_v33 = vadd.f32 1e-05, %v8114_v36 }
0x3dd3   :  { %v8115_v39 = vadd.f32 1e-05, %v8113_v38 }
0x3dd4   :  { %14042 = vrsqrt.f32 %v8116_v33 }
0x3dd5   :  { %14044 = vrsqrt.f32 %v8115_v39 }
0x3dde   :  { %v14043_v7 = vpop.eup %14042 }
0x3ddf   :  { %v14045_v40 = vpop.eup %14044  ;;  %v8120_v41 = vmul.f32 %v14043_v7, %v8104_v26 }
0x3de0   :  { %v8119_v42 = vmul.f32 %v14045_v40, %v8103_v27 }
0x3de1   :  { %v8128_v44 = vmul.f32 %v12327_v5, %v8120_v41 }
0x3de2   :  { %v8127_v45 = vmul.f32 %v12327_v5, %v8119_v42 }
0x3de3   :  { %v15177_v49 = vadd.f32 %v12328_v43, %v8128_v44 }
0x3de4   :  { %v15175_v48 = vadd.f32 %v12328_v43, %v8127_v45 }
0x3de6   :  { %13390 = vmatprep.mubr.msk.f32.mxu1 %vm175_vm0, %v15175_v48 }
0x3de7   :  { %13391 = vmatmul.mubr.msk.f32.vlgmr.msra.gmra.mrb[94].mxu1 %vm175_vm0, %v15177_v49 }
0x3de8   :  { %13395 = vmatprep.mubr.msk.f32.mxu1 %vm14180_vm1, %v14179_v8 }
0x3eba   :  { %v13392_v53 = vpop.f32.mrb[94].mxu1 }
0x3ebb   :  { %v15186_v52 = vadd.f32 %v13392_v53, %v12374_v51  ;;  %v8280_v56 = vpop.f32.mrb[95].mxu1 }
0x3ebc   :  { %v15188_v57 = vadd.f32 %v12374_v51, %v8280_v56 }
0x3ebd   :  { %8367 = vrot.lane.b32.xlu1 %v15186_v52, %s14181_s0 }
0x3ebe   :  { %8290 = vrot.lane.b32.xlu0 %v15188_v57, %s14181_s0 }
0x3f2f   :  { %v8368_v61 = vpop.permute.xlu1 %8367 }
0x3f30   :  { %v8291_v60 = vpop.permute.xlu0 %8290 }
0x3f31   :  { %13394 = vmatpush3.xpose.msk.msra.mxu1 %vm260_vm2, %v8291_v60 }
0x3f32   :  { %13398 = vmatprep.subr.mxu1 %v14179_v8 }
0x3f34   :  { %13396 = vmatmul.mubr.msk.f32.vlgmr.msra.gmra.mrb[96].mxu1 %vm260_vm2, %v15188_v57 }
0x3f35   :  { %13399 = vmatpush3.xpose.msk.msra.mxu1 %vm260_vm2, %v8368_v61  ;;  %13400 = vmatprep.mubr.msk.f32.mxu1 %vm14180_vm1, %v14179_v8 }
0x3f36   :  { %13408 = vmatprep.subr.mxu1 %v14179_v8 }
0x3f38   :  { %13401 = vmatmul.mubr.msk.f32.vlgmr.msra.gmra.mrb[98].mxu1 %vm260_vm2, %v15186_v52 }
0x3f39   :  { %13410 = vmatprep.mubr.msk.f32.mxu1 %vm14180_vm1, %v14179_v8 }
0x4007   :  { %v8362_v63 = vpop.f32.mrb[96].mxu1 }
0x4008   :  { %v13397_v1 = vpop.f32.mrb[97].mxu1  ;;  %v8443_v10 = vsel %vm260_vm2, %v8362_v63, -inf }
0x400b   :  { %v8439_v2 = vpop.f32.mrb[98].mxu1 }
0x400c   :  { %v13402_v3 = vpop.f32.mrb[99].mxu1  ;;  %v8446_v50 = vsel %vm260_vm2, %v8439_v2, -inf }
0x400d   :  { %8447 = vmax.xlane.f32.xlu1 %v8446_v50 }
0x401e   :  { %8697 = vrot.lane.b32.xlu1 %v15186_v52, %s14184_s10 }
0x4022   :  { %8695 = vrot.lane.b32.xlu1 %v15186_v52, %s14183_s7 }
0x409a   :  { %v8448_v23 = vpop.xlane.xlu1 %8447 }
0x409b   :  { %v8450_v0 = vsub.f32 %v8439_v2, %v8448_v23 }
0x409d   :  { %v8453_v4 = vmul.f32 1.442695, %v8450_v0 }
0x409e   :  { %v8698_v31 = vpop.permute.xlu1 %8697 }
0x409f   :  { %14046 = vpow2.f32 %v8453_v4 }
0x40a2   :  { %v8696_v62 = vpop.permute.xlu1 %8695 }
0x40a9   :  { %v14047_v6 = vpop.eup %14046 }
0x40aa   :  { %v8458_v9 = vsel %vm260_vm2, %v14047_v6, 0.0 }
0x40ab   :  { %8459 = vadd.xlane.f32.xlu0 %v8458_v9 }
0x40c1   :  { %8541 = vrot.lane.b32.xlu0 %v15186_v52, %s14182_s5 }
0x40e0   :  { %8444 = vmax.xlane.f32.xlu0 %v8443_v10 }
0x40f6   :  { %8465 = vrot.lane.b32.xlu0 %v15188_v57, %s14182_s5 }
0x40fa   :  { %8617 = vrot.lane.b32.xlu0 %v15188_v57, %s14183_s7 }
0x4138   :  { %v8460_v11 = vpop.xlane.xlu0 %8459 }
0x4139   :  { %14048 = vrcp.f32 %v8460_v11  ;;  %v12335_v11 = vld [vmem:[%s15600_s13 + $0x28] sm:$0xff] }
0x413c   :  { %v8542_v14 = vpop.permute.xlu0 %8541 }
0x413d   :  { %13409 = vmatpush3.msra.mxu1 %v8542_v14  ;;  %v12334_v14 = vld [vmem:[%s15600_s13 + $0x20] sm:$0xff] }
0x413e   :  { %13418 = vmatprep.subr.mxu1 %v14179_v8 }
0x4143   :  { %v14049_v15 = vpop.eup %14048 }
0x4144   :  { %v8464_v16 = vmul.f32 %v14049_v15, %v14047_v6 }
0x4146   :  { %13411 = vmatmul.mubr.msk.f32.vlgmr.msra.gmra.mrb[100].mxu1 %vm260_vm2, %v8464_v16 }
0x4147   :  { %13419 = vmatpush3.xpose.msk.msra.mxu1 %vm260_vm2, %v8698_v31  ;;  %13420 = vmatprep.mubr.msk.f32.mxu1 %vm14180_vm1, %v14179_v8 }
0x4148   :  { %13428 = vmatprep.subr.mxu1 %v14179_v8 }
0x414a   :  { %13421 = vmatmul.mubr.msk.f32.vlgmr.msra.gmra.mrb[102].mxu1 %vm260_vm2, %v8696_v62 }
0x414b   :  { %13430 = vmatprep.mubr.msk.f32.mxu1 %vm14180_vm1, %v14179_v8 }
0x416d   :  { %v8445_v12 = vpop.xlane.xlu0 %8444 }
0x416e   :  { %v8449_v17 = vsub.f32 %v8362_v63, %v8445_v12 }
0x4170   :  { %v8451_v18 = vmul.f32 1.442695, %v8449_v17 }
0x4171   :  { %v8466_v19 = vpop.permute.xlu0 %8465 }
0x4172   :  { %14050 = vpow2.f32 %v8451_v18  ;;  %13404 = vmatpush3.msra.mxu0 %v8466_v19 }
0x4173   :  { %13413 = vmatprep.subr.mxu0 %v14179_v8 }
0x4175   :  { %v8618_v24 = vpop.permute.xlu0 %8617 }
0x417c   :  { %v14051_v20 = vpop.eup %14050 }
0x417d   :  { %v8455_v21 = vsel %vm260_vm2, %v14051_v20, 0.0 }
0x417e   :  { %8456 = vadd.xlane.f32.xlu1 %v8455_v21 }
0x418f   :  { %8619 = vrot.lane.b32.xlu1 %v15188_v57, %s14184_s10 }
0x420b   :  { %v8457_v22 = vpop.xlane.xlu1 %8456 }
0x420c   :  { %14052 = vrcp.f32 %v8457_v22 }
0x420f   :  { %v8620_v26 = vpop.permute.xlu1 %8619 }
0x4216   :  { %v14053_v13 = vpop.eup %14052 }
0x4217   :  { %v8462_v25 = vmul.f32 %v14053_v13, %v14051_v20 }
0x4219   :  { %13406 = vmatmul.mubr.msk.f32.vlgmr.msra.gmra.mrb[64].mxu0 %vm260_vm2, %v8462_v25  ;;  %v15233_v27 = vpop.f32.mrb[100].mxu1  ;;  %v12336_v25 = vld [vmem:[%s15600_s13 + $0x30] sm:$0xff] }
0x421a   :  { %13414 = vmatpush3.xpose.msk.msra.mxu0 %vm260_vm2, %v8620_v26  ;;  %v13412_v28 = vpop.f32.mrb[101].mxu1  ;;  %13415 = vmatprep.mubr.msk.f32.mxu0 %vm14180_vm1, %v14179_v8 }
0x421b   :  { %13423 = vmatprep.subr.mxu0 %v14179_v8 }
0x421d   :  { %13416 = vmatmul.mubr.msk.f32.vlgmr.msra.gmra.mrb[66].mxu0 %vm260_vm2, %v8618_v24  ;;  %v8769_v55 = vpop.f32.mrb[102].mxu1 }
0x421e   :  { %v13422_v54 = vpop.f32.mrb[103].mxu1  ;;  %v8776_v59 = vsel %vm260_vm2, %v8769_v55, -inf  ;;  %13425 = vmatprep.mubr.msk.f32.mxu0 %vm14180_vm1, %v14179_v8 }
0x421f   :  { %8777 = vmax.xlane.f32.xlu1 %v8776_v59 }
0x4230   :  { %9111 = vrot.lane.b32.xlu1 %v15188_v57, %s14185_s11 }
0x4234   :  { %9109 = vrot.lane.b32.xlu1 %v15188_v57, %s14187_s16 }
0x4238   :  { %9187 = vrot.lane.b32.xlu1 %v15186_v52, %s14187_s16 }
0x42ac   :  { %v8778_v58 = vpop.xlane.xlu1 %8777 }
0x42ad   :  { %v8780_v30 = vsub.f32 %v8769_v55, %v8778_v58 }
0x42af   :  { %v8783_v32 = vmul.f32 1.442695, %v8780_v30 }
0x42b0   :  { %v9112_v5 = vpop.permute.xlu1 %9111 }
0x42b1   :  { %14054 = vpow2.f32 %v8783_v32 }
0x42b4   :  { %v9110_v42 = vpop.permute.xlu1 %9109 }
0x42b8   :  { %v9188_v44 = vpop.permute.xlu1 %9187 }
0x42bb   :  { %v14055_v34 = vpop.eup %14054 }
0x42bc   :  { %v8788_v35 = vsel %vm260_vm2, %v14055_v34, 0.0 }
0x42bd   :  { %8789 = vadd.xlane.f32.xlu0 %v8788_v35 }
0x42d3   :  { %8871 = vrot.lane.b32.xlu0 %v15186_v52, %s14186_s15 }
0x42d7   :  { %9189 = vrot.lane.b32.xlu0 %v15186_v52, %s14185_s11 }
0x42ec   :  { %v15254_v29 = vpop.f32.mrb[64].mxu0 }
0x42ed   :  { %v13407_v36 = vpop.f32.mrb[65].mxu0 }
0x42f0   :  { %v8691_v37 = vpop.f32.mrb[66].mxu0 }
0x42f1   :  { %v13417_v38 = vpop.f32.mrb[67].mxu0  ;;  %v8773_v33 = vsel %vm260_vm2, %v8691_v37, -inf }
0x42f6   :  { %8774 = vmax.xlane.f32.xlu0 %v8773_v33 }
0x430c   :  { %8795 = vrot.lane.b32.xlu0 %v15188_v57, %s14186_s15 }
0x4310   :  { %9287 = vrot.lane.b32.xlu0 %v15188_v57, %s14188_s18 }
0x4314   :  { %9524 = vrot.lane.b32.xlu0 %v15188_v57, %s14189_s22 }
0x4318   :  { %9602 = vrot.lane.b32.xlu0 %v15186_v52, %s14189_s22 }
0x431c   :  { %9522 = vrot.lane.b32.xlu0 %v15188_v57, %s14190_s23 }
0x4320   :  { %9600 = vrot.lane.b32.xlu0 %v15186_v52, %s14190_s23 }
0x434a   :  { %v8790_v39 = vpop.xlane.xlu0 %8789 }
0x434b   :  { %14056 = vrcp.f32 %v8790_v39 }
0x434e   :  { %v8872_v7 = vpop.permute.xlu0 %8871 }
0x434f   :  { %13429 = vmatpush3.msra.mxu1 %v8872_v7 }
0x4350   :  { %13443 = vmatprep.subr.mxu1 %v14179_v8 }
0x4352   :  { %v9190_v43 = vpop.permute.xlu0 %9189 }
0x4355   :  { %v14057_v40 = vpop.eup %14056 }
0x4356   :  { %v8794_v41 = vmul.f32 %v14057_v40, %v14055_v34 }
0x4358   :  { %13431 = vmatmul.mubr.msk.f32.vlgmr.msra.gmra.mrb[104].mxu1 %vm260_vm2, %v8794_v41 }
0x4359   :  { %13444 = vmatpush3.xpose.msk.msra.mxu1 %vm260_vm2, %v9112_v5  ;;  %13445 = vmatprep.mubr.msk.f32.mxu1 %vm14180_vm1, %v14179_v8 }
0x435a   :  { %13448 = vmatprep.subr.mxu1 %v14179_v8 }
0x435c   :  { %13446 = vmatmul.mubr.msk.f32.vlgmr.msra.gmra.mrb[106].mxu1 %vm260_vm2, %v9110_v42 }
0x435d   :  { %13449 = vmatpush3.xpose.msk.msra.mxu1 %vm260_vm2, %v9190_v43  ;;  %13450 = vmatprep.mubr.msk.f32.mxu1 %vm14180_vm1, %v14179_v8 }
0x435e   :  { %13458 = vmatprep.subr.mxu1 %v14179_v8 }
0x4360   :  { %13451 = vmatmul.mubr.msk.f32.vlgmr.msra.gmra.mrb[108].mxu1 %vm260_vm2, %v9188_v44 }
0x4361   :  { %13460 = vmatprep.mubr.msk.f32.mxu1 %vm14180_vm1, %v14179_v8 }
0x4383   :  { %v8775_v45 = vpop.xlane.xlu0 %8774 }
0x4384   :  { %v8779_v51 = vsub.f32 %v8691_v37, %v8775_v45 }
0x4386   :  { %v8781_v53 = vmul.f32 1.442695, %v8779_v51 }
0x4387   :  { %v8796_v56 = vpop.permute.xlu0 %8795 }
0x4388   :  { %14058 = vpow2.f32 %v8781_v53  ;;  %13424 = vmatpush3.msra.mxu0 %v8796_v56 }
0x4389   :  { %13433 = vmatprep.subr.mxu0 %v12335_v11 }
0x438b   :  { %v9288_v26 = vpop.permute.xlu0 %9287 }
0x438f   :  { %v9525_v54 = vpop.permute.xlu0 %9524 }
0x4392   :  { %v14059_v60 = vpop.eup %14058 }
0x4393   :  { %v8785_v61 = vsel %vm260_vm2, %v14059_v60, 0.0 }
0x4394   :  { %8786 = vadd.xlane.f32.xlu1 %v8785_v61 }
0x4421   :  { %v8787_v63 = vpop.xlane.xlu1 %8786 }
0x4422   :  { %14060 = vrcp.f32 %v8787_v63 }
0x442b   :  { %v8943_v1 = vpop.f32.mrb[104].mxu1 }
0x442c   :  { %v14061_v2 = vpop.eup %14060  ;;  %v13432_v3 = vpop.f32.mrb[105].mxu1 }
0x442d   :  { %v8792_v50 = vmul.f32 %v14061_v2, %v14059_v60 }
0x442f   :  { %13426 = vmatmul.mubr.msk.f32.vlgmr.msra.gmra.mrb[68].mxu0 %vm260_vm2, %v8792_v50  ;;  %v9183_v23 = vpop.f32.mrb[106].mxu1 }
0x4430   :  { %v13447_v0 = vpop.f32.mrb[107].mxu1  ;;  %v9265_v4 = vsel %vm260_vm2, %v9183_v23, -inf  ;;  %13434 = vmatpush3.msra.mxu0 %v12335_v11  ;;  %v12346_v11 = vld [vmem:[%s15601_s17 + $0x20] sm:$0xff] }
0x4431   :  { %9266 = vmax.xlane.f32.xlu1 %v9265_v4  ;;  %13438 = vmatprep.subr.mxu0 %v12334_v14 }
0x4433   :  { %v9261_v6 = vpop.f32.mrb[108].mxu1 }
0x4434   :  { %v13452_v9 = vpop.f32.mrb[109].mxu1  ;;  %v9268_v10 = vsel %vm260_vm2, %v9261_v6, -inf }
0x4435   :  { %9269 = vmax.xlane.f32.xlu1 %v9268_v10 }
0x44be   :  { %v9267_v15 = vpop.xlane.xlu1 %9266 }
0x44bf   :  { %v9271_v31 = vsub.f32 %v9183_v23, %v9267_v15  ;;  %v12337_v23 = vld [vmem:[%s15600_s13 + $0x38] sm:$0xff]  ;;  %v12348_v15 = vld [vmem:[%s15601_s17 + $0x30] sm:$0xff] }
0x44c1   :  { %v9273_v16 = vmul.f32 1.442695, %v9271_v31  ;;  %v12349_v31 = vld [vmem:[%s15601_s17 + $0x38] sm:$0xff] }
0x44c2   :  { %v9270_v62 = vpop.xlane.xlu1 %9269 }
0x44c3   :  { %14062 = vpow2.f32 %v9273_v16  ;;  %v9272_v12 = vsub.f32 %v9261_v6, %v9270_v62  ;;  %v13777_v16 = vpack.c.bf16 %v12349_v31, %v12348_v15 }
0x44c5   :  { %v9275_v17 = vmul.f32 1.442695, %v9272_v12 }
0x44c7   :  { %14064 = vpow2.f32 %v9275_v17  ;;  %v12409_v17 = vld [vmem:[%s15602_s21 + $0x1] ss:$0 sm:$0xff] }
0x44cd   :  { %v14063_v18 = vpop.eup %14062 }
0x44ce   :  { %v9277_v19 = vsel %vm260_vm2, %v14063_v18, 0.0 }
0x44cf   :  { %9278 = vadd.xlane.f32.xlu1 %v9277_v19 }
0x44d1   :  { %v14065_v20 = vpop.eup %14064 }
0x44d2   :  { %v9280_v21 = vsel %vm260_vm2, %v14065_v20, 0.0 }
0x44d3   :  { %9281 = vadd.xlane.f32.xlu1 %v9280_v21 }
0x44e4   :  { %9363 = vrot.lane.b32.xlu1 %v15186_v52, %s14188_s18 }
0x4502   :  { %v8867_v22 = vpop.f32.mrb[68].mxu0 }
0x4503   :  { %v13427_v13 = vpop.f32.mrb[69].mxu0  ;;  %13435 = vmatprep.mubr.msk.f32.mxu0 %vm260_vm2, %v8867_v22 }
0x4504   :  { %13436 = vmatmul.mubr.msk.f32.vlgmr.msra.gmra.mrb[70].mxu0 %vm260_vm2, %v8943_v1 }
0x4505   :  { %13440 = vmatprep.mubr.msk.f32.mxu0 %vm260_vm2, %v15254_v29  ;;  %13439 = vmatpush3.msra.mxu0 %v12334_v14  ;;  %v12347_v14 = vld [vmem:[%s15601_s17 + $0x28] sm:$0xff] }
0x4506   :  { %13453 = vmatprep.subr.mxu0 %v14179_v8 }
0x450c   :  { %13441 = vmatmul.mubr.msk.f32.vlgmr.msra.gmra.mrb[70].mxu0 %vm260_vm2, %v15233_v27  ;;  %v9603_v27 = vpop.permute.xlu0 %9602 }
0x450d   :  { %13454 = vmatpush3.msra.mxu0 %v9288_v26  ;;  %13455 = vmatprep.mubr.msk.f32.mxu0 %vm14180_vm1, %v14179_v8  ;;  %v12415_v26 = vld [vmem:[%s15603_s25 + $0x1] ss:$0 sm:$0xff] }
0x450e   :  { %13463 = vmatprep.subr.mxu0 %v12336_v25 }
0x4510   :  { %v9523_v34 = vpop.permute.xlu0 %9522 }
0x4514   :  { %v9601_v38 = vpop.permute.xlu0 %9600 }
0x455c   :  { %v9279_v28 = vpop.xlane.xlu1 %9278 }
0x455d   :  { %14066 = vrcp.f32 %v9279_v28 }
0x4560   :  { %v9282_v24 = vpop.xlane.xlu1 %9281 }
0x4561   :  { %14068 = vrcp.f32 %v9282_v24 }
0x4564   :  { %v9364_v55 = vpop.permute.xlu1 %9363 }
0x4565   :  { %13459 = vmatpush3.msra.mxu1 %v9364_v55 }
0x4566   :  { %13468 = vmatprep.subr.mxu1 %v14179_v8 }
0x4567   :  { %v14067_v59 = vpop.eup %14066 }
0x4568   :  { %v9284_v58 = vmul.f32 %v14067_v59, %v14063_v18 }
0x456a   :  { %13456 = vmatmul.mubr.msk.f32.vlgmr.msra.gmra.mrb[72].mxu0 %vm260_vm2, %v9284_v58 }
0x456b   :  { %v14069_v30 = vpop.eup %14068  ;;  %13464 = vmatpush3.msra.mxu0 %v12336_v25 }
0x456c   :  { %v9286_v32 = vmul.f32 %v14069_v30, %v14065_v20  ;;  %13473 = vmatprep.subr.mxu0 %v14179_v8 }
0x456e   :  { %13461 = vmatmul.mubr.msk.f32.vlgmr.msra.gmra.mrb[110].mxu1 %vm260_vm2, %v9286_v32 }
0x456f   :  { %13469 = vmatpush3.xpose.msk.msra.mxu1 %vm260_vm2, %v9525_v54  ;;  %13470 = vmatprep.mubr.msk.f32.mxu1 %vm14180_vm1, %v14179_v8 }
0x4570   :  { %13478 = vmatprep.subr.mxu1 %v14179_v8 }
0x4572   :  { %13471 = vmatmul.mubr.msk.f32.vlgmr.msra.gmra.mrb[112].mxu1 %vm260_vm2, %v9523_v34 }
0x4573   :  { %13480 = vmatprep.mubr.msk.f32.mxu1 %vm14180_vm1, %v14179_v8 }
0x463d   :  { %v9359_v35 = vpop.f32.mrb[72].mxu0 }
0x463e   :  { %v13457_v29 = vpop.f32.mrb[73].mxu0  ;;  %13465 = vmatprep.mubr.msk.f32.mxu0 %vm260_vm2, %v9359_v35 }
0x463f   :  { %v12341_v29 = vld [vmem:[%s15604_s29 + $0x20] sm:$0xff] }
0x4641   :  { %v9435_v36 = vpop.f32.mrb[110].mxu1 }
0x4642   :  { %v13462_v37 = vpop.f32.mrb[111].mxu1  ;;  %13466 = vmatmul.mubr.msk.f32.vlgmr.msra.gmra.mrb[70].mxu0 %vm260_vm2, %v9435_v36  ;;  %v12342_v36 = vld [vmem:[%s15604_s29 + $0x28] sm:$0xff] }
0x4643   :  { %13474 = vmatpush3.xpose.msk.msra.mxu0 %vm260_vm2, %v9603_v27  ;;  %13475 = vmatprep.mubr.msk.f32.mxu0 %vm14180_vm1, %v14179_v8  ;;  %v13765_v37 = vpack.c.bf16 %v12342_v36, %v12341_v29 }
0x4644   :  { %13483 = vmatprep.subr.mxu0 %v14179_v8 }
0x4645   :  { %v9596_v33 = vpop.f32.mrb[112].mxu1 }
0x4646   :  { %v13472_v39 = vpop.f32.mrb[113].mxu1  ;;  %13476 = vmatmul.mubr.msk.f32.vlgmr.msra.gmra.mrb[74].mxu0 %vm260_vm2, %v9601_v38  ;;  %v9678_v7 = vsel %vm260_vm2, %v9596_v33, -inf  ;;  %v12343_v38 = vld [vmem:[%s15604_s29 + $0x30] sm:$0xff] }
0x4647   :  { %9679 = vmax.xlane.f32.xlu1 %v9678_v7  ;;  %13485 = vmatprep.mubr.msk.f32.mxu0 %vm14180_vm1, %v14179_v8 }
0x46d4   :  { %v9680_v5 = vpop.xlane.xlu1 %9679 }
0x46d5   :  { %v9684_v40 = vsub.f32 %v9596_v33, %v9680_v5  ;;  %v12344_v33 = vld [vmem:[%s15604_s29 + $0x38] sm:$0xff] }
0x46d6   :  { %v13769_v39 = vpack.c.bf16 %v12344_v33, %v12343_v38 }
0x46d7   :  { %v9686_v41 = vmul.f32 1.442695, %v9684_v40 }
0x46d9   :  { %14070 = vpow2.f32 %v9686_v41 }
0x46e3   :  { %v14071_v45 = vpop.eup %14070 }
0x46e4   :  { %v9690_v51 = vsel %vm260_vm2, %v14071_v45, 0.0 }
0x4719   :  { %v9674_v42 = vpop.f32.mrb[74].mxu0 }
0x471a   :  { %v13477_v43 = vpop.f32.mrb[75].mxu0  ;;  %v9681_v44 = vsel %vm260_vm2, %v9674_v42, -inf }
0x471b   :  { %9682 = vmax.xlane.f32.xlu0 %v9681_v44 }
0x471f   :  { %9691 = vadd.xlane.f32.xlu0 %v9690_v51 }
0x4735   :  { %9700 = vrot.lane.b32.xlu0 %v15188_v57, %s15615_s6 }
0x47a8   :  { %v9683_v53 = vpop.xlane.xlu0 %9682 }
0x47a9   :  { %v9685_v56 = vsub.f32 %v9674_v42, %v9683_v53 }
0x47ab   :  { %v9688_v60 = vmul.f32 1.442695, %v9685_v56 }
0x47ac   :  { %v9692_v61 = vpop.xlane.xlu0 %9691 }
0x47ad   :  { %14072 = vpow2.f32 %v9688_v60  ;;  %v12411_v60 = vld [vmem:[%s15606_s8 + $0x1] ss:$0 sm:$0xff] }
0x47ae   :  { %14074 = vrcp.f32 %v9692_v61 }
0x47b0   :  { %v9701_v63 = vpop.permute.xlu0 %9700 }
0x47b1   :  { %13479 = vmatpush3.msra.mxu1 %v9701_v63 }
0x47b2   :  { %13766 = vmatprep.subr.bf16.mxu1 %v13765_v37 }
0x47b7   :  { %v14073_v1 = vpop.eup %14072 }
0x47b8   :  { %v14075_v2 = vpop.eup %14074  ;;  %v9693_v3 = vsel %vm260_vm2, %v14073_v1, 0.0 }
0x47b9   :  { %v9697_v50 = vmul.f32 %v14075_v2, %v14071_v45  ;;  %9694 = vadd.xlane.f32.xlu1 %v9693_v3  ;;  %v12410_v45 = vld [vmem:[%s15605_s3 + $0x1] ss:$0 sm:$0xff] }
0x47ba   :  { %v12412_v3 = vld [vmem:[%s15607_s14 + $0x1] ss:$0 sm:$0xff] }
0x47bb   :  { %13481 = vmatmul.mubr.msk.f32.vlgmr.msra.gmra.mrb[114].mxu1 %vm260_vm2, %v9697_v50 }
0x47bc   :  { %13768 = vmatpush3.bf16.msra.mxu1 %v13765_v37 }
0x47bd   :  { %13770 = vmatprep.subr.bf16.mxu1 %v13769_v39 }
0x47c0   :  { %13772 = vmatpush3.bf16.msra.mxu1 %v13769_v39 }
0x47c1   :  { %13515 = vmatprep.subr.mxu1 %v14179_v8 }
0x47ca   :  { %9776 = vrot.lane.b32.xlu1 %v15186_v52, %s15615_s6  ;;  %v13773_v52 = vpack.c.bf16 %v12347_v14, %v12346_v11 }
0x4846   :  { %v9695_v57 = vpop.xlane.xlu1 %9694 }
0x4847   :  { %14076 = vrcp.f32 %v9695_v57 }
0x484a   :  { %v9777_v0 = vpop.permute.xlu1 %9776 }
0x484b   :  { %13484 = vmatpush3.msra.mxu0 %v9777_v0 }
0x484c   :  { %13488 = vmatprep.subr.mxu0 %v12337_v23 }
0x4851   :  { %v14077_v4 = vpop.eup %14076 }
0x4852   :  { %v9699_v6 = vmul.f32 %v14077_v4, %v14073_v1 }
0x4854   :  { %13486 = vmatmul.mubr.msk.f32.vlgmr.msra.gmra.mrb[76].mxu0 %vm260_vm2, %v9699_v6 }
0x4855   :  { %13489 = vmatpush3.msra.mxu0 %v12337_v23 }
0x4856   :  { %13774 = vmatprep.subr.bf16.mxu0 %v13773_v52 }
0x488e   :  { %v9772_v9 = vpop.f32.mrb[114].mxu1 }
0x488f   :  { %v13482_v10 = vpop.f32.mrb[115].mxu1  ;;  %13490 = vmatprep.mubr.msk.f32.mxu0 %vm260_vm2, %v9772_v9 }
0x4927   :  { %v9848_v62 = vpop.f32.mrb[76].mxu0 }
0x4928   :  { %v13487_v12 = vpop.f32.mrb[77].mxu0  ;;  %13491 = vmatmul.mubr.msk.f32.vlgmr.msra.gmra.mrb[70].mxu0 %vm260_vm2, %v9848_v62 }
0x4929   :  { %13776 = vmatpush3.bf16.msra.mxu0 %v13773_v52  ;;  %13512 = vmatprep.mubr.msk.f32.mxu0 %vm175_vm0, %v14784_v46 }
0x492a   :  { %13778 = vmatprep.subr.bf16.mxu0 %v13777_v16 }
0x492d   :  { %13780 = vmatpush3.bf16.msra.mxu0 %v13777_v16 }
0x492e   :  { %13525 = vmatprep.subr.mxu0 %v14179_v8 }
0x4930   :  { %13513 = vmatmul.mubr.msk.f32.vlgmr.msra.gmra.mrb[78].mxu0 %vm175_vm0, %v14786_v47 }
0x4931   :  { %13527 = vmatprep.mubr.msk.f32.mxu0 %vm14180_vm1, %v14179_v8 }
0x49fb   :  { %v13492_v18 = vpop.f32.mrb[70].mxu0 }
0x49fc   :  { %v9942_v19 = vadd.f32 %v13492_v18, %v12409_v17  ;;  %v9924_v20 = vpop.f32.mrb[71].mxu0 }
0x49fd   :  { %v9941_v21 = vadd.f32 %v12409_v17, %v9924_v20 }
0x49fe   :  { %v9944_v22 = vadd.f32 %v9942_v19, %v15177_v49 }
0x49ff   :  { %v9943_v46 = vadd.f32 %v9941_v21, %v15175_v48 }
0x4a00   :  { %v9948_v13 = vsel %vm175_vm0, %v9944_v22, 0.0 }
0x4a01   :  { %9949 = vadd.xlane.f32.xlu0 %v9948_v13  ;;  %v9945_v25 = vsel %vm175_vm0, %v9943_v46, 0.0 }
0x4a02   :  { %9946 = vadd.xlane.f32.xlu1 %v9945_v25 }
0x4a03   :  { %v13514_v47 = vpop.f32.mrb[78].mxu0 }
0x4a04   :  { %v10146_v28 = vpop.f32.mrb[79].mxu0  ;;  %v15357_v35 = vadd.f32 %v13514_v47, %v12415_v26 }
0x4a05   :  { %v15353_v24 = vadd.f32 %v12415_v26, %v10146_v28 }
0x4a8e   :  { %v9950_v55 = vpop.xlane.xlu0 %9949 }
0x4a8f   :  { %v9952_v54 = vmul.f32 0.03125, %v9950_v55  ;;  %v9947_v59 = vpop.xlane.xlu1 %9946 }
0x4a90   :  { %v9951_v58 = vmul.f32 0.03125, %v9947_v59 }
0x4a91   :  { %v9954_v49 = vsub.f32 %v9944_v22, %v9952_v54 }
0x4a92   :  { %v9953_v48 = vsub.f32 %v9943_v46, %v9951_v58 }
0x4a93   :  { %v9956_v30 = vmul.f32 %v9954_v49, %v9954_v49 }
0x4a94   :  { %v9955_v27 = vmul.f32 %v9953_v48, %v9953_v48 }
0x4a95   :  { %v9960_v32 = vsel %vm175_vm0, %v9956_v30, 0.0 }
0x4a96   :  { %9961 = vadd.xlane.f32.xlu1 %v9960_v32  ;;  %v9957_v34 = vsel %vm175_vm0, %v9955_v27, 0.0 }
0x4a97   :  { %9958 = vadd.xlane.f32.xlu0 %v9957_v34 }
0x4aa7   :  { %10561 = vrot.lane.b32.xlu1 %v15357_v35, %s14183_s7 }
0x4b23   :  { %v9962_v7 = vpop.xlane.xlu1 %9961 }
0x4b24   :  { %v9964_v5 = vmul.f32 0.03125, %v9962_v7  ;;  %v9959_v40 = vpop.xlane.xlu0 %9958 }
0x4b25   :  { %v9963_v41 = vmul.f32 0.03125, %v9959_v40 }
0x4b26   :  { %v9966_v42 = vadd.f32 1e-05, %v9964_v5 }
0x4b27   :  { %v9965_v43 = vadd.f32 1e-05, %v9963_v41  ;;  %v10562_v46 = vpop.permute.xlu1 %10561 }
0x4b28   :  { %14078 = vrsqrt.f32 %v9966_v42 }
0x4b29   :  { %14080 = vrsqrt.f32 %v9965_v43 }
0x4b32   :  { %v14079_v44 = vpop.eup %14078 }
0x4b33   :  { %v14081_v51 = vpop.eup %14080  ;;  %v9970_v53 = vmul.f32 %v14079_v44, %v9954_v49 }
0x4b34   :  { %v9969_v56 = vmul.f32 %v14081_v51, %v9953_v48 }
0x4b35   :  { %v9978_v61 = vmul.f32 %v12410_v45, %v9970_v53 }
0x4b36   :  { %v9977_v63 = vmul.f32 %v12410_v45, %v9969_v56 }
0x4b37   :  { %v15370_v2 = vadd.f32 %v12411_v60, %v9978_v61 }
0x4b38   :  { %v15368_v1 = vadd.f32 %v12411_v60, %v9977_v63 }
0x4b3a   :  { %13501 = vmatprep.mubr.msk.f32.mxu1 %vm175_vm0, %v15368_v1 }
0x4b3b   :  { %13502 = vmatmul.mubr.msk.f32.vlgmr.msra.gmra.mrb[116].mxu1 %vm175_vm0, %v15370_v2 }
0x4b3c   :  { %13516 = vmatpush3.xpose.msk.msra.mxu1 %vm260_vm2, %v15353_v24  ;;  %13517 = vmatprep.mubr.msk.f32.mxu1 %vm14180_vm1, %v14179_v8 }
0x4b3d   :  { %13520 = vmatprep.subr.mxu1 %v14179_v8 }
0x4c0e   :  { %v13503_v50 = vpop.f32.mrb[116].mxu1 }
0x4c0f   :  { %v10065_v57 = vpop.f32.mrb[117].mxu1  ;;  %v15390_v0 = vadd.f32 %v13503_v50, %v12412_v3 }
0x4c10   :  { %v15382_v23 = vadd.f32 %v12412_v3, %v10065_v57 }
0x4c12   :  { %13518 = vmatmul.mubr.msk.f32.vlgmr.msra.gmra.mrb[118].mxu1 %vm260_vm2, %v15382_v23 }
0x4c13   :  { %13521 = vmatpush3.xpose.msk.msra.mxu1 %vm260_vm2, %v15357_v35  ;;  %13522 = vmatprep.mubr.msk.f32.mxu1 %vm14180_vm1, %v14179_v8 }
0x4c14   :  { %13530 = vmatprep.subr.mxu1 %v14179_v8 }
0x4c16   :  { %13523 = vmatmul.mubr.msk.f32.vlgmr.msra.gmra.mrb[120].mxu1 %vm260_vm2, %v15390_v0 }
0x4c17   :  { %13532 = vmatprep.mubr.msk.f32.mxu1 %vm14180_vm1, %v14179_v8 }
0x4ce5   :  { %v10227_v4 = vpop.f32.mrb[118].mxu1 }
0x4ce6   :  { %v13519_v6 = vpop.f32.mrb[119].mxu1  ;;  %v10307_v14 = vsel %vm260_vm2, %v10227_v4, -inf }
0x4ce9   :  { %v10303_v9 = vpop.f32.mrb[120].mxu1 }
0x4cea   :  { %v13524_v10 = vpop.f32.mrb[121].mxu1  ;;  %v10310_v11 = vsel %vm260_vm2, %v10303_v9, -inf }
0x4ceb   :  { %10311 = vmax.xlane.f32.xlu0 %v10310_v11 }
0x4d01   :  { %10405 = vrot.lane.b32.xlu0 %v15357_v35, %s14181_s0 }
0x4d20   :  { %10308 = vmax.xlane.f32.xlu0 %v10307_v14 }
0x4d36   :  { %10329 = vrot.lane.b32.xlu0 %v15353_v24, %s14181_s0 }
0x4d3a   :  { %10481 = vrot.lane.b32.xlu0 %v15382_v23, %s14183_s7 }
0x4d78   :  { %v10312_v52 = vpop.xlane.xlu0 %10311 }
0x4d79   :  { %v10314_v15 = vsub.f32 %v10303_v9, %v10312_v52 }
0x4d7b   :  { %v10317_v31 = vmul.f32 1.442695, %v10314_v15 }
0x4d7c   :  { %v10406_v16 = vpop.permute.xlu0 %10405 }
0x4d7d   :  { %14082 = vpow2.f32 %v10317_v31  ;;  %13531 = vmatpush3.msra.mxu1 %v10406_v16  ;;  %v12352_v16 = vld [vmem:[%s15608_s19 + $0x28] sm:$0xff] }
0x4d7e   :  { %13540 = vmatprep.subr.mxu1 %v14179_v8 }
0x4d87   :  { %v14083_v62 = vpop.eup %14082 }
0x4d88   :  { %v10322_v12 = vsel %vm260_vm2, %v14083_v62, 0.0 }
0x4d89   :  { %10323 = vadd.xlane.f32.xlu1 %v10322_v12 }
0x4d9a   :  { %10559 = vrot.lane.b32.xlu1 %v15390_v0, %s14183_s7 }
0x4dad   :  { %v10309_v17 = vpop.xlane.xlu0 %10308 }
0x4dae   :  { %v10313_v18 = vsub.f32 %v10227_v4, %v10309_v17 }
0x4db0   :  { %v10315_v19 = vmul.f32 1.442695, %v10313_v18 }
0x4db1   :  { %v10330_v20 = vpop.permute.xlu0 %10329 }
0x4db2   :  { %14084 = vpow2.f32 %v10315_v19  ;;  %13526 = vmatpush3.msra.mxu0 %v10330_v20 }
0x4db3   :  { %13535 = vmatprep.subr.mxu0 %v14179_v8 }
0x4db5   :  { %v10482_v58 = vpop.permute.xlu0 %10481 }
0x4dbc   :  { %v14085_v21 = vpop.eup %14084 }
0x4dbd   :  { %v10319_v22 = vsel %vm260_vm2, %v14085_v21, 0.0 }
0x4dbe   :  { %10320 = vadd.xlane.f32.xlu1 %v10319_v22 }
0x4dcf   :  { %10483 = vrot.lane.b32.xlu1 %v15353_v24, %s14183_s7 }
0x4e16   :  { %v10324_v13 = vpop.xlane.xlu1 %10323 }
0x4e17   :  { %14086 = vrcp.f32 %v10324_v13 }
0x4e1a   :  { %v10560_v47 = vpop.permute.xlu1 %10559 }
0x4e21   :  { %v14087_v25 = vpop.eup %14086 }
0x4e22   :  { %v10328_v26 = vmul.f32 %v14087_v25, %v14083_v62  ;;  %v12351_v62 = vld [vmem:[%s15608_s19 + $0x20] sm:$0xff] }
0x4e24   :  { %13533 = vmatmul.mubr.msk.f32.vlgmr.msra.gmra.mrb[122].mxu1 %vm260_vm2, %v10328_v26 }
0x4e25   :  { %13541 = vmatpush3.xpose.msk.msra.mxu1 %vm260_vm2, %v10562_v46  ;;  %13542 = vmatprep.mubr.msk.f32.mxu1 %vm14180_vm1, %v14179_v8 }
0x4e26   :  { %13550 = vmatprep.subr.mxu1 %v14179_v8 }
0x4e28   :  { %13543 = vmatmul.mubr.msk.f32.vlgmr.msra.gmra.mrb[124].mxu1 %vm260_vm2, %v10560_v47 }
0x4e29   :  { %13552 = vmatprep.mubr.msk.f32.mxu1 %vm14180_vm1, %v14179_v8 }
0x4e4b   :  { %v10321_v28 = vpop.xlane.xlu1 %10320 }
0x4e4c   :  { %14088 = vrcp.f32 %v10321_v28  ;;  %v12353_v28 = vld [vmem:[%s15608_s19 + $0x30] sm:$0xff] }
0x4e4f   :  { %v10484_v59 = vpop.permute.xlu1 %10483 }
0x4e56   :  { %v14089_v55 = vpop.eup %14088 }
0x4e57   :  { %v10326_v54 = vmul.f32 %v14089_v55, %v14085_v21 }
0x4e59   :  { %13528 = vmatmul.mubr.msk.f32.vlgmr.msra.gmra.mrb[80].mxu0 %vm260_vm2, %v10326_v54 }
0x4e5a   :  { %13536 = vmatpush3.xpose.msk.msra.mxu0 %vm260_vm2, %v10484_v59  ;;  %13537 = vmatprep.mubr.msk.f32.mxu0 %vm14180_vm1, %v14179_v8 }
0x4e5b   :  { %13545 = vmatprep.subr.mxu0 %v14179_v8 }
0x4e5d   :  { %13538 = vmatmul.mubr.msk.f32.vlgmr.msra.gmra.mrb[82].mxu0 %vm260_vm2, %v10482_v58 }
0x4e5e   :  { %13547 = vmatprep.mubr.msk.f32.mxu0 %vm14180_vm1, %v14179_v8 }
0x4ef7   :  { %v15429_v49 = vpop.f32.mrb[122].mxu1 }
0x4ef8   :  { %v13534_v48 = vpop.f32.mrb[123].mxu1 }
0x4efb   :  { %v10633_v30 = vpop.f32.mrb[124].mxu1 }
0x4efc   :  { %v13544_v27 = vpop.f32.mrb[125].mxu1  ;;  %v10640_v32 = vsel %vm260_vm2, %v10633_v30, -inf }
0x4efd   :  { %10641 = vmax.xlane.f32.xlu1 %v10640_v32 }
0x4f0e   :  { %10975 = vrot.lane.b32.xlu1 %v15353_v24, %s14187_s16 }
0x4f12   :  { %10973 = vrot.lane.b32.xlu1 %v15382_v23, %s14187_s16 }
0x4f16   :  { %11051 = vrot.lane.b32.xlu1 %v15390_v0, %s14187_s16 }
0x4f2c   :  { %v15438_v34 = vpop.f32.mrb[80].mxu0 }
0x4f2d   :  { %v13529_v29 = vpop.f32.mrb[81].mxu0 }
0x4f30   :  { %v10555_v36 = vpop.f32.mrb[82].mxu0 }
0x4f31   :  { %v13539_v37 = vpop.f32.mrb[83].mxu0  ;;  %v10637_v40 = vsel %vm260_vm2, %v10555_v36, -inf }
0x4f8a   :  { %v10642_v38 = vpop.xlane.xlu1 %10641 }
0x4f8b   :  { %v10644_v33 = vsub.f32 %v10633_v30, %v10642_v38 }
0x4f8d   :  { %v10647_v39 = vmul.f32 1.442695, %v10644_v33 }
0x4f8e   :  { %v10976_v43 = vpop.permute.xlu1 %10975 }
0x4f8f   :  { %14090 = vpow2.f32 %v10647_v39 }
0x4f92   :  { %v10974_v51 = vpop.permute.xlu1 %10973 }
0x4f96   :  { %v11052_v56 = vpop.permute.xlu1 %11051 }
0x4f99   :  { %v14091_v7 = vpop.eup %14090 }
0x4f9a   :  { %v10652_v5 = vsel %vm260_vm2, %v14091_v7, 0.0 }
0x4f9b   :  { %10653 = vadd.xlane.f32.xlu0 %v10652_v5 }
0x4fb1   :  { %10735 = vrot.lane.b32.xlu0 %v15357_v35, %s14184_s10 }
0x4fb5   :  { %11053 = vrot.lane.b32.xlu0 %v15357_v35, %s14187_s16 }
0x4fd4   :  { %10638 = vmax.xlane.f32.xlu0 %v10637_v40 }
0x4fea   :  { %10659 = vrot.lane.b32.xlu0 %v15353_v24, %s14184_s10 }
0x4fee   :  { %11151 = vrot.lane.b32.xlu0 %v15353_v24, %s14185_s11 }
0x4ff2   :  { %11388 = vrot.lane.b32.xlu0 %v15353_v24, %s14190_s23 }
0x4ff6   :  { %11466 = vrot.lane.b32.xlu0 %v15357_v35, %s14190_s23 }
0x4ffa   :  { %11386 = vrot.lane.b32.xlu0 %v15382_v23, %s14190_s23 }
0x4ffe   :  { %11464 = vrot.lane.b32.xlu0 %v15390_v0, %s14190_s23 }
0x5028   :  { %v10654_v41 = vpop.xlane.xlu0 %10653 }
0x5029   :  { %14092 = vrcp.f32 %v10654_v41 }
0x502c   :  { %v10736_v42 = vpop.permute.xlu0 %10735 }
0x502d   :  { %13551 = vmatpush3.msra.mxu1 %v10736_v42 }
0x502e   :  { %13565 = vmatprep.subr.mxu1 %v14179_v8 }
0x5030   :  { %v11054_v53 = vpop.permute.xlu0 %11053 }
0x5033   :  { %v14093_v44 = vpop.eup %14092 }
0x5034   :  { %v10658_v45 = vmul.f32 %v14093_v44, %v14091_v7 }
0x5036   :  { %13553 = vmatmul.mubr.msk.f32.vlgmr.msra.gmra.mrb[126].mxu1 %vm260_vm2, %v10658_v45 }
0x5037   :  { %13566 = vmatpush3.xpose.msk.msra.mxu1 %vm260_vm2, %v10976_v43  ;;  %13567 = vmatprep.mubr.msk.f32.mxu1 %vm14180_vm1, %v14179_v8 }
0x5038   :  { %13570 = vmatprep.subr.mxu1 %v14179_v8 }
0x503a   :  { %13568 = vmatmul.mubr.msk.f32.vlgmr.msra.gmra.mrb[128].mxu1 %vm260_vm2, %v10974_v51 }
0x503b   :  { %13571 = vmatpush3.xpose.msk.msra.mxu1 %vm260_vm2, %v11054_v53  ;;  %13572 = vmatprep.mubr.msk.f32.mxu1 %vm14180_vm1, %v14179_v8 }
0x503c   :  { %13580 = vmatprep.subr.mxu1 %v14179_v8 }
0x503e   :  { %13573 = vmatmul.mubr.msk.f32.vlgmr.msra.gmra.mrb[130].mxu1 %vm260_vm2, %v11052_v56 }
0x503f   :  { %13582 = vmatprep.mubr.msk.f32.mxu1 %vm14180_vm1, %v14179_v8 }
0x5061   :  { %v10639_v60 = vpop.xlane.xlu0 %10638 }
0x5062   :  { %v10643_v61 = vsub.f32 %v10555_v36, %v10639_v60 }
0x5064   :  { %v10645_v63 = vmul.f32 1.442695, %v10643_v61 }
0x5065   :  { %v10660_v3 = vpop.permute.xlu0 %10659 }
0x5066   :  { %14094 = vpow2.f32 %v10645_v63  ;;  %13546 = vmatpush3.msra.mxu0 %v10660_v3 }
0x5067   :  { %13555 = vmatprep.subr.mxu0 %v12352_v16 }
0x5069   :  { %v11152_v55 = vpop.permute.xlu0 %11151 }
0x506d   :  { %v11389_v48 = vpop.permute.xlu0 %11388 }
0x5070   :  { %v14095_v50 = vpop.eup %14094 }
0x5071   :  { %v10649_v57 = vsel %vm260_vm2, %v14095_v50, 0.0 }
0x5072   :  { %10650 = vadd.xlane.f32.xlu1 %v10649_v57 }
0x50ff   :  { %v10651_v23 = vpop.xlane.xlu1 %10650 }
0x5100   :  { %14096 = vrcp.f32 %v10651_v23 }
0x5109   :  { %v10807_v0 = vpop.f32.mrb[126].mxu1 }
0x510a   :  { %v14097_v4 = vpop.eup %14096  ;;  %v13554_v6 = vpop.f32.mrb[127].mxu1 }
0x510b   :  { %v10656_v9 = vmul.f32 %v14097_v4, %v14095_v50  ;;  %v12354_v4 = vld [vmem:[%s15608_s19 + $0x38] sm:$0xff] }
0x510d   :  { %13548 = vmatmul.mubr.msk.f32.vlgmr.msra.gmra.mrb[84].mxu0 %vm260_vm2, %v10656_v9  ;;  %v11047_v10 = vpop.f32.mrb[128].mxu1 }
0x510e   :  { %v13569_v11 = vpop.f32.mrb[129].mxu1  ;;  %v11129_v14 = vsel %vm260_vm2, %v11047_v10, -inf  ;;  %13556 = vmatpush3.msra.mxu0 %v12352_v16 }
0x510f   :  { %11130 = vmax.xlane.f32.xlu1 %v11129_v14  ;;  %13560 = vmatprep.subr.mxu0 %v12351_v62 }
0x5111   :  { %v11125_v52 = vpop.f32.mrb[130].mxu1 }
0x5112   :  { %v13574_v15 = vpop.f32.mrb[131].mxu1  ;;  %v11132_v31 = vsel %vm260_vm2, %v11125_v52, -inf }
0x5113   :  { %11133 = vmax.xlane.f32.xlu1 %v11132_v31 }
0x519c   :  { %v11131_v12 = vpop.xlane.xlu1 %11130 }
0x519d   :  { %v11135_v17 = vsub.f32 %v11047_v10, %v11131_v12 }
0x519f   :  { %v11137_v18 = vmul.f32 1.442695, %v11135_v17 }
0x51a0   :  { %v11134_v19 = vpop.xlane.xlu1 %11133 }
0x51a1   :  { %14098 = vpow2.f32 %v11137_v18  ;;  %v11136_v20 = vsub.f32 %v11125_v52, %v11134_v19 }
0x51a3   :  { %v11139_v21 = vmul.f32 1.442695, %v11136_v20 }
0x51a5   :  { %14100 = vpow2.f32 %v11139_v21 }
0x51ab   :  { %v14099_v22 = vpop.eup %14098 }
0x51ac   :  { %v11141_v46 = vsel %vm260_vm2, %v14099_v22, 0.0 }
0x51ad   :  { %11142 = vadd.xlane.f32.xlu1 %v11141_v46 }
0x51af   :  { %v14101_v13 = vpop.eup %14100 }
0x51b0   :  { %v11144_v25 = vsel %vm260_vm2, %v14101_v13, 0.0 }
0x51b1   :  { %11145 = vadd.xlane.f32.xlu1 %v11144_v25 }
0x51c2   :  { %11227 = vrot.lane.b32.xlu1 %v15357_v35, %s14185_s11 }
0x51e0   :  { %v10731_v26 = vpop.f32.mrb[84].mxu0 }
0x51e1   :  { %v13549_v47 = vpop.f32.mrb[85].mxu0  ;;  %13557 = vmatprep.mubr.msk.f32.mxu0 %vm260_vm2, %v10731_v26 }
0x51e2   :  { %13558 = vmatmul.mubr.msk.f32.vlgmr.msra.gmra.mrb[86].mxu0 %vm260_vm2, %v10807_v0 }
0x51e3   :  { %13562 = vmatprep.mubr.msk.f32.mxu0 %vm260_vm2, %v15438_v34  ;;  %13561 = vmatpush3.msra.mxu0 %v12351_v62 }
0x51e4   :  { %13575 = vmatprep.subr.mxu0 %v14179_v8 }
0x51ea   :  { %13563 = vmatmul.mubr.msk.f32.vlgmr.msra.gmra.mrb[86].mxu0 %vm260_vm2, %v15429_v49  ;;  %v11467_v49 = vpop.permute.xlu0 %11466 }
0x51eb   :  { %13576 = vmatpush3.msra.mxu0 %v11152_v55  ;;  %13577 = vmatprep.mubr.msk.f32.mxu0 %vm14180_vm1, %v14179_v8  ;;  %v12358_v55 = vld [vmem:[%s15610_s30 + $0x20] sm:$0xff] }
0x51ec   :  { %13585 = vmatprep.subr.mxu0 %v12353_v28 }
0x51ee   :  { %v11387_v29 = vpop.permute.xlu0 %11386 }
0x51f2   :  { %v11465_v39 = vpop.permute.xlu0 %11464 }
0x523a   :  { %v11143_v54 = vpop.xlane.xlu1 %11142 }
0x523b   :  { %14102 = vrcp.f32 %v11143_v54  ;;  %v12359_v54 = vld [vmem:[%s15610_s30 + $0x28] sm:$0xff] }
0x523e   :  { %v11146_v59 = vpop.xlane.xlu1 %11145 }
0x523f   :  { %14104 = vrcp.f32 %v11146_v59  ;;  %v13781_v59 = vpack.c.bf16 %v12359_v54, %v12358_v55 }
0x5242   :  { %v11228_v58 = vpop.permute.xlu1 %11227 }
0x5243   :  { %13581 = vmatpush3.msra.mxu1 %v11228_v58  ;;  %v12360_v58 = vld [vmem:[%s15610_s30 + $0x30] sm:$0xff] }
0x5244   :  { %13590 = vmatprep.subr.mxu1 %v14179_v8 }
0x5245   :  { %v14103_v30 = vpop.eup %14102 }
0x5246   :  { %v11148_v27 = vmul.f32 %v14103_v30, %v14099_v22 }
0x5248   :  { %13578 = vmatmul.mubr.msk.f32.vlgmr.msra.gmra.mrb[88].mxu0 %vm260_vm2, %v11148_v27  ;;  %v12363_v27 = vld [vmem:[%s15611_s28 + $0x40] sm:$0xff] }
0x5249   :  { %v14105_v32 = vpop.eup %14104  ;;  %13586 = vmatpush3.msra.mxu0 %v12353_v28 }
0x524a   :  { %v11150_v34 = vmul.f32 %v14105_v32, %v14101_v13  ;;  %13595 = vmatprep.subr.mxu0 %v14179_v8  ;;  %v12364_v32 = vld [vmem:[%s15611_s28 + $0x48] sm:$0xff] }
0x524c   :  { %13583 = vmatmul.mubr.msk.f32.vlgmr.msra.gmra.mrb[132].mxu1 %vm260_vm2, %v11150_v34  ;;  %v13789_v34 = vpack.c.bf16 %v12364_v32, %v12363_v27  ;;  %v12460_v32 = vld [vmem:[%s14363_s27 + $0x1] ss:$0 sm:$0xff] }
0x524d   :  { %13591 = vmatpush3.xpose.msk.msra.mxu1 %vm260_vm2, %v11389_v48  ;;  %13592 = vmatprep.mubr.msk.f32.mxu1 %vm14180_vm1, %v14179_v8  ;;  %v12361_v48 = vld [vmem:[%s15610_s30 + $0x38] sm:$0xff] }
0x524e   :  { %13600 = vmatprep.subr.mxu1 %v14179_v8  ;;  %v13785_v30 = vpack.c.bf16 %v12361_v48, %v12360_v58  ;;  %v12459_v58 = vld [vmem:[%s14358_s20 + $0x1] ss:$0 sm:$0xff] }
0x5250   :  { %13593 = vmatmul.mubr.msk.f32.vlgmr.msra.gmra.mrb[134].mxu1 %vm260_vm2, %v11387_v29  ;;  %v12366_v29 = vld [vmem:[%s15611_s28 + $0x58] sm:$0xff] }
0x5251   :  { %13602 = vmatprep.mubr.msk.f32.mxu1 %vm14180_vm1, %v14179_v8 }
0x531b   :  { %v11223_v36 = vpop.f32.mrb[88].mxu0 }
0x531c   :  { %v13579_v37 = vpop.f32.mrb[89].mxu0  ;;  %13587 = vmatprep.mubr.msk.f32.mxu0 %vm260_vm2, %v11223_v36 }
0x531d   :  { %v12367_v37 = vld [vmem:[%s15611_s28 + $0x60] sm:$0xff] }
0x531f   :  { %v11299_v38 = vpop.f32.mrb[132].mxu1 }
0x5320   :  { %v13584_v33 = vpop.f32.mrb[133].mxu1  ;;  %13588 = vmatmul.mubr.msk.f32.vlgmr.msra.gmra.mrb[86].mxu0 %vm260_vm2, %v11299_v38  ;;  %v12368_v38 = vld [vmem:[%s15611_s28 + $0x68] sm:$0xff] }
0x5321   :  { %13596 = vmatpush3.xpose.msk.msra.mxu0 %vm260_vm2, %v11467_v49  ;;  %13597 = vmatprep.mubr.msk.f32.mxu0 %vm14180_vm1, %v14179_v8  ;;  %v12365_v49 = vld [vmem:[%s15611_s28 + $0x50] sm:$0xff]  ;;  %v13797_v33 = vpack.c.bf16 %v12368_v38, %v12367_v37 }
0x5322   :  { %13605 = vmatprep.subr.mxu0 %v14179_v8  ;;  %v13793_v36 = vpack.c.bf16 %v12366_v29, %v12365_v49 }
0x5323   :  { %v11460_v7 = vpop.f32.mrb[134].mxu1 }
0x5324   :  { %v13594_v5 = vpop.f32.mrb[135].mxu1  ;;  %13598 = vmatmul.mubr.msk.f32.vlgmr.msra.gmra.mrb[90].mxu0 %vm260_vm2, %v11465_v39  ;;  %v11542_v40 = vsel %vm260_vm2, %v11460_v7, -inf }
0x5325   :  { %11543 = vmax.xlane.f32.xlu1 %v11542_v40  ;;  %13607 = vmatprep.mubr.msk.f32.mxu0 %vm14180_vm1, %v14179_v8 }
0x53b2   :  { %v11544_v41 = vpop.xlane.xlu1 %11543 }
0x53b3   :  { %v11548_v42 = vsub.f32 %v11460_v7, %v11544_v41 }
0x53b5   :  { %v11550_v43 = vmul.f32 1.442695, %v11548_v42 }
0x53b7   :  { %14106 = vpow2.f32 %v11550_v43 }
0x53c1   :  { %v14107_v53 = vpop.eup %14106 }
0x53c2   :  { %v11554_v56 = vsel %vm260_vm2, %v14107_v53, 0.0 }
0x53f7   :  { %v11538_v44 = vpop.f32.mrb[90].mxu0 }
0x53f8   :  { %v13599_v45 = vpop.f32.mrb[91].mxu0  ;;  %v11545_v51 = vsel %vm260_vm2, %v11538_v44, -inf }
0x53f9   :  { %11546 = vmax.xlane.f32.xlu0 %v11545_v51 }
0x53fd   :  { %11555 = vadd.xlane.f32.xlu0 %v11554_v56  ;;  %v12452_v56 = vld [vmem:[%s15613_s2 + $0x1] ss:$0 sm:$0xff] }
0x5413   :  { %11564 = vrot.lane.b32.xlu0 %v15353_v24, %s14189_s22 }
0x5486   :  { %v11547_v60 = vpop.xlane.xlu0 %11546 }
0x5487   :  { %v11549_v61 = vsub.f32 %v11538_v44, %v11547_v60  ;;  %v12451_v44 = vld [vmem:[%s15612_s1 + $0x1] ss:$0 sm:$0xff] }
0x5489   :  { %v11552_v8 = vmul.f32 1.442695, %v11549_v61 }
0x548a   :  { %v11556_v63 = vpop.xlane.xlu0 %11555 }
0x548b   :  { %14108 = vpow2.f32 %v11552_v8 }
0x548c   :  { %14110 = vrcp.f32 %v11556_v63 }
0x548e   :  { %v11565_v3 = vpop.permute.xlu0 %11564 }
0x548f   :  { %13601 = vmatpush3.msra.mxu1 %v11565_v3  ;;  %v12369_v3 = vld [vmem:[%s15611_s28 + $0x70] sm:$0xff] }
0x5490   :  { %13782 = vmatprep.subr.bf16.mxu1 %v13781_v59 }
0x5495   :  { %v14109_v50 = vpop.eup %14108 }
0x5496   :  { %v14111_v57 = vpop.eup %14110  ;;  %v11557_v23 = vsel %vm260_vm2, %v14109_v50, 0.0 }
0x5497   :  { %v11561_v0 = vmul.f32 %v14111_v57, %v14107_v53  ;;  %11558 = vadd.xlane.f32.xlu1 %v11557_v23  ;;  %v12453_v23 = vld [vmem:[%s15614_s26 + $0x1] ss:$0 sm:$0xff] }
0x5499   :  { %13603 = vmatmul.mubr.msk.f32.vlgmr.msra.gmra.mrb[136].mxu1 %vm260_vm2, %v11561_v0 }
0x549a   :  { %13784 = vmatpush3.bf16.msra.mxu1 %v13781_v59 }
0x549b   :  { %13786 = vmatprep.subr.bf16.mxu1 %v13785_v30 }
0x549e   :  { %13788 = vmatpush3.bf16.msra.mxu1 %v13785_v30 }
0x54a8   :  { %11640 = vrot.lane.b32.xlu1 %v15357_v35, %s14189_s22  ;;  %v12450_v35 = vld [vmem:[%s15609_s24 + $0x1] ss:$0 sm:$0xff] }
0x5524   :  { %v11559_v24 = vpop.xlane.xlu1 %11558 }
0x5525   :  { %14112 = vrcp.f32 %v11559_v24 }
0x5528   :  { %v11641_v6 = vpop.permute.xlu1 %11640 }
0x5529   :  { %13606 = vmatpush3.msra.mxu0 %v11641_v6 }
0x552a   :  { %13610 = vmatprep.subr.mxu0 %v12354_v4 }
0x552f   :  { %v14113_v9 = vpop.eup %14112 }
0x5530   :  { %v11563_v10 = vmul.f32 %v14113_v9, %v14109_v50  ;;  %v12370_v50 = vld [vmem:[%s15611_s28 + $0x78] sm:$0xff] }
0x5531   :  { %v13801_v57 = vpack.c.bf16 %v12370_v50, %v12369_v3 }
0x5532   :  { %13608 = vmatmul.mubr.msk.f32.vlgmr.msra.gmra.mrb[92].mxu0 %vm260_vm2, %v11563_v10 }
0x5533   :  { %13611 = vmatpush3.msra.mxu0 %v12354_v4 }
0x5534   :  { %13790 = vmatprep.subr.bf16.mxu0 %v13789_v34 }
0x556c   :  { %v11636_v11 = vpop.f32.mrb[136].mxu1 }
0x556d   :  { %v13604_v14 = vpop.f32.mrb[137].mxu1  ;;  %13612 = vmatprep.mubr.msk.f32.mxu0 %vm260_vm2, %v11636_v11  ;;  %v12456_v11 = vld [vmem:[%s14353_s12 + $0x1] ss:$0 sm:$0xff]  ;;  %s14192_s12 = smov [#allocation2]  }
0x556e   :  { %s12078_s0 = sshll.u32 %s14192_s12, 4  ;;  %s12079_s0 = int_to_ptr.vmem [resolvable:$true] %s12078_s0 }
0x556f   :  { %s14122_s5 = scalar_lea.vmem %s12079_s0, 256  ;;  %p14127_p1 = scmp.lt.s32.totalorder %s12079_s0, %s12079_s0 }
0x5570   :  { %p14123_p0 = scmp.ne.s32.totalorder %s12079_s0, %s14122_s5  ;;  %p14128_p2 = scmp.lt.s32.totalorder %s14122_s5, %s14122_s5 }
0x5572   :  { %p14129_p3 = por %p14128_p2, %p14127_p1 }
0x5574   :  { %p14130_p4 = pnand %p14129_p3, %p14123_p0 }
0x5605   :  { %v11712_v52 = vpop.f32.mrb[92].mxu0 }
0x5606   :  { %v13609_v15 = vpop.f32.mrb[93].mxu0  ;;  %13613 = vmatmul.mubr.msk.f32.vlgmr.msra.gmra.mrb[86].mxu0 %vm260_vm2, %v11712_v52 }
0x5607   :  { %13792 = vmatpush3.bf16.msra.mxu0 %v13789_v34 }
0x5608   :  { %13794 = vmatprep.subr.bf16.mxu0 %v13793_v36 }
0x560b   :  { %13796 = vmatpush3.bf16.msra.mxu0 %v13793_v36 }
0x560c   :  { %13798 = vmatprep.subr.bf16.mxu0 %v13797_v33 }
0x560f   :  { %13800 = vmatpush3.bf16.msra.mxu0 %v13797_v33 }
0x5610   :  { %13802 = vmatprep.subr.bf16.mxu0 %v13801_v57 }
0x5613   :  { %13804 = vmatpush3.bf16.msra.mxu0 %v13801_v57 }
0x56d9   :  { %v13614_v31 = vpop.f32.mrb[86].mxu0 }
0x56da   :  { %v11806_v16 = vadd.f32 %v13614_v31, %v12450_v35  ;;  %v11788_v62 = vpop.f32.mrb[87].mxu0 }
0x56db   :  { %v11805_v12 = vadd.f32 %v12450_v35, %v11788_v62 }
0x56dc   :  { %v11808_v17 = vadd.f32 %v11806_v16, %v15370_v2 }
0x56dd   :  { %v11807_v18 = vadd.f32 %v11805_v12, %v15368_v1 }
0x56de   :  { %v11812_v19 = vsel %vm175_vm0, %v11808_v17, 0.0 }
0x56df   :  { %11813 = vadd.xlane.f32.xlu0 %v11812_v19  ;;  %v11809_v20 = vsel %vm175_vm0, %v11807_v18, 0.0 }
0x56e0   :  { %11810 = vadd.xlane.f32.xlu1 %v11809_v20 }
0x576c   :  { %v11814_v21 = vpop.xlane.xlu0 %11813 }
0x576d   :  { %v11816_v22 = vmul.f32 0.03125, %v11814_v21  ;;  %v11811_v46 = vpop.xlane.xlu1 %11810 }
0x576e   :  { %v11815_v13 = vmul.f32 0.03125, %v11811_v46 }
0x576f   :  { %v11818_v25 = vsub.f32 %v11808_v17, %v11816_v22 }
0x5770   :  { %v11817_v26 = vsub.f32 %v11807_v18, %v11815_v13 }
0x5771   :  { %v11820_v47 = vmul.f32 %v11818_v25, %v11818_v25 }
0x5772   :  { %v11819_v2 = vmul.f32 %v11817_v26, %v11817_v26 }
0x5773   :  { %v11824_v1 = vsel %vm175_vm0, %v11820_v47, 0.0 }
0x5774   :  { %11825 = vadd.xlane.f32.xlu1 %v11824_v1  ;;  %v11821_v28 = vsel %vm175_vm0, %v11819_v2, 0.0 }
0x5775   :  { %11822 = vadd.xlane.f32.xlu0 %v11821_v28 }
0x5801   :  { %v11826_v39 = vpop.xlane.xlu1 %11825 }
0x5802   :  { %v11828_v7 = vmul.f32 0.03125, %v11826_v39  ;;  %v11823_v5 = vpop.xlane.xlu0 %11822 }
0x5803   :  { %v11827_v40 = vmul.f32 0.03125, %v11823_v5 }
0x5804   :  { %v11830_v41 = vadd.f32 1e-05, %v11828_v7 }
0x5805   :  { %v11829_v42 = vadd.f32 1e-05, %v11827_v40 }
0x5806   :  { %14114 = vrsqrt.f32 %v11830_v41 }
0x5807   :  { %14116 = vrsqrt.f32 %v11829_v42 }
0x5810   :  { %v14115_v43 = vpop.eup %14114 }
0x5811   :  { %v14117_v45 = vpop.eup %14116  ;;  %v11834_v51 = vmul.f32 %v14115_v43, %v11818_v25 }
0x5812   :  { %v11833_v53 = vmul.f32 %v14117_v45, %v11817_v26 }
0x5813   :  { %v11842_v60 = vmul.f32 %v12451_v44, %v11834_v51 }
0x5814   :  { %v11841_v61 = vmul.f32 %v12451_v44, %v11833_v53 }
0x5815   :  { %v11850_v63 = vadd.f32 %v12452_v56, %v11842_v60 }
0x5816   :  { %v11849_v8 = vadd.f32 %v12452_v56, %v11841_v61 }
0x5818   :  { %13623 = vmatprep.mubr.msk.f32.mxu1 %vm175_vm0, %v11849_v8 }
0x5819   :  { %13624 = vmatmul.mubr.msk.f32.vlgmr.msra.gmra.mrb[138].mxu1 %vm175_vm0, %v11850_v63 }
0x58ec   :  { %v13625_v0 = vpop.f32.mrb[138].mxu1 }
0x58ed   :  { %v11935_v24 = vadd.f32 %v13625_v0, %v12453_v23  ;;  %v11929_v4 = vpop.f32.mrb[139].mxu1 }
0x58ee   :  { %v11930_v6 = vadd.f32 %v12453_v23, %v11929_v4 }
0x58ef   :  { %v11939_v10 = vmax.f32 %v11935_v24, 0.0 }
0x58f0   :  { %v11938_v9 = vmax.f32 %v11930_v6, 0.0 }
0x58f2   :  { %13642 = vmatprep.mubr.msk.f32.mxu0 %vm2052_vm3, %v11938_v9 }
0x58f3   :  { %13643 = vmatmul.mubr.msk.f32.vlgmr.msra.gmra.mrb[94].mxu0 %vm2052_vm3, %v11939_v10 }
0x59c6   :  { %v13644_v14 = vpop.f32.mrb[94].mxu0 }
0x59c7   :  { %v12024_v52 = vadd.f32 %v13644_v14, %v12456_v11  ;;  %v12018_v15 = vpop.f32.mrb[95].mxu0 }
0x59c8   :  { %v12019_v35 = vadd.f32 %v12456_v11, %v12018_v15 }
0x59c9   :  { %v12028_v31 = vadd.f32 %v12024_v52, %v11850_v63 }
0x59ca   :  { %v12027_v16 = vadd.f32 %v12019_v35, %v11849_v8 }
0x59cb   :  { %v12032_v62 = vsel %vm175_vm0, %v12028_v31, 0.0 }
0x59cc   :  { %12033 = vadd.xlane.f32.xlu1 %v12032_v62  ;;  %v12029_v12 = vsel %vm175_vm0, %v12027_v16, 0.0 }
0x59cd   :  { %12030 = vadd.xlane.f32.xlu0 %v12029_v12 }
0x5a59   :  { %v12034_v17 = vpop.xlane.xlu1 %12033 }
0x5a5a   :  { %v12036_v18 = vmul.f32 0.03125, %v12034_v17  ;;  %v12031_v19 = vpop.xlane.xlu0 %12030 }
0x5a5b   :  { %v12035_v20 = vmul.f32 0.03125, %v12031_v19 }
0x5a5c   :  { %v12038_v21 = vsub.f32 %v12028_v31, %v12036_v18 }
0x5a5d   :  { %v12037_v22 = vsub.f32 %v12027_v16, %v12035_v20 }
0x5a5e   :  { %v12040_v46 = vmul.f32 %v12038_v21, %v12038_v21 }
0x5a5f   :  { %v12039_v13 = vmul.f32 %v12037_v22, %v12037_v22 }
0x5a60   :  { %v12044_v25 = vsel %vm175_vm0, %v12040_v46, 0.0 }
0x5a61   :  { %12045 = vadd.xlane.f32.xlu1 %v12044_v25  ;;  %v12041_v26 = vsel %vm175_vm0, %v12039_v13, 0.0 }
0x5a62   :  { %12042 = vadd.xlane.f32.xlu0 %v12041_v26 }
0x5aee   :  { %v12046_v47 = vpop.xlane.xlu1 %12045 }
0x5aef   :  { %v12048_v2 = vmul.f32 0.03125, %v12046_v47  ;;  %v12043_v1 = vpop.xlane.xlu0 %12042 }
0x5af0   :  { %v12047_v28 = vmul.f32 0.03125, %v12043_v1 }
0x5af1   :  { %v12050_v55 = vadd.f32 1e-05, %v12048_v2 }
0x5af2   :  { %v12049_v54 = vadd.f32 1e-05, %v12047_v28 }
0x5af3   :  { %14118 = vrsqrt.f32 %v12050_v55 }
0x5af4   :  { %14120 = vrsqrt.f32 %v12049_v54 }
0x5afd   :  { %v14119_v59 = vpop.eup %14118 }
0x5afe   :  { %v14121_v48 = vpop.eup %14120  ;;  %v12054_v30 = vmul.f32 %v14119_v59, %v12038_v21 }
0x5aff   :  { %v12053_v27 = vmul.f32 %v14121_v48, %v12037_v22 }
0x5b00   :  { %v12062_v49 = vmul.f32 %v12459_v58, %v12054_v30 }
0x5b01   :  { %v12061_v34 = vmul.f32 %v12459_v58, %v12053_v27 }
0x5b02   :  { %v12070_v29 = vadd.f32 %v12460_v32, %v12062_v49 }
0x5b03   :  { %v12069_v36 = vadd.f32 %v12460_v32, %v12061_v34 }
0x5b04   :  { %12072 = vst.msk [vmem:[#allocation2 + $0x8] sm:$0xff] %vm175_vm0, %v12070_v29 }
0x5b05   :  { %12071 = vst.msk [vmem:[#allocation2] sm:$0xff] %vm175_vm0, %v12069_v36 }
0x5b06   :  { %14133 = shalt.err (!%p14130_p4)
}
0x5b07   :  { %s14134_s20 = scalar_lea.hbm %s14368_s4, 256 }
0x5b08   :  { %p14135_p5 = scmp.ne.s32.totalorder %s14368_s4, %s14134_s20  ;;  %p14138_p6 = scmp.lt.u32.totalorder %s14134_s20, %s14368_s4 }
0x5b0a   :  { %p14140_p7 = pnand %p14138_p6, %p14135_p5 }
0x5b0c   :  { %14143 = shalt.err (!%p14140_p7)
}
0x5b0d   :  { %s14193_s27 = smov 128   ;;  %s14194_s7 = smov 8  }
0x5b0e   :  { %12084 = dma.vmem_to_hbm [thread:$0]  %s12079_s0, 256, %s14368_s4, [#allocation3], %s14193_s27, %s14193_s27, %s14194_s7  }
0x5b0f   :  { %14144 = dma.done.wait [#allocation3], 256  }
0x5b10   :  { %14145 = vsyncadd [#allocation3], 4294967040 }
0x5b11   :  { %12088 = vsyncpa [#allocation3], 1 }

</bundles_post_ra>
